<compile_context>
chip_gen: v6e
topology: v6e:2x2x1
jax: 0.10.0
libtpu: 0.0.40
codegen_flags: <defaults>
</compile_context>

<pallas_src>
import jax
import jax.numpy as jnp
import numpy as np
from jax import lax
from jax.experimental import pallas as pl
from jax.experimental.pallas import tpu as pltpu

FACTOR_NUMBERS = 43   # input channels (from the module)
H = 200               # spatial height; the module's fc hard-codes 4 * 200
BATCH = 2             # small batch for the example run


def cnn_kernel(x_ref, w1_ref, b1_ref, w2_ref, b2_ref, w3_ref, b3_ref,
               v_ref, c_ref, out_ref):
    hh = x_ref.shape[0]                 # NB * H rows in this block
    nb = hh // H

    # Upcast the bf16 input stream once; all elementwise work stays f32 (v5e VPU has no bf16).
    x = x_ref[...].astype(jnp.float32)  # (NB*H, 43)

    # Boundary masks (hoisted; reused by all three conv layers). Generalized to per-batch rows
    # so sublane rolls never mix adjacent batch elements inside the block.
    idx = lax.broadcasted_iota(jnp.int32, (hh, 1), 0)
    hpos = idx % H
    top = hpos == 0            # wrapped/cross-batch row after roll(+1)  -> zero (top padding)
    bot = hpos == H - 1        # wrapped/cross-batch row after roll(-1)  -> zero (bottom padding)

    def conv3x1_relu(xin, w_ref, b_ref):
        # 1-D 'same' conv (kernel 3, pad 1) along H as 3 shifted bf16 matmuls + ReLU.
        # xin: (NB*H, Cin) f32, w_ref: (3, Cin, Cout) bf16, b_ref: (1, Cout) f32
        x_prev = jnp.where(top, 0.0, pltpu.roll(xin, 1, 0))        # x[h-1], zero at h=0
        x_next = jnp.where(bot, 0.0, pltpu.roll(xin, hh - 1, 0))   # x[h+1], zero at h=H-1
        bf = jnp.bfloat16
        acc = jnp.dot(xin.astype(bf),    w_ref[1], preferred_element_type=jnp.float32)
        acc = acc + jnp.dot(x_prev.astype(bf), w_ref[0], preferred_element_type=jnp.float32)
        acc = acc + jnp.dot(x_next.astype(bf), w_ref[2], preferred_element_type=jnp.float32)
        return jnp.maximum(acc + b_ref[...], 0.0)

    h = conv3x1_relu(x, w1_ref, b1_ref)            # (NB*H, 16)
    h = conv3x1_relu(h, w2_ref, b2_ref)            # (NB*H, 32)
    h = conv3x1_relu(h, w3_ref, b3_ref)            # (NB*H, 64)

    # Fused conv6 + fc per batch element:
    #   y[b] = sum_{h,k} h3[b,h,k] * V[h,k] + (sum_{h,c} wfc[h,c]*b6[c] + bfc)
    prod = h.reshape(nb, H, h.shape[-1]) * v_ref[...]          # broadcast (H,64) over batch
    y = jnp.sum(prod, axis=2, keepdims=True)                    # (NB, H, 1)  lane reduce
    y = jnp.sum(y, axis=1, keepdims=True)                       # (NB, 1, 1)  sublane reduce
    out_ref[...] = y + c_ref[0]


def cnn_forward(x_nchw, kparams, nb=64):
    """x_nchw: (N, 43, H, 1) float32 -> (N, 1) float32 (matches PyTorch forward)."""
    n = x_nchw.shape[0]
    (w1, b1, w2, b2, w3, b3, v, const) = kparams

    # Batch block size: clamp to n, keep even so bf16 blocks stay (16,128)-aligned.
    nb = max(1, min(nb, n))
    nb = nb + (nb & 1)
    n_blocks = pl.cdiv(n, nb)
    n_pad = n_blocks * nb

    # Single fused producer: squeeze W, NCHW -> NHC transpose, bf16 cast (one HBM pass).
    x_nhc = jnp.transpose(x_nchw[..., 0], (0, 2, 1)).astype(jnp.bfloat16)   # (N, H, 43) bf16
    if n_pad != n:
        x_nhc = jnp.pad(x_nhc, ((0, n_pad - n), (0, 0), (0, 0)))
    x2d = x_nhc.reshape(n_pad * H, FACTOR_NUMBERS)                          # (N_pad*H, 43) bf16

    out = pl.pallas_call(
        cnn_kernel,
        out_shape=jax.ShapeDtypeStruct((n_pad, 1, 1), jnp.float32),
        grid=(n_blocks,),
        in_specs=[
            pl.BlockSpec((nb * H, FACTOR_NUMBERS), lambda i: (i, 0)),      # x batch block (bf16)
            pl.BlockSpec((3, FACTOR_NUMBERS, 16), lambda i: (0, 0, 0)),    # w1 (bf16)
            pl.BlockSpec((1, 16), lambda i: (0, 0)),                       # b1
            pl.BlockSpec((3, 16, 32), lambda i: (0, 0, 0)),                # w2 (bf16)
            pl.BlockSpec((1, 32), lambda i: (0, 0)),                       # b2
            pl.BlockSpec((3, 32, 64), lambda i: (0, 0, 0)),                # w3 (bf16)
            pl.BlockSpec((1, 64), lambda i: (0, 0)),                       # b3
            pl.BlockSpec((H, 64), lambda i: (0, 0)),                       # V = fused conv6+fc
            pl.BlockSpec(memory_space=pltpu.MemorySpace.SMEM),             # fused scalar bias
        ],
        out_specs=pl.BlockSpec((nb, 1, 1), lambda i: (i, 0, 0)),
        compiler_params=pltpu.CompilerParams(
            dimension_semantics=("parallel",),
            vmem_limit_bytes=48 * 1024 * 1024),
    )(x2d, w1, b1, w2, b2, w3, b3, v, const)
    return out.reshape(n_pad, 1)[:n]                                       # (N, 1)


def init_params(key):
    """Deterministic synthetic parameters in the base (torch-equivalent) f32 layouts."""
    ks = jax.random.split(key, 10)

    def u(k, shape, fan_in):
        bound = 1.0 / np.sqrt(fan_in)
        return jax.random.uniform(k, shape, jnp.float32, -bound, bound)

    w1 = u(ks[0], (3, FACTOR_NUMBERS, 16), FACTOR_NUMBERS * 3)   # (kH, Cin, Cout)
    b1 = u(ks[1], (1, 16), FACTOR_NUMBERS * 3)
    w2 = u(ks[2], (3, 16, 32), 16 * 3)
    b2 = u(ks[3], (1, 32), 16 * 3)
    w3 = u(ks[4], (3, 32, 64), 32 * 3)
    b3 = u(ks[5], (1, 64), 32 * 3)
    w6 = u(ks[6], (64, 4), 64)                                   # 1x1 conv as (Cin, Cout)
    b6 = u(ks[7], (1, 4), 64)
    wfc = u(ks[8], (1, 4 * H), 4 * H)                            # torch Linear weight (1, 800)
    bfc = u(ks[9], (1, 1), 4 * H)
    return (w1, b1, w2, b2, w3, b3, w6, b6, wfc, bfc)


def prepare_kernel_params(params):
    """Fuse conv6+fc and cast conv weights to bf16 for the kernel."""
    (w1, b1, w2, b2, w3, b3, w6, b6, wfc, bfc) = params
    # torch flatten of (N, 4, H, 1) is channel-major (index = c*H + h) -> fc weight as (H, 4)
    wfc_r = wfc.reshape(4, H).T                                              # (H, 4)
    v = jnp.dot(wfc_r, w6.T, precision=lax.Precision.HIGHEST)                # (H, 64)
    const = (jnp.sum(wfc_r * b6) + bfc[0, 0]).reshape(1).astype(jnp.float32) # scalar, via SMEM
    bf = jnp.bfloat16
    return (w1.astype(bf), b1, w2.astype(bf), b2, w3.astype(bf), b3,
            v.astype(jnp.float32), const)


def reference_forward(x_nchw, params):
    """Pure-JAX f32 NCHW reference mirroring the PyTorch forward exactly."""
    (w1, b1, w2, b2, w3, b3, w6, b6, wfc, bfc) = params

    def conv_nchw(x, w_khc, b, pad_h):
        # (kH, Cin, Cout) -> torch OIHW (Cout, Cin, kH, 1)
        w_oihw = jnp.transpose(w_khc, (2, 1, 0))[..., None]
        y = lax.conv_general_dilated(
            x, w_oihw, window_strides=(1, 1),
            padding=((pad_h, pad_h), (0, 0)),
            dimension_numbers=("NCHW", "OIHW", "NCHW"),
            precision=lax.Precision.HIGHEST)
        return y + b.reshape(1, -1, 1, 1)

    x = jax.nn.relu(conv_nchw(x_nchw, w1, b1, 1))
    x = jax.nn.relu(conv_nchw(x, w2, b2, 1))
    x = jax.nn.relu(conv_nchw(x, w3, b3, 1))
    w6_oihw = w6.T[:, :, None, None]
    x = lax.conv_general_dilated(x, w6_oihw, (1, 1), ((0, 0), (0, 0)),
                                 dimension_numbers=("NCHW", "OIHW", "NCHW"),
                                 precision=lax.Precision.HIGHEST)
    x = x + b6.reshape(1, -1, 1, 1)
    flat = x.reshape(x.shape[0], -1)                             # (N, 4*H), channel-major
    return jnp.dot(flat, wfc.T, precision=lax.Precision.HIGHEST) + bfc


if __name__ == "__main__":
    key = jax.random.PRNGKey(0)
    k_x, k_p = jax.random.split(key)

    x = jax.random.normal(k_x, (BATCH, FACTOR_NUMBERS, H, 1), jnp.float32)
    params = init_params(k_p)
    kparams = prepare_kernel_params(params)

    out = jax.block_until_ready(cnn_forward(x, kparams))
    ref = jax.block_until_ready(reference_forward(x, params))

    # Kernel uses bf16 MXU operands and a bf16 input stream (f32 accumulation);
    # reference is full f32 -> loose-ish tolerance.
    np.testing.assert_allclose(np.asarray(out), np.asarray(ref), rtol=2e-2, atol=2e-2)
    assert out.shape == (BATCH, 1)

    print("KERNEL_OK")
</pallas_src>

<mosaic_0001>
module attributes {stable_mosaic.version = 11 : i64} {
  func.func @cnn_kernel(%arg0: i32, %arg1: memref<400x43xbf16, #tpu.memory_space<vmem>>, %arg2: memref<3x43x16xbf16, #tpu.memory_space<vmem>>, %arg3: memref<1x16xf32, #tpu.memory_space<vmem>>, %arg4: memref<3x16x32xbf16, #tpu.memory_space<vmem>>, %arg5: memref<1x32xf32, #tpu.memory_space<vmem>>, %arg6: memref<3x32x64xbf16, #tpu.memory_space<vmem>>, %arg7: memref<1x64xf32, #tpu.memory_space<vmem>>, %arg8: memref<200x64xf32, #tpu.memory_space<vmem>>, %arg9: memref<1xf32, #tpu.memory_space<smem>>, %arg10: memref<2x1x1xf32, #tpu.memory_space<vmem>>) attributes {dimension_semantics = [#tpu.dimension_semantics<parallel>], iteration_bounds = array<i64: 1>, scalar_prefetch = 0 : i64, scratch_operands = 0 : i64, tpu.core_type = #tpu.core_type<tc>, window_params = [{transform_indices = @transform_0, window_bounds = array<i64: 400, 43>}, {pipeline_mode = #tpu.pipeline_mode<synchronous>, transform_indices = @transform_1, window_bounds = array<i64: 3, 43, 16>}, {pipeline_mode = #tpu.pipeline_mode<synchronous>, transform_indices = @transform_2, window_bounds = array<i64: 1, 16>}, {pipeline_mode = #tpu.pipeline_mode<synchronous>, transform_indices = @transform_3, window_bounds = array<i64: 3, 16, 32>}, {pipeline_mode = #tpu.pipeline_mode<synchronous>, transform_indices = @transform_4, window_bounds = array<i64: 1, 32>}, {pipeline_mode = #tpu.pipeline_mode<synchronous>, transform_indices = @transform_5, window_bounds = array<i64: 3, 32, 64>}, {pipeline_mode = #tpu.pipeline_mode<synchronous>, transform_indices = @transform_6, window_bounds = array<i64: 1, 64>}, {pipeline_mode = #tpu.pipeline_mode<synchronous>, transform_indices = @transform_7, window_bounds = array<i64: 200, 64>}, {transform_indices = @transform_8, window_bounds = array<i64: 1>}, {transform_indices = @transform_9, window_bounds = array<i64: 2, 1, 1>}]} {
    %c0 = arith.constant 0 : index
    %c0_0 = arith.constant 0 : index
    %0 = vector.load %arg1[%c0, %c0_0] : memref<400x43xbf16, #tpu.memory_space<vmem>>, vector<400x43xbf16>
    %1 = arith.extf %0 : vector<400x43xbf16> to vector<400x43xf32>
    %2 = tpu.iota {dimensions = array<i32: 0>} : vector<400x1xi32>
    %c200_i32 = arith.constant 200 : i32
    %c0_i32 = arith.constant 0 : i32
    %3 = arith.cmpi eq, %c200_i32, %c0_i32 : i32
    %c1_i32 = arith.constant 1 : i32
    %4 = arith.select %3, %c1_i32, %c200_i32 : i32
    %5 = vector.broadcast %4 : i32 to vector<400x1xi32>
    %6 = arith.remsi %2, %5 : vector<400x1xi32>
    %c0_i32_1 = arith.constant 0 : i32
    %7 = vector.broadcast %c0_i32_1 : i32 to vector<400x1xi32>
    %8 = arith.cmpi ne, %6, %7 : vector<400x1xi32>
    %c0_i32_2 = arith.constant 0 : i32
    %9 = vector.broadcast %c0_i32_2 : i32 to vector<400x1xi32>
    %10 = arith.cmpi slt, %6, %9 : vector<400x1xi32>
    %c0_i32_3 = arith.constant 0 : i32
    %11 = arith.cmpi slt, %4, %c0_i32_3 : i32
    %12 = vector.broadcast %11 : i1 to vector<400x1xi1>
    %13 = vector.broadcast %12 : vector<400x1xi1> to vector<400x1xi1>
    %14 = arith.xori %10, %13 : vector<400x1xi1>
    %15 = arith.andi %14, %8 : vector<400x1xi1>
    %16 = vector.broadcast %4 : i32 to vector<400x1xi32>
    %17 = arith.addi %6, %16 : vector<400x1xi32>
    %18 = arith.select %15, %17, %6 : vector<400x1xi1>, vector<400x1xi32>
    %c0_i32_4 = arith.constant 0 : i32
    %19 = vector.broadcast %c0_i32_4 : i32 to vector<400x1xi32>
    %20 = arith.cmpi eq, %18, %19 : vector<400x1xi32>
    %c199_i32 = arith.constant 199 : i32
    %21 = vector.broadcast %c199_i32 : i32 to vector<400x1xi32>
    %22 = arith.cmpi eq, %18, %21 : vector<400x1xi32>
    %c1_i32_5 = arith.constant 1 : i32
    %23 = tpu.dynamic_rotate %1 by %c1_i32_5 dim 0 : vector<400x43xf32>, i32 -> vector<400x43xf32>
    %cst = arith.constant 0.000000e+00 : f32
    %24 = vector.shape_cast %20 : vector<400x1xi1> to vector<400x1xi1>
    %25 = vector.broadcast %24 : vector<400x1xi1> to vector<400x43xi1>
    %26 = vector.broadcast %cst : f32 to vector<400x43xf32>
    %27 = arith.select %25, %26, %23 : vector<400x43xi1>, vector<400x43xf32>
    %c399_i32 = arith.constant 399 : i32
    %28 = tpu.dynamic_rotate %1 by %c399_i32 dim 0 : vector<400x43xf32>, i32 -> vector<400x43xf32>
    %cst_6 = arith.constant 0.000000e+00 : f32
    %29 = vector.shape_cast %22 : vector<400x1xi1> to vector<400x1xi1>
    %30 = vector.broadcast %29 : vector<400x1xi1> to vector<400x43xi1>
    %31 = vector.broadcast %cst_6 : f32 to vector<400x43xf32>
    %32 = arith.select %30, %31, %28 : vector<400x43xi1>, vector<400x43xf32>
    %33 = arith.truncf %1 : vector<400x43xf32> to vector<400x43xbf16>
    %c1 = arith.constant 1 : index
    %c0_7 = arith.constant 0 : index
    %c0_8 = arith.constant 0 : index
    %34 = vector.load %arg2[%c1, %c0_7, %c0_8] : memref<3x43x16xbf16, #tpu.memory_space<vmem>>, vector<1x43x16xbf16>
    %35 = vector.shape_cast %34 : vector<1x43x16xbf16> to vector<43x16xbf16>
    %cst_9 = arith.constant dense<0.000000e+00> : vector<400x16xf32>
    %36 = tpu.matmul %33, %35, %cst_9 {dimension_numbers = #tpu.dot_dimension_numbers<[1], [0], [0], [1], [0, 0, 1, 1], [], []>} : vector<400x43xbf16>, vector<43x16xbf16>, vector<400x16xf32> -> vector<400x16xf32>
    %37 = arith.truncf %27 : vector<400x43xf32> to vector<400x43xbf16>
    %c0_10 = arith.constant 0 : index
    %c0_11 = arith.constant 0 : index
    %c0_12 = arith.constant 0 : index
    %38 = vector.load %arg2[%c0_10, %c0_11, %c0_12] : memref<3x43x16xbf16, #tpu.memory_space<vmem>>, vector<1x43x16xbf16>
    %39 = vector.shape_cast %38 : vector<1x43x16xbf16> to vector<43x16xbf16>
    %cst_13 = arith.constant dense<0.000000e+00> : vector<400x16xf32>
    %40 = tpu.matmul %37, %39, %cst_13 {dimension_numbers = #tpu.dot_dimension_numbers<[1], [0], [0], [1], [0, 0, 1, 1], [], []>} : vector<400x43xbf16>, vector<43x16xbf16>, vector<400x16xf32> -> vector<400x16xf32>
    %41 = arith.addf %36, %40 : vector<400x16xf32>
    %42 = arith.truncf %32 : vector<400x43xf32> to vector<400x43xbf16>
    %c2 = arith.constant 2 : index
    %c0_14 = arith.constant 0 : index
    %c0_15 = arith.constant 0 : index
    %43 = vector.load %arg2[%c2, %c0_14, %c0_15] : memref<3x43x16xbf16, #tpu.memory_space<vmem>>, vector<1x43x16xbf16>
    %44 = vector.shape_cast %43 : vector<1x43x16xbf16> to vector<43x16xbf16>
    %cst_16 = arith.constant dense<0.000000e+00> : vector<400x16xf32>
    %45 = tpu.matmul %42, %44, %cst_16 {dimension_numbers = #tpu.dot_dimension_numbers<[1], [0], [0], [1], [0, 0, 1, 1], [], []>} : vector<400x43xbf16>, vector<43x16xbf16>, vector<400x16xf32> -> vector<400x16xf32>
    %46 = arith.addf %41, %45 : vector<400x16xf32>
    %c0_17 = arith.constant 0 : index
    %c0_18 = arith.constant 0 : index
    %47 = vector.load %arg3[%c0_17, %c0_18] : memref<1x16xf32, #tpu.memory_space<vmem>>, vector<1x16xf32>
    %48 = vector.broadcast %47 : vector<1x16xf32> to vector<400x16xf32>
    %49 = arith.addf %46, %48 : vector<400x16xf32>
    %cst_19 = arith.constant 0.000000e+00 : f32
    %50 = vector.broadcast %cst_19 : f32 to vector<400x16xf32>
    %51 = arith.maximumf %49, %50 : vector<400x16xf32>
    %c1_i32_20 = arith.constant 1 : i32
    %52 = tpu.dynamic_rotate %51 by %c1_i32_20 dim 0 : vector<400x16xf32>, i32 -> vector<400x16xf32>
    %cst_21 = arith.constant 0.000000e+00 : f32
    %53 = vector.shape_cast %20 : vector<400x1xi1> to vector<400x1xi1>
    %54 = vector.broadcast %53 : vector<400x1xi1> to vector<400x16xi1>
    %55 = vector.broadcast %cst_21 : f32 to vector<400x16xf32>
    %56 = arith.select %54, %55, %52 : vector<400x16xi1>, vector<400x16xf32>
    %c399_i32_22 = arith.constant 399 : i32
    %57 = tpu.dynamic_rotate %51 by %c399_i32_22 dim 0 : vector<400x16xf32>, i32 -> vector<400x16xf32>
    %cst_23 = arith.constant 0.000000e+00 : f32
    %58 = vector.shape_cast %22 : vector<400x1xi1> to vector<400x1xi1>
    %59 = vector.broadcast %58 : vector<400x1xi1> to vector<400x16xi1>
    %60 = vector.broadcast %cst_23 : f32 to vector<400x16xf32>
    %61 = arith.select %59, %60, %57 : vector<400x16xi1>, vector<400x16xf32>
    %62 = arith.truncf %51 : vector<400x16xf32> to vector<400x16xbf16>
    %c1_24 = arith.constant 1 : index
    %c0_25 = arith.constant 0 : index
    %c0_26 = arith.constant 0 : index
    %63 = vector.load %arg4[%c1_24, %c0_25, %c0_26] : memref<3x16x32xbf16, #tpu.memory_space<vmem>>, vector<1x16x32xbf16>
    %64 = vector.shape_cast %63 : vector<1x16x32xbf16> to vector<16x32xbf16>
    %cst_27 = arith.constant dense<0.000000e+00> : vector<400x32xf32>
    %65 = tpu.matmul %62, %64, %cst_27 {dimension_numbers = #tpu.dot_dimension_numbers<[1], [0], [0], [1], [0, 0, 1, 1], [], []>} : vector<400x16xbf16>, vector<16x32xbf16>, vector<400x32xf32> -> vector<400x32xf32>
    %66 = arith.truncf %56 : vector<400x16xf32> to vector<400x16xbf16>
    %c0_28 = arith.constant 0 : index
    %c0_29 = arith.constant 0 : index
    %c0_30 = arith.constant 0 : index
    %67 = vector.load %arg4[%c0_28, %c0_29, %c0_30] : memref<3x16x32xbf16, #tpu.memory_space<vmem>>, vector<1x16x32xbf16>
    %68 = vector.shape_cast %67 : vector<1x16x32xbf16> to vector<16x32xbf16>
    %cst_31 = arith.constant dense<0.000000e+00> : vector<400x32xf32>
    %69 = tpu.matmul %66, %68, %cst_31 {dimension_numbers = #tpu.dot_dimension_numbers<[1], [0], [0], [1], [0, 0, 1, 1], [], []>} : vector<400x16xbf16>, vector<16x32xbf16>, vector<400x32xf32> -> vector<400x32xf32>
    %70 = arith.addf %65, %69 : vector<400x32xf32>
    %71 = arith.truncf %61 : vector<400x16xf32> to vector<400x16xbf16>
    %c2_32 = arith.constant 2 : index
    %c0_33 = arith.constant 0 : index
    %c0_34 = arith.constant 0 : index
    %72 = vector.load %arg4[%c2_32, %c0_33, %c0_34] : memref<3x16x32xbf16, #tpu.memory_space<vmem>>, vector<1x16x32xbf16>
    %73 = vector.shape_cast %72 : vector<1x16x32xbf16> to vector<16x32xbf16>
    %cst_35 = arith.constant dense<0.000000e+00> : vector<400x32xf32>
    %74 = tpu.matmul %71, %73, %cst_35 {dimension_numbers = #tpu.dot_dimension_numbers<[1], [0], [0], [1], [0, 0, 1, 1], [], []>} : vector<400x16xbf16>, vector<16x32xbf16>, vector<400x32xf32> -> vector<400x32xf32>
    %75 = arith.addf %70, %74 : vector<400x32xf32>
    %c0_36 = arith.constant 0 : index
    %c0_37 = arith.constant 0 : index
    %76 = vector.load %arg5[%c0_36, %c0_37] : memref<1x32xf32, #tpu.memory_space<vmem>>, vector<1x32xf32>
    %77 = vector.broadcast %76 : vector<1x32xf32> to vector<400x32xf32>
    %78 = arith.addf %75, %77 : vector<400x32xf32>
    %cst_38 = arith.constant 0.000000e+00 : f32
    %79 = vector.broadcast %cst_38 : f32 to vector<400x32xf32>
    %80 = arith.maximumf %78, %79 : vector<400x32xf32>
    %c1_i32_39 = arith.constant 1 : i32
    %81 = tpu.dynamic_rotate %80 by %c1_i32_39 dim 0 : vector<400x32xf32>, i32 -> vector<400x32xf32>
    %cst_40 = arith.constant 0.000000e+00 : f32
    %82 = vector.shape_cast %20 : vector<400x1xi1> to vector<400x1xi1>
    %83 = vector.broadcast %82 : vector<400x1xi1> to vector<400x32xi1>
    %84 = vector.broadcast %cst_40 : f32 to vector<400x32xf32>
    %85 = arith.select %83, %84, %81 : vector<400x32xi1>, vector<400x32xf32>
    %c399_i32_41 = arith.constant 399 : i32
    %86 = tpu.dynamic_rotate %80 by %c399_i32_41 dim 0 : vector<400x32xf32>, i32 -> vector<400x32xf32>
    %cst_42 = arith.constant 0.000000e+00 : f32
    %87 = vector.shape_cast %22 : vector<400x1xi1> to vector<400x1xi1>
    %88 = vector.broadcast %87 : vector<400x1xi1> to vector<400x32xi1>
    %89 = vector.broadcast %cst_42 : f32 to vector<400x32xf32>
    %90 = arith.select %88, %89, %86 : vector<400x32xi1>, vector<400x32xf32>
    %91 = arith.truncf %80 : vector<400x32xf32> to vector<400x32xbf16>
    %c1_43 = arith.constant 1 : index
    %c0_44 = arith.constant 0 : index
    %c0_45 = arith.constant 0 : index
    %92 = vector.load %arg6[%c1_43, %c0_44, %c0_45] : memref<3x32x64xbf16, #tpu.memory_space<vmem>>, vector<1x32x64xbf16>
    %93 = vector.shape_cast %92 : vector<1x32x64xbf16> to vector<32x64xbf16>
    %cst_46 = arith.constant dense<0.000000e+00> : vector<400x64xf32>
    %94 = tpu.matmul %91, %93, %cst_46 {dimension_numbers = #tpu.dot_dimension_numbers<[1], [0], [0], [1], [0, 0, 1, 1], [], []>} : vector<400x32xbf16>, vector<32x64xbf16>, vector<400x64xf32> -> vector<400x64xf32>
    %95 = arith.truncf %85 : vector<400x32xf32> to vector<400x32xbf16>
    %c0_47 = arith.constant 0 : index
    %c0_48 = arith.constant 0 : index
    %c0_49 = arith.constant 0 : index
    %96 = vector.load %arg6[%c0_47, %c0_48, %c0_49] : memref<3x32x64xbf16, #tpu.memory_space<vmem>>, vector<1x32x64xbf16>
    %97 = vector.shape_cast %96 : vector<1x32x64xbf16> to vector<32x64xbf16>
    %cst_50 = arith.constant dense<0.000000e+00> : vector<400x64xf32>
    %98 = tpu.matmul %95, %97, %cst_50 {dimension_numbers = #tpu.dot_dimension_numbers<[1], [0], [0], [1], [0, 0, 1, 1], [], []>} : vector<400x32xbf16>, vector<32x64xbf16>, vector<400x64xf32> -> vector<400x64xf32>
    %99 = arith.addf %94, %98 : vector<400x64xf32>
    %100 = arith.truncf %90 : vector<400x32xf32> to vector<400x32xbf16>
    %c2_51 = arith.constant 2 : index
    %c0_52 = arith.constant 0 : index
    %c0_53 = arith.constant 0 : index
    %101 = vector.load %arg6[%c2_51, %c0_52, %c0_53] : memref<3x32x64xbf16, #tpu.memory_space<vmem>>, vector<1x32x64xbf16>
    %102 = vector.shape_cast %101 : vector<1x32x64xbf16> to vector<32x64xbf16>
    %cst_54 = arith.constant dense<0.000000e+00> : vector<400x64xf32>
    %103 = tpu.matmul %100, %102, %cst_54 {dimension_numbers = #tpu.dot_dimension_numbers<[1], [0], [0], [1], [0, 0, 1, 1], [], []>} : vector<400x32xbf16>, vector<32x64xbf16>, vector<400x64xf32> -> vector<400x64xf32>
    %104 = arith.addf %99, %103 : vector<400x64xf32>
    %c0_55 = arith.constant 0 : index
    %c0_56 = arith.constant 0 : index
    %105 = vector.load %arg7[%c0_55, %c0_56] : memref<1x64xf32, #tpu.memory_space<vmem>>, vector<1x64xf32>
    %106 = vector.broadcast %105 : vector<1x64xf32> to vector<400x64xf32>
    %107 = arith.addf %104, %106 : vector<400x64xf32>
    %cst_57 = arith.constant 0.000000e+00 : f32
    %108 = vector.broadcast %cst_57 : f32 to vector<400x64xf32>
    %109 = arith.maximumf %107, %108 : vector<400x64xf32>
    %110 = vector.shape_cast %109 : vector<400x64xf32> to vector<2x200x64xf32>
    %c0_58 = arith.constant 0 : index
    %c0_59 = arith.constant 0 : index
    %111 = vector.load %arg8[%c0_58, %c0_59] : memref<200x64xf32, #tpu.memory_space<vmem>>, vector<200x64xf32>
    %112 = vector.shape_cast %111 : vector<200x64xf32> to vector<1x200x64xf32>
    %113 = vector.broadcast %112 : vector<1x200x64xf32> to vector<2x200x64xf32>
    %114 = arith.mulf %110, %113 : vector<2x200x64xf32>
    %cst_60 = arith.constant dense<0.000000e+00> : vector<2x200xf32>
    %115 = vector.multi_reduction <add>, %114, %cst_60 [2] : vector<2x200x64xf32> to vector<2x200xf32>
    %116 = vector.shape_cast %115 : vector<2x200xf32> to vector<2x200x1xf32>
    %cst_61 = arith.constant dense<0.000000e+00> : vector<2x1xf32>
    %117 = vector.multi_reduction <add>, %116, %cst_61 [1] : vector<2x200x1xf32> to vector<2x1xf32>
    %118 = vector.shape_cast %117 : vector<2x1xf32> to vector<2x1x1xf32>
    %c0_62 = arith.constant 0 : index
    %119 = memref.load %arg9[%c0_62] : memref<1xf32, #tpu.memory_space<smem>>
    %120 = vector.broadcast %119 : f32 to vector<2x1x1xf32>
    %121 = arith.addf %118, %120 : vector<2x1x1xf32>
    %c0_63 = arith.constant 0 : index
    %c0_64 = arith.constant 0 : index
    %c0_65 = arith.constant 0 : index
    %122 = vector.load %arg10[%c0_63, %c0_64, %c0_65] : memref<2x1x1xf32, #tpu.memory_space<vmem>>, vector<2x1x1xf32>
    tpu.vector_store %arg10[%c0_63, %c0_64, %c0_65], %121 {strides = array<i32>} : memref<2x1x1xf32, #tpu.memory_space<vmem>>, vector<2x1x1xf32>,
    return
  }
  func.func @transform_0(%arg0: i32) -> (i32, i32) {
    %c0_i32 = arith.constant 0 : i32
    %c0_i32_0 = arith.constant 0 : i32
    return %arg0, %c0_i32 : i32, i32
  }
  func.func @transform_1(%arg0: i32) -> (i32, i32, i32) {
    %c0_i32 = arith.constant 0 : i32
    %c0_i32_0 = arith.constant 0 : i32
    %c0_i32_1 = arith.constant 0 : i32
    %c0_i32_2 = arith.constant 0 : i32
    return %c0_i32, %c0_i32_0, %c0_i32_1 : i32, i32, i32
  }
  func.func @transform_2(%arg0: i32) -> (i32, i32) {
    %c0_i32 = arith.constant 0 : i32
    %c0_i32_0 = arith.constant 0 : i32
    %c0_i32_1 = arith.constant 0 : i32
    return %c0_i32, %c0_i32_0 : i32, i32
  }
  func.func @transform_3(%arg0: i32) -> (i32, i32, i32) {
    %c0_i32 = arith.constant 0 : i32
    %c0_i32_0 = arith.constant 0 : i32
    %c0_i32_1 = arith.constant 0 : i32
    %c0_i32_2 = arith.constant 0 : i32
    return %c0_i32, %c0_i32_0, %c0_i32_1 : i32, i32, i32
  }
  func.func @transform_4(%arg0: i32) -> (i32, i32) {
    %c0_i32 = arith.constant 0 : i32
    %c0_i32_0 = arith.constant 0 : i32
    %c0_i32_1 = arith.constant 0 : i32
    return %c0_i32, %c0_i32_0 : i32, i32
  }
  func.func @transform_5(%arg0: i32) -> (i32, i32, i32) {
    %c0_i32 = arith.constant 0 : i32
    %c0_i32_0 = arith.constant 0 : i32
    %c0_i32_1 = arith.constant 0 : i32
    %c0_i32_2 = arith.constant 0 : i32
    return %c0_i32, %c0_i32_0, %c0_i32_1 : i32, i32, i32
  }
  func.func @transform_6(%arg0: i32) -> (i32, i32) {
    %c0_i32 = arith.constant 0 : i32
    %c0_i32_0 = arith.constant 0 : i32
    %c0_i32_1 = arith.constant 0 : i32
    return %c0_i32, %c0_i32_0 : i32, i32
  }
  func.func @transform_7(%arg0: i32) -> (i32, i32) {
    %c0_i32 = arith.constant 0 : i32
    %c0_i32_0 = arith.constant 0 : i32
    %c0_i32_1 = arith.constant 0 : i32
    return %c0_i32, %c0_i32_0 : i32, i32
  }
  func.func @transform_8(%arg0: i32) -> i32 {
    %c0_i32 = arith.constant 0 : i32
    %c0_i32_0 = arith.constant 0 : i32
    return %c0_i32 : i32
  }
  func.func @transform_9(%arg0: i32) -> (i32, i32, i32) {
    %c0_i32 = arith.constant 0 : i32
    %c0_i32_0 = arith.constant 0 : i32
    %c0_i32_1 = arith.constant 0 : i32
    return %arg0, %c0_i32, %c0_i32_0 : i32, i32, i32
  }
}

</mosaic_0001>

<bundles_post_ra>
// kernel: tpu_custom_call.1
= control target key start
LH: loop header
LB: loop body
LE: loop exit
PB: predicated region body
PF: predicated region fallthrough
CT: control target
= control target key end

     0   :  { %vm1718_vm0 = vcmask 1044480   ;;  %vm1719_vm1 = vcmask 1045504   ;;  %v13237_v0 = vmov 0.0   ;;  %v7891_v2 = vmov 65535   ;;  %s13192_s1 = inlined_call_operand.vmem [shape: bf16[3,43,16], index: 1, kind: input, shape index: {}]   ;;  %s13193_s0 = inlined_call_operand.vmem [shape: bf16[400,43], index: 0, kind: input, shape index: {}]   ;;  %s13194_s3 = inlined_call_operand.vmem [shape: bf16[3,16,32], index: 3, kind: input, shape index: {}]   ;;  %s13195_s2 = inlined_call_operand.vmem [shape: f32[1,16], index: 2, kind: input, shape index: {}]   ;;  %s13196_s5 = inlined_call_operand.vmem [shape: bf16[3,32,64], index: 5, kind: input, shape index: {}]   ;;  %s13197_s4 = inlined_call_operand.vmem [shape: f32[1,32], index: 4, kind: input, shape index: {}]   ;;  %s13198_s6 = inlined_call_operand.vmem [shape: f32[1,64], index: 6, kind: input, shape index: {}]   ;;  %s13199_s7 = inlined_call_operand.vmem [shape: f32[200,64], index: 7, kind: input, shape index: {}]   ;;  %s13200_s8 = inlined_call_operand.<no memory space> [shape: f32[1], index: 8, kind: input, shape index: {}]   ;;  %s13201_s9 = inlined_call_operand.vmem [shape: f32[2,1,1], index: 9, kind: output, shape index: {}]  }
   0x1   :  { %6753 = vmatprep.subr.bf16.mxu0 %v13237_v0  ;;  %7689 = vmatprep.subr.bf16.mxu1 %v13237_v0  ;;  %v7798_v1 = vld [vmem:[%s13192_s1 + $0x10] sm:$0x3f]   ;;  %v1720_v3 = vsel %vm1718_vm0, 4294967295, %v7891_v2  ;;  %v134_v4 = vlaneseq  ;;  %v7801_v7 = vld [vmem:[%s13192_s1 + $0x8] sm:$0xff]   ;;  %v34_v8 = vld [vmem:[%s13193_s0] sm:$0xff]   ;;  %vm7892_vm2 = vmmov 0  }
   0x2   :  { %v7948_v5 = vsel %vm1719_vm1, %v1720_v3, 0  ;;  %v7960_v9 = vld [vmem:[%s13193_s0 + $0x8] sm:$0xff]   ;;  %v7965_v10 = vld [vmem:[%s13193_s0 + $0xc4] sm:$0xf]  ;;  %v84_v14 = vunpack.c.l.bf16 %v34_v8  ;;  %v85_v15 = vunpack.c.h.bf16 %v34_v8  ;;  %6759 = vmatprep.mubr.msk.bf16.mxu0 %vm7892_vm2, %v13237_v0  ;;  %6811 = vmatprep.mubr.msk.bf16.mxu1 %vm7892_vm2, %v13237_v0  ;;  %vm1642_vm5 = vcmask 351232  }
   0x3   :  { %v1723_v6 = vand.u32 %v7798_v1, %v7948_v5  ;;  %13627 = vst [vmem:[#allocation3_spill] sm:$0xff] %v7965_v10  ;;  %v7967_v11 = vshrl.u32 %v134_v4, 7  ;;  %v7972_v12 = vld [vmem:[%s13192_s1 + $0x28] sm:$0x3f]   ;;  %v7977_v13 = vld [vmem:[%s13192_s1 + $0x40] sm:$0x3f]   ;;  %v86_v16 = vunpack.c.l.bf16 %v7960_v9  ;;  %v13215_v17 = vunpack.c.l.bf16 %v7965_v10 }
   0x4   :  { %v1085_v21 = vrot.slane %v84_v14, 7  ;;  %v7993_v22 = vrot.slane %v85_v15, 7  ;;  %v7999_v24 = vrot.slane %v84_v14, 1  ;;  %v8004_v25 = vld [vmem:[%s13193_s0 + $0x64] sm:$0xf]  ;;  %v1337_v29 = vrot.slane %v85_v15, 1 }
   0x5   :  { %6754 = vmatpush3.bf16.msra.mxu0 %v1723_v6  ;;  %7692 = vmatpush3.bf16.msra.mxu1 %v1723_v6  ;;  %v136_v18 = vadd.s32 8, %v7967_v11  ;;  %v7989_v19 = vmul.u32.u64.low 2748779070, %v7967_v11  ;;  %v7990_v20 = vmul.u32.u64.high 2748779070, %v7967_v11, %v7989_v19  ;;  %vm13379_vm3 = vcmp.lt.s32.totalorder %v7967_v11, 1  ;;  %13629 = vst [vmem:[#allocation5_spill] sm:$0xff] %v8004_v25  ;;  %v7802_v26 = vld [vmem:[%s13192_s1] sm:$0xff]  }
   0x6   :  { %6755 = vmatprep.subr.bf16.mxu0 %v13237_v0  ;;  %7690 = vmatprep.subr.bf16.mxu1 %v13237_v0  ;;  %v7997_v23 = vrot.slane %v13215_v17, 7  ;;  %13628 = vst [vmem:[#allocation4_spill] sm:$0xff] %v7999_v24  ;;  %v8014_v30 = vrot.slane %v86_v16, 1  ;;  %v8019_v31 = vld [vmem:[%s13193_s0 + $0x68] sm:$0xff]   ;;  %v2176_v32 = vand.u32 %v7972_v12, %v7948_v5  ;;  %v2536_v33 = vand.u32 %v7977_v13, %v7948_v5 }
   0x7   :  { %v8009_v27 = vmul.u32.u64.low 2748779070, %v136_v18  ;;  %v8010_v28 = vmul.u32.u64.high 2748779070, %v136_v18, %v8009_v27  ;;  %13630 = vst [vmem:[#allocation6_spill] sm:$0xff] %v8019_v31  ;;  %vm1386_vm4 = vcmp.lt.s32.totalorder %v7967_v11, 7  ;;  %v191_v34 = vshrl.u32 %v7990_v20, 7 }
   0x8   :  { %v1184_v35 = vsel %vm13379_vm3, %v1085_v21, %v7993_v22  ;;  %v1185_v36 = vsel %vm13379_vm3, %v7997_v23, %v1085_v21  ;;  %v1434_v37 = vsel %vm1386_vm4, %v1337_v29, %v8014_v30  ;;  %v13214_v38 = vunpack.c.l.bf16 %v8004_v25 }
   0x9   :  { %6756 = vmatpush3.bf16.msra.mxu0 %v7801_v7  ;;  %7693 = vmatpush3.bf16.msra.mxu1 %v7801_v7  ;;  %v13213_v39 = vunpack.c.l.bf16 %v8019_v31  ;;  %v13212_v40 = vunpack.c.h.bf16 %v8019_v31  ;;  %v161_v41 = vadd.s32 208, %v7967_v11  ;;  %v192_v42 = vmul.u32 200, %v191_v34 }
   0xa   :  { %6757 = vmatprep.subr.bf16.mxu0 %v13237_v0  ;;  %7691 = vmatprep.subr.bf16.mxu1 %v13237_v0  ;;  %v202_v43 = vshrl.u32 %v8010_v28, 7  ;;  %v1435_v44 = vsel %vm1386_vm4, %v7999_v24, %v1337_v29  ;;  %v162_v45 = vadd.s32 216, %v7967_v11  ;;  %v8053_v48 = vrot.slane %v13214_v38, 7 }
   0xb   :  { %v8048_v46 = vmul.u32.u64.low 2748779070, %v161_v41  ;;  %v8049_v47 = vmul.u32.u64.high 2748779070, %v161_v41, %v8048_v46  ;;  %v1111_v49 = vrot.slane %v13213_v39, 7  ;;  %v193_v50 = vsub.s32 %v7967_v11, %v192_v42 }
   0xc   :  { %v203_v51 = vmul.u32 200, %v202_v43  ;;  %v8059_v52 = vmul.u32.u64.low 2748779070, %v162_v45  ;;  %v8060_v53 = vmul.u32.u64.high 2748779070, %v162_v45, %v8059_v52  ;;  %v8064_v54 = vrot.slane %v13212_v40, 7 }
   0xd   :  { %6758 = vmatpush3.bf16.msra.mxu0 %v7802_v26  ;;  %7694 = vmatpush3.bf16.msra.mxu1 %v7802_v26  ;;  %v13233_v55 = vunpack.c.h.bf16 %v7960_v9  ;;  %v137_v56 = vadd.s32 16, %v7967_v11  ;;  %vm735_vm6 = vcmp.ne.s32.totalorder %v193_v50, 0  ;;  %vm785_vm7 = vcmp.lt.s32.totalorder %v193_v50, 0 }
   0xe   :  { %6965 = vmatprep.subr.bf16.mxu0 %v13237_v0  ;;  %6859 = vmatprep.subr.bf16.mxu1 %v13237_v0  ;;  %v204_v57 = vsub.s32 %v136_v18, %v203_v51  ;;  %v885_v58 = vadd.s32 200, %v193_v50  ;;  %vm835_vm8 = vmand %vm785_vm7, %vm735_vm6  ;;  %v477_v59 = vshrl.u32 %v8049_v47, 7  ;;  %v1159_v60 = vsel %vm13379_vm3, %v8053_v48, %v1111_v49 }
   0xf   :  { %v8072_v61 = vmul.u32.u64.low 2748779070, %v137_v56  ;;  %v8073_v62 = vmul.u32.u64.high 2748779070, %v137_v56, %v8072_v61  ;;  %v488_v3 = vshrl.u32 %v8060_v53, 7  ;;  %v8089_v8 = vadd.s32 24, %v7967_v11 }
  0x10   :  { %vm736_vm9 = vcmp.ne.s32.totalorder %v204_v57, 0  ;;  %vm786_vm10 = vcmp.lt.s32.totalorder %v204_v57, 0  ;;  %v886_v63 = vadd.s32 200, %v204_v57  ;;  %v8075_v1 = vsel %vm835_vm8, %v885_v58, %v193_v50 }
  0x11   :  { %13631 = vst [vmem:[#allocation7_spill] sm:$0xff] %v8075_v1  ;;  %vm836_vm11 = vmand %vm786_vm10, %vm736_vm9  ;;  %vm13202_vm12 = vcmp.eq.s32.totalorder %v8075_v1, 0  ;;  %vm13376_vm13 = vcmp.eq.s32.totalorder %v8075_v1, 199  ;;  %v478_v2 = vmul.u32 200, %v477_v59  ;;  %v489_v15 = vmul.u32 200, %v488_v3  ;;  %v8153_v59 = vld [vmem:[%s13193_s0 + $0x10] sm:$0xff]  }
  0x12   :  { %v8080_v4 = vsel %vm836_vm11, %v886_v63, %v204_v57  ;;  %v1286_v6 = vsel %vm13202_vm12, 0.0, %v1185_v36  ;;  %v8086_v7 = vsel %vm13376_vm13, 0.0, %v1435_v44  ;;  %v1158_v20 = vsel %vm13379_vm3, %v1111_v49, %v8064_v54  ;;  %v8110_v36 = vld [vmem:[%s13193_s0 + $0x70] sm:$0xff]  }
  0x13   :  { %13632 = vst [vmem:[#allocation8_spill] sm:$0xff] %v8080_v4  ;;  %vm13203_vm14 = vcmp.eq.s32.totalorder %v8080_v4, 0  ;;  %vm13375_vm15 = vcmp.eq.s32.totalorder %v8080_v4, 199  ;;  %v479_v14 = vsub.s32 %v161_v41, %v478_v2  ;;  %v213_v21 = vshrl.u32 %v8073_v62, 7  ;;  %13633 = vst [vmem:[#allocation9_spill] sm:$0xff] %v8110_v36 }
  0x14   :  { %v1287_v18 = vsel %vm13203_vm14, 0.0, %v1184_v35  ;;  %v8097_v19 = vsel %vm13375_vm15, 0.0, %v1434_v37  ;;  %v490_v28 = vsub.s32 %v162_v45, %v489_v15  ;;  %v1087_v35 = vrot.slane %v86_v16, 7  ;;  %v7803_v45 = vld [vmem:[%s13192_s1 + $0x38] sm:$0xff]   ;;  %v7804_v15 = vld [vmem:[%s13192_s1 + $0x20] sm:$0xff]  }
  0x15   :  { %v1594_v26 = vpack.c.bf16 %v1287_v18, %v1286_v6  ;;  %vm761_vm0 = vcmp.ne.s32.totalorder %v479_v14, 0  ;;  %vm811_vm1 = vcmp.lt.s32.totalorder %v479_v14, 0  ;;  %v911_v29 = vadd.s32 200, %v479_v14 }
  0x16   :  { %v214_v34 = vmul.u32 200, %v213_v21  ;;  %vm762_vm6 = vcmp.ne.s32.totalorder %v490_v28, 0  ;;  %vm812_vm7 = vcmp.lt.s32.totalorder %v490_v28, 0  ;;  %vm861_vm8 = vmand %vm811_vm1, %vm761_vm0  ;;  %v912_v37 = vadd.s32 200, %v490_v28 }
  0x17   :  { %6760 = vmatmul.mubr.msk.bf16.vlgmr.msra.gmra.mxu0 %vm1642_vm5, %v1594_v26  ;;  %v8115_v41 = vrot.slane %v13233_v55, 7  ;;  %vm862_vm9 = vmand %vm812_vm7, %vm762_vm6  ;;  %v8117_v42 = vsel %vm861_vm8, %v911_v29, %v479_v14  ;;  %v8125_v43 = vmul.u32.u64.low 2748779070, %v8089_v8  ;;  %v8126_v44 = vmul.u32.u64.high 2748779070, %v8089_v8, %v8125_v43 }
  0x18   :  { %13634 = vst [vmem:[#allocation10_spill] sm:$0xff] %v8117_v42  ;;  %6966 = vmatpush3.bf16.msra.mxu0 %v2536_v33  ;;  %6763 = vmatprep.mubr.msk.bf16.mxu0 %vm7892_vm2, %v13237_v0  ;;  %v215_v16 = vsub.s32 %v137_v56, %v214_v34  ;;  %v8131_v46 = vsel %vm862_vm9, %v912_v37, %v490_v28  ;;  %vm13207_vm10 = vcmp.eq.s32.totalorder %v8117_v42, 0  ;;  %v13211_v47 = vunpack.c.l.bf16 %v8110_v36  ;;  %v7806_v28 = vld [vmem:[%s13192_s1 + $0x30] sm:$0xff]  }
  0x19   :  { %13635 = vst [vmem:[#allocation11_spill] sm:$0xff] %v8131_v46  ;;  %v13209_v13 = vunpack.c.h.bf16 %v8110_v36  ;;  %6967 = vmatprep.subr.bf16.mxu0 %v13237_v0  ;;  %vm13204_vm11 = vcmp.eq.s32.totalorder %v8131_v46, 0  ;;  %v1312_v33 = vsel %vm13207_vm10, 0.0, %v1159_v60  ;;  %v163_v51 = vadd.s32 224, %v7967_v11 }
  0x1a   :  { %vm737_vm0 = vcmp.ne.s32.totalorder %v215_v16, 0  ;;  %vm787_vm1 = vcmp.lt.s32.totalorder %v215_v16, 0  ;;  %v1313_v49 = vsel %vm13204_vm11, 0.0, %v1158_v20  ;;  %v887_v50 = vadd.s32 200, %v215_v16 }
  0x1b   :  { %vm837_vm6 = vmand %vm787_vm1, %vm737_vm0  ;;  %v164_v52 = vadd.s32 232, %v7967_v11  ;;  %v1607_v53 = vpack.c.bf16 %v1313_v49, %v1312_v33  ;;  %v224_v56 = vshrl.u32 %v8126_v44, 7  ;;  %v1183_v57 = vsel %vm13379_vm3, %v7993_v22, %v1087_v35  ;;  %v7805_v44 = vld [vmem:[%s13192_s1 + $0x18] sm:$0xff]  }
  0x1c   :  { %v1113_v58 = vrot.slane %v13211_v47, 7  ;;  %6968 = vmatpush3.bf16.msra.mxu0 %v7803_v45  ;;  %v8155_v60 = vsel %vm837_vm6, %v887_v50, %v215_v16  ;;  %v8157_v61 = vmul.u32.u64.low 2748779070, %v163_v51  ;;  %v8158_v62 = vmul.u32.u64.high 2748779070, %v163_v51, %v8157_v61 }
  0x1d   :  { %13636 = vst [vmem:[#allocation12_spill] sm:$0xff] %v8155_v60  ;;  %v8162_v63 = vrot.slane %v13209_v13, 7  ;;  %6969 = vmatprep.subr.bf16.mxu0 %v13237_v0  ;;  %6812 = vmatmul.mubr.msk.bf16.vlgmr.msra.gmra.mxu1 %vm1642_vm5, %v1607_v53  ;;  %v225_v22 = vmul.u32 200, %v224_v56  ;;  %vm13364_vm7 = vcmp.eq.s32.totalorder %v8155_v60, 0  ;;  %v1182_v6 = vsel %vm13379_vm3, %v1087_v35, %v8115_v41 }
  0x1e   :  { %v8167_v2 = vmul.u32.u64.low 2748779070, %v164_v52  ;;  %v8168_v3 = vmul.u32.u64.high 2748779070, %v164_v52, %v8167_v2  ;;  %6860 = vmatpush3.bf16.msra.mxu1 %v2176_v32  ;;  %6815 = vmatprep.mubr.msk.bf16.mxu1 %vm7892_vm2, %v13237_v0  ;;  %v13231_v14 = vunpack.c.l.bf16 %v8153_v59  ;;  %v1288_v20 = vsel %vm13364_vm7, 0.0, %v1183_v57 }
  0x1f   :  { %v226_v18 = vsub.s32 %v8089_v8, %v225_v22  ;;  %v139_v5 = vadd.s32 32, %v7967_v11  ;;  %v8187_v12 = vadd.s32 40, %v7967_v11  ;;  %6861 = vmatprep.subr.bf16.mxu1 %v13237_v0  ;;  %v499_v32 = vshrl.u32 %v8158_v62, 7 }
  0x20   :  { %v1156_v21 = vsel %vm13379_vm3, %v1113_v58, %v8162_v63  ;;  %v1157_v8 = vsel %vm13379_vm3, %v8064_v54, %v1113_v58  ;;  %v13230_v26 = vunpack.c.h.bf16 %v8153_v59  ;;  %v510_v34 = vshrl.u32 %v8168_v3, 7  ;;  %v8210_v54 = vld [vmem:[%s13193_s0 + $0x78] sm:$0xff]   ;;  %6970 = vmatpush3.bf16.msra.mxu0 %v7806_v28 }
  0x21   :  { %vm738_vm8 = vcmp.ne.s32.totalorder %v226_v18, 0  ;;  %vm788_vm9 = vcmp.lt.s32.totalorder %v226_v18, 0  ;;  %v888_v29 = vadd.s32 200, %v226_v18  ;;  %v500_v35 = vmul.u32 200, %v499_v32  ;;  %7173 = vmatprep.subr.bf16.mxu0 %v13237_v0 }
  0x22   :  { %vm838_vm0 = vmand %vm788_vm9, %vm738_vm8  ;;  %v8202_v37 = vmul.u32.u64.low 2748779070, %v139_v5  ;;  %v8203_v16 = vmul.u32.u64.high 2748779070, %v139_v5, %v8202_v37  ;;  %v1089_v43 = vrot.slane %v13231_v14, 7  ;;  %6862 = vmatpush3.bf16.msra.mxu1 %v7804_v15  ;;  %v511_v33 = vmul.u32 200, %v510_v34 }
  0x23   :  { %v8215_v45 = vsel %vm838_vm0, %v888_v29, %v226_v18  ;;  %v8218_v49 = vmul.u32.u64.low 2748779070, %v8187_v12  ;;  %v8219_v50 = vmul.u32.u64.high 2748779070, %v8187_v12, %v8218_v49  ;;  %6863 = vmatprep.subr.bf16.mxu1 %v13237_v0  ;;  %v501_v53 = vsub.s32 %v163_v51, %v500_v35 }
  0x24   :  { %13637 = vst [vmem:[#allocation13_spill] sm:$0xff] %v8215_v45  ;;  %vm13363_vm1 = vcmp.eq.s32.totalorder %v8215_v45, 0  ;;  %v8226_v56 = vrot.slane %v13230_v26, 7  ;;  %v165_v57 = vadd.s32 240, %v7967_v11  ;;  %v512_v61 = vsub.s32 %v164_v52, %v511_v33 }
  0x25   :  { %v1289_v58 = vsel %vm13363_vm1, 0.0, %v1182_v6  ;;  %v13216_v62 = vunpack.c.l.bf16 %v8210_v54  ;;  %v8233_v22 = vadd.s32 248, %v7967_v11  ;;  %vm763_vm6 = vcmp.ne.s32.totalorder %v501_v53, 0 }
  0x26   :  { %v1595_v2 = vpack.c.bf16 %v1289_v58, %v1288_v20  ;;  %vm813_vm8 = vcmp.lt.s32.totalorder %v501_v53, 0  ;;  %v913_v3 = vadd.s32 200, %v501_v53  ;;  %6864 = vmatpush3.bf16.msra.mxu1 %v7805_v44  ;;  %vm764_vm9 = vcmp.ne.s32.totalorder %v512_v61, 0 }
  0x27   :  { %vm814_vm0 = vcmp.lt.s32.totalorder %v512_v61, 0  ;;  %vm863_vm12 = vmand %vm813_vm8, %vm763_vm6  ;;  %v914_v51 = vadd.s32 200, %v512_v61  ;;  %v235_v15 = vshrl.u32 %v8203_v16, 7  ;;  %7071 = vmatprep.subr.bf16.mxu1 %v13237_v0  ;;  %v246_v6 = vshrl.u32 %v8219_v50, 7 }
  0x28   :  { %6764 = vmatmul.mubr.msk.bf16.gmra.mxu0 %vm1642_vm5, %v1595_v2  ;;  %vm864_vm14 = vmand %vm814_vm0, %vm764_vm9  ;;  %v8238_v52 = vsel %vm863_vm12, %v913_v3, %v501_v53  ;;  %v8241_v18 = vmul.u32.u64.low 2748779070, %v165_v57  ;;  %v8242_v20 = vmul.u32.u64.high 2748779070, %v165_v57, %v8241_v18  ;;  %v13227_v29 = vunpack.c.h.bf16 %v8210_v54 }
  0x29   :  { %13638 = vst [vmem:[#allocation14_spill] sm:$0xff] %v8238_v52  ;;  %v8244_v32 = vsel %vm864_vm14, %v914_v51, %v512_v61  ;;  %vm13206_vm11 = vcmp.eq.s32.totalorder %v8238_v52, 0  ;;  %6767 = vmatprep.mubr.msk.bf16.mxu0 %vm7892_vm2, %v13237_v0  ;;  %v236_v28 = vmul.u32 200, %v235_v15  ;;  %v247_v35 = vmul.u32 200, %v246_v6 }
  0x2a   :  { %13639 = vst [vmem:[#allocation15_spill] sm:$0xff] %v8244_v32  ;;  %vm13205_vm6 = vcmp.eq.s32.totalorder %v8244_v32, 0  ;;  %v1314_v34 = vsel %vm13206_vm11, 0.0, %v1157_v8  ;;  %v1115_v37 = vrot.slane %v13216_v62, 7  ;;  %v1180_v58 = vsel %vm13379_vm3, %v1089_v43, %v8226_v56 }
  0x2b   :  { %v1315_v16 = vsel %vm13205_vm6, 0.0, %v1156_v21  ;;  %v237_v44 = vsub.s32 %v139_v5, %v236_v28  ;;  %v8258_v33 = vmul.u32.u64.low 2748779070, %v8233_v22  ;;  %v8259_v49 = vmul.u32.u64.high 2748779070, %v8233_v22, %v8258_v33  ;;  %v8292_v28 = vld [vmem:[%s13193_s0 + $0x18] sm:$0xff]  }
  0x2c   :  { %v1608_v50 = vpack.c.bf16 %v1315_v16, %v1314_v34  ;;  %v248_v53 = vsub.s32 %v8187_v12, %v247_v35  ;;  %v521_v8 = vshrl.u32 %v8242_v20, 7  ;;  %v1181_v5 = vsel %vm13379_vm3, %v8115_v41, %v1089_v43 }
  0x2d   :  { %vm739_vm12 = vcmp.ne.s32.totalorder %v237_v44, 0  ;;  %vm789_vm14 = vcmp.lt.s32.totalorder %v237_v44, 0  ;;  %v889_v61 = vadd.s32 200, %v237_v44  ;;  %v532_v3 = vshrl.u32 %v8259_v49, 7 }
  0x2e   :  { %6816 = vmatmul.mubr.msk.bf16.gmra.mxu1 %vm1642_vm5, %v1608_v50  ;;  %vm740_vm8 = vcmp.ne.s32.totalorder %v248_v53, 0  ;;  %vm790_vm9 = vcmp.lt.s32.totalorder %v248_v53, 0  ;;  %vm839_vm0 = vmand %vm789_vm14, %vm739_vm12  ;;  %v890_v21 = vadd.s32 200, %v248_v53  ;;  %v522_v12 = vmul.u32 200, %v521_v8 }
  0x2f   :  { %6819 = vmatprep.mubr.msk.bf16.mxu1 %vm7892_vm2, %v13237_v0  ;;  %vm840_vm6 = vmand %vm790_vm9, %vm740_vm8  ;;  %v8272_v2 = vsel %vm839_vm0, %v889_v61, %v237_v44  ;;  %v8277_v51 = vrot.slane %v13227_v29, 7  ;;  %v1155_v41 = vsel %vm13379_vm3, %v8162_v63, %v1115_v37  ;;  %v141_v6 = vadd.s32 48, %v7967_v11 }
  0x30   :  { %13640 = vst [vmem:[#allocation16_spill] sm:$0xff] %v8272_v2  ;;  %v8282_v43 = vsel %vm840_vm6, %v890_v21, %v248_v53  ;;  %vm13240_vm12 = vcmp.eq.s32.totalorder %v8272_v2, 0  ;;  %v523_v15 = vsub.s32 %v165_v57, %v522_v12  ;;  %v533_v20 = vmul.u32 200, %v532_v3  ;;  %v8323_v3 = vld [vmem:[%s13193_s0 + $0x80] sm:$0xff]  }
  0x31   :  { %13641 = vst [vmem:[#allocation17_spill] sm:$0xff] %v8282_v43  ;;  %vm13208_vm14 = vcmp.eq.s32.totalorder %v8282_v43, 0  ;;  %v1290_v18 = vsel %vm13240_vm12, 0.0, %v1181_v5  ;;  %v142_v63 = vadd.s32 56, %v7967_v11  ;;  %v13229_v50 = vunpack.c.l.bf16 %v8292_v28 }
  0x32   :  { %v1291_v34 = vsel %vm13208_vm14, 0.0, %v1180_v58  ;;  %vm765_vm6 = vcmp.ne.s32.totalorder %v523_v15, 0  ;;  %vm815_vm8 = vcmp.lt.s32.totalorder %v523_v15, 0  ;;  %v915_v57 = vadd.s32 200, %v523_v15 }
  0x33   :  { %v1596_v35 = vpack.c.bf16 %v1291_v34, %v1290_v18  ;;  %v534_v16 = vsub.s32 %v8233_v22, %v533_v20  ;;  %vm865_vm9 = vmand %vm815_vm8, %vm765_vm6  ;;  %v8298_v44 = vmul.u32.u64.low 2748779070, %v141_v6  ;;  %v8299_v33 = vmul.u32.u64.high 2748779070, %v141_v6, %v8298_v44 }
  0x34   :  { %v8301_v49 = vsel %vm865_vm9, %v915_v57, %v523_v15  ;;  %v8304_v53 = vmul.u32.u64.low 2748779070, %v142_v63  ;;  %v8305_v8 = vmul.u32.u64.high 2748779070, %v142_v63, %v8304_v53  ;;  %v1154_v22 = vsel %vm13379_vm3, %v1115_v37, %v8277_v51 }
  0x35   :  { %13642 = vst [vmem:[#allocation18_spill] sm:$0xff] %v8301_v49  ;;  %6768 = vmatmul.mubr.msk.bf16.gmra.mxu0 %vm1642_vm5, %v1596_v35  ;;  %vm766_vm0 = vcmp.ne.s32.totalorder %v534_v16, 0  ;;  %vm816_vm11 = vcmp.lt.s32.totalorder %v534_v16, 0  ;;  %v916_v58 = vadd.s32 200, %v534_v16  ;;  %vm13217_vm10 = vcmp.eq.s32.totalorder %v8301_v49, 0 }
  0x36   :  { %vm866_vm14 = vmand %vm816_vm11, %vm766_vm0  ;;  %6771 = vmatprep.mubr.msk.bf16.mxu0 %vm7892_vm2, %v13237_v0  ;;  %v13223_v61 = vunpack.c.h.bf16 %v8292_v28  ;;  %v1316_v21 = vsel %vm13217_vm10, 0.0, %v1155_v41  ;;  %v257_v12 = vshrl.u32 %v8299_v33, 7  ;;  %v268_v37 = vshrl.u32 %v8305_v8, 7 }
  0x37   :  { %v8315_v5 = vsel %vm866_vm14, %v916_v58, %v534_v16  ;;  %v1091_v15 = vrot.slane %v13229_v50, 7  ;;  %v167_v41 = vadd.s32 256, %v7967_v11  ;;  %v168_v34 = vadd.s32 264, %v7967_v11 }
  0x38   :  { %13643 = vst [vmem:[#allocation19_spill] sm:$0xff] %v8315_v5  ;;  %vm13210_vm11 = vcmp.eq.s32.totalorder %v8315_v5, 0  ;;  %v258_v20 = vmul.u32 200, %v257_v12  ;;  %v269_v35 = vmul.u32 200, %v268_v37  ;;  %v8335_v16 = vrot.slane %v13223_v61, 7 }
  0x39   :  { %v1317_v18 = vsel %vm13210_vm11, 0.0, %v1154_v22  ;;  %v13226_v44 = vunpack.c.l.bf16 %v8323_v3  ;;  %v13224_v53 = vunpack.c.h.bf16 %v8323_v3  ;;  %v173_v1 = vadd.s32 304, %v7967_v11 }
  0x3a   :  { %v1609_v57 = vpack.c.bf16 %v1317_v18, %v1316_v21  ;;  %v259_v33 = vsub.s32 %v141_v6, %v258_v20  ;;  %v8339_v8 = vmul.u32.u64.low 2748779070, %v167_v41  ;;  %v8340_v58 = vmul.u32.u64.high 2748779070, %v167_v41, %v8339_v8 }
  0x3b   :  { %v270_v22 = vsub.s32 %v142_v63, %v269_v35  ;;  %v8343_v12 = vmul.u32.u64.low 2748779070, %v168_v34  ;;  %v8344_v13 = vmul.u32.u64.high 2748779070, %v168_v34, %v8343_v12  ;;  %v1179_v6 = vsel %vm13379_vm3, %v8226_v56, %v1091_v15 }
  0x3c   :  { %6820 = vmatmul.mubr.msk.bf16.gmra.mxu1 %vm1642_vm5, %v1609_v57  ;;  %vm741_vm14 = vcmp.ne.s32.totalorder %v259_v33, 0  ;;  %vm791_vm6 = vcmp.lt.s32.totalorder %v259_v33, 0  ;;  %v891_v21 = vadd.s32 200, %v259_v33  ;;  %v1178_v63 = vsel %vm13379_vm3, %v1091_v15, %v8335_v16  ;;  %v8374_v12 = vld [vmem:[%s13193_s0 + $0x20] sm:$0xff]  }
  0x3d   :  { %6823 = vmatprep.mubr.msk.bf16.mxu1 %vm7892_vm2, %v13237_v0  ;;  %vm742_vm8 = vcmp.ne.s32.totalorder %v270_v22, 0  ;;  %vm792_vm9 = vcmp.lt.s32.totalorder %v270_v22, 0  ;;  %vm841_vm0 = vmand %vm791_vm6, %vm741_vm14  ;;  %v892_v37 = vadd.s32 200, %v270_v22  ;;  %v543_v20 = vshrl.u32 %v8340_v58, 7 }
  0x3e   :  { %vm842_vm11 = vmand %vm792_vm9, %vm742_vm8  ;;  %v8354_v18 = vsel %vm841_vm0, %v891_v21, %v259_v33  ;;  %v1117_v57 = vrot.slane %v13226_v44, 7  ;;  %v8361_v35 = vrot.slane %v13224_v53, 7  ;;  %v554_v8 = vshrl.u32 %v8344_v13, 7 }
  0x3f   :  { %13644 = vst [vmem:[#allocation20_spill] sm:$0xff] %v8354_v18  ;;  %v8363_v56 = vsel %vm842_vm11, %v892_v37, %v270_v22  ;;  %vm13219_vm14 = vcmp.eq.s32.totalorder %v8354_v18, 0  ;;  %v143_v15 = vadd.s32 64, %v7967_v11  ;;  %v544_v58 = vmul.u32 200, %v543_v20 }
  0x40   :  { %13645 = vst [vmem:[#allocation21_spill] sm:$0xff] %v8363_v56  ;;  %vm13218_vm6 = vcmp.eq.s32.totalorder %v8363_v56, 0  ;;  %v1292_v33 = vsel %vm13219_vm14, 0.0, %v1179_v6  ;;  %v144_v22 = vadd.s32 72, %v7967_v11  ;;  %v555_v37 = vmul.u32 200, %v554_v8 }
  0x41   :  { %v1293_v21 = vsel %vm13218_vm6, 0.0, %v1178_v63  ;;  %v8379_v13 = vmul.u32.u64.low 2748779070, %v143_v15  ;;  %v8380_v47 = vmul.u32.u64.high 2748779070, %v143_v15, %v8379_v13  ;;  %v545_v39 = vsub.s32 %v167_v41, %v544_v58 }
  0x42   :  { %v1597_v40 = vpack.c.bf16 %v1293_v21, %v1292_v33  ;;  %v8382_v38 = vmul.u32.u64.low 2748779070, %v144_v22  ;;  %v8383_v17 = vmul.u32.u64.high 2748779070, %v144_v22, %v8382_v38  ;;  %v556_v6 = vsub.s32 %v168_v34, %v555_v37  ;;  %v8406_v21 = vld [vmem:[%s13193_s0 + $0x88] sm:$0xff]  }
  0x43   :  { %v1153_v20 = vsel %vm13379_vm3, %v8277_v51, %v1117_v57  ;;  %v13220_v62 = vunpack.c.l.bf16 %v8374_v12  ;;  %vm767_vm11 = vcmp.ne.s32.totalorder %v545_v39, 0  ;;  %vm817_vm8 = vcmp.lt.s32.totalorder %v545_v39, 0 }
  0x44   :  { %6772 = vmatmul.mubr.msk.bf16.gmra.mxu0 %vm1642_vm5, %v1597_v40  ;;  %v917_v63 = vadd.s32 200, %v545_v39  ;;  %v13222_v8 = vunpack.c.h.bf16 %v8374_v12  ;;  %vm768_vm9 = vcmp.ne.s32.totalorder %v556_v6, 0  ;;  %vm818_vm0 = vcmp.lt.s32.totalorder %v556_v6, 0  ;;  %vm867_vm10 = vmand %vm817_vm8, %vm767_vm11 }
  0x45   :  { %v918_v41 = vadd.s32 200, %v556_v6  ;;  %6775 = vmatprep.mubr.msk.bf16.mxu0 %vm7892_vm2, %v13237_v0  ;;  %v279_v38 = vshrl.u32 %v8380_v47, 7  ;;  %vm868_vm6 = vmand %vm818_vm0, %vm768_vm9  ;;  %v1152_v40 = vsel %vm13379_vm3, %v1117_v57, %v8361_v35  ;;  %v290_v34 = vshrl.u32 %v8383_v17, 7 }
  0x46   :  { %v8394_v51 = vsel %vm867_vm10, %v917_v63, %v545_v39  ;;  %v1093_v57 = vrot.slane %v13220_v62, 7  ;;  %v8417_v13 = vrot.slane %v13222_v8, 7  ;;  %v13228_v62 = vunpack.c.h.bf16 %v8406_v21 }
  0x47   :  { %13646 = vst [vmem:[#allocation22_spill] sm:$0xff] %v8394_v51  ;;  %v8400_v33 = vsel %vm868_vm6, %v918_v41, %v556_v6  ;;  %vm13234_vm14 = vcmp.eq.s32.totalorder %v8394_v51, 0  ;;  %v280_v58 = vmul.u32 200, %v279_v38  ;;  %v291_v47 = vmul.u32 200, %v290_v34 }
  0x48   :  { %13647 = vst [vmem:[#allocation23_spill] sm:$0xff] %v8400_v33  ;;  %vm13221_vm11 = vcmp.eq.s32.totalorder %v8400_v33, 0  ;;  %v1318_v39 = vsel %vm13234_vm14, 0.0, %v1153_v20  ;;  %v169_v6 = vadd.s32 272, %v7967_v11  ;;  %v13225_v38 = vunpack.c.l.bf16 %v8406_v21 }
  0x49   :  { %v1319_v17 = vsel %vm13221_vm11, 0.0, %v1152_v40  ;;  %v281_v37 = vsub.s32 %v143_v15, %v280_v58  ;;  %v292_v41 = vsub.s32 %v144_v22, %v291_v47  ;;  %v170_v20 = vadd.s32 280, %v7967_v11 }
  0x4a   :  { %v1610_v63 = vpack.c.bf16 %v1319_v17, %v1318_v39  ;;  %v1177_v40 = vsel %vm13379_vm3, %v8335_v16, %v1093_v57  ;;  %v1176_v58 = vsel %vm13379_vm3, %v1093_v57, %v8417_v13  ;;  %v8440_v17 = vld [vmem:[%s13193_s0 + $0x28] sm:$0xff]   ;;  %vm13439_vm1 = vcmp.eq.s32.totalorder %v8394_v51, 199 }
  0x4b   :  { %vm743_vm10 = vcmp.ne.s32.totalorder %v281_v37, 0  ;;  %vm793_vm6 = vcmp.lt.s32.totalorder %v281_v37, 0  ;;  %v893_v34 = vadd.s32 200, %v281_v37  ;;  %vm744_vm8 = vcmp.ne.s32.totalorder %v292_v41, 0  ;;  %13649 = vst [vmem:[#allocation25_spill] sm:$0xff] %v8440_v17 }
  0x4c   :  { %6824 = vmatmul.mubr.msk.bf16.gmra.mxu1 %vm1642_vm5, %v1610_v63  ;;  %vm794_vm9 = vcmp.lt.s32.totalorder %v292_v41, 0  ;;  %vm843_vm0 = vmand %vm793_vm6, %vm743_vm10  ;;  %v894_v15 = vadd.s32 200, %v292_v41  ;;  %v8434_v39 = vmul.u32.u64.low 2748779070, %v169_v6  ;;  %v8435_v47 = vmul.u32.u64.high 2748779070, %v169_v6, %v8434_v39 }
  0x4d   :  { %6827 = vmatprep.mubr.msk.bf16.mxu1 %vm7892_vm2, %v13237_v0  ;;  %vm844_vm11 = vmand %vm794_vm9, %vm744_vm8  ;;  %v8429_v22 = vsel %vm843_vm0, %v893_v34, %v281_v37  ;;  %v8445_v16 = vmul.u32.u64.low 2748779070, %v170_v20  ;;  %v8446_v8 = vmul.u32.u64.high 2748779070, %v170_v20, %v8445_v16  ;;  %v1119_v37 = vrot.slane %v13225_v38, 7 }
  0x4e   :  { %13648 = vst [vmem:[#allocation24_spill] sm:$0xff] %v8429_v22  ;;  %v8442_v63 = vsel %vm844_vm11, %v894_v15, %v292_v41  ;;  %vm13239_vm10 = vcmp.eq.s32.totalorder %v8429_v22, 0  ;;  %v8455_v34 = vrot.slane %v13228_v62, 7  ;;  %v13232_v15 = vunpack.c.l.bf16 %v8440_v17 }
  0x4f   :  { %13650 = vst [vmem:[#allocation26_spill] sm:$0xff] %v8442_v63  ;;  %vm13235_vm6 = vcmp.eq.s32.totalorder %v8442_v63, 0  ;;  %v1294_v57 = vsel %vm13239_vm10, 0.0, %v1177_v40  ;;  %v145_v39 = vadd.s32 80, %v7967_v11  ;;  %v146_v16 = vadd.s32 88, %v7967_v11 }
  0x50   :  { %v1295_v41 = vsel %vm13235_vm6, 0.0, %v1176_v58  ;;  %v565_v53 = vshrl.u32 %v8435_v47, 7  ;;  %v13236_v40 = vunpack.c.h.bf16 %v8440_v17  ;;  %v576_v38 = vshrl.u32 %v8446_v8, 7  ;;  %v8471_v58 = vld [vmem:[%s13193_s0 + $0x90] sm:$0xff]  }
  0x51   :  { %v1598_v61 = vpack.c.bf16 %v1295_v41, %v1294_v57  ;;  %v8465_v44 = vmul.u32.u64.low 2748779070, %v145_v39  ;;  %v8466_v29 = vmul.u32.u64.high 2748779070, %v145_v39, %v8465_v44  ;;  %v1150_v57 = vsel %vm13379_vm3, %v1119_v37, %v8455_v34 }
  0x52   :  { %v566_v62 = vmul.u32 200, %v565_v53  ;;  %v8477_v47 = vmul.u32.u64.low 2748779070, %v146_v16  ;;  %v8478_v41 = vmul.u32.u64.high 2748779070, %v146_v16, %v8477_v47  ;;  %v1151_v44 = vsel %vm13379_vm3, %v8361_v35, %v1119_v37 }
  0x53   :  { %6776 = vmatmul.mubr.msk.bf16.gmra.mxu0 %vm1642_vm5, %v1598_v61  ;;  %v577_v50 = vmul.u32 200, %v576_v38  ;;  %v1095_v8 = vrot.slane %v13232_v15, 7  ;;  %v171_v61 = vadd.s32 288, %v7967_v11  ;;  %v8490_v26 = vrot.slane %v13236_v40, 7 }
  0x54   :  { %6779 = vmatprep.mubr.msk.bf16.mxu0 %vm7892_vm2, %v13237_v0  ;;  %v567_v53 = vsub.s32 %v169_v6, %v566_v62  ;;  %v13241_v47 = vunpack.c.l.bf16 %v8471_v58  ;;  %v172_v38 = vadd.s32 296, %v7967_v11  ;;  %v301_v35 = vshrl.u32 %v8466_v29, 7 }
  0x55   :  { %v578_v27 = vsub.s32 %v170_v20, %v577_v50  ;;  %v8495_v37 = vmul.u32.u64.low 2748779070, %v171_v61  ;;  %v8496_v14 = vmul.u32.u64.high 2748779070, %v171_v61, %v8495_v37  ;;  %v312_v55 = vshrl.u32 %v8478_v41, 7 }
  0x56   :  { %vm769_vm11 = vcmp.ne.s32.totalorder %v567_v53, 0  ;;  %vm819_vm8 = vcmp.lt.s32.totalorder %v567_v53, 0  ;;  %v919_v15 = vadd.s32 200, %v567_v53  ;;  %v302_v6 = vmul.u32 200, %v301_v35 }
  0x57   :  { %vm770_vm9 = vcmp.ne.s32.totalorder %v578_v27, 0  ;;  %vm820_vm0 = vcmp.lt.s32.totalorder %v578_v27, 0  ;;  %vm869_vm14 = vmand %vm819_vm8, %vm769_vm11  ;;  %v920_v62 = vadd.s32 200, %v578_v27  ;;  %v313_v0 = vmul.u32 200, %v312_v55 }
  0x58   :  { %vm870_vm6 = vmand %vm820_vm0, %vm770_vm9  ;;  %v8499_v40 = vsel %vm869_vm14, %v919_v15, %v567_v53  ;;  %v8501_v50 = vmul.u32.u64.low 2748779070, %v172_v38  ;;  %v8502_v20 = vmul.u32.u64.high 2748779070, %v172_v38, %v8501_v50  ;;  %v303_v37 = vsub.s32 %v145_v39, %v302_v6 }
  0x59   :  { %13651 = vst [vmem:[#allocation27_spill] sm:$0xff] %v8499_v40  ;;  %v8504_v29 = vsel %vm870_vm6, %v920_v62, %v578_v27  ;;  %vm13245_vm10 = vcmp.eq.s32.totalorder %v8499_v40, 0  ;;  %v1175_v41 = vsel %vm13379_vm3, %v8417_v13, %v1095_v8  ;;  %v314_v15 = vsub.s32 %v146_v16, %v313_v0 }
  0x5a   :  { %13652 = vst [vmem:[#allocation28_spill] sm:$0xff] %v8504_v29  ;;  %vm13244_vm11 = vcmp.eq.s32.totalorder %v8504_v29, 0  ;;  %v1320_v35 = vsel %vm13245_vm10, 0.0, %v1151_v44  ;;  %v13246_v55 = vunpack.c.h.bf16 %v8471_v58  ;;  %vm745_vm14 = vcmp.ne.s32.totalorder %v303_v37, 0 }
  0x5b   :  { %v1321_v53 = vsel %vm13244_vm11, 0.0, %v1150_v57  ;;  %vm795_vm6 = vcmp.lt.s32.totalorder %v303_v37, 0  ;;  %v895_v27 = vadd.s32 200, %v303_v37  ;;  %vm746_vm8 = vcmp.ne.s32.totalorder %v314_v15, 0  ;;  %v8526_v57 = vld [vmem:[%s13193_s0 + $0x30] sm:$0xff]  }
  0x5c   :  { %v1611_v62 = vpack.c.bf16 %v1321_v53, %v1320_v35  ;;  %vm796_vm9 = vcmp.lt.s32.totalorder %v314_v15, 0  ;;  %vm845_vm0 = vmand %vm795_vm6, %vm745_vm14  ;;  %v896_v39 = vadd.s32 200, %v314_v15  ;;  %v1174_v0 = vsel %vm13379_vm3, %v1095_v8, %v8490_v26  ;;  %13654 = vst [vmem:[#allocation30_spill] sm:$0xff] %v8526_v57 }
  0x5d   :  { %vm846_vm12 = vmand %vm796_vm9, %vm746_vm8  ;;  %v8516_v13 = vsel %vm845_vm0, %v895_v27, %v303_v37  ;;  %v587_v16 = vshrl.u32 %v8496_v14, 7  ;;  %v598_v44 = vshrl.u32 %v8502_v20, 7  ;;  %v1121_v50 = vrot.slane %v13241_v47, 7 }
  0x5e   :  { %13653 = vst [vmem:[#allocation29_spill] sm:$0xff] %v8516_v13  ;;  %6828 = vmatmul.mubr.msk.bf16.gmra.mxu1 %vm1642_vm5, %v1611_v62  ;;  %v8529_v6 = vsel %vm846_vm12, %v896_v39, %v314_v15  ;;  %vm13261_vm14 = vcmp.eq.s32.totalorder %v8516_v13, 0  ;;  %v13656_v37 = vmov 0.0   ;;  %v1122_v15 = vrot.slane %v13246_v55, 7 }
  0x5f   :  { %13655 = vst [vmem:[#allocation31_spill] sm:$0xff] %v8529_v6  ;;  %6831 = vmatprep.mubr.msk.bf16.mxu1 %vm7892_vm2, %v13656_v37  ;;  %vm13260_vm6 = vcmp.eq.s32.totalorder %v8529_v6, 0  ;;  %v1296_v14 = vsel %vm13261_vm14, 0.0, %v1175_v41  ;;  %v588_v8 = vmul.u32 200, %v587_v16  ;;  %v599_v20 = vmul.u32 200, %v598_v44 }
  0x60   :  { %v1297_v35 = vsel %vm13260_vm6, 0.0, %v1174_v0  ;;  %v13249_v53 = vunpack.c.l.bf16 %v8526_v57  ;;  %v147_v47 = vadd.s32 96, %v7967_v11  ;;  %v1149_v4 = vsel %vm13379_vm3, %v8455_v34, %v1121_v50 }
  0x61   :  { %v1599_v27 = vpack.c.bf16 %v1297_v35, %v1296_v14  ;;  %v589_v62 = vsub.s32 %v171_v61, %v588_v8  ;;  %v600_v39 = vsub.s32 %v172_v38, %v599_v20  ;;  %v148_v16 = vadd.s32 104, %v7967_v11  ;;  %v8554_v61 = vld [vmem:[%s13193_s0 + $0x98] sm:$0xff]  }
  0x62   :  { %v8558_v34 = vmul.u32.u64.low 2748779070, %v147_v47  ;;  %v8559_v44 = vmul.u32.u64.high 2748779070, %v147_v47, %v8558_v34  ;;  %v1148_v14 = vsel %vm13379_vm3, %v1121_v50, %v1122_v15  ;;  %v1097_v35 = vrot.slane %v13249_v53, 7 }
  0x63   :  { %6780 = vmatmul.mubr.msk.bf16.gmra.mxu0 %vm1642_vm5, %v1599_v27  ;;  %vm771_vm12 = vcmp.ne.s32.totalorder %v589_v62, 0  ;;  %vm772_vm8 = vcmp.ne.s32.totalorder %v600_v39, 0  ;;  %vm821_vm9 = vcmp.lt.s32.totalorder %v589_v62, 0  ;;  %vm822_vm0 = vcmp.lt.s32.totalorder %v600_v39, 0 }
  0x64   :  { %vm871_vm11 = vmand %vm821_vm9, %vm771_vm12  ;;  %v921_v38 = vadd.s32 200, %v589_v62  ;;  %v922_v0 = vadd.s32 200, %v600_v39  ;;  %6783 = vmatprep.mubr.msk.bf16.mxu0 %vm7892_vm2, %v13656_v37  ;;  %v8563_v8 = vmul.u32.u64.low 2748779070, %v148_v16  ;;  %v8564_v20 = vmul.u32.u64.high 2748779070, %v148_v16, %v8563_v8 }
  0x65   :  { %vm872_vm10 = vmand %vm822_vm0, %vm772_vm8  ;;  %v13659_v50 = vunpack.c.h.bf16 %v8526_v57  ;;  %v8588_v32 = vmul.u32.u64.low 2748779070, %v173_v1  ;;  %v8589_v52 = vmul.u32.u64.high 2748779070, %v173_v1, %v8588_v32  ;;  %v13660_v8 = vunpack.c.l.bf16 %v8554_v61 }
  0x66   :  { %v8568_v27 = vsel %vm871_vm11, %v921_v38, %v589_v62  ;;  %v8570_v55 = vsel %vm872_vm10, %v922_v0, %v600_v39  ;;  %v323_v38 = vshrl.u32 %v8559_v44, 7  ;;  %v174_v0 = vadd.s32 312, %v7967_v11 }
  0x67   :  { %13657 = vst [vmem:[#allocation32_spill] sm:$0xff] %v8568_v27  ;;  %13658 = vst [vmem:[#allocation33_spill] sm:$0xff] %v8570_v55  ;;  %vm13259_vm12 = vcmp.eq.s32.totalorder %v8568_v27, 0  ;;  %vm13258_vm8 = vcmp.eq.s32.totalorder %v8570_v55, 0  ;;  %v8578_v34 = vrot.slane %v13659_v50, 7  ;;  %v334_v41 = vshrl.u32 %v8564_v20, 7 }
  0x68   :  { %v1322_v62 = vsel %vm13259_vm12, 0.0, %v1149_v4  ;;  %v1323_v39 = vsel %vm13258_vm8, 0.0, %v1148_v14  ;;  %v324_v50 = vmul.u32 200, %v323_v38  ;;  %v1123_v4 = vrot.slane %v13660_v8, 7 }
  0x69   :  { %v1612_v53 = vpack.c.bf16 %v1323_v39, %v1322_v62  ;;  %v8591_v46 = vmul.u32.u64.low 2748779070, %v174_v0  ;;  %v8592_v42 = vmul.u32.u64.high 2748779070, %v174_v0, %v8591_v46  ;;  %v335_v14 = vmul.u32 200, %v334_v41 }
  0x6a   :  { %v325_v44 = vsub.s32 %v147_v47, %v324_v50  ;;  %v1172_v20 = vsel %vm13379_vm3, %v1097_v35, %v8578_v34  ;;  %v1173_v32 = vsel %vm13379_vm3, %v8490_v26, %v1097_v35  ;;  %v609_v46 = vshrl.u32 %v8589_v52, 7  ;;  %v8615_v47 = vld [vmem:[%s13193_s0 + $0x38] sm:$0xff]  }
  0x6b   :  { %6832 = vmatmul.mubr.msk.bf16.gmra.mxu1 %vm1642_vm5, %v1612_v53  ;;  %v336_v62 = vsub.s32 %v148_v16, %v335_v14  ;;  %v13661_v8 = vunpack.c.h.bf16 %v8554_v61  ;;  %v1147_v53 = vsel %vm13379_vm3, %v1122_v15, %v1123_v4  ;;  %13662 = vst [vmem:[#allocation34_spill] sm:$0xff] %v8615_v47  ;;  %v620_v26 = vshrl.u32 %v8592_v42, 7 }
  0x6c   :  { %6835 = vmatprep.mubr.msk.bf16.mxu1 %vm7892_vm2, %v13656_v37  ;;  %vm747_vm10 = vcmp.ne.s32.totalorder %v325_v44, 0  ;;  %vm797_vm11 = vcmp.lt.s32.totalorder %v325_v44, 0  ;;  %v897_v41 = vadd.s32 200, %v325_v44  ;;  %v610_v16 = vmul.u32 200, %v609_v46 }
  0x6d   :  { %v8608_v39 = vrot.slane %v13661_v8, 7  ;;  %vm748_vm9 = vcmp.ne.s32.totalorder %v336_v62, 0  ;;  %vm798_vm0 = vcmp.lt.s32.totalorder %v336_v62, 0  ;;  %vm847_vm8 = vmand %vm797_vm11, %vm747_vm10  ;;  %v898_v52 = vadd.s32 200, %v336_v62 }
  0x6e   :  { %vm848_vm12 = vmand %vm798_vm0, %vm748_vm9  ;;  %v8618_v35 = vsel %vm847_vm8, %v897_v41, %v325_v44  ;;  %v621_v38 = vmul.u32 200, %v620_v26  ;;  %v13266_v15 = vunpack.c.l.bf16 %v8615_v47  ;;  %v13271_v50 = vunpack.c.h.bf16 %v8615_v47 }
  0x6f   :  { %13663 = vst [vmem:[#allocation35_spill] sm:$0xff] %v8618_v35  ;;  %v8622_v14 = vsel %vm848_vm12, %v898_v52, %v336_v62  ;;  %vm13265_vm6 = vcmp.eq.s32.totalorder %v8618_v35, 0  ;;  %v611_v8 = vsub.s32 %v173_v1, %v610_v16  ;;  %v149_v42 = vadd.s32 112, %v7967_v11 }
  0x70   :  { %13664 = vst [vmem:[#allocation36_spill] sm:$0xff] %v8622_v14  ;;  %vm13264_vm14 = vcmp.eq.s32.totalorder %v8622_v14, 0  ;;  %v1298_v46 = vsel %vm13265_vm6, 0.0, %v1173_v32  ;;  %v622_v36 = vsub.s32 %v174_v0, %v621_v38  ;;  %v150_v44 = vadd.s32 120, %v7967_v11 }
  0x71   :  { %v1299_v41 = vsel %vm13264_vm14, 0.0, %v1172_v20  ;;  %vm773_vm8 = vcmp.ne.s32.totalorder %v611_v8, 0  ;;  %vm823_vm10 = vcmp.lt.s32.totalorder %v611_v8, 0  ;;  %v923_v62 = vadd.s32 200, %v611_v8 }
  0x72   :  { %v1600_v26 = vpack.c.bf16 %v1299_v41, %v1298_v46  ;;  %vm774_vm12 = vcmp.ne.s32.totalorder %v622_v36, 0  ;;  %vm824_vm11 = vcmp.lt.s32.totalorder %v622_v36, 0  ;;  %vm873_vm9 = vmand %vm823_vm10, %vm773_vm8  ;;  %v924_v1 = vadd.s32 200, %v622_v36 }
  0x73   :  { %vm874_vm0 = vmand %vm824_vm11, %vm774_vm12  ;;  %v8632_v52 = vsel %vm873_vm9, %v923_v62, %v611_v8  ;;  %v1146_v0 = vsel %vm13379_vm3, %v1123_v4, %v8608_v39  ;;  %v8637_v32 = vmul.u32.u64.low 2748779070, %v149_v42  ;;  %v8638_v16 = vmul.u32.u64.high 2748779070, %v149_v42, %v8637_v32  ;;  %v8654_v8 = vld [vmem:[%s13193_s0 + $0xa0] sm:$0xff]  }
  0x74   :  { %13665 = vst [vmem:[#allocation37_spill] sm:$0xff] %v8632_v52  ;;  %6784 = vmatmul.mubr.msk.bf16.gmra.mxu0 %vm1642_vm5, %v1600_v26  ;;  %v8641_v20 = vsel %vm874_vm0, %v924_v1, %v622_v36  ;;  %vm13283_vm14 = vcmp.eq.s32.totalorder %v8632_v52, 0  ;;  %v1099_v4 = vrot.slane %v13266_v15, 7  ;;  %v175_v62 = vadd.s32 320, %v7967_v11 }
  0x75   :  { %13666 = vst [vmem:[#allocation38_spill] sm:$0xff] %v8641_v20  ;;  %vm13282_vm6 = vcmp.eq.s32.totalorder %v8641_v20, 0  ;;  %v1324_v38 = vsel %vm13283_vm14, 0.0, %v1147_v53  ;;  %6787 = vmatprep.mubr.msk.bf16.mxu0 %vm7892_vm2, %v13656_v37  ;;  %v8658_v46 = vmul.u32.u64.low 2748779070, %v150_v44  ;;  %v8659_v41 = vmul.u32.u64.high 2748779070, %v150_v44, %v8658_v46 }
  0x76   :  { %v1325_v36 = vsel %vm13282_vm6, 0.0, %v1146_v0  ;;  %v345_v26 = vshrl.u32 %v8638_v16, 7  ;;  %v8665_v1 = vrot.slane %v13271_v50, 7  ;;  %v176_v32 = vadd.s32 328, %v7967_v11 }
  0x77   :  { %v1613_v53 = vpack.c.bf16 %v1325_v36, %v1324_v38  ;;  %v13279_v15 = vunpack.c.l.bf16 %v8654_v8  ;;  %v8670_v25 = vmul.u32.u64.low 2748779070, %v175_v62  ;;  %v8671_v0 = vmul.u32.u64.high 2748779070, %v175_v62, %v8670_v25 }
  0x78   :  { %v346_v46 = vmul.u32 200, %v345_v26  ;;  %v8674_v24 = vmul.u32.u64.low 2748779070, %v176_v32  ;;  %v8675_v38 = vmul.u32.u64.high 2748779070, %v176_v32, %v8674_v24  ;;  %v356_v16 = vshrl.u32 %v8659_v41, 7 }
  0x79   :  { %6836 = vmatmul.mubr.msk.bf16.gmra.mxu1 %vm1642_vm5, %v1613_v53  ;;  %v1171_v36 = vsel %vm13379_vm3, %v8578_v34, %v1099_v4  ;;  %v1170_v25 = vsel %vm13379_vm3, %v1099_v4, %v8665_v1  ;;  %v151_v53 = vadd.s32 128, %v7967_v11  ;;  %v8688_v26 = vadd.s32 136, %v7967_v11 }
  0x7a   :  { %6839 = vmatprep.mubr.msk.bf16.mxu1 %vm7892_vm2, %v13656_v37  ;;  %v347_v50 = vsub.s32 %v149_v42, %v346_v46  ;;  %v357_v24 = vmul.u32 200, %v356_v16  ;;  %v631_v31 = vshrl.u32 %v8671_v0, 7  ;;  %v1125_v41 = vrot.slane %v13279_v15, 7  ;;  %v8706_v15 = vld [vmem:[%s13193_s0 + $0x40] sm:$0xff]  }
  0x7b   :  { %v13667_v10 = vunpack.c.h.bf16 %v8654_v8  ;;  %v642_v42 = vshrl.u32 %v8675_v38, 7  ;;  %v8698_v35 = vmul.u32.u64.low 2748779070, %v151_v53  ;;  %v8699_v47 = vmul.u32.u64.high 2748779070, %v151_v53, %v8698_v35  ;;  %13669 = vst [vmem:[#allocation40_spill] sm:$0xff] %v8706_v15 }
  0x7c   :  { %vm749_vm8 = vcmp.ne.s32.totalorder %v347_v50, 0  ;;  %vm799_vm10 = vcmp.lt.s32.totalorder %v347_v50, 0  ;;  %v899_v34 = vadd.s32 200, %v347_v50  ;;  %v358_v4 = vsub.s32 %v150_v44, %v357_v24 }
  0x7d   :  { %v8695_v14 = vrot.slane %v13667_v10, 7  ;;  %vm849_vm12 = vmand %vm799_vm10, %vm749_vm8  ;;  %v632_v46 = vmul.u32 200, %v631_v31  ;;  %v643_v0 = vmul.u32 200, %v642_v42  ;;  %v1145_v38 = vsel %vm13379_vm3, %v8608_v39, %v1125_v41 }
  0x7e   :  { %v8701_v16 = vsel %vm849_vm12, %v899_v34, %v347_v50  ;;  %v8709_v10 = vmul.u32.u64.low 2748779070, %v8688_v26  ;;  %v8710_v6 = vmul.u32.u64.high 2748779070, %v8688_v26, %v8709_v10  ;;  %vm750_vm11 = vcmp.ne.s32.totalorder %v358_v4, 0 }
  0x7f   :  { %13668 = vst [vmem:[#allocation39_spill] sm:$0xff] %v8701_v16  ;;  %vm800_vm9 = vcmp.lt.s32.totalorder %v358_v4, 0  ;;  %v900_v44 = vadd.s32 200, %v358_v4  ;;  %vm13360_vm0 = vcmp.eq.s32.totalorder %v8701_v16, 0  ;;  %v633_v31 = vsub.s32 %v175_v62, %v632_v46 }
  0x80   :  { %vm850_vm8 = vmand %vm800_vm9, %vm750_vm11  ;;  %v644_v35 = vsub.s32 %v176_v32, %v643_v0  ;;  %v1144_v50 = vsel %vm13379_vm3, %v1125_v41, %v8695_v14  ;;  %v1300_v34 = vsel %vm13360_vm0, 0.0, %v1171_v36  ;;  %v13286_v42 = vunpack.c.l.bf16 %v8706_v15  ;;  %v8731_v36 = vld [vmem:[%s13193_s0 + $0xa8] sm:$0xff]  }
  0x81   :  { %v8719_v24 = vsel %vm850_vm8, %v900_v44, %v358_v4  ;;  %v367_v10 = vshrl.u32 %v8699_v47, 7  ;;  %vm775_vm12 = vcmp.ne.s32.totalorder %v633_v31, 0  ;;  %vm825_vm9 = vcmp.lt.s32.totalorder %v633_v31, 0  ;;  %13671 = vst [vmem:[#allocation42_spill] sm:$0xff] %v8731_v36 }
  0x82   :  { %13670 = vst [vmem:[#allocation41_spill] sm:$0xff] %v8719_v24  ;;  %vm13331_vm10 = vcmp.eq.s32.totalorder %v8719_v24, 0  ;;  %vm776_vm11 = vcmp.ne.s32.totalorder %v644_v35, 0  ;;  %vm826_vm6 = vcmp.lt.s32.totalorder %v644_v35, 0  ;;  %vm875_vm14 = vmand %vm825_vm9, %vm775_vm12  ;;  %v925_v39 = vadd.s32 200, %v633_v31 }
  0x83   :  { %v1301_v62 = vsel %vm13331_vm10, 0.0, %v1170_v25  ;;  %v926_v32 = vadd.s32 200, %v644_v35  ;;  %vm876_vm8 = vmand %vm826_vm6, %vm776_vm11  ;;  %v13289_v47 = vunpack.c.h.bf16 %v8706_v15  ;;  %v368_v4 = vmul.u32 200, %v367_v10 }
  0x84   :  { %v1601_v41 = vpack.c.bf16 %v1301_v62, %v1300_v34  ;;  %v378_v46 = vshrl.u32 %v8710_v6, 7  ;;  %v8735_v0 = vsel %vm875_vm14, %v925_v39, %v633_v31  ;;  %v1101_v25 = vrot.slane %v13286_v42, 7 }
  0x85   :  { %13672 = vst [vmem:[#allocation43_spill] sm:$0xff] %v8735_v0  ;;  %v8737_v44 = vsel %vm876_vm8, %v926_v32, %v644_v35  ;;  %v177_v24 = vadd.s32 336, %v7967_v11  ;;  %vm13288_vm12 = vcmp.eq.s32.totalorder %v8735_v0, 0  ;;  %v178_v10 = vadd.s32 344, %v7967_v11 }
  0x86   :  { %13673 = vst [vmem:[#allocation44_spill] sm:$0xff] %v8737_v44  ;;  %6788 = vmatmul.mubr.msk.bf16.gmra.mxu0 %vm1642_vm5, %v1601_v41  ;;  %vm13287_vm6 = vcmp.eq.s32.totalorder %v8737_v44, 0  ;;  %v1326_v6 = vsel %vm13288_vm12, 0.0, %v1145_v38  ;;  %v369_v35 = vsub.s32 %v151_v53, %v368_v4  ;;  %v379_v62 = vmul.u32 200, %v378_v46 }
  0x87   :  { %v1327_v31 = vsel %vm13287_vm6, 0.0, %v1144_v50  ;;  %6791 = vmatprep.mubr.msk.bf16.mxu0 %vm7892_vm2, %v13656_v37  ;;  %v8755_v32 = vrot.slane %v13289_v47, 7  ;;  %v8757_v41 = vmul.u32.u64.low 2748779070, %v177_v24  ;;  %v8758_v42 = vmul.u32.u64.high 2748779070, %v177_v24, %v8757_v41 }
  0x88   :  { %v1614_v39 = vpack.c.bf16 %v1327_v31, %v1326_v6  ;;  %v380_v34 = vsub.s32 %v8688_v26, %v379_v62  ;;  %vm751_vm14 = vcmp.ne.s32.totalorder %v369_v35, 0  ;;  %vm801_vm11 = vcmp.lt.s32.totalorder %v369_v35, 0 }
  0x89   :  { %v901_v38 = vadd.s32 200, %v369_v35  ;;  %vm851_vm9 = vmand %vm801_vm11, %vm751_vm14  ;;  %v1169_v53 = vsel %vm13379_vm3, %v8665_v1, %v1101_v25  ;;  %v13294_v50 = vunpack.c.h.bf16 %v8731_v36  ;;  %v1168_v1 = vsel %vm13379_vm3, %v1101_v25, %v8755_v32 }
  0x8a   :  { %6840 = vmatmul.mubr.msk.bf16.gmra.mxu1 %vm1642_vm5, %v1614_v39  ;;  %v8766_v4 = vmul.u32.u64.low 2748779070, %v178_v10  ;;  %v8767_v46 = vmul.u32.u64.high 2748779070, %v178_v10, %v8766_v4  ;;  %vm752_vm8 = vcmp.ne.s32.totalorder %v380_v34, 0  ;;  %vm802_vm6 = vcmp.lt.s32.totalorder %v380_v34, 0 }
  0x8b   :  { %6843 = vmatprep.mubr.msk.bf16.mxu1 %vm7892_vm2, %v13656_v37  ;;  %v902_v26 = vadd.s32 200, %v380_v34  ;;  %v8771_v6 = vsel %vm851_vm9, %v901_v38, %v369_v35  ;;  %vm852_vm12 = vmand %vm802_vm6, %vm752_vm8  ;;  %v653_v31 = vshrl.u32 %v8758_v42, 7  ;;  %v13676_v38 = vunpack.c.l.bf16 %v8731_v36 }
  0x8c   :  { %13674 = vst [vmem:[#allocation45_spill] sm:$0xff] %v8771_v6  ;;  %vm13298_vm14 = vcmp.eq.s32.totalorder %v8771_v6, 0  ;;  %v664_v35 = vshrl.u32 %v8767_v46, 7  ;;  %v8790_v25 = vrot.slane %v13294_v50, 7  ;;  %v153_v42 = vadd.s32 144, %v7967_v11  ;;  %v8797_v46 = vld [vmem:[%s13193_s0 + $0x48] sm:$0xff]  }
  0x8d   :  { %v8778_v62 = vsel %vm852_vm12, %v902_v26, %v380_v34  ;;  %v1302_v39 = vsel %vm13298_vm14, 0.0, %v1169_v53  ;;  %v654_v41 = vmul.u32 200, %v653_v31  ;;  %v1127_v4 = vrot.slane %v13676_v38, 7  ;;  %13677 = vst [vmem:[#allocation47_spill] sm:$0xff] %v8797_v46 }
  0x8e   :  { %13675 = vst [vmem:[#allocation46_spill] sm:$0xff] %v8778_v62  ;;  %vm13297_vm11 = vcmp.eq.s32.totalorder %v8778_v62, 0  ;;  %v154_v34 = vadd.s32 152, %v7967_v11  ;;  %v665_v6 = vmul.u32 200, %v664_v35  ;;  %vm13432_vm7 = vcmp.eq.s32.totalorder %v8400_v33, 199  ;;  %v7870_v33 = vld [vmem:[%s13193_s0 + $0x30] sm:$0xff]  }
  0x8f   :  { %v1303_v47 = vsel %vm13297_vm11, 0.0, %v1168_v1  ;;  %v655_v26 = vsub.s32 %v177_v24, %v654_v41  ;;  %v8799_v31 = vmul.u32.u64.low 2748779070, %v153_v42  ;;  %v8800_v38 = vmul.u32.u64.high 2748779070, %v153_v42, %v8799_v31  ;;  %v8831_v41 = vld [vmem:[%s13193_s0 + $0xb0] sm:$0xff]  }
  0x90   :  { %v1602_v53 = vpack.c.bf16 %v1303_v47, %v1302_v39  ;;  %v8802_v1 = vmul.u32.u64.low 2748779070, %v154_v34  ;;  %v8803_v62 = vmul.u32.u64.high 2748779070, %v154_v34, %v8802_v1  ;;  %v666_v50 = vsub.s32 %v178_v10, %v665_v6  ;;  %13680 = vst [vmem:[#allocation50_spill] sm:$0xff] %v8831_v41 }
  0x91   :  { %vm777_vm12 = vcmp.ne.s32.totalorder %v655_v26, 0  ;;  %vm827_vm6 = vcmp.lt.s32.totalorder %v655_v26, 0  ;;  %v927_v16 = vadd.s32 200, %v655_v26  ;;  %v1142_v24 = vsel %vm13379_vm3, %v1127_v4, %v8790_v25 }
  0x92   :  { %6792 = vmatmul.mubr.msk.bf16.gmra.mxu0 %vm1642_vm5, %v1602_v53  ;;  %vm877_vm9 = vmand %vm827_vm6, %vm777_vm12  ;;  %v1143_v47 = vsel %vm13379_vm3, %v8695_v14, %v1127_v4  ;;  %v13311_v39 = vunpack.c.l.bf16 %v8797_v46  ;;  %vm778_vm8 = vcmp.ne.s32.totalorder %v666_v50, 0  ;;  %vm828_vm11 = vcmp.lt.s32.totalorder %v666_v50, 0 }
  0x93   :  { %6795 = vmatprep.mubr.msk.bf16.mxu0 %vm7892_vm2, %v13656_v37  ;;  %v928_v10 = vadd.s32 200, %v666_v50  ;;  %v8815_v6 = vsel %vm877_vm9, %v927_v16, %v655_v26  ;;  %vm878_vm14 = vmand %vm828_vm11, %vm778_vm8  ;;  %v389_v35 = vshrl.u32 %v8800_v38, 7  ;;  %v400_v53 = vshrl.u32 %v8803_v62, 7 }
  0x94   :  { %13678 = vst [vmem:[#allocation48_spill] sm:$0xff] %v8815_v6  ;;  %vm13310_vm12 = vcmp.eq.s32.totalorder %v8815_v6, 0  ;;  %v179_v31 = vadd.s32 352, %v7967_v11  ;;  %v180_v1 = vadd.s32 360, %v7967_v11  ;;  %v1103_v62 = vrot.slane %v13311_v39, 7 }
  0x95   :  { %v8821_v14 = vsel %vm878_vm14, %v928_v10, %v666_v50  ;;  %v1328_v4 = vsel %vm13310_vm12, 0.0, %v1143_v47  ;;  %v390_v16 = vmul.u32 200, %v389_v35  ;;  %v401_v26 = vmul.u32 200, %v400_v53 }
  0x96   :  { %13679 = vst [vmem:[#allocation49_spill] sm:$0xff] %v8821_v14  ;;  %vm13309_vm6 = vcmp.eq.s32.totalorder %v8821_v14, 0  ;;  %v8837_v38 = vmul.u32.u64.low 2748779070, %v179_v31  ;;  %v8838_v47 = vmul.u32.u64.high 2748779070, %v179_v31, %v8837_v38  ;;  %v13681_v35 = vunpack.c.h.bf16 %v8797_v46 }
  0x97   :  { %v1329_v50 = vsel %vm13309_vm6, 0.0, %v1142_v24  ;;  %v391_v15 = vsub.s32 %v153_v42, %v390_v16  ;;  %v402_v6 = vsub.s32 %v154_v34, %v401_v26  ;;  %v13312_v13 = vunpack.c.l.bf16 %v8831_v41 }
  0x98   :  { %v1615_v10 = vpack.c.bf16 %v1329_v50, %v1328_v4  ;;  %v8842_v53 = vrot.slane %v13681_v35, 7  ;;  %v8845_v57 = vmul.u32.u64.low 2748779070, %v180_v1  ;;  %v8846_v63 = vmul.u32.u64.high 2748779070, %v180_v1, %v8845_v57 }
  0x99   :  { %vm753_vm14 = vcmp.ne.s32.totalorder %v391_v15, 0  ;;  %vm754_vm11 = vcmp.ne.s32.totalorder %v402_v6, 0  ;;  %vm803_vm9 = vcmp.lt.s32.totalorder %v391_v15, 0  ;;  %vm804_vm8 = vcmp.lt.s32.totalorder %v402_v6, 0 }
  0x9a   :  { %6844 = vmatmul.mubr.msk.bf16.gmra.mxu1 %vm1642_vm5, %v1615_v10  ;;  %vm853_vm6 = vmand %vm803_vm9, %vm753_vm14  ;;  %v903_v42 = vadd.s32 200, %v391_v15  ;;  %v904_v34 = vadd.s32 200, %v402_v6  ;;  %v675_v24 = vshrl.u32 %v8838_v47, 7  ;;  %v1166_v4 = vsel %vm13379_vm3, %v1103_v62, %v8842_v53 }
  0x9b   :  { %6847 = vmatprep.mubr.msk.bf16.mxu1 %vm7892_vm2, %v13656_v37  ;;  %vm854_vm12 = vmand %vm804_vm8, %vm754_vm11  ;;  %v1167_v57 = vsel %vm13379_vm3, %v8755_v32, %v1103_v62  ;;  %v13317_v16 = vunpack.c.h.bf16 %v8831_v41  ;;  %v155_v26 = vadd.s32 160, %v7967_v11  ;;  %v686_v47 = vshrl.u32 %v8846_v63, 7  ;;  %v8877_v63 = vld [vmem:[%s13193_s0 + $0x50] sm:$0xff]  }
  0x9c   :  { %v8860_v50 = vsel %vm853_vm6, %v903_v42, %v391_v15  ;;  %v8862_v38 = vsel %vm854_vm12, %v904_v34, %v402_v6  ;;  %v676_v10 = vmul.u32 200, %v675_v24  ;;  %v1129_v35 = vrot.slane %v13312_v13, 7 }
  0x9d   :  { %13682 = vst [vmem:[#allocation51_spill] sm:$0xff] %v8860_v50  ;;  %13683 = vst [vmem:[#allocation52_spill] sm:$0xff] %v8862_v38  ;;  %vm13316_vm14 = vcmp.eq.s32.totalorder %v8860_v50, 0  ;;  %vm13315_vm11 = vcmp.eq.s32.totalorder %v8862_v38, 0  ;;  %v156_v32 = vadd.s32 168, %v7967_v11  ;;  %v687_v42 = vmul.u32 200, %v686_v47 }
  0x9e   :  { %v1304_v62 = vsel %vm13316_vm14, 0.0, %v1167_v57  ;;  %v1305_v15 = vsel %vm13315_vm11, 0.0, %v1166_v4  ;;  %v677_v6 = vsub.s32 %v179_v31, %v676_v10  ;;  %v8881_v24 = vrot.slane %v13317_v16, 7 }
  0x9f   :  { %v1603_v34 = vpack.c.bf16 %v1305_v15, %v1304_v62  ;;  %v8883_v39 = vmul.u32.u64.low 2748779070, %v155_v26  ;;  %v8884_v13 = vmul.u32.u64.high 2748779070, %v155_v26, %v8883_v39  ;;  %v688_v50 = vsub.s32 %v180_v1, %v687_v42 }
  0xa0   :  { %vm779_vm12 = vcmp.ne.s32.totalorder %v677_v6, 0  ;;  %vm829_vm6 = vcmp.lt.s32.totalorder %v677_v6, 0  ;;  %v929_v57 = vadd.s32 200, %v677_v6  ;;  %v1141_v31 = vsel %vm13379_vm3, %v8790_v25, %v1129_v35 }
  0xa1   :  { %6796 = vmatmul.mubr.msk.bf16.gmra.mxu0 %vm1642_vm5, %v1603_v34  ;;  %vm879_vm9 = vmand %vm829_vm6, %vm779_vm12  ;;  %v13322_v4 = vunpack.c.l.bf16 %v8877_v63  ;;  %v8891_v10 = vmul.u32.u64.low 2748779070, %v156_v32  ;;  %v8892_v47 = vmul.u32.u64.high 2748779070, %v156_v32, %v8891_v10  ;;  %vm780_vm8 = vcmp.ne.s32.totalorder %v688_v50, 0 }
  0xa2   :  { %vm830_vm11 = vcmp.lt.s32.totalorder %v688_v50, 0  ;;  %v930_v62 = vadd.s32 200, %v688_v50  ;;  %v8894_v39 = vsel %vm879_vm9, %v929_v57, %v677_v6  ;;  %6799 = vmatprep.mubr.msk.bf16.mxu0 %vm7892_vm2, %v13656_v37  ;;  %v1140_v25 = vsel %vm13379_vm3, %v1129_v35, %v8881_v24 }
  0xa3   :  { %13684 = vst [vmem:[#allocation53_spill] sm:$0xff] %v8894_v39  ;;  %vm880_vm14 = vmand %vm830_vm11, %vm780_vm8  ;;  %vm13330_vm12 = vcmp.eq.s32.totalorder %v8894_v39, 0  ;;  %v411_v1 = vshrl.u32 %v8884_v13, 7  ;;  %v181_v34 = vadd.s32 368, %v7967_v11  ;;  %v422_v10 = vshrl.u32 %v8892_v47, 7  ;;  %v8916_v13 = vld [vmem:[%s13193_s0 + $0xb8] sm:$0xff]  }
  0xa4   :  { %v8903_v15 = vsel %vm880_vm14, %v930_v62, %v688_v50  ;;  %v1330_v42 = vsel %vm13330_vm12, 0.0, %v1141_v31  ;;  %v1105_v16 = vrot.slane %v13322_v4, 7  ;;  %13686 = vst [vmem:[#allocation55_spill] sm:$0xff] %v8916_v13  ;;  %v182_v35 = vadd.s32 376, %v7967_v11 }
  0xa5   :  { %13685 = vst [vmem:[#allocation54_spill] sm:$0xff] %v8903_v15  ;;  %vm13329_vm6 = vcmp.eq.s32.totalorder %v8903_v15, 0  ;;  %v412_v57 = vmul.u32 200, %v411_v1  ;;  %v8921_v31 = vmul.u32.u64.low 2748779070, %v181_v34  ;;  %v8922_v62 = vmul.u32.u64.high 2748779070, %v181_v34, %v8921_v31 }
  0xa6   :  { %v1331_v50 = vsel %vm13329_vm6, 0.0, %v1140_v25  ;;  %v423_v38 = vmul.u32 200, %v422_v10  ;;  %v13687_v47 = vunpack.c.h.bf16 %v8877_v63  ;;  %v13333_v4 = vunpack.c.l.bf16 %v8916_v13 }
  0xa7   :  { %v1616_v6 = vpack.c.bf16 %v1331_v50, %v1330_v42  ;;  %v413_v1 = vsub.s32 %v155_v26, %v412_v57  ;;  %v8929_v39 = vmul.u32.u64.low 2748779070, %v182_v35  ;;  %v8930_v14 = vmul.u32.u64.high 2748779070, %v182_v35, %v8929_v39 }
  0xa8   :  { %v8926_v46 = vrot.slane %v13687_v47, 7  ;;  %v424_v25 = vsub.s32 %v156_v32, %v423_v38  ;;  %v1165_v26 = vsel %vm13379_vm3, %v8842_v53, %v1105_v16  ;;  %v13332_v42 = vunpack.c.h.bf16 %v8916_v13 }
  0xa9   :  { %6848 = vmatmul.mubr.msk.bf16.gmra.mxu1 %vm1642_vm5, %v1616_v6  ;;  %vm755_vm14 = vcmp.ne.s32.totalorder %v413_v1, 0  ;;  %vm805_vm11 = vcmp.lt.s32.totalorder %v413_v1, 0  ;;  %v905_v15 = vadd.s32 200, %v413_v1  ;;  %v697_v57 = vshrl.u32 %v8922_v62, 7 }
  0xaa   :  { %6851 = vmatprep.mubr.msk.bf16.mxu1 %vm7892_vm2, %v13656_v37  ;;  %vm855_vm9 = vmand %vm805_vm11, %vm755_vm14  ;;  %vm756_vm8 = vcmp.ne.s32.totalorder %v424_v25, 0  ;;  %vm806_vm6 = vcmp.lt.s32.totalorder %v424_v25, 0  ;;  %v906_v39 = vadd.s32 200, %v424_v25  ;;  %v1164_v38 = vsel %vm13379_vm3, %v1105_v16, %v8926_v46 }
  0xab   :  { %v8940_v6 = vsel %vm855_vm9, %v905_v15, %v413_v1  ;;  %vm856_vm12 = vmand %vm806_vm6, %vm756_vm8  ;;  %v698_v32 = vmul.u32 200, %v697_v57  ;;  %v708_v10 = vshrl.u32 %v8930_v14, 7  ;;  %v1131_v31 = vrot.slane %v13333_v4, 7 }
  0xac   :  { %13688 = vst [vmem:[#allocation56_spill] sm:$0xff] %v8940_v6  ;;  %vm13357_vm10 = vcmp.eq.s32.totalorder %v8940_v6, 0  ;;  %v8947_v53 = vsel %vm856_vm12, %v906_v39, %v424_v25  ;;  %v157_v15 = vadd.s32 176, %v7967_v11  ;;  %v158_v47 = vadd.s32 184, %v7967_v11  ;;  %v8965_v25 = vld [vmem:[%s13193_s0 + $0x58] sm:$0xff]  }
  0xad   :  { %13689 = vst [vmem:[#allocation57_spill] sm:$0xff] %v8947_v53  ;;  %v1306_v50 = vsel %vm13357_vm10, 0.0, %v1165_v26  ;;  %vm13334_vm6 = vcmp.eq.s32.totalorder %v8947_v53, 0  ;;  %v699_v62 = vsub.s32 %v181_v34, %v698_v32  ;;  %v709_v1 = vmul.u32 200, %v708_v10 }
  0xae   :  { %v1307_v16 = vsel %vm13334_vm6, 0.0, %v1164_v38  ;;  %v8960_v14 = vrot.slane %v13332_v42, 7  ;;  %v8967_v26 = vmul.u32.u64.low 2748779070, %v157_v15  ;;  %v8968_v57 = vmul.u32.u64.high 2748779070, %v157_v15, %v8967_v26 }
  0xaf   :  { %v1604_v39 = vpack.c.bf16 %v1307_v16, %v1306_v50  ;;  %v710_v34 = vsub.s32 %v182_v35, %v709_v1  ;;  %vm781_vm12 = vcmp.ne.s32.totalorder %v699_v62, 0  ;;  %vm831_vm14 = vcmp.lt.s32.totalorder %v699_v62, 0 }
  0xb0   :  { %vm881_vm11 = vmand %vm831_vm14, %vm781_vm12  ;;  %v931_v32 = vadd.s32 200, %v699_v62  ;;  %v1139_v38 = vsel %vm13379_vm3, %v8881_v24, %v1131_v31  ;;  %v8973_v10 = vmul.u32.u64.low 2748779070, %v158_v47  ;;  %v8974_v42 = vmul.u32.u64.high 2748779070, %v158_v47, %v8973_v10 }
  0xb1   :  { %6800 = vmatmul.mubr.msk.bf16.gmra.mxu0 %vm1642_vm5, %v1604_v39  ;;  %vm782_vm9 = vcmp.ne.s32.totalorder %v710_v34, 0  ;;  %vm832_vm8 = vcmp.lt.s32.totalorder %v710_v34, 0  ;;  %v932_v4 = vadd.s32 200, %v710_v34  ;;  %v13346_v26 = vunpack.c.l.bf16 %v8965_v25 }
  0xb2   :  { %vm882_vm6 = vmand %vm832_vm8, %vm782_vm9  ;;  %v8978_v35 = vsel %vm881_vm11, %v931_v32, %v699_v62  ;;  %v1138_v50 = vsel %vm13379_vm3, %v1131_v31, %v8960_v14  ;;  %6803 = vmatprep.mubr.msk.bf16.mxu0 %vm7892_vm2, %v13656_v37  ;;  %v433_v24 = vshrl.u32 %v8968_v57, 7  ;;  %v183_v16 = vadd.s32 384, %v7967_v11 }
  0xb3   :  { %13690 = vst [vmem:[#allocation58_spill] sm:$0xff] %v8978_v35  ;;  %v8986_v1 = vsel %vm882_vm6, %v932_v4, %v710_v34  ;;  %vm13345_vm12 = vcmp.eq.s32.totalorder %v8978_v35, 0  ;;  %v13344_v39 = vunpack.c.h.bf16 %v8965_v25  ;;  %v444_v10 = vshrl.u32 %v8974_v42, 7 }
  0xb4   :  { %13691 = vst [vmem:[#allocation59_spill] sm:$0xff] %v8986_v1  ;;  %vm13343_vm14 = vcmp.eq.s32.totalorder %v8986_v1, 0  ;;  %v1332_v62 = vsel %vm13345_vm12, 0.0, %v1139_v38  ;;  %v434_v32 = vmul.u32 200, %v433_v24  ;;  %v1107_v4 = vrot.slane %v13346_v26, 7 }
  0xb5   :  { %v1333_v31 = vsel %vm13343_vm14, 0.0, %v1138_v50  ;;  %v184_v57 = vadd.s32 392, %v7967_v11  ;;  %v9000_v41 = vmul.u32.u64.low 2748779070, %v183_v16  ;;  %v9001_v22 = vmul.u32.u64.high 2748779070, %v183_v16, %v9000_v41  ;;  %v9006_v38 = vld [vmem:[%s13193_s0 + $0xc0] sm:$0xf] }
  0xb6   :  { %v1617_v34 = vpack.c.bf16 %v1333_v31, %v1332_v62  ;;  %v435_v13 = vsub.s32 %v157_v15, %v434_v32  ;;  %v445_v35 = vmul.u32 200, %v444_v10  ;;  %v9014_v15 = vrot.slane %v13344_v39, 7 }
  0xb7   :  { %v9008_v24 = vmul.u32.u64.low 2748779070, %v184_v57  ;;  %v9009_v50 = vmul.u32.u64.high 2748779070, %v184_v57, %v9008_v24  ;;  %v1163_v62 = vsel %vm13379_vm3, %v8926_v46, %v1107_v4  ;;  %v159_v32 = vadd.s32 192, %v7967_v11 }
  0xb8   :  { %6852 = vmatmul.mubr.msk.bf16.gmra.mxu1 %vm1642_vm5, %v1617_v34  ;;  %vm757_vm6 = vcmp.ne.s32.totalorder %v435_v13, 0  ;;  %vm807_vm11 = vcmp.lt.s32.totalorder %v435_v13, 0  ;;  %v907_v42 = vadd.s32 200, %v435_v13  ;;  %v446_v41 = vsub.s32 %v158_v47, %v445_v35 }
  0xb9   :  { %6855 = vmatprep.mubr.msk.bf16.mxu1 %vm7892_vm2, %v13656_v37  ;;  %vm857_vm9 = vmand %vm807_vm11, %vm757_vm6  ;;  %v719_v34 = vshrl.u32 %v9001_v22, 7  ;;  %v160_v24 = vadd.s32 200, %v7967_v11  ;;  %v1162_v46 = vsel %vm13379_vm3, %v1107_v4, %v9014_v15  ;;  %v13694_v36 = vunpack.c.l.bf16 %v9006_v38  ;;  %v9045_v4 = vld [vmem:[%s13193_s0 + $0x60] sm:$0xf] }
  0xba   :  { %v9022_v31 = vsel %vm857_vm9, %v907_v42, %v435_v13  ;;  %vm758_vm8 = vcmp.ne.s32.totalorder %v446_v41, 0  ;;  %vm808_vm14 = vcmp.lt.s32.totalorder %v446_v41, 0  ;;  %v908_v39 = vadd.s32 200, %v446_v41 }
  0xbb   :  { %13692 = vst [vmem:[#allocation60_spill] sm:$0xff] %v9022_v31  ;;  %vm13353_vm12 = vcmp.eq.s32.totalorder %v9022_v31, 0  ;;  %vm858_vm6 = vmand %vm808_vm14, %vm758_vm8  ;;  %v720_v47 = vmul.u32 200, %v719_v34  ;;  %v730_v13 = vshrl.u32 %v9009_v50, 7  ;;  %v1133_v17 = vrot.slane %v13694_v36, 7 }
  0xbc   :  { %v9032_v35 = vsel %vm858_vm6, %v908_v39, %v446_v41  ;;  %v1308_v22 = vsel %vm13353_vm12, 0.0, %v1163_v62  ;;  %v9036_v42 = vmul.u32.u64.low 2748779070, %v159_v32  ;;  %v9037_v26 = vmul.u32.u64.high 2748779070, %v159_v32, %v9036_v42 }
  0xbd   :  { %13693 = vst [vmem:[#allocation61_spill] sm:$0xff] %v9032_v35  ;;  %vm13354_vm11 = vcmp.eq.s32.totalorder %v9032_v35, 0  ;;  %v721_v10 = vsub.s32 %v183_v16, %v720_v47  ;;  %v731_v1 = vmul.u32 200, %v730_v13  ;;  %v108_v47 = vunpack.c.l.bf16 %v9045_v4 }
  0xbe   :  { %v1309_v39 = vsel %vm13354_vm11, 0.0, %v1162_v46  ;;  %v9049_v50 = vmul.u32.u64.low 2748779070, %v160_v24  ;;  %v9050_v41 = vmul.u32.u64.high 2748779070, %v160_v24, %v9049_v50  ;;  %v455_v36 = vshrl.u32 %v9037_v26, 7 }
  0xbf   :  { %v1605_v62 = vpack.c.bf16 %v1309_v39, %v1308_v22  ;;  %v732_v34 = vsub.s32 %v184_v57, %v731_v1  ;;  %vm783_vm14 = vcmp.ne.s32.totalorder %v721_v10, 0  ;;  %vm833_vm9 = vcmp.lt.s32.totalorder %v721_v10, 0 }
  0xc0   :  { %vm883_vm8 = vmand %vm833_vm9, %vm783_vm14  ;;  %v933_v16 = vadd.s32 200, %v721_v10  ;;  %v1137_v46 = vsel %vm13379_vm3, %v8960_v14, %v1133_v17  ;;  %v1136_v1 = vsel %vm13379_vm3, %v1133_v17, %v7997_v23  ;;  %v456_v26 = vmul.u32 200, %v455_v36 }
  0xc1   :  { %6804 = vmatmul.mubr.msk.bf16.gmra.mxu0 %vm1642_vm5, %v1605_v62  ;;  %vm784_vm6 = vcmp.ne.s32.totalorder %v732_v34, 0  ;;  %vm834_vm12 = vcmp.lt.s32.totalorder %v732_v34, 0  ;;  %v934_v13 = vadd.s32 200, %v732_v34  ;;  %v466_v57 = vshrl.u32 %v9050_v41, 7 }
  0xc2   :  { %vm884_vm11 = vmand %vm834_vm12, %vm784_vm6  ;;  %v9058_v22 = vsel %vm883_vm8, %v933_v16, %v721_v10  ;;  %6807 = vmatprep.mubr.msk.bf16.mxu0 %vm7892_vm2, %v13656_v37  ;;  %v457_v10 = vsub.s32 %v159_v32, %v456_v26  ;;  %v1109_v39 = vrot.slane %v108_v47, 7  ;;  %vm13367_vm0 = vcmp.eq.s32.totalorder %v9022_v31, 199 }
  0xc3   :  { %13695 = vst [vmem:[#allocation62_spill] sm:$0xff] %v9058_v22  ;;  %v9066_v42 = vsel %vm884_vm11, %v934_v13, %v732_v34  ;;  %vm13356_vm14 = vcmp.eq.s32.totalorder %v9058_v22, 0  ;;  %v467_v17 = vmul.u32 200, %v466_v57  ;;  %vm13401_vm15 = vcmp.eq.s32.totalorder %v8632_v52, 199 }
  0xc4   :  { %13696 = vst [vmem:[#allocation63_spill] sm:$0xff] %v9066_v42  ;;  %vm13355_vm9 = vcmp.eq.s32.totalorder %v9066_v42, 0  ;;  %v1334_v14 = vsel %vm13356_vm14, 0.0, %v1137_v46  ;;  %vm759_vm12 = vcmp.ne.s32.totalorder %v457_v10, 0  ;;  %vm809_vm8 = vcmp.lt.s32.totalorder %v457_v10, 0 }
  0xc5   :  { %v1335_v23 = vsel %vm13355_vm9, 0.0, %v1136_v1  ;;  %v909_v41 = vadd.s32 200, %v457_v10  ;;  %v468_v62 = vsub.s32 %v160_v24, %v467_v17  ;;  %vm859_vm11 = vmand %vm809_vm8, %vm759_vm12  ;;  %v1161_v32 = vsel %vm13379_vm3, %v9014_v15, %v1109_v39  ;;  %v7864_v15 = vld [vmem:[%s13193_s0] sm:$0xff]  }
  0xc6   :  { %v1618_v50 = vpack.c.bf16 %v1335_v23, %v1334_v14  ;;  %v1160_v24 = vsel %vm13379_vm3, %v1109_v39, %v8053_v48  ;;  %v13699_v14 = vunpack.c.h.bf16 %v7960_v9  ;;  %v13700_v39 = vunpack.c.l.bf16 %v8153_v59 }
  0xc7   :  { %v9077_v34 = vsel %vm859_vm11, %v909_v41, %v457_v10  ;;  %vm760_vm6 = vcmp.ne.s32.totalorder %v468_v62, 0  ;;  %vm810_vm9 = vcmp.lt.s32.totalorder %v468_v62, 0  ;;  %v910_v16 = vadd.s32 200, %v468_v62 }
  0xc8   :  { %6856 = vmatmul.mubr.msk.bf16.gmra.mxu1 %vm1642_vm5, %v1618_v50  ;;  %13697 = vst [vmem:[#allocation64_spill] sm:$0xff] %v9077_v34  ;;  %vm13359_vm14 = vcmp.eq.s32.totalorder %v9077_v34, 0  ;;  %vm860_vm10 = vmand %vm810_vm9, %vm760_vm6  ;;  %v1339_v10 = vrot.slane %v13699_v14, 1  ;;  %v1340_v23 = vrot.slane %v13700_v39, 1  ;;  %v7865_v50 = vld [vmem:[%s13193_s0 + $0x8] sm:$0xff]   ;;  %vm13361_vm9 = vcmp.eq.s32.totalorder %v8215_v45, 199 }
  0xc9   :  { %6865 = vmatprep.mubr.msk.bf16.mxu1 %vm7892_vm2, %v13656_v37  ;;  %v9088_v36 = vsel %vm860_vm10, %v910_v16, %v468_v62  ;;  %v1310_v13 = vsel %vm13359_vm14, 0.0, %v1161_v32  ;;  %vm13362_vm10 = vcmp.eq.s32.totalorder %v8155_v60, 199  ;;  %v13702_v16 = vpack.c.bf16 %v8097_v19, %v8086_v7 }
  0xca   :  { %13698 = vst [vmem:[#allocation65_spill] sm:$0xff] %v9088_v36  ;;  %vm13358_vm12 = vcmp.eq.s32.totalorder %v9088_v36, 0  ;;  %v1432_v62 = vsel %vm1386_vm4, %v1339_v10, %v1340_v23  ;;  %v1433_v9 = vsel %vm1386_vm4, %v8014_v30, %v1339_v10  ;;  %v13705_v7 = vunpack.c.l.bf16 %v8292_v28 }
  0xcb   :  { %v1311_v46 = vsel %vm13358_vm12, 0.0, %v1160_v24  ;;  %v1540_v30 = vsel %vm13361_vm9, 0.0, %v1432_v62  ;;  %v13707_v10 = vunpack.c.l.bf16 %v8323_v3  ;;  %vm13373_vm8 = vcmp.eq.s32.totalorder %v8272_v2, 199  ;;  %v13732_v2 = vld [vmem:[#allocation26_spill] sm:$0xff] }
  0xcc   :  { %v1606_v26 = vpack.c.bf16 %v1311_v46, %v1310_v13  ;;  %v1539_v13 = vsel %vm13362_vm10, 0.0, %v1433_v9  ;;  %v1342_v19 = vrot.slane %v13705_v7, 1  ;;  %vm13374_vm11 = vcmp.eq.s32.totalorder %v8282_v43, 199 }
  0xcd   :  { %v9149_v39 = vrot.slane %v13707_v10, 1  ;;  %v13709_v9 = vunpack.c.h.bf16 %v8292_v28  ;;  %v13710_v7 = vunpack.c.l.bf16 %v8374_v12  ;;  %vm13372_vm6 = vcmp.eq.s32.totalorder %v8940_v6, 199 }
  0xce   :  { %6808 = vmatmul.mubr.msk.bf16.gmra.mxu0 %vm1642_vm5, %v1606_v26  ;;  %vm13368_vm12 = vcmp.eq.s32.totalorder %v8947_v53, 199  ;;  %v13712_v28 = vunpack.c.h.bf16 %v8877_v63  ;;  %vm13440_vm14 = vcmp.eq.s32.totalorder %v8315_v5, 199  ;;  %vm13371_vm9 = vcmp.eq.s32.totalorder %v9032_v35, 199 }
  0xcf   :  { %6971 = vmatprep.mubr.msk.bf16.mxu0 %vm7892_vm2, %v13656_v37  ;;  %vm13444_vm10 = vcmp.eq.s32.totalorder %v8301_v49, 199  ;;  %vm13408_vm3 = vcmp.eq.s32.totalorder %v8735_v0, 199  ;;  %vm13409_vm13 = vcmp.eq.s32.totalorder %v8737_v44, 199  ;;  %v13742_v0 = vld [vmem:[#allocation50_spill] sm:$0xff]  ;;  %v13749_v49 = vld [vmem:[#allocation35_spill] sm:$0xff] }
  0xd0   :  { %6866 = vmatmul.mubr.msk.bf16.vlgmr.msra.gmra.mxu1 %vm1642_vm5, %v7864_v15  ;;  %v13704_v15 = vunpack.c.h.bf16 %v8153_v59  ;;  %v13708_v59 = vunpack.c.h.bf16 %v8323_v3  ;;  %v13711_v3 = vunpack.c.l.bf16 %v8877_v63  ;;  %v13743_v44 = vunpack.c.l.bf16 %v13742_v0 }
  0xd1   :  { %6869 = vmatprep.mubr.msk.bf16.mxu1 %vm7892_vm2, %v13656_v37 }
  0xd2   :  { %v1341_v46 = vrot.slane %v13704_v15, 1  ;;  %v9156_v62 = vrot.slane %v13708_v59, 1 }
  0xd4   :  { %v1431_v15 = vsel %vm1386_vm4, %v1340_v23, %v1341_v46  ;;  %v13714_v23 = vunpack.c.h.bf16 %v8965_v25 }
  0xd6   :  { %6972 = vmatmul.mubr.msk.bf16.vlgmr.msra.gmra.mxu0 %vm1642_vm5, %v13702_v16  ;;  %v1430_v16 = vsel %vm1386_vm4, %v1341_v46, %v1342_v19  ;;  %v1359_v46 = vrot.slane %v13714_v23, 1 }
  0xd7   :  { %v9098_v1 = vpop.f32.mrf.mxu0  ;;  %6975 = vmatprep.mubr.msk.bf16.mxu0 %vm7892_vm2, %v13656_v37 }
  0xd8   :  { %6870 = vmatmul.mubr.msk.bf16.gmra.mxu1 %vm1642_vm5, %v7865_v50  ;;  %v2412_v50 = vpack.c.bf16 %v1540_v30, %v1539_v13  ;;  %v9168_v13 = vrot.slane %v13710_v7, 1  ;;  %v9172_v30 = vrot.slane %v13711_v3, 1 }
  0xd9   :  { %v6761_v57 = vpop.f32.mrf.mxu0  ;;  %6873 = vmatprep.mubr.msk.bf16.mxu1 %vm7892_vm2, %v13656_v37 }
  0xda   :  { %v13706_v57 = vunpack.c.h.bf16 %v8210_v54 }
  0xdb   :  { %v9106_v48 = vpop.f32.mrf.mxu0 }
  0xdc   :  { %v9145_v14 = vrot.slane %v13706_v57, 1  ;;  %v13713_v57 = vunpack.c.l.bf16 %v8965_v25 }
  0xdd   :  { %v6762_v17 = vpop.f32.mrf.mxu0  ;;  %v9115_v41 = vpop.f32.mrf.mxu1 }
  0xde   :  { %13701 = vst [vmem:[#allocation66_spill] sm:$0xff] %v9115_v41  ;;  %v7866_v17 = vld [vmem:[%s13193_s0 + $0x10] sm:$0xff]   ;;  %v1358_v10 = vrot.slane %v13713_v57, 1  ;;  %6976 = vmatmul.mubr.msk.bf16.gmra.mxu0 %vm1642_vm5, %v2412_v50  ;;  %v1542_v50 = vsel %vm13374_vm11, 0.0, %v1430_v16  ;;  %v13716_v41 = vunpack.c.h.bf16 %v8406_v21  ;;  %vm13398_vm11 = vcmp.eq.s32.totalorder %v8570_v55, 199 }
  0xdf   :  { %v6813_v32 = vpop.f32.mrf.mxu1  ;;  %6979 = vmatprep.mubr.msk.bf16.mxu0 %vm7892_vm2, %v13656_v37 }
  0xe0   :  { %v1343_v32 = vrot.slane %v13709_v9, 1  ;;  %6874 = vmatmul.mubr.msk.bf16.gmra.mxu1 %vm1642_vm5, %v7866_v17  ;;  %v9191_v9 = vrot.slane %v108_v47, 1  ;;  %v1541_v17 = vsel %vm13373_vm8, 0.0, %v1431_v15  ;;  %v1413_v57 = vsel %vm1386_vm4, %v1358_v10, %v1359_v46 }
  0xe1   :  { %v9129_v24 = vpop.f32.mrf.mxu1  ;;  %6877 = vmatprep.mubr.msk.bf16.mxu1 %vm7892_vm2, %v13656_v37  ;;  %v1371_v53 = vrot.slane %v13716_v41, 1  ;;  %vm13420_vm8 = vcmp.eq.s32.totalorder %v8568_v27, 199 }
  0xe2   :  { %13703 = vst [vmem:[#allocation67_spill] sm:$0xff] %v9129_v24  ;;  %v1412_v16 = vsel %vm1386_vm4, %v1359_v46, %v9191_v9  ;;  %v2413_v46 = vpack.c.bf16 %v1542_v50, %v1541_v17  ;;  %v1428_v17 = vsel %vm1386_vm4, %v1343_v32, %v9168_v13  ;;  %v1429_v50 = vsel %vm1386_vm4, %v1342_v19, %v1343_v32 }
  0xe3   :  { %v6814_v26 = vpop.f32.mrf.mxu1  ;;  %v13723_v19 = vunpack.c.h.bf16 %v8654_v8 }
  0xe4   :  { %v1357_v26 = vrot.slane %v13712_v28, 1 }
  0xe5   :  { %v9272_v32 = vrot.slane %v13723_v19, 1 }
  0xe6   :  { %v1414_v47 = vsel %vm1386_vm4, %v1357_v26, %v1358_v10  ;;  %v1415_v7 = vsel %vm1386_vm4, %v9172_v30, %v1357_v26  ;;  %v13715_v26 = vunpack.c.l.bf16 %v8406_v21  ;;  %v7867_v10 = vld [vmem:[%s13193_s0 + $0x18] sm:$0xff]   ;;  %6980 = vmatmul.mubr.msk.bf16.gmra.mxu0 %vm1642_vm5, %v2413_v46 }
  0xe7   :  { %v9211_v28 = vsel %vm13372_vm6, 0.0, %v1415_v7  ;;  %v9215_v15 = vsel %vm13368_vm12, 0.0, %v1414_v47  ;;  %v9228_v7 = vsel %vm13367_vm0, 0.0, %v1413_v57  ;;  %v9232_v47 = vsel %vm13371_vm9, 0.0, %v1412_v16  ;;  %6983 = vmatprep.mubr.msk.bf16.mxu0 %vm7892_vm2, %v13656_v37 }
  0xe8   :  { %v9180_v59 = vpop.f32.mrf.mxu0  ;;  %v1370_v23 = vrot.slane %v13715_v26, 1  ;;  %vm13421_vm0 = vcmp.eq.s32.totalorder %v8499_v40, 199  ;;  %vm13431_vm12 = vcmp.eq.s32.totalorder %v8504_v29, 199  ;;  %v13717_v16 = vunpack.c.l.bf16 %v8471_v58  ;;  %6878 = vmatmul.mubr.msk.bf16.gmra.mxu1 %vm1642_vm5, %v7867_v10 }
  0xe9   :  { %vm13391_vm9 = vcmp.eq.s32.totalorder %v8354_v18, 199  ;;  %vm13388_vm6 = vcmp.eq.s32.totalorder %v8363_v56, 199  ;;  %6881 = vmatprep.mubr.msk.bf16.mxu1 %vm7892_vm2, %v13656_v37  ;;  %v13726_v10 = vunpack.c.l.bf16 %v8210_v54  ;;  %v1403_v54 = vsel %vm1386_vm4, %v9149_v39, %v9156_v62 }
  0xea   :  { %v6765_v3 = vpop.f32.mrf.mxu0  ;;  %v1372_v57 = vrot.slane %v13717_v16, 1  ;;  %v13721_v16 = vunpack.c.h.bf16 %v8554_v61 }
  0xeb   :  { %v13718_v3 = vunpack.c.h.bf16 %v8471_v58  ;;  %v13720_v58 = vunpack.c.l.bf16 %v8554_v61  ;;  %v1543_v61 = vsel %vm13391_vm9, 0.0, %v1429_v50  ;;  %v9290_v46 = vrot.slane %v13726_v10, 1  ;;  %v13729_v50 = vld [vmem:[#allocation42_spill] sm:$0xff] }
  0xec   :  { %v9234_v24 = vpop.f32.mrf.mxu0  ;;  %vm1044_vm9 = vcmp.eq.s32.totalorder %v13732_v2, 199  ;;  %v1400_v51 = vsel %vm1386_vm4, %v1371_v53, %v1372_v57  ;;  %v13760_v2 = vld [vmem:[#allocation39_spill] sm:$0xff] }
  0xed   :  { %v1373_v35 = vrot.slane %v13718_v3, 1  ;;  %v1374_v3 = vrot.slane %v13720_v58, 1  ;;  %v1405_v56 = vsel %vm1386_vm4, %v9290_v46, %v9145_v14 }
  0xee   :  { %v9249_v21 = vpop.f32.mrf.mxu1  ;;  %v6766_v41 = vpop.f32.mrf.mxu0 }
  0xef   :  { %13719 = vst [vmem:[#allocation68_spill] sm:$0xff] %v9249_v21  ;;  %v1375_v41 = vrot.slane %v13721_v16, 1  ;;  %v13722_v21 = vunpack.c.l.bf16 %v8654_v8  ;;  %v13724_v8 = vunpack.c.h.bf16 %v8374_v12  ;;  %v13727_v16 = vld [vmem:[#allocation25_spill] sm:$0xff]  ;;  %v1402_v12 = vsel %vm1386_vm4, %v9156_v62, %v1370_v23 }
  0xf0   :  { %v6817_v26 = vpop.f32.mrf.mxu1  ;;  %v13728_v19 = vunpack.c.l.bf16 %v13727_v16 }
  0xf1   :  { %v9268_v31 = vrot.slane %v13722_v21, 1  ;;  %v1544_v26 = vsel %vm13388_vm6, 0.0, %v1428_v17  ;;  %v1345_v21 = vrot.slane %v13724_v8, 1  ;;  %v1404_v17 = vsel %vm1386_vm4, %v9145_v14, %v9149_v39  ;;  %v13731_v39 = vld [vmem:[#allocation24_spill] sm:$0xff] }
  0xf2   :  { %v9286_v58 = vpop.f32.mrf.mxu1  ;;  %v1346_v6 = vrot.slane %v13728_v19, 1  ;;  %v13730_v8 = vunpack.c.l.bf16 %v13729_v50  ;;  %v7868_v19 = vld [vmem:[%s13193_s0 + $0x20] sm:$0xff]   ;;  %v9320_v18 = vsel %vm13440_vm14, 0.0, %v1404_v17  ;;  %v2414_v43 = vpack.c.bf16 %v1544_v26, %v1543_v61 }
  0xf3   :  { %13725 = vst [vmem:[#allocation69_spill] sm:$0xff] %v9286_v58  ;;  %vm1043_vm6 = vcmp.eq.s32.totalorder %v13731_v39, 199  ;;  %v1427_v14 = vsel %vm1386_vm4, %v9168_v13, %v1345_v21  ;;  %v9341_v26 = vsel %vm13432_vm7, 0.0, %v1402_v12  ;;  %v1401_v13 = vsel %vm1386_vm4, %v1370_v23, %v1371_v53  ;;  %6882 = vmatmul.mubr.msk.bf16.gmra.mxu1 %vm1642_vm5, %v7868_v19 }
  0xf4   :  { %v9309_v10 = vrot.slane %v13730_v8, 1  ;;  %v6818_v58 = vpop.f32.mrf.mxu1  ;;  %v9327_v8 = vsel %vm13444_vm10, 0.0, %v1405_v56  ;;  %v1426_v56 = vsel %vm1386_vm4, %v1345_v21, %v1346_v6  ;;  %v9353_v61 = vsel %vm13421_vm0, 0.0, %v1401_v13  ;;  %6984 = vmatmul.mubr.msk.bf16.gmra.mxu0 %vm1642_vm5, %v2414_v43  ;;  %6885 = vmatprep.mubr.msk.bf16.mxu1 %vm7892_vm2, %v13656_v37 }
  0xf5   :  { %v9323_v62 = vpop.f32.mrf.mxu0  ;;  %v9331_v58 = vsel %vm13439_vm1, 0.0, %v1403_v54  ;;  %v9357_v12 = vsel %vm13431_vm12, 0.0, %v1400_v51  ;;  %v1398_v21 = vsel %vm1386_vm4, %v1373_v35, %v1374_v3  ;;  %v1545_v53 = vsel %vm1043_vm6, 0.0, %v1427_v14  ;;  %6987 = vmatprep.mubr.msk.bf16.mxu0 %vm7892_vm2, %v13656_v37 }
  0xf6   :  { %v9377_v54 = vsel %vm13398_vm11, 0.0, %v1398_v21  ;;  %v1546_v43 = vsel %vm1044_vm9, 0.0, %v1426_v56  ;;  %v1397_v19 = vsel %vm1386_vm4, %v1374_v3, %v1375_v41  ;;  %v13733_v14 = vunpack.c.h.bf16 %v13727_v16 }
  0xf7   :  { %v6769_v17 = vpop.f32.mrf.mxu0  ;;  %v9398_v56 = vsel %vm13401_vm15, 0.0, %v1397_v19  ;;  %vm13736_vm11 = vcmp.eq.s32.totalorder %v8641_v20, 199  ;;  %v2415_v16 = vpack.c.bf16 %v1546_v43, %v1545_v53  ;;  %v13739_v43 = vld [vmem:[#allocation31_spill] sm:$0xff]  ;;  %vm1049_vm12 = vcmp.eq.s32.totalorder %v13760_v2, 199  ;;  %v13770_v2 = vld [vmem:[#allocation45_spill] sm:$0xff] }
  0xf8   :  { %v1399_v17 = vsel %vm1386_vm4, %v1372_v57, %v1373_v35  ;;  %v1396_v57 = vsel %vm1386_vm4, %v1375_v41, %v9268_v31  ;;  %v1347_v21 = vrot.slane %v13733_v14, 1  ;;  %v7869_v41 = vld [vmem:[%s13193_s0 + $0x28] sm:$0xff]   ;;  %vm1046_vm15 = vcmp.eq.s32.totalorder %v13739_v43, 199 }
  0xf9   :  { %v9367_v23 = vpop.f32.mrf.mxu0  ;;  %v9373_v51 = vsel %vm13420_vm8, 0.0, %v1399_v17  ;;  %v13734_v17 = vld [vmem:[#allocation30_spill] sm:$0xff]  ;;  %v9402_v35 = vsel %vm13736_vm11, 0.0, %v1396_v57  ;;  %v13738_v57 = vld [vmem:[#allocation29_spill] sm:$0xff]  ;;  %vm1047_vm8 = vcmp.eq.s32.totalorder %v13749_v49, 199  ;;  %vm13446_vm1 = vcmp.eq.s32.totalorder %v13770_v2, 199 }
  0xfa   :  { %v13735_v13 = vunpack.c.l.bf16 %v13734_v17  ;;  %vm1045_vm11 = vcmp.eq.s32.totalorder %v13738_v57, 199  ;;  %v1425_v20 = vsel %vm1386_vm4, %v1346_v6, %v1347_v21  ;;  %v7871_v57 = vld [vmem:[%s13193_s0 + $0x38] sm:$0xff]  }
  0xfb   :  { %v6770_v27 = vpop.f32.mrf.mxu0  ;;  %6886 = vmatmul.mubr.msk.bf16.gmra.mxu1 %vm1642_vm5, %v7869_v41  ;;  %v1547_v6 = vsel %vm1045_vm11, 0.0, %v1425_v20  ;;  %v13746_v41 = vunpack.c.h.bf16 %v13734_v17 }
  0xfc   :  { %v1348_v55 = vrot.slane %v13735_v13, 1  ;;  %v9404_v29 = vpop.f32.mrf.mxu1  ;;  %v1394_v27 = vsel %vm1386_vm4, %v9272_v32, %v9309_v10  ;;  %v1395_v13 = vsel %vm1386_vm4, %v9268_v31, %v9272_v32  ;;  %6988 = vmatmul.mubr.msk.bf16.gmra.mxu0 %vm1642_vm5, %v2415_v16  ;;  %6889 = vmatprep.mubr.msk.bf16.mxu1 %vm7892_vm2, %v13656_v37  ;;  %v13747_v31 = vld [vmem:[#allocation34_spill] sm:$0xff] }
  0xfd   :  { %13737 = vst [vmem:[#allocation25_spill] sm:$0xff] %v9404_v29  ;;  %v9422_v14 = vsel %vm13408_vm3, 0.0, %v1395_v13  ;;  %v9426_v53 = vsel %vm13409_vm13, 0.0, %v1394_v27  ;;  %v13741_v13 = vunpack.c.h.bf16 %v13729_v50  ;;  %v1380_v27 = vrot.slane %v13743_v44, 1  ;;  %6991 = vmatprep.mubr.msk.bf16.mxu0 %vm7892_vm2, %v13656_v37  ;;  %v13745_v44 = vld [vmem:[#allocation49_spill] sm:$0xff] }
  0xfe   :  { %v6821_v19 = vpop.f32.mrf.mxu1  ;;  %v1424_v3 = vsel %vm1386_vm4, %v1347_v21, %v1348_v55  ;;  %vm13424_vm13 = vcmp.eq.s32.totalorder %v13745_v44, 199  ;;  %v1349_v16 = vrot.slane %v13746_v41, 1  ;;  %v13748_v52 = vunpack.c.l.bf16 %v13747_v31 }
  0xff   :  { %v1379_v19 = vrot.slane %v13741_v13, 1  ;;  %v1548_v50 = vsel %vm1046_vm15, 0.0, %v1424_v3  ;;  %v13744_v13 = vld [vmem:[#allocation48_spill] sm:$0xff] }
 0x100   :  { %v9435_v32 = vpop.f32.mrf.mxu1  ;;  %vm13425_vm3 = vcmp.eq.s32.totalorder %v13744_v13, 199  ;;  %v1350_v40 = vrot.slane %v13748_v52, 1  ;;  %v2416_v5 = vpack.c.bf16 %v1548_v50, %v1547_v6  ;;  %v13750_v6 = vld [vmem:[#allocation36_spill] sm:$0xff]  ;;  %v1423_v41 = vsel %vm1386_vm4, %v1348_v55, %v1349_v16  ;;  %v13752_v13 = vld [vmem:[#allocation55_spill] sm:$0xff] }
 0x101   :  { %13740 = vst [vmem:[#allocation42_spill] sm:$0xff] %v9435_v32  ;;  %v1392_v3 = vsel %vm1386_vm4, %v1379_v19, %v1380_v27  ;;  %vm1048_vm0 = vcmp.eq.s32.totalorder %v13750_v6, 199  ;;  %v13753_v29 = vunpack.c.l.bf16 %v13752_v13  ;;  %v1549_v55 = vsel %vm1047_vm8, 0.0, %v1423_v41 }
 0x102   :  { %v6822_v21 = vpop.f32.mrf.mxu1  ;;  %v9474_v52 = vsel %vm13424_vm13, 0.0, %v1392_v3  ;;  %v1422_v50 = vsel %vm1386_vm4, %v1349_v16, %v1350_v40  ;;  %v13757_v16 = vld [vmem:[#allocation40_spill] sm:$0xff] }
 0x103   :  { %v1393_v21 = vsel %vm1386_vm4, %v9309_v10, %v1379_v19  ;;  %v13751_v19 = vunpack.c.h.bf16 %v13742_v0  ;;  %v1382_v44 = vrot.slane %v13753_v29, 1  ;;  %6890 = vmatmul.mubr.msk.bf16.gmra.mxu1 %vm1642_vm5, %v7870_v33  ;;  %v1550_v0 = vsel %vm1048_vm0, 0.0, %v1422_v50  ;;  %v13755_v29 = vld [vmem:[#allocation54_spill] sm:$0xff] }
 0x104   :  { %v9460_v20 = vpop.f32.mrf.mxu0  ;;  %v9470_v17 = vsel %vm13425_vm3, 0.0, %v1393_v21  ;;  %6992 = vmatmul.mubr.msk.bf16.gmra.mxu0 %vm1642_vm5, %v2416_v5  ;;  %6893 = vmatprep.mubr.msk.bf16.mxu1 %vm7892_vm2, %v13656_v37  ;;  %vm13435_vm3 = vcmp.eq.s32.totalorder %v13755_v29, 199  ;;  %v13756_v5 = vunpack.c.h.bf16 %v13747_v31  ;;  %v2417_v49 = vpack.c.bf16 %v1550_v0, %v1549_v55 }
 0x105   :  { %v1381_v21 = vrot.slane %v13751_v19, 1  ;;  %6995 = vmatprep.mubr.msk.bf16.mxu0 %vm7892_vm2, %v13656_v37  ;;  %v13758_v19 = vunpack.c.l.bf16 %v13757_v16 }
 0x106   :  { %v6773_v32 = vpop.f32.mrf.mxu0  ;;  %v1351_v33 = vrot.slane %v13756_v5, 1  ;;  %v13761_v5 = vld [vmem:[#allocation41_spill] sm:$0xff] }
 0x107   :  { %v13754_v32 = vld [vmem:[#allocation53_spill] sm:$0xff]  ;;  %v1352_v10 = vrot.slane %v13758_v19, 1  ;;  %v1390_v50 = vsel %vm1386_vm4, %v1381_v21, %v1382_v44  ;;  %v1391_v6 = vsel %vm1386_vm4, %v1380_v27, %v1381_v21  ;;  %vm1050_vm7 = vcmp.eq.s32.totalorder %v13761_v5, 199 }
 0x108   :  { %v9489_v3 = vpop.f32.mrf.mxu0  ;;  %vm13436_vm13 = vcmp.eq.s32.totalorder %v13754_v32, 199  ;;  %v1421_v0 = vsel %vm1386_vm4, %v1350_v40, %v1351_v33  ;;  %v13762_v21 = vunpack.c.h.bf16 %v13752_v13  ;;  %v13763_v32 = vunpack.c.l.bf16 %v9006_v38  ;;  %v13765_v38 = vld [vmem:[#allocation58_spill] sm:$0xff] }
 0x109   :  { %v9517_v31 = vsel %vm13436_vm13, 0.0, %v1391_v6  ;;  %v1420_v55 = vsel %vm1386_vm4, %v1351_v33, %v1352_v10  ;;  %v1551_v40 = vsel %vm1049_vm12, 0.0, %v1421_v0  ;;  %v13768_v33 = vld [vmem:[#allocation47_spill] sm:$0xff] }
 0x10a   :  { %v6774_v43 = vpop.f32.mrf.mxu0  ;;  %v1383_v6 = vrot.slane %v13762_v21, 1  ;;  %v1384_v29 = vrot.slane %v13763_v32, 1  ;;  %v1552_v13 = vsel %vm1050_vm7, 0.0, %v1420_v55  ;;  %v13766_v32 = vld [vmem:[#allocation59_spill] sm:$0xff] }
 0x10b   :  { %v9521_v43 = vsel %vm13435_vm3, 0.0, %v1390_v50  ;;  %6894 = vmatmul.mubr.msk.bf16.gmra.mxu1 %vm1642_vm5, %v7871_v57  ;;  %vm13443_vm3 = vcmp.eq.s32.totalorder %v13765_v38, 199  ;;  %vm13442_vm13 = vcmp.eq.s32.totalorder %v13766_v32, 199  ;;  %v7872_v0 = vld [vmem:[%s13193_s0 + $0x40] sm:$0xff]  }
 0x10c   :  { %v9508_v41 = vpop.f32.mrf.mxu1  ;;  %6996 = vmatmul.mubr.msk.bf16.gmra.mxu0 %vm1642_vm5, %v2417_v49  ;;  %6897 = vmatprep.mubr.msk.bf16.mxu1 %vm7892_vm2, %v13656_v37  ;;  %v13767_v49 = vunpack.c.h.bf16 %v13757_v16  ;;  %v1388_v55 = vsel %vm1386_vm4, %v1383_v6, %v1384_v29  ;;  %v1389_v5 = vsel %vm1386_vm4, %v1382_v44, %v1383_v6 }
 0x10d   :  { %13759 = vst [vmem:[#allocation30_spill] sm:$0xff] %v9508_v41  ;;  %6999 = vmatprep.mubr.msk.bf16.mxu0 %vm7892_vm2, %v13656_v37  ;;  %v2418_v41 = vpack.c.bf16 %v1552_v13, %v1551_v40 }
 0x10e   :  { %v6825_v19 = vpop.f32.mrf.mxu1  ;;  %v1353_v57 = vrot.slane %v13767_v49, 1  ;;  %v9564_v49 = vsel %vm13443_vm3, 0.0, %v1389_v5  ;;  %vm13447_vm3 = vcmp.eq.s32.totalorder %v9066_v42, 199  ;;  %v7875_v42 = vld [vmem:[%s13193_s0 + $0x68] sm:$0xff]  }
 0x10f   :  { %v13769_v19 = vunpack.c.l.bf16 %v13768_v33 }
 0x110   :  { %v9536_v50 = vpop.f32.mrf.mxu1  ;;  %v1419_v13 = vsel %vm1386_vm4, %v1352_v10, %v1353_v57 }
 0x111   :  { %13764 = vst [vmem:[#allocation50_spill] sm:$0xff] %v9536_v50  ;;  %v1354_v21 = vrot.slane %v13769_v19, 1  ;;  %v13771_v19 = vld [vmem:[#allocation46_spill] sm:$0xff]  ;;  %v1553_v10 = vsel %vm13446_vm1, 0.0, %v1419_v13  ;;  %v13775_v13 = vld [vmem:[#allocation4_spill] sm:$0xff] }
 0x112   :  { %v6826_v27 = vpop.f32.mrf.mxu1  ;;  %vm1052_vm14 = vcmp.eq.s32.totalorder %v13771_v19, 199 }
 0x113   :  { %v9552_v50 = vpop.f32.mrf.mxu0  ;;  %v9568_v27 = vsel %vm13442_vm13, 0.0, %v1388_v55  ;;  %v1418_v40 = vsel %vm1386_vm4, %v1353_v57, %v1354_v21  ;;  %6898 = vmatmul.mubr.msk.bf16.gmra.mxu1 %vm1642_vm5, %v7872_v0  ;;  %vm13448_vm13 = vcmp.eq.s32.totalorder %v9058_v22, 199  ;;  %v13774_v0 = vunpack.c.h.bf16 %v13768_v33 }
 0x114   :  { %7000 = vmatmul.mubr.msk.bf16.gmra.mxu0 %vm1642_vm5, %v2418_v41  ;;  %6901 = vmatprep.mubr.msk.bf16.mxu1 %vm7892_vm2, %v13656_v37  ;;  %v1554_v57 = vsel %vm1052_vm14, 0.0, %v1418_v40 }
 0x115   :  { %v6777_v16 = vpop.f32.mrf.mxu0  ;;  %7003 = vmatprep.mubr.msk.bf16.mxu0 %vm7892_vm2, %v13656_v37  ;;  %v1355_v41 = vrot.slane %v13774_v0, 1  ;;  %v13777_v0 = vld [vmem:[#allocation52_spill] sm:$0xff] }
 0x116   :  { %v13772_v16 = vld [vmem:[#allocation3_spill] sm:$0xff]  ;;  %vm13455_vm1 = vcmp.eq.s32.totalorder %v13777_v0, 199 }
 0x117   :  { %v9577_v6 = vpop.f32.mrf.mxu0  ;;  %v13773_v5 = vunpack.c.l.bf16 %v13772_v16  ;;  %v7873_v16 = vld [vmem:[%s13193_s0 + $0x48] sm:$0xff]  }
 0x119   :  { %v1385_v38 = vrot.slane %v13773_v5, 1  ;;  %v6778_v55 = vpop.f32.mrf.mxu0  ;;  %v2419_v5 = vpack.c.bf16 %v1554_v57, %v1553_v10  ;;  %v1417_v10 = vsel %vm1386_vm4, %v1354_v21, %v1355_v41 }
 0x11a   :  { %v13776_v55 = vld [vmem:[#allocation51_spill] sm:$0xff] }
 0x11b   :  { %v1387_v44 = vsel %vm1386_vm4, %v1384_v29, %v1385_v38  ;;  %v1436_v40 = vsel %vm1386_vm4, %v1385_v38, %v13775_v13  ;;  %vm13456_vm10 = vcmp.eq.s32.totalorder %v13776_v55, 199  ;;  %v1416_v29 = vsel %vm1386_vm4, %v1355_v41, %v9172_v30  ;;  %6902 = vmatmul.mubr.msk.bf16.gmra.mxu1 %vm1642_vm5, %v7873_v16 }
 0x11c   :  { %v9606_v32 = vsel %vm13448_vm13, 0.0, %v1387_v44  ;;  %v9610_v33 = vsel %vm13447_vm3, 0.0, %v1436_v40  ;;  %7004 = vmatmul.mubr.msk.bf16.gmra.mxu0 %vm1642_vm5, %v2419_v5  ;;  %6905 = vmatprep.mubr.msk.bf16.mxu1 %vm7892_vm2, %v13656_v37  ;;  %v1555_v30 = vsel %vm13456_vm10, 0.0, %v1417_v10  ;;  %v1556_v21 = vsel %vm13455_vm1, 0.0, %v1416_v29  ;;  %v7833_v29 = vld [vmem:[%s13194_s3 + $0x8] sm:$0xff]  }
 0x11d   :  { %7007 = vmatprep.mubr.msk.bf16.mxu0 %vm7892_vm2, %v13656_v37  ;;  %v2420_v13 = vpack.c.bf16 %v1556_v21, %v1555_v30  ;;  %7174 = vmatpush3.bf16.msra.mxu0 %v7833_v29  ;;  %v13779_v21 = vpack.c.bf16 %v9215_v15, %v9211_v28  ;;  %v13783_v29 = vld [vmem:[#allocation6_spill] sm:$0xff]  ;;  %v7832_v28 = vld [vmem:[%s13194_s3] sm:$0xff]   ;;  %vm13453_vm3 = vcmp.eq.s32.totalorder %v9077_v34, 199  ;;  %vm13454_vm13 = vcmp.eq.s32.totalorder %v9088_v36, 199 }
 0x11e   :  { %v9620_v57 = vpop.f32.mrf.mxu1  ;;  %7377 = vmatprep.subr.bf16.mxu0 %v13656_v37  ;;  %v7874_v15 = vld [vmem:[%s13193_s0 + $0x64] sm:$0xf]  ;;  %7072 = vmatpush3.bf16.msra.mxu1 %v7832_v28  ;;  %v13786_v28 = vunpack.c.h.bf16 %v13783_v29 }
 0x11f   :  { %7275 = vmatprep.subr.bf16.mxu1 %v13656_v37 }
 0x120   :  { %v6829_v44 = vpop.f32.mrf.mxu1 }
 0x122   :  { %v9632_v41 = vpop.f32.mrf.mxu1 }
 0x123   :  { %v9634_v40 = vpop.f32.mrf.mxu0  ;;  %6906 = vmatmul.mubr.msk.bf16.gmra.mxu1 %vm1642_vm5, %v8877_v63 }
 0x124   :  { %v6830_v16 = vpop.f32.mrf.mxu1  ;;  %7008 = vmatmul.mubr.msk.bf16.gmra.mxu0 %vm1642_vm5, %v2420_v13  ;;  %6909 = vmatprep.mubr.msk.bf16.mxu1 %vm7892_vm2, %v13656_v37  ;;  %v13781_v13 = vld [vmem:[#allocation5_spill] sm:$0xff] }
 0x125   :  { %v6781_v5 = vpop.f32.mrf.mxu0  ;;  %7011 = vmatprep.mubr.msk.bf16.mxu0 %vm7892_vm2, %v13656_v37  ;;  %v13782_v16 = vunpack.c.l.bf16 %v13781_v13 }
 0x127   :  { %v9639_v38 = vpop.f32.mrf.mxu0  ;;  %v1361_v5 = vrot.slane %v13782_v16, 1 }
 0x129   :  { %v6782_v10 = vpop.f32.mrf.mxu0  ;;  %v1411_v16 = vsel %vm1386_vm4, %v9191_v9, %v1361_v5 }
 0x12a   :  { %v13784_v10 = vunpack.c.l.bf16 %v13783_v29  ;;  %v1561_v9 = vsel %vm13453_vm3, 0.0, %v1411_v16 }
 0x12b   :  { %v9648_v30 = vpop.f32.mrf.mxu1  ;;  %6910 = vmatmul.mubr.msk.bf16.gmra.mxu1 %vm1642_vm5, %v8965_v25 }
 0x12c   :  { %13778 = vst [vmem:[#allocation34_spill] sm:$0xff] %v9648_v30  ;;  %7012 = vmatmul.mubr.msk.bf16.gmra.mxu0 %vm1642_vm5, %v13779_v21  ;;  %6913 = vmatprep.mubr.msk.bf16.mxu1 %vm7892_vm2, %v13656_v37  ;;  %v6261_v21 = vcombine.low %v9045_v4, %v7874_v15  ;;  %v13785_v4 = vpack.c.bf16 %v9232_v47, %v9228_v7  ;;  %v1363_v15 = vrot.slane %v13786_v28, 1  ;;  %v13790_v30 = vld [vmem:[#allocation10_spill] sm:$0xff] }
 0x12d   :  { %v6833_v63 = vpop.f32.mrf.mxu1  ;;  %7015 = vmatprep.mubr.msk.bf16.mxu0 %vm7892_vm2, %v13656_v37  ;;  %vm13472_vm3 = vcmp.eq.s32.totalorder %v13790_v30, 199 }
 0x12e   :  { %v1362_v63 = vrot.slane %v13784_v10, 1 }
 0x12f   :  { %v9657_v44 = vpop.f32.mrf.mxu1 }
 0x130   :  { %13780 = vst [vmem:[#allocation55_spill] sm:$0xff] %v9657_v44  ;;  %v1410_v13 = vsel %vm1386_vm4, %v1361_v5, %v1362_v63 }
 0x131   :  { %v6834_v25 = vpop.f32.mrf.mxu1  ;;  %v1562_v5 = vsel %vm13454_vm13, 0.0, %v1410_v13  ;;  %v13791_v13 = vld [vmem:[#allocation11_spill] sm:$0xff] }
 0x132   :  { %v2423_v22 = vpack.c.bf16 %v1562_v5, %v1561_v9  ;;  %vm13460_vm13 = vcmp.eq.s32.totalorder %v13791_v13, 199 }
 0x133   :  { %6914 = vmatmul.mubr.msk.bf16.gmra.mxu1 %vm1642_vm5, %v6261_v21  ;;  %v13787_v21 = vld [vmem:[#allocation9_spill] sm:$0xff] }
 0x134   :  { %v9682_v10 = vpop.f32.mrf.mxu0  ;;  %7016 = vmatmul.mubr.msk.bf16.gmra.mxu0 %vm1642_vm5, %v13785_v4  ;;  %6917 = vmatprep.mubr.msk.bf16.mxu1 %vm7892_vm2, %v13656_v37  ;;  %v13788_v7 = vunpack.c.l.bf16 %v13787_v21 }
 0x135   :  { %7019 = vmatprep.mubr.msk.bf16.mxu0 %vm7892_vm2, %v13656_v37 }
 0x136   :  { %v6785_v25 = vpop.f32.mrf.mxu0  ;;  %v1364_v47 = vrot.slane %v13788_v7, 1 }
 0x137   :  { %v1409_v25 = vsel %vm1386_vm4, %v1362_v63, %v1363_v15  ;;  %v13793_v63 = vunpack.c.h.bf16 %v13787_v21 }
 0x138   :  { %v9701_v4 = vpop.f32.mrf.mxu0  ;;  %v1408_v29 = vsel %vm1386_vm4, %v1363_v15, %v1364_v47  ;;  %v1563_v9 = vsel %vm13472_vm3, 0.0, %v1409_v25 }
 0x139   :  { %v9706_v44 = vpop.f32.mrf.mxu1  ;;  %v1564_v5 = vsel %vm13460_vm13, 0.0, %v1408_v29  ;;  %v1365_v15 = vrot.slane %v13793_v63, 1 }
 0x13a   :  { %13789 = vst [vmem:[#allocation40_spill] sm:$0xff] %v9706_v44  ;;  %v6786_v16 = vpop.f32.mrf.mxu0 }
 0x13b   :  { %v6837_v28 = vpop.f32.mrf.mxu1  ;;  %6918 = vmatmul.mubr.msk.bf16.gmra.mxu1 %vm1642_vm5, %v7875_v42  ;;  %v2424_v16 = vpack.c.bf16 %v1564_v5, %v1563_v9  ;;  %v1406_v25 = vsel %vm1386_vm4, %v1365_v15, %v9290_v46  ;;  %v1407_v29 = vsel %vm1386_vm4, %v1364_v47, %v1365_v15  ;;  %v7877_v47 = vld [vmem:[%s13193_s0 + $0x78] sm:$0xff]  }
 0x13c   :  { %7020 = vmatmul.mubr.msk.bf16.gmra.mxu0 %vm1642_vm5, %v2423_v22  ;;  %6921 = vmatprep.mubr.msk.bf16.mxu1 %vm7892_vm2, %v13656_v37  ;;  %v7876_v22 = vld [vmem:[%s13193_s0 + $0x70] sm:$0xff]   ;;  %v13794_v28 = vld [vmem:[#allocation14_spill] sm:$0xff] }
 0x13d   :  { %v9716_v7 = vpop.f32.mrf.mxu1  ;;  %7023 = vmatprep.mubr.msk.bf16.mxu0 %vm7892_vm2, %v13656_v37  ;;  %vm13457_vm1 = vcmp.eq.s32.totalorder %v13794_v28, 199 }
 0x13e   :  { %13792 = vst [vmem:[#allocation47_spill] sm:$0xff] %v9716_v7  ;;  %v13795_v7 = vld [vmem:[#allocation15_spill] sm:$0xff]  ;;  %v1565_v21 = vsel %vm13457_vm1, 0.0, %v1407_v29  ;;  %vm13817_vm1 = vcmp.lt.s32.totalorder %v7967_v11, 1 }
 0x13f   :  { %v6838_v42 = vpop.f32.mrf.mxu1  ;;  %vm13458_vm10 = vcmp.eq.s32.totalorder %v13795_v7, 199  ;;  %v7878_v29 = vld [vmem:[%s13193_s0 + $0x80] sm:$0xff]  }
 0x140   :  { %v1566_v9 = vsel %vm13458_vm10, 0.0, %v1406_v25 }
 0x141   :  { %v2425_v5 = vpack.c.bf16 %v1566_v9, %v1565_v21 }
 0x143   :  { %6922 = vmatmul.mubr.msk.bf16.gmra.mxu1 %vm1642_vm5, %v7876_v22 }
 0x144   :  { %7024 = vmatmul.mubr.msk.bf16.gmra.mxu0 %vm1642_vm5, %v2424_v16  ;;  %6925 = vmatprep.mubr.msk.bf16.mxu1 %vm7892_vm2, %v13656_v37 }
 0x145   :  { %7027 = vmatprep.mubr.msk.bf16.mxu0 %vm7892_vm2, %v13656_v37 }
 0x146   :  { %v9748_v46 = vpop.f32.mrf.mxu0 }
 0x148   :  { %v6789_v63 = vpop.f32.mrf.mxu0 }
 0x14a   :  { %v9753_v15 = vpop.f32.mrf.mxu1  ;;  %v9755_v42 = vpop.f32.mrf.mxu0 }
 0x14b   :  { %13796 = vst [vmem:[#allocation3_spill] sm:$0xff] %v9753_v15  ;;  %6926 = vmatmul.mubr.msk.bf16.gmra.mxu1 %vm1642_vm5, %v7877_v47  ;;  %v13798_v47 = vpack.c.bf16 %v9320_v18, %v9327_v8  ;;  %v13800_v18 = vpack.c.bf16 %v9341_v26, %v9331_v58  ;;  %v13802_v58 = vpack.c.bf16 %v9357_v12, %v9353_v61 }
 0x14c   :  { %7028 = vmatmul.mubr.msk.bf16.gmra.mxu0 %vm1642_vm5, %v2425_v5  ;;  %v6841_v22 = vpop.f32.mrf.mxu1  ;;  %v6790_v16 = vpop.f32.mrf.mxu0  ;;  %6929 = vmatprep.mubr.msk.bf16.mxu1 %vm7892_vm2, %v13656_v37  ;;  %v13804_v61 = vpack.c.bf16 %v9377_v54, %v9373_v51  ;;  %v13806_v54 = vpack.c.bf16 %v9402_v35, %v9398_v56  ;;  %v13808_v35 = vpack.c.bf16 %v9426_v53, %v9422_v14 }
 0x14d   :  { %7031 = vmatprep.mubr.msk.bf16.mxu0 %vm7892_vm2, %v13656_v37  ;;  %v7879_v22 = vld [vmem:[%s13193_s0 + $0x88] sm:$0xff]   ;;  %v13810_v14 = vpack.c.bf16 %v9474_v52, %v9470_v17  ;;  %v13812_v17 = vpack.c.bf16 %v9521_v43, %v9517_v31 }
 0x14e   :  { %v9763_v25 = vpop.f32.mrf.mxu1 }
 0x14f   :  { %13797 = vst [vmem:[#allocation4_spill] sm:$0xff] %v9763_v25 }
 0x150   :  { %v6842_v21 = vpop.f32.mrf.mxu1 }
 0x152   :  { %v9768_v9 = vpop.f32.mrf.mxu0 }
 0x153   :  { %6930 = vmatmul.mubr.msk.bf16.gmra.mxu1 %vm1642_vm5, %v7878_v29 }
 0x154   :  { %7032 = vmatmul.mubr.msk.bf16.gmra.mxu0 %vm1642_vm5, %v13798_v47  ;;  %v6793_v5 = vpop.f32.mrf.mxu0  ;;  %6933 = vmatprep.mubr.msk.bf16.mxu1 %vm7892_vm2, %v13656_v37  ;;  %v7880_v47 = vld [vmem:[%s13193_s0 + $0x90] sm:$0xff]  }
 0x155   :  { %7035 = vmatprep.mubr.msk.bf16.mxu0 %vm7892_vm2, %v13656_v37 }
 0x156   :  { %v9779_v63 = vpop.f32.mrf.mxu0 }
 0x158   :  { %v6794_v16 = vpop.f32.mrf.mxu0 }
 0x15a   :  { %v9784_v29 = vpop.f32.mrf.mxu1 }
 0x15b   :  { %13799 = vst [vmem:[#allocation5_spill] sm:$0xff] %v9784_v29  ;;  %6934 = vmatmul.mubr.msk.bf16.gmra.mxu1 %vm1642_vm5, %v7879_v22 }
 0x15c   :  { %7036 = vmatmul.mubr.msk.bf16.gmra.mxu0 %vm1642_vm5, %v13800_v18  ;;  %6937 = vmatprep.mubr.msk.bf16.mxu1 %vm7892_vm2, %v13656_v37  ;;  %v6845_v8 = vpop.f32.mrf.mxu1  ;;  %v7881_v18 = vld [vmem:[%s13193_s0 + $0x98] sm:$0xff]  }
 0x15d   :  { %7039 = vmatprep.mubr.msk.bf16.mxu0 %vm7892_vm2, %v13656_v37 }
 0x15e   :  { %v9795_v21 = vpop.f32.mrf.mxu1 }
 0x15f   :  { %13801 = vst [vmem:[#allocation6_spill] sm:$0xff] %v9795_v21 }
 0x160   :  { %v6846_v5 = vpop.f32.mrf.mxu1 }
 0x161   :  { %v9800_v22 = vpop.f32.mrf.mxu0 }
 0x163   :  { %6938 = vmatmul.mubr.msk.bf16.gmra.mxu1 %vm1642_vm5, %v7880_v47  ;;  %v6797_v26 = vpop.f32.mrf.mxu0 }
 0x164   :  { %7040 = vmatmul.mubr.msk.bf16.gmra.mxu0 %vm1642_vm5, %v13802_v58  ;;  %6941 = vmatprep.mubr.msk.bf16.mxu1 %vm7892_vm2, %v13656_v37  ;;  %v7882_v58 = vld [vmem:[%s13193_s0 + $0xa0] sm:$0xff]  }
 0x165   :  { %7043 = vmatprep.mubr.msk.bf16.mxu0 %vm7892_vm2, %v13656_v37  ;;  %v9811_v16 = vpop.f32.mrf.mxu0 }
 0x167   :  { %v6798_v8 = vpop.f32.mrf.mxu0 }
 0x168   :  { %v7883_v8 = vld [vmem:[%s13193_s0 + $0xa8] sm:$0xff]  }
 0x169   :  { %v9816_v47 = vpop.f32.mrf.mxu1 }
 0x16a   :  { %13803 = vst [vmem:[#allocation9_spill] sm:$0xff] %v9816_v47 }
 0x16b   :  { %6942 = vmatmul.mubr.msk.bf16.gmra.mxu1 %vm1642_vm5, %v7881_v18  ;;  %v6849_v12 = vpop.f32.mrf.mxu1 }
 0x16c   :  { %7044 = vmatmul.mubr.msk.bf16.gmra.mxu0 %vm1642_vm5, %v13804_v61  ;;  %6945 = vmatprep.mubr.msk.bf16.mxu1 %vm7892_vm2, %v13656_v37 }
 0x16d   :  { %7047 = vmatprep.mubr.msk.bf16.mxu0 %vm7892_vm2, %v13656_v37  ;;  %v9827_v5 = vpop.f32.mrf.mxu1 }
 0x16e   :  { %13805 = vst [vmem:[#allocation70_spill] sm:$0xff] %v9827_v5 }
 0x16f   :  { %v6850_v26 = vpop.f32.mrf.mxu1 }
 0x171   :  { %v9837_v51 = vpop.f32.mrf.mxu0 }
 0x173   :  { %6946 = vmatmul.mubr.msk.bf16.gmra.mxu1 %vm1642_vm5, %v7882_v58  ;;  %v6801_v18 = vpop.f32.mrf.mxu0 }
 0x174   :  { %7048 = vmatmul.mubr.msk.bf16.gmra.mxu0 %vm1642_vm5, %v13806_v54  ;;  %6949 = vmatprep.mubr.msk.bf16.mxu1 %vm7892_vm2, %v13656_v37  ;;  %v7884_v54 = vld [vmem:[%s13193_s0 + $0xb0] sm:$0xff]  }
 0x175   :  { %7051 = vmatprep.mubr.msk.bf16.mxu0 %vm7892_vm2, %v13656_v37  ;;  %v9846_v61 = vpop.f32.mrf.mxu0 }
 0x177   :  { %v6802_v12 = vpop.f32.mrf.mxu0 }
 0x178   :  { %v9848_v58 = vpop.f32.mrf.mxu1  ;;  %v7885_v12 = vld [vmem:[%s13193_s0 + $0xb8] sm:$0xff]  }
 0x179   :  { %13807 = vst [vmem:[#allocation71_spill] sm:$0xff] %v9848_v58 }
 0x17a   :  { %v6853_v56 = vpop.f32.mrf.mxu1 }
 0x17b   :  { %6950 = vmatmul.mubr.msk.bf16.gmra.mxu1 %vm1642_vm5, %v7883_v8 }
 0x17c   :  { %7052 = vmatmul.mubr.msk.bf16.gmra.mxu0 %vm1642_vm5, %v13808_v35  ;;  %6953 = vmatprep.mubr.msk.bf16.mxu1 %vm7892_vm2, %v13656_v37  ;;  %v9859_v26 = vpop.f32.mrf.mxu1 }
 0x17d   :  { %7055 = vmatprep.mubr.msk.bf16.mxu0 %vm7892_vm2, %v13656_v37  ;;  %13809 = vst [vmem:[#allocation72_spill] sm:$0xff] %v9859_v26 }
 0x17e   :  { %v6854_v18 = vpop.f32.mrf.mxu1 }
 0x181   :  { %v9873_v53 = vpop.f32.mrf.mxu0 }
 0x183   :  { %6954 = vmatmul.mubr.msk.bf16.gmra.mxu1 %vm1642_vm5, %v7884_v54  ;;  %v6805_v8 = vpop.f32.mrf.mxu0 }
 0x184   :  { %7056 = vmatmul.mubr.msk.bf16.gmra.mxu0 %vm1642_vm5, %v13810_v14  ;;  %6957 = vmatprep.mubr.msk.bf16.mxu1 %vm7892_vm2, %v13656_v37  ;;  %v7886_v14 = vld [vmem:[%s13193_s0 + $0xc4] sm:$0xf]  ;;  %v7887_v8 = vld [vmem:[%s13193_s0 + $0xc0] sm:$0xf] }
 0x185   :  { %7059 = vmatprep.mubr.msk.bf16.mxu0 %vm7892_vm2, %v13656_v37  ;;  %v9878_v35 = vpop.f32.mrf.mxu0  ;;  %v6273_v31 = vcombine.low %v7887_v8, %v7886_v14 }
 0x187   :  { %v6806_v56 = vpop.f32.mrf.mxu0 }
 0x188   :  { %v9880_v54 = vpop.f32.mrf.mxu1 }
 0x189   :  { %13811 = vst [vmem:[#allocation73_spill] sm:$0xff] %v9880_v54 }
 0x18a   :  { %v6857_v52 = vpop.f32.mrf.mxu1 }
 0x18b   :  { %6958 = vmatmul.mubr.msk.bf16.gmra.mxu1 %vm1642_vm5, %v7885_v12 }
 0x18c   :  { %7060 = vmatmul.mubr.msk.bf16.gmra.mxu0 %vm1642_vm5, %v13812_v17  ;;  %6961 = vmatprep.mubr.msk.bf16.mxu1 %vm7892_vm2, %v13656_v37  ;;  %v9891_v18 = vpop.f32.mrf.mxu1  ;;  %v13814_v17 = vpack.c.bf16 %v9568_v27, %v9564_v49  ;;  %v9916_v49 = vld [vmem:[%s13195_s2] ss:$0 sm:$0xff]  ;;  %v13815_v27 = vpack.c.bf16 %v9610_v33, %v9606_v32 }
 0x18d   :  { %7063 = vmatprep.mubr.msk.bf16.mxu0 %vm7892_vm2, %v13656_v37  ;;  %13813 = vst [vmem:[#allocation74_spill] sm:$0xff] %v9891_v18 }
 0x18e   :  { %v6858_v43 = vpop.f32.mrf.mxu1  ;;  %v9899_v12 = vpop.f32.mrf.mxu0 }
 0x190   :  { %v2212_v56 = vpop.f32.mrf.mxu1  ;;  %v6809_v52 = vpop.f32.mrf.mxu0 }
 0x192   :  { %v6867_v18 = vpop.f32.mrf.mxu1  ;;  %v9910_v14 = vpop.f32.mrf.mxu0 }
 0x193   :  { %6962 = vmatmul.mubr.msk.bf16.gmra.mxu1 %vm1642_vm5, %v6273_v31  ;;  %v2213_v31 = vadd.f32 %v2212_v56, %v9098_v1 }
 0x194   :  { %7064 = vmatmul.mubr.msk.bf16.gmra.mxu0 %vm1642_vm5, %v13814_v17  ;;  %7073 = vmatprep.mubr.msk.bf16.mxu1 %vm7892_vm2, %v13656_v37  ;;  %v2215_v8 = vpop.f32.mrf.mxu1  ;;  %v6810_v43 = vpop.f32.mrf.mxu0 }
 0x195   :  { %7067 = vmatprep.mubr.msk.bf16.mxu0 %vm7892_vm2, %v13656_v37  ;;  %v2216_v1 = vadd.f32 %v2215_v8, %v9106_v48 }
 0x196   :  { %v6868_v54 = vpop.f32.mrf.mxu1  ;;  %v2572_v58 = vpop.f32.mrf.mxu0 }
 0x197   :  { %v2771_v18 = vadd.f32 %v2572_v58, %v2213_v31 }
 0x198   :  { %v2220_v26 = vpop.f32.mrf.mxu1  ;;  %v6973_v54 = vpop.f32.mrf.mxu0 }
 0x199   :  { %v2828_v56 = vadd.f32 %v9916_v49, %v2771_v18  ;;  %v2221_v32 = vadd.f32 %v2220_v26, %v9180_v59 }
 0x19a   :  { %v6871_v17 = vpop.f32.mrf.mxu1  ;;  %v2575_v43 = vpop.f32.mrf.mxu0 }
 0x19b   :  { %v2772_v5 = vadd.f32 %v2575_v43, %v2216_v1  ;;  %v9926_v47 = vmax.f32 %v2828_v56, 0.0 }
 0x19c   :  { %7068 = vmatmul.mubr.msk.bf16.gmra.mxu0 %vm1642_vm5, %v13815_v27  ;;  %v2223_v52 = vpop.f32.mrf.mxu1  ;;  %v6974_v29 = vpop.f32.mrf.mxu0  ;;  %vm3289_vm5 = vcmask 130048  }
 0x19d   :  { %7175 = vmatprep.mubr.msk.bf16.mxu0 %vm7892_vm2, %v13656_v37  ;;  %13816 = vst [vmem:[#allocation75_spill] sm:$0xff] %v9926_v47  ;;  %v2829_v33 = vadd.f32 %v9916_v49, %v2772_v5  ;;  %v13461_v54 = vrot.slane %v9926_v47, 7  ;;  %v2224_v29 = vadd.f32 %v2223_v52, %v9234_v24  ;;  %v13459_v5 = vrot.slane %v9926_v47, 1 }
 0x19e   :  { %v6872_v21 = vpop.f32.mrf.mxu1  ;;  %v2580_v31 = vpop.f32.mrf.mxu0 }
 0x19f   :  { %v2879_v27 = vmax.f32 %v2829_v33, 0.0  ;;  %v2773_v17 = vadd.f32 %v2580_v31, %v2221_v32 }
 0x1a0   :  { %v2228_v58 = vpop.f32.mrf.mxu1  ;;  %v6977_v8 = vpop.f32.mrf.mxu0 }
 0x1a1   :  { %v2929_v18 = vrot.slane %v2879_v27, 7  ;;  %v3079_v25 = vrot.slane %v2879_v27, 1  ;;  %v3228_v1 = vpack.c.bf16 %v2879_v27, %v9926_v47  ;;  %v2830_v21 = vadd.f32 %v9916_v49, %v2773_v17 }
 0x1a2   :  { %v6875_v48 = vpop.f32.mrf.mxu1  ;;  %v2583_v26 = vpop.f32.mrf.mxu0  ;;  %v2229_v52 = vadd.f32 %v2228_v58, %v9323_v62 }
 0x1a3   :  { %v9939_v56 = vsel %vm13817_vm1, %v13461_v54, %v2929_v18  ;;  %v2880_v43 = vmax.f32 %v2830_v21, 0.0  ;;  %v2774_v32 = vadd.f32 %v2583_v26, %v2224_v29  ;;  %v3176_v24 = vsel %vm1386_vm4, %v13459_v5, %v3079_v25  ;;  %v13822_v5 = vld [vmem:[#allocation8_spill] sm:$0xff] }
 0x1a4   :  { %v2231_v59 = vpop.f32.mrf.mxu1  ;;  %13818 = vst [vmem:[#allocation76_spill] sm:$0xff] %v9939_v56  ;;  %7176 = vmatmul.mubr.msk.bf16.vlgmr.msra.gmra.mxu0 %vm3289_vm5, %v3228_v1  ;;  %v6978_v31 = vpop.f32.mrf.mxu0  ;;  %vm13823_vm13 = vcmp.eq.s32.totalorder %v13822_v5, 199 }
 0x1a5   :  { %7179 = vmatprep.mubr.msk.bf16.mxu0 %vm7892_vm2, %v13656_v37  ;;  %v2930_v27 = vrot.slane %v2880_v43, 7  ;;  %v3080_v17 = vrot.slane %v2880_v43, 1  ;;  %v2831_v48 = vadd.f32 %v9916_v49, %v2774_v32 }
 0x1a6   :  { %v6876_v33 = vpop.f32.mrf.mxu1  ;;  %v2588_v21 = vpop.f32.mrf.mxu0 }
 0x1a7   :  { %v3025_v1 = vsel %vm13817_vm1, %v2929_v18, %v2930_v27  ;;  %v3175_v29 = vsel %vm1386_vm4, %v3079_v25, %v3080_v17  ;;  %v2775_v26 = vadd.f32 %v2588_v21, %v2229_v52  ;;  %v13819_v33 = vld [vmem:[#allocation7_spill] sm:$0xff]  ;;  %v2881_v58 = vmax.f32 %v2831_v48, 0.0 }
 0x1a8   :  { %v2236_v8 = vpop.f32.mrf.mxu1  ;;  %vm13820_vm10 = vcmp.eq.s32.totalorder %v13819_v33, 199  ;;  %v9960_v62 = vsel %vm13823_vm13, 0.0, %v3175_v29  ;;  %v6981_v32 = vpop.f32.mrf.mxu0  ;;  %v2232_v18 = vadd.f32 %v2231_v59, %v9367_v23  ;;  %vm13825_vm13 = vmmov %vm13817_vm1  ;;  %vm13827_vm1 = vcmp.eq.s32.totalorder %v8215_v45, 0 }
 0x1a9   :  { %v9956_v31 = vsel %vm13820_vm10, 0.0, %v3176_v24  ;;  %13824 = vst [vmem:[#allocation8_spill] sm:$0xff] %v9960_v62  ;;  %v2832_v56 = vadd.f32 %v9916_v49, %v2775_v26  ;;  %v2931_v25 = vrot.slane %v2881_v58, 7  ;;  %v3081_v52 = vrot.slane %v2881_v58, 1 }
 0x1aa   :  { %13821 = vst [vmem:[#allocation77_spill] sm:$0xff] %v9956_v31  ;;  %v6879_v54 = vpop.f32.mrf.mxu1  ;;  %v3229_v21 = vpack.c.bf16 %v2881_v58, %v2880_v43  ;;  %v2591_v24 = vpop.f32.mrf.mxu0  ;;  %vm13826_vm10 = vcmp.eq.s32.totalorder %v8155_v60, 0 }
 0x1ab   :  { %v2882_v15 = vmax.f32 %v2832_v56, 0.0  ;;  %v2776_v44 = vadd.f32 %v2591_v24, %v2232_v18  ;;  %v3024_v29 = vsel %vm13825_vm13, %v2930_v27, %v2931_v25  ;;  %v3174_v54 = vsel %vm1386_vm4, %v3080_v17, %v3081_v52 }
 0x1ac   :  { %v2239_v33 = vpop.f32.mrf.mxu1  ;;  %7180 = vmatmul.mubr.msk.bf16.gmra.mxu0 %vm3289_vm5, %v3229_v21  ;;  %v6982_v32 = vpop.f32.mrf.mxu0  ;;  %v9973_v23 = vsel %vm13826_vm10, 0.0, %v3025_v1  ;;  %v9980_v56 = vsel %vm13827_vm1, 0.0, %v3024_v29  ;;  %v2237_v27 = vadd.f32 %v2236_v8, %v9460_v20  ;;  %vm13828_vm10 = vcmp.eq.s32.totalorder %v8155_v60, 199 }
 0x1ad   :  { %v2932_v59 = vrot.slane %v2882_v15, 7  ;;  %v3082_v43 = vrot.slane %v2882_v15, 1  ;;  %v2833_v26 = vadd.f32 %v9916_v49, %v2776_v44  ;;  %7183 = vmatprep.mubr.msk.bf16.mxu0 %vm7892_vm2, %v13656_v37  ;;  %v2240_v24 = vadd.f32 %v2239_v33, %v9489_v3 }
 0x1ae   :  { %v6880_v48 = vpop.f32.mrf.mxu1  ;;  %v9992_v20 = vsel %vm13828_vm10, 0.0, %v3174_v54  ;;  %vm13830_vm1 = vcmp.eq.s32.totalorder %v8215_v45, 199 }
 0x1af   :  { %v3023_v1 = vsel %vm13825_vm13, %v2931_v25, %v2932_v59  ;;  %v3173_v44 = vsel %vm1386_vm4, %v3081_v52, %v3082_v43  ;;  %v2883_v21 = vmax.f32 %v2833_v26, 0.0  ;;  %13829 = vst [vmem:[#allocation78_spill] sm:$0xff] %v9992_v20  ;;  %v13834_v52 = vld [vmem:[#allocation17_spill] sm:$0xff] }
 0x1b0   :  { %v9996_v8 = vsel %vm13830_vm1, 0.0, %v3173_v44  ;;  %vm13835_vm1 = vcmp.eq.s32.totalorder %v13834_v52, 0 }
 0x1b1   :  { %13831 = vst [vmem:[#allocation79_spill] sm:$0xff] %v9996_v8  ;;  %v2933_v47 = vrot.slane %v2883_v21, 7  ;;  %v3083_v18 = vrot.slane %v2883_v21, 1  ;;  %v3230_v25 = vpack.c.bf16 %v2883_v21, %v2882_v15  ;;  %v13832_v15 = vld [vmem:[#allocation16_spill] sm:$0xff] }
 0x1b2   :  { %vm13833_vm10 = vcmp.eq.s32.totalorder %v13832_v15, 0 }
 0x1b3   :  { %v2244_v17 = vpop.f32.mrf.mxu1  ;;  %v3172_v54 = vsel %vm1386_vm4, %v3082_v43, %v3083_v18  ;;  %v10008_v21 = vsel %vm13833_vm10, 0.0, %v3023_v1  ;;  %vm13836_vm10 = vcmp.eq.s32.totalorder %v13834_v52, 199 }
 0x1b4   :  { %v2596_v58 = vpop.f32.mrf.mxu0  ;;  %7184 = vmatmul.mubr.msk.bf16.gmra.mxu0 %vm3289_vm5, %v3230_v25  ;;  %v2245_v45 = vadd.f32 %v2244_v17, %v9552_v50 }
 0x1b5   :  { %v2777_v48 = vadd.f32 %v2596_v58, %v2237_v27  ;;  %v6883_v32 = vpop.f32.mrf.mxu1  ;;  %v3022_v27 = vsel %vm13825_vm13, %v2932_v59, %v2933_v47  ;;  %7187 = vmatprep.mubr.msk.bf16.mxu0 %vm7892_vm2, %v13656_v37 }
 0x1b6   :  { %v6985_v29 = vpop.f32.mrf.mxu0 }
 0x1b7   :  { %v2834_v26 = vadd.f32 %v9916_v49, %v2777_v48  ;;  %v2247_v3 = vpop.f32.mrf.mxu1  ;;  %v10012_v48 = vsel %vm13835_vm1, 0.0, %v3022_v27  ;;  %vm13838_vm1 = vmmov %vm13825_vm13 }
 0x1b8   :  { %v2599_v33 = vpop.f32.mrf.mxu0  ;;  %v2248_v43 = vadd.f32 %v2247_v3, %v9577_v6 }
 0x1b9   :  { %v2778_v58 = vadd.f32 %v2599_v33, %v2240_v24  ;;  %v2884_v32 = vmax.f32 %v2834_v26, 0.0  ;;  %v6884_v44 = vpop.f32.mrf.mxu1 }
 0x1ba   :  { %v6986_v29 = vpop.f32.mrf.mxu0 }
 0x1bb   :  { %v2835_v59 = vadd.f32 %v9916_v49, %v2778_v58  ;;  %v2934_v24 = vrot.slane %v2884_v32, 7  ;;  %v3084_v25 = vrot.slane %v2884_v32, 1  ;;  %v2252_v26 = vpop.f32.mrf.mxu1 }
 0x1bc   :  { %v2604_v33 = vpop.f32.mrf.mxu0 }
 0x1bd   :  { %v2885_v1 = vmax.f32 %v2835_v59, 0.0  ;;  %v2779_v44 = vadd.f32 %v2604_v33, %v2245_v45  ;;  %v3021_v27 = vsel %vm13825_vm13, %v2933_v47, %v2934_v24  ;;  %v3171_v50 = vsel %vm1386_vm4, %v3083_v18, %v3084_v25  ;;  %v6887_v17 = vpop.f32.mrf.mxu1 }
 0x1be   :  { %v6989_v58 = vpop.f32.mrf.mxu0  ;;  %v10028_v45 = vsel %vm13836_vm10, 0.0, %v3171_v50  ;;  %vm13839_vm13 = vcmp.eq.s32.totalorder %v13832_v15, 199  ;;  %v13843_v50 = vld [vmem:[#allocation21_spill] sm:$0xff] }
 0x1bf   :  { %v2935_v29 = vrot.slane %v2885_v1, 7  ;;  %v3085_v60 = vrot.slane %v2885_v1, 1  ;;  %v3231_v20 = vpack.c.bf16 %v2885_v1, %v2884_v32  ;;  %v2836_v8 = vadd.f32 %v9916_v49, %v2779_v44  ;;  %v2255_v31 = vpop.f32.mrf.mxu1  ;;  %13837 = vst [vmem:[#allocation80_spill] sm:$0xff] %v10028_v45  ;;  %v13841_v1 = vld [vmem:[#allocation20_spill] sm:$0xff] }
 0x1c0   :  { %v2607_v62 = vpop.f32.mrf.mxu0  ;;  %v10036_v32 = vsel %vm13839_vm13, 0.0, %v3172_v54  ;;  %vm13842_vm3 = vcmp.eq.s32.totalorder %v13841_v1, 0  ;;  %vm13844_vm10 = vcmp.eq.s32.totalorder %v13843_v50, 0  ;;  %vm13848_vm13 = vcmp.eq.s32.totalorder %v13843_v50, 199 }
 0x1c1   :  { %v3020_v47 = vsel %vm13838_vm1, %v2934_v24, %v2935_v29  ;;  %v3170_v18 = vsel %vm1386_vm4, %v3084_v25, %v3085_v60  ;;  %v2886_v59 = vmax.f32 %v2836_v8, 0.0  ;;  %13840 = vst [vmem:[#allocation81_spill] sm:$0xff] %v10036_v32  ;;  %v2780_v33 = vadd.f32 %v2607_v62, %v2248_v43  ;;  %7188 = vmatmul.mubr.msk.bf16.gmra.mxu0 %vm3289_vm5, %v3231_v20  ;;  %v6888_v6 = vpop.f32.mrf.mxu1 }
 0x1c2   :  { %v6990_v3 = vpop.f32.mrf.mxu0  ;;  %v10041_v44 = vsel %vm13842_vm3, 0.0, %v3021_v27  ;;  %v10045_v24 = vsel %vm13844_vm10, 0.0, %v3020_v47  ;;  %v2253_v25 = vadd.f32 %v2252_v26, %v9634_v40  ;;  %7191 = vmatprep.mubr.msk.bf16.mxu0 %vm7892_vm2, %v13656_v37  ;;  %vm13845_vm3 = vmmov %vm13838_vm1  ;;  %vm13846_vm1 = vcmp.eq.s32.totalorder %v13841_v1, 199 }
 0x1c3   :  { %v2936_v54 = vrot.slane %v2886_v59, 7  ;;  %v3086_v17 = vrot.slane %v2886_v59, 1  ;;  %v2837_v20 = vadd.f32 %v9916_v49, %v2780_v33  ;;  %v2260_v43 = vpop.f32.mrf.mxu1  ;;  %v10061_v8 = vsel %vm13846_vm1, 0.0, %v3170_v18  ;;  %vm13850_vm10 = vmmov %vm13845_vm3 }
 0x1c4   :  { %v2612_v27 = vpop.f32.mrf.mxu0  ;;  %13847 = vst [vmem:[#allocation82_spill] sm:$0xff] %v10061_v8  ;;  %v2256_v33 = vadd.f32 %v2255_v31, %v9639_v38 }
 0x1c5   :  { %v3019_v58 = vsel %vm13845_vm3, %v2935_v29, %v2936_v54  ;;  %v3169_v47 = vsel %vm1386_vm4, %v3085_v60, %v3086_v17  ;;  %v2781_v6 = vadd.f32 %v2612_v27, %v2253_v25  ;;  %v2887_v40 = vmax.f32 %v2837_v20, 0.0  ;;  %v6891_v26 = vpop.f32.mrf.mxu1 }
 0x1c6   :  { %v6993_v3 = vpop.f32.mrf.mxu0  ;;  %v10065_v62 = vsel %vm13848_vm13, 0.0, %v3169_v47  ;;  %vm13851_vm3 = vcmp.eq.s32.totalorder %v13731_v39, 0  ;;  %vm13854_vm13 = vmmov %vm13850_vm10 }
 0x1c7   :  { %13849 = vst [vmem:[#allocation83_spill] sm:$0xff] %v10065_v62  ;;  %v2838_v52 = vadd.f32 %v9916_v49, %v2781_v6  ;;  %v2937_v60 = vrot.slane %v2887_v40, 7  ;;  %v3087_v25 = vrot.slane %v2887_v40, 1  ;;  %v3232_v20 = vpack.c.bf16 %v2887_v40, %v2886_v59  ;;  %v2263_v27 = vpop.f32.mrf.mxu1 }
 0x1c8   :  { %v2615_v26 = vpop.f32.mrf.mxu0  ;;  %v10078_v6 = vsel %vm13851_vm3, 0.0, %v3019_v58 }
 0x1c9   :  { %v2888_v3 = vmax.f32 %v2838_v52, 0.0  ;;  %v2782_v1 = vadd.f32 %v2615_v26, %v2256_v33  ;;  %v3018_v18 = vsel %vm13850_vm10, %v2936_v54, %v2937_v60  ;;  %v3168_v47 = vsel %vm1386_vm4, %v3086_v17, %v3087_v25  ;;  %7192 = vmatmul.mubr.msk.bf16.gmra.mxu0 %vm3289_vm5, %v3232_v20  ;;  %v6892_v38 = vpop.f32.mrf.mxu1  ;;  %v13852_v52 = vld [vmem:[#allocation26_spill] sm:$0xff] }
 0x1ca   :  { %v6994_v31 = vpop.f32.mrf.mxu0  ;;  %7195 = vmatprep.mubr.msk.bf16.mxu0 %vm7892_vm2, %v13656_v37  ;;  %vm13853_vm1 = vcmp.eq.s32.totalorder %v13852_v52, 0  ;;  %v2261_v17 = vadd.f32 %v2260_v43, %v9682_v10  ;;  %v10097_v10 = vsel %vm1043_vm6, 0.0, %v3168_v47 }
 0x1cb   :  { %v2938_v29 = vrot.slane %v2888_v3, 7  ;;  %v3088_v59 = vrot.slane %v2888_v3, 1  ;;  %v2839_v40 = vadd.f32 %v9916_v49, %v2782_v1  ;;  %v10085_v54 = vsel %vm13853_vm1, 0.0, %v3018_v18  ;;  %v2268_v33 = vpop.f32.mrf.mxu1  ;;  %13855 = vst [vmem:[#allocation84_spill] sm:$0xff] %v10097_v10 }
 0x1cc   :  { %v2620_v20 = vpop.f32.mrf.mxu0  ;;  %v2264_v31 = vadd.f32 %v2263_v27, %v9701_v4  ;;  %v2269_v52 = vadd.f32 %v2268_v33, %v9748_v46 }
 0x1cd   :  { %v3017_v58 = vsel %vm13854_vm13, %v2937_v60, %v2938_v29  ;;  %v3167_v1 = vsel %vm1386_vm4, %v3087_v25, %v3088_v59  ;;  %v2889_v38 = vmax.f32 %v2839_v40, 0.0  ;;  %v2783_v50 = vadd.f32 %v2620_v20, %v2261_v17  ;;  %v6895_v15 = vpop.f32.mrf.mxu1  ;;  %v13859_v25 = vld [vmem:[#allocation31_spill] sm:$0xff]  ;;  %vm13861_vm13 = vmmov %vm13850_vm10 }
 0x1ce   :  { %v6997_v18 = vpop.f32.mrf.mxu0  ;;  %v10101_v43 = vsel %vm1044_vm9, 0.0, %v3167_v1  ;;  %vm13860_vm1 = vcmp.eq.s32.totalorder %v13859_v25, 0 }
 0x1cf   :  { %13856 = vst [vmem:[#allocation85_spill] sm:$0xff] %v10101_v43  ;;  %v2939_v26 = vrot.slane %v2889_v38, 7  ;;  %v3089_v8 = vrot.slane %v2889_v38, 1  ;;  %v3233_v60 = vpack.c.bf16 %v2889_v38, %v2888_v3  ;;  %v2840_v40 = vadd.f32 %v9916_v49, %v2783_v50  ;;  %v2271_v4 = vpop.f32.mrf.mxu1  ;;  %v13857_v3 = vld [vmem:[#allocation29_spill] sm:$0xff] }
 0x1d0   :  { %v2623_v27 = vpop.f32.mrf.mxu0  ;;  %vm13858_vm3 = vcmp.eq.s32.totalorder %v13857_v3, 0 }
 0x1d1   :  { %v3016_v15 = vsel %vm13850_vm10, %v2938_v29, %v2939_v26  ;;  %v3166_v47 = vsel %vm1386_vm4, %v3088_v59, %v3089_v8  ;;  %v2784_v17 = vadd.f32 %v2623_v27, %v2264_v31  ;;  %v2890_v20 = vmax.f32 %v2840_v40, 0.0  ;;  %7196 = vmatmul.mubr.msk.bf16.gmra.mxu0 %vm3289_vm5, %v3233_v60  ;;  %v6896_v1 = vpop.f32.mrf.mxu1 }
 0x1d2   :  { %v6998_v18 = vpop.f32.mrf.mxu0  ;;  %v10113_v38 = vsel %vm13858_vm3, 0.0, %v3017_v58  ;;  %v10117_v50 = vsel %vm13860_vm1, 0.0, %v3016_v15  ;;  %7199 = vmatprep.mubr.msk.bf16.mxu0 %vm7892_vm2, %v13656_v37  ;;  %v2272_v59 = vadd.f32 %v2271_v4, %v9755_v42 }
 0x1d3   :  { %v2841_v29 = vadd.f32 %v9916_v49, %v2784_v17  ;;  %v2940_v31 = vrot.slane %v2890_v20, 7  ;;  %v3090_v60 = vrot.slane %v2890_v20, 1  ;;  %v2276_v40 = vpop.f32.mrf.mxu1 }
 0x1d4   :  { %v2628_v27 = vpop.f32.mrf.mxu0 }
 0x1d5   :  { %v2891_v58 = vmax.f32 %v2841_v29, 0.0  ;;  %v2785_v1 = vadd.f32 %v2628_v27, %v2269_v52  ;;  %v3015_v15 = vsel %vm13861_vm13, %v2939_v26, %v2940_v31  ;;  %v3165_v46 = vsel %vm1386_vm4, %v3089_v8, %v3090_v60  ;;  %v6899_v33 = vpop.f32.mrf.mxu1  ;;  %vm13868_vm13 = vmmov %vm13850_vm10 }
 0x1d6   :  { %v7001_v17 = vpop.f32.mrf.mxu0  ;;  %v10133_v52 = vsel %vm1046_vm15, 0.0, %v3165_v46  ;;  %v13866_v46 = vld [vmem:[#allocation36_spill] sm:$0xff] }
 0x1d7   :  { %v2941_v18 = vrot.slane %v2891_v58, 7  ;;  %v3091_v39 = vrot.slane %v2891_v58, 1  ;;  %v3234_v10 = vpack.c.bf16 %v2891_v58, %v2890_v20  ;;  %v2842_v43 = vadd.f32 %v9916_v49, %v2785_v1  ;;  %v2279_v62 = vpop.f32.mrf.mxu1  ;;  %13862 = vst [vmem:[#allocation86_spill] sm:$0xff] %v10133_v52  ;;  %v13864_v58 = vld [vmem:[#allocation35_spill] sm:$0xff] }
 0x1d8   :  { %v2631_v32 = vpop.f32.mrf.mxu0  ;;  %v10141_v20 = vsel %vm1045_vm11, 0.0, %v3166_v47  ;;  %vm13865_vm3 = vcmp.eq.s32.totalorder %v13864_v58, 0  ;;  %vm13867_vm1 = vcmp.eq.s32.totalorder %v13866_v46, 0 }
 0x1d9   :  { %v3014_v26 = vsel %vm13850_vm10, %v2940_v31, %v2941_v18  ;;  %v3164_v8 = vsel %vm1386_vm4, %v3090_v60, %v3091_v39  ;;  %v2892_v29 = vmax.f32 %v2842_v43, 0.0  ;;  %13863 = vst [vmem:[#allocation87_spill] sm:$0xff] %v10141_v20  ;;  %v2786_v27 = vadd.f32 %v2631_v32, %v2272_v59  ;;  %7200 = vmatmul.mubr.msk.bf16.gmra.mxu0 %vm3289_vm5, %v3234_v10  ;;  %v6900_v42 = vpop.f32.mrf.mxu1 }
 0x1da   :  { %v7002_v4 = vpop.f32.mrf.mxu0  ;;  %v10146_v1 = vsel %vm13865_vm3, 0.0, %v3015_v15  ;;  %v10150_v31 = vsel %vm13867_vm1, 0.0, %v3014_v26  ;;  %v2277_v60 = vadd.f32 %v2276_v40, %v9768_v9  ;;  %7203 = vmatprep.mubr.msk.bf16.mxu0 %vm7892_vm2, %v13656_v37  ;;  %v10166_v43 = vsel %vm1047_vm8, 0.0, %v3164_v8 }
 0x1db   :  { %v2942_v47 = vrot.slane %v2892_v29, 7  ;;  %v3092_v33 = vrot.slane %v2892_v29, 1  ;;  %v2843_v10 = vadd.f32 %v9916_v49, %v2786_v27  ;;  %v2284_v59 = vpop.f32.mrf.mxu1  ;;  %13869 = vst [vmem:[#allocation88_spill] sm:$0xff] %v10166_v43  ;;  %v2280_v27 = vadd.f32 %v2279_v62, %v9779_v63 }
 0x1dc   :  { %v2636_v15 = vpop.f32.mrf.mxu0 }
 0x1dd   :  { %v3013_v17 = vsel %vm13868_vm13, %v2941_v18, %v2942_v47  ;;  %v3163_v26 = vsel %vm1386_vm4, %v3091_v39, %v3092_v33  ;;  %v2787_v42 = vadd.f32 %v2636_v15, %v2277_v60  ;;  %v2893_v9 = vmax.f32 %v2843_v10, 0.0  ;;  %v6903_v40 = vpop.f32.mrf.mxu1  ;;  %vm13875_vm13 = vmmov %vm13850_vm10 }
 0x1de   :  { %v7005_v4 = vpop.f32.mrf.mxu0  ;;  %v10170_v32 = vsel %vm1048_vm0, 0.0, %v3163_v26 }
 0x1df   :  { %13870 = vst [vmem:[#allocation89_spill] sm:$0xff] %v10170_v32  ;;  %v2844_v25 = vadd.f32 %v9916_v49, %v2787_v42  ;;  %v2943_v39 = vrot.slane %v2893_v9, 7  ;;  %v3093_v60 = vrot.slane %v2893_v9, 1  ;;  %v3235_v10 = vpack.c.bf16 %v2893_v9, %v2892_v29  ;;  %v2287_v15 = vpop.f32.mrf.mxu1  ;;  %v13871_v42 = vld [vmem:[#allocation39_spill] sm:$0xff] }
 0x1e0   :  { %v2639_v40 = vpop.f32.mrf.mxu0  ;;  %vm13872_vm3 = vcmp.eq.s32.totalorder %v13871_v42, 0 }
 0x1e1   :  { %v2894_v4 = vmax.f32 %v2844_v25, 0.0  ;;  %v2788_v58 = vadd.f32 %v2639_v40, %v2280_v27  ;;  %v3012_v8 = vsel %vm13850_vm10, %v2942_v47, %v2943_v39  ;;  %v3162_v26 = vsel %vm1386_vm4, %v3092_v33, %v3093_v60  ;;  %7204 = vmatmul.mubr.msk.bf16.gmra.mxu0 %vm3289_vm5, %v3235_v10  ;;  %v6904_v63 = vpop.f32.mrf.mxu1  ;;  %v13873_v25 = vld [vmem:[#allocation41_spill] sm:$0xff] }
 0x1e2   :  { %v7006_v62 = vpop.f32.mrf.mxu0  ;;  %v10183_v18 = vsel %vm13872_vm3, 0.0, %v3013_v17  ;;  %7207 = vmatprep.mubr.msk.bf16.mxu0 %vm7892_vm2, %v13656_v37  ;;  %vm13874_vm1 = vcmp.eq.s32.totalorder %v13873_v25, 0  ;;  %v2285_v33 = vadd.f32 %v2284_v59, %v9800_v22  ;;  %v10202_v22 = vsel %vm1049_vm12, 0.0, %v3162_v26 }
 0x1e3   :  { %v2944_v46 = vrot.slane %v2894_v4, 7  ;;  %v3094_v29 = vrot.slane %v2894_v4, 1  ;;  %v2845_v9 = vadd.f32 %v9916_v49, %v2788_v58  ;;  %v10190_v47 = vsel %vm13874_vm1, 0.0, %v3012_v8  ;;  %v2292_v27 = vpop.f32.mrf.mxu1  ;;  %13876 = vst [vmem:[#allocation90_spill] sm:$0xff] %v10202_v22 }
 0x1e4   :  { %v2644_v10 = vpop.f32.mrf.mxu0  ;;  %v2288_v62 = vadd.f32 %v2287_v15, %v9811_v16  ;;  %vm13878_vm3 = vcmp.eq.s32.totalorder %v13770_v2, 0  ;;  %vm13879_vm1 = vcmp.eq.s32.totalorder %v13771_v19, 0 }
 0x1e5   :  { %v3011_v17 = vsel %vm13875_vm13, %v2943_v39, %v2944_v46  ;;  %v3161_v58 = vsel %vm1386_vm4, %v3093_v60, %v3094_v29  ;;  %v2895_v63 = vmax.f32 %v2845_v9, 0.0  ;;  %v2789_v3 = vadd.f32 %v2644_v10, %v2285_v33  ;;  %v6907_v43 = vpop.f32.mrf.mxu1  ;;  %vm13880_vm13 = vmmov %vm13850_vm10 }
 0x1e6   :  { %v7009_v8 = vpop.f32.mrf.mxu0  ;;  %v10206_v59 = vsel %vm1050_vm7, 0.0, %v3161_v58 }
 0x1e7   :  { %13877 = vst [vmem:[#allocation91_spill] sm:$0xff] %v10206_v59  ;;  %v2945_v40 = vrot.slane %v2895_v63, 7  ;;  %v3095_v32 = vrot.slane %v2895_v63, 1  ;;  %v3236_v39 = vpack.c.bf16 %v2895_v63, %v2894_v4  ;;  %v2846_v9 = vadd.f32 %v9916_v49, %v2789_v3  ;;  %v2295_v16 = vpop.f32.mrf.mxu1 }
 0x1e8   :  { %v2647_v15 = vpop.f32.mrf.mxu0  ;;  %v10218_v4 = vsel %vm13878_vm3, 0.0, %v3011_v17  ;;  %v2293_v63 = vadd.f32 %v2292_v27, %v9837_v51  ;;  %vm13882_vm3 = vcmp.eq.s32.totalorder %v13770_v2, 199 }
 0x1e9   :  { %v3010_v43 = vsel %vm13850_vm10, %v2944_v46, %v2945_v40  ;;  %v3160_v26 = vsel %vm1386_vm4, %v3094_v29, %v3095_v32  ;;  %v2790_v33 = vadd.f32 %v2647_v15, %v2288_v62  ;;  %v2896_v10 = vmax.f32 %v2846_v9, 0.0  ;;  %7208 = vmatmul.mubr.msk.bf16.gmra.mxu0 %vm3289_vm5, %v3236_v39  ;;  %v6908_v58 = vpop.f32.mrf.mxu1 }
 0x1ea   :  { %v7010_v8 = vpop.f32.mrf.mxu0  ;;  %v10222_v3 = vsel %vm13879_vm1, 0.0, %v3010_v43  ;;  %7211 = vmatprep.mubr.msk.bf16.mxu0 %vm7892_vm2, %v13656_v37  ;;  %v2296_v29 = vadd.f32 %v2295_v16, %v9846_v61  ;;  %vm13884_vm1 = vcmp.eq.s32.totalorder %v13776_v55, 0 }
 0x1eb   :  { %v2847_v46 = vadd.f32 %v9916_v49, %v2790_v33  ;;  %v2946_v62 = vrot.slane %v2896_v10, 7  ;;  %v3096_v39 = vrot.slane %v2896_v10, 1  ;;  %v2300_v9 = vpop.f32.mrf.mxu1 }
 0x1ec   :  { %v2652_v15 = vpop.f32.mrf.mxu0 }
 0x1ed   :  { %v2897_v17 = vmax.f32 %v2847_v46, 0.0  ;;  %v2791_v58 = vadd.f32 %v2652_v15, %v2293_v63  ;;  %v3009_v43 = vsel %vm13880_vm13, %v2945_v40, %v2946_v62  ;;  %v3159_v51 = vsel %vm1386_vm4, %v3095_v32, %v3096_v39  ;;  %v6911_v27 = vpop.f32.mrf.mxu1 }
 0x1ee   :  { %v7013_v33 = vpop.f32.mrf.mxu0  ;;  %v10238_v63 = vsel %vm1052_vm14, 0.0, %v3159_v51  ;;  %vm13885_vm13 = vcmp.eq.s32.totalorder %v13777_v0, 0 }
 0x1ef   :  { %v2947_v8 = vrot.slane %v2897_v17, 7  ;;  %v3097_v60 = vrot.slane %v2897_v17, 1  ;;  %v3237_v25 = vpack.c.bf16 %v2897_v17, %v2896_v10  ;;  %v2848_v42 = vadd.f32 %v9916_v49, %v2791_v58  ;;  %v2303_v22 = vpop.f32.mrf.mxu1  ;;  %13881 = vst [vmem:[#allocation92_spill] sm:$0xff] %v10238_v63 }
 0x1f0   :  { %v2655_v59 = vpop.f32.mrf.mxu0  ;;  %v10246_v10 = vsel %vm13882_vm3, 0.0, %v3160_v26  ;;  %v10251_v17 = vsel %vm13884_vm1, 0.0, %v3009_v43  ;;  %vm13886_vm3 = vcmp.eq.s32.totalorder %v13776_v55, 199  ;;  %vm13888_vm1 = vcmp.eq.s32.totalorder %v13777_v0, 199 }
 0x1f1   :  { %v3008_v40 = vsel %vm13850_vm10, %v2946_v62, %v2947_v8  ;;  %v3158_v32 = vsel %vm1386_vm4, %v3096_v39, %v3097_v60  ;;  %v2898_v46 = vmax.f32 %v2848_v42, 0.0  ;;  %13883 = vst [vmem:[#allocation93_spill] sm:$0xff] %v10246_v10  ;;  %v2792_v15 = vadd.f32 %v2655_v59, %v2296_v29  ;;  %7212 = vmatmul.mubr.msk.bf16.gmra.mxu0 %vm3289_vm5, %v3237_v25  ;;  %v6912_v61 = vpop.f32.mrf.mxu1 }
 0x1f2   :  { %v7014_v16 = vpop.f32.mrf.mxu0  ;;  %v10255_v62 = vsel %vm13885_vm13, 0.0, %v3008_v40  ;;  %v2301_v39 = vadd.f32 %v2300_v9, %v9873_v53  ;;  %7215 = vmatprep.mubr.msk.bf16.mxu0 %vm7892_vm2, %v13656_v37  ;;  %v10271_v61 = vsel %vm13886_vm3, 0.0, %v3158_v32  ;;  %vm13890_vm13 = vmmov %vm13850_vm10 }
 0x1f3   :  { %v2948_v26 = vrot.slane %v2898_v46, 7  ;;  %v3098_v58 = vrot.slane %v2898_v46, 1  ;;  %v2849_v59 = vadd.f32 %v9916_v49, %v2792_v15  ;;  %v2308_v29 = vpop.f32.mrf.mxu1  ;;  %13887 = vst [vmem:[#allocation94_spill] sm:$0xff] %v10271_v61  ;;  %v2304_v15 = vadd.f32 %v2303_v22, %v9878_v35 }
 0x1f4   :  { %v2660_v43 = vpop.f32.mrf.mxu0 }
 0x1f5   :  { %v3007_v51 = vsel %vm13850_vm10, %v2947_v8, %v2948_v26  ;;  %v3157_v27 = vsel %vm1386_vm4, %v3097_v60, %v3098_v58  ;;  %v2793_v33 = vadd.f32 %v2660_v43, %v2301_v39  ;;  %v2899_v53 = vmax.f32 %v2849_v59, 0.0  ;;  %v6915_v9 = vpop.f32.mrf.mxu1 }
 0x1f6   :  { %v7017_v40 = vpop.f32.mrf.mxu0  ;;  %v10275_v16 = vsel %vm13888_vm1, 0.0, %v3157_v27  ;;  %vm13895_vm1 = vmmov %vm13890_vm13 }
 0x1f7   :  { %13889 = vst [vmem:[#allocation95_spill] sm:$0xff] %v10275_v16  ;;  %v2850_v42 = vadd.f32 %v9916_v49, %v2793_v33  ;;  %v2949_v60 = vrot.slane %v2899_v53, 7  ;;  %v3099_v39 = vrot.slane %v2899_v53, 1  ;;  %v3238_v59 = vpack.c.bf16 %v2899_v53, %v2898_v46  ;;  %v2311_v43 = vpop.f32.mrf.mxu1  ;;  %v13891_v33 = vld [vmem:[#allocation56_spill] sm:$0xff] }
 0x1f8   :  { %v2663_v9 = vpop.f32.mrf.mxu0  ;;  %vm13892_vm10 = vcmp.eq.s32.totalorder %v13891_v33, 0 }
 0x1f9   :  { %v2900_v40 = vmax.f32 %v2850_v42, 0.0  ;;  %v2794_v25 = vadd.f32 %v2663_v9, %v2304_v15  ;;  %v3006_v32 = vsel %vm13890_vm13, %v2948_v26, %v2949_v60  ;;  %v3156_v27 = vsel %vm1386_vm4, %v3098_v58, %v3099_v39  ;;  %7216 = vmatmul.mubr.msk.bf16.gmra.mxu0 %vm3289_vm5, %v3238_v59  ;;  %v6916_v35 = vpop.f32.mrf.mxu1  ;;  %v13893_v42 = vld [vmem:[#allocation57_spill] sm:$0xff] }
 0x1fa   :  { %v7018_v22 = vpop.f32.mrf.mxu0  ;;  %v10288_v8 = vsel %vm13892_vm10, 0.0, %v3007_v51  ;;  %7219 = vmatprep.mubr.msk.bf16.mxu0 %vm7892_vm2, %v13656_v37  ;;  %vm13894_vm3 = vcmp.eq.s32.totalorder %v13893_v42, 0  ;;  %v2309_v58 = vadd.f32 %v2308_v29, %v9899_v12  ;;  %vm13896_vm13 = vcmp.eq.s32.totalorder %v13891_v33, 199 }
 0x1fb   :  { %v2950_v0 = vrot.slane %v2900_v40, 7  ;;  %v3100_v46 = vrot.slane %v2900_v40, 1  ;;  %v2851_v53 = vadd.f32 %v9916_v49, %v2794_v25  ;;  %v10295_v26 = vsel %vm13894_vm3, 0.0, %v3006_v32  ;;  %v2316_v15 = vpop.f32.mrf.mxu1  ;;  %vm13900_vm3 = vmmov %vm13895_vm1 }
 0x1fc   :  { %v2668_v59 = vpop.f32.mrf.mxu0  ;;  %v2312_v22 = vadd.f32 %v2311_v43, %v9910_v14  ;;  %v10307_v12 = vsel %vm13896_vm13, 0.0, %v3156_v27  ;;  %vm13898_vm10 = vcmp.eq.s32.totalorder %v13893_v42, 199  ;;  %v13905_v42 = vld [vmem:[#allocation66_spill] sm:$0xff] }
 0x1fd   :  { %v3005_v51 = vsel %vm13895_vm1, %v2949_v60, %v2950_v0  ;;  %v3155_v25 = vsel %vm1386_vm4, %v3099_v39, %v3100_v46  ;;  %v2901_v35 = vmax.f32 %v2851_v53, 0.0  ;;  %v2795_v55 = vadd.f32 %v2668_v59, %v2309_v58  ;;  %v6919_v19 = vpop.f32.mrf.mxu1  ;;  %13897 = vst [vmem:[#allocation96_spill] sm:$0xff] %v10307_v12  ;;  %v13903_v39 = vld [vmem:[#allocation61_spill] sm:$0xff] }
 0x1fe   :  { %v7021_v32 = vpop.f32.mrf.mxu0  ;;  %v10311_v29 = vsel %vm13898_vm10, 0.0, %v3155_v25  ;;  %vm13904_vm13 = vcmp.eq.s32.totalorder %v13903_v39, 0  ;;  %v2317_v33 = vadd.f32 %v2316_v15, %v13905_v42  ;;  %vm13906_vm10 = vmmov %vm13900_vm3 }
 0x1ff   :  { %13899 = vst [vmem:[#allocation97_spill] sm:$0xff] %v10311_v29  ;;  %v2951_v9 = vrot.slane %v2901_v35, 7  ;;  %v3101_v2 = vrot.slane %v2901_v35, 1  ;;  %v3239_v60 = vpack.c.bf16 %v2901_v35, %v2900_v40  ;;  %v2852_v53 = vadd.f32 %v9916_v49, %v2795_v55  ;;  %v2319_v14 = vpop.f32.mrf.mxu1  ;;  %v13901_v40 = vld [vmem:[#allocation60_spill] sm:$0xff] }
 0x200   :  { %v2671_v43 = vpop.f32.mrf.mxu0  ;;  %vm13902_vm1 = vcmp.eq.s32.totalorder %v13901_v40, 0 }
 0x201   :  { %v3004_v19 = vsel %vm13900_vm3, %v2950_v0, %v2951_v9  ;;  %v3154_v27 = vsel %vm1386_vm4, %v3100_v46, %v3101_v2  ;;  %v2796_v58 = vadd.f32 %v2671_v43, %v2312_v22  ;;  %v2902_v59 = vmax.f32 %v2852_v53, 0.0  ;;  %7220 = vmatmul.mubr.msk.bf16.gmra.mxu0 %vm3289_vm5, %v3239_v60  ;;  %v6920_v25 = vpop.f32.mrf.mxu1  ;;  %v13907_v46 = vld [vmem:[#allocation67_spill] sm:$0xff] }
 0x202   :  { %v7022_v32 = vpop.f32.mrf.mxu0  ;;  %v10323_v35 = vsel %vm13902_vm1, 0.0, %v3005_v51  ;;  %v10327_v55 = vsel %vm13904_vm13, 0.0, %v3004_v19  ;;  %7223 = vmatprep.mubr.msk.bf16.mxu0 %vm7892_vm2, %v13656_v37  ;;  %v2320_v16 = vadd.f32 %v2319_v14, %v13907_v46  ;;  %vm13908_vm3 = vcmp.eq.s32.totalorder %v13903_v39, 199  ;;  %vm13910_vm1 = vmmov %vm13906_vm10 }
 0x203   :  { %v2853_v0 = vadd.f32 %v9916_v49, %v2796_v58  ;;  %v2952_v22 = vrot.slane %v2902_v59, 7  ;;  %v3102_v60 = vrot.slane %v2902_v59, 1  ;;  %v2324_v53 = vpop.f32.mrf.mxu1  ;;  %vm13911_vm13 = vcmp.eq.s32.totalorder %v13901_v40, 199 }
 0x204   :  { %v2676_v43 = vpop.f32.mrf.mxu0 }
 0x205   :  { %v2903_v51 = vmax.f32 %v2853_v0, 0.0  ;;  %v2797_v25 = vadd.f32 %v2676_v43, %v2317_v33  ;;  %v3003_v19 = vsel %vm13906_vm10, %v2951_v9, %v2952_v22  ;;  %v3153_v42 = vsel %vm1386_vm4, %v3101_v2, %v3102_v60  ;;  %v6923_v15 = vpop.f32.mrf.mxu1 }
 0x206   :  { %v7025_v58 = vpop.f32.mrf.mxu0  ;;  %v10343_v33 = vsel %vm13908_vm3, 0.0, %v3153_v42  ;;  %vm13913_vm10 = vcmp.eq.s32.totalorder %v9077_v34, 0  ;;  %vm13914_vm3 = vcmp.eq.s32.totalorder %v9088_v36, 0 }
 0x207   :  { %v2953_v32 = vrot.slane %v2903_v51, 7  ;;  %v3103_v12 = vrot.slane %v2903_v51, 1  ;;  %v3240_v29 = vpack.c.bf16 %v2903_v51, %v2902_v59  ;;  %v2854_v61 = vadd.f32 %v9916_v49, %v2797_v25  ;;  %v2327_v10 = vpop.f32.mrf.mxu1  ;;  %13909 = vst [vmem:[#allocation66_spill] sm:$0xff] %v10343_v33 }
 0x208   :  { %v2679_v63 = vpop.f32.mrf.mxu0  ;;  %v10351_v59 = vsel %vm13911_vm13, 0.0, %v3154_v27  ;;  %v10356_v51 = vsel %vm13913_vm10, 0.0, %v3003_v19  ;;  %vm13916_vm13 = vcmp.eq.s32.totalorder %v9077_v34, 199  ;;  %vm13918_vm10 = vcmp.eq.s32.totalorder %v9088_v36, 199 }
 0x209   :  { %v3002_v9 = vsel %vm13910_vm1, %v2952_v22, %v2953_v32  ;;  %v3152_v2 = vsel %vm1386_vm4, %v3102_v60, %v3103_v12  ;;  %v2904_v0 = vmax.f32 %v2854_v61, 0.0  ;;  %13912 = vst [vmem:[#allocation67_spill] sm:$0xff] %v10351_v59  ;;  %v2798_v43 = vadd.f32 %v2679_v63, %v2320_v16  ;;  %7224 = vmatmul.mubr.msk.bf16.gmra.mxu0 %vm3289_vm5, %v3240_v29  ;;  %v6924_v14 = vpop.f32.mrf.mxu1  ;;  %v13915_v60 = vld [vmem:[#allocation68_spill] sm:$0xff] }
 0x20a   :  { %v7026_v46 = vpop.f32.mrf.mxu0  ;;  %v10360_v22 = vsel %vm13914_vm3, 0.0, %v3002_v9  ;;  %v2325_v25 = vadd.f32 %v2324_v53, %v13915_v60  ;;  %7227 = vmatprep.mubr.msk.bf16.mxu0 %vm7892_vm2, %v13656_v37  ;;  %v10376_v60 = vsel %vm13916_vm13, 0.0, %v3152_v2  ;;  %vm13921_vm3 = vmmov %vm13910_vm1  ;;  %vm13923_vm13 = vcmp.eq.s32.totalorder %v13791_v13, 0 }
 0x20b   :  { %v2954_v27 = vrot.slane %v2904_v0, 7  ;;  %v3104_v42 = vrot.slane %v2904_v0, 1  ;;  %v2855_v16 = vadd.f32 %v9916_v49, %v2798_v43  ;;  %v2332_v29 = vpop.f32.mrf.mxu1  ;;  %13917 = vst [vmem:[#allocation68_spill] sm:$0xff] %v10376_v60  ;;  %v13920_v43 = vld [vmem:[#allocation69_spill] sm:$0xff] }
 0x20c   :  { %v2684_v19 = vpop.f32.mrf.mxu0  ;;  %v2328_v63 = vadd.f32 %v2327_v10, %v13920_v43 }
 0x20d   :  { %v3001_v15 = vsel %vm13910_vm1, %v2953_v32, %v2954_v27  ;;  %v3151_v58 = vsel %vm1386_vm4, %v3103_v12, %v3104_v42  ;;  %v2799_v9 = vadd.f32 %v2684_v19, %v2325_v25  ;;  %v2905_v53 = vmax.f32 %v2855_v16, 0.0  ;;  %v6927_v14 = vpop.f32.mrf.mxu1 }
 0x20e   :  { %v7029_v46 = vpop.f32.mrf.mxu0  ;;  %v10380_v61 = vsel %vm13918_vm10, 0.0, %v3151_v58  ;;  %vm13922_vm1 = vcmp.eq.s32.totalorder %v13790_v30, 0  ;;  %vm13925_vm10 = vmmov %vm13921_vm3 }
 0x20f   :  { %13919 = vst [vmem:[#allocation98_spill] sm:$0xff] %v10380_v61  ;;  %v2856_v39 = vadd.f32 %v9916_v49, %v2799_v9  ;;  %v2955_v12 = vrot.slane %v2905_v53, 7  ;;  %v3105_v25 = vrot.slane %v2905_v53, 1  ;;  %v3241_v16 = vpack.c.bf16 %v2905_v53, %v2904_v0  ;;  %v2335_v19 = vpop.f32.mrf.mxu1 }
 0x210   :  { %v2687_v14 = vpop.f32.mrf.mxu0  ;;  %v10393_v43 = vsel %vm13922_vm1, 0.0, %v3001_v15  ;;  %vm13929_vm1 = vcmp.eq.s32.totalorder %v13791_v13, 199 }
 0x211   :  { %v2906_v46 = vmax.f32 %v2856_v39, 0.0  ;;  %v2800_v34 = vadd.f32 %v2687_v14, %v2328_v63  ;;  %v3000_v2 = vsel %vm13921_vm3, %v2954_v27, %v2955_v12  ;;  %v3150_v58 = vsel %vm1386_vm4, %v3104_v42, %v3105_v25  ;;  %7228 = vmatmul.mubr.msk.bf16.gmra.mxu0 %vm3289_vm5, %v3241_v16  ;;  %v6928_v10 = vpop.f32.mrf.mxu1  ;;  %v13924_v27 = vld [vmem:[#allocation25_spill] sm:$0xff] }
 0x212   :  { %v7030_v9 = vpop.f32.mrf.mxu0  ;;  %7231 = vmatprep.mubr.msk.bf16.mxu0 %vm7892_vm2, %v13656_v37  ;;  %v10400_v39 = vsel %vm13923_vm13, 0.0, %v3000_v2  ;;  %v2333_v42 = vadd.f32 %v2332_v29, %v13924_v27  ;;  %vm13927_vm3 = vcmp.eq.s32.totalorder %v13790_v30, 199  ;;  %vm13931_vm13 = vmmov %vm13925_vm10 }
 0x213   :  { %v2956_v32 = vrot.slane %v2906_v46, 7  ;;  %v3106_v0 = vrot.slane %v2906_v46, 1  ;;  %v2857_v53 = vadd.f32 %v9916_v49, %v2800_v34  ;;  %v2340_v63 = vpop.f32.mrf.mxu1  ;;  %v13926_v9 = vld [vmem:[#allocation42_spill] sm:$0xff]  ;;  %v10412_v29 = vsel %vm13927_vm3, 0.0, %v3150_v58 }
 0x214   :  { %v2692_v16 = vpop.f32.mrf.mxu0  ;;  %v2336_v36 = vadd.f32 %v2335_v19, %v13926_v9  ;;  %13928 = vst [vmem:[#allocation69_spill] sm:$0xff] %v10412_v29  ;;  %vm13933_vm3 = vcmp.eq.s32.totalorder %v13795_v7, 0 }
 0x215   :  { %v2999_v15 = vsel %vm13925_vm10, %v2955_v12, %v2956_v32  ;;  %v3149_v34 = vsel %vm1386_vm4, %v3105_v25, %v3106_v0  ;;  %v2907_v10 = vmax.f32 %v2857_v53, 0.0  ;;  %v2801_v40 = vadd.f32 %v2692_v16, %v2333_v42  ;;  %v6931_v60 = vpop.f32.mrf.mxu1 }
 0x216   :  { %v7033_v2 = vpop.f32.mrf.mxu0  ;;  %v10416_v27 = vsel %vm13929_vm1, 0.0, %v3149_v34  ;;  %vm13932_vm10 = vcmp.eq.s32.totalorder %v13794_v28, 0  ;;  %vm13935_vm1 = vmmov %vm13931_vm13 }
 0x217   :  { %13930 = vst [vmem:[#allocation25_spill] sm:$0xff] %v10416_v27  ;;  %v2957_v14 = vrot.slane %v2907_v10, 7  ;;  %v3107_v61 = vrot.slane %v2907_v10, 1  ;;  %v3242_v12 = vpack.c.bf16 %v2907_v10, %v2906_v46  ;;  %v2858_v53 = vadd.f32 %v9916_v49, %v2801_v40  ;;  %v2343_v19 = vpop.f32.mrf.mxu1  ;;  %v13934_v10 = vld [vmem:[#allocation30_spill] sm:$0xff] }
 0x218   :  { %v2695_v42 = vpop.f32.mrf.mxu0  ;;  %v10428_v46 = vsel %vm13932_vm10, 0.0, %v2999_v15  ;;  %v2341_v25 = vadd.f32 %v2340_v63, %v13934_v10  ;;  %vm13939_vm10 = vmmov %vm13935_vm1 }
 0x219   :  { %v2998_v60 = vsel %vm13931_vm13, %v2956_v32, %v2957_v14  ;;  %v3148_v58 = vsel %vm1386_vm4, %v3106_v0, %v3107_v61  ;;  %v2802_v16 = vadd.f32 %v2695_v42, %v2336_v36  ;;  %v2908_v9 = vmax.f32 %v2858_v53, 0.0  ;;  %7232 = vmatmul.mubr.msk.bf16.gmra.mxu0 %vm3289_vm5, %v3242_v12  ;;  %v6932_v34 = vpop.f32.mrf.mxu1  ;;  %v10447_v36 = vld [vmem:[%s13195_s2] ss:$0 sm:$0xff] }
 0x21a   :  { %v7034_v2 = vpop.f32.mrf.mxu0  ;;  %v10432_v40 = vsel %vm13933_vm3, 0.0, %v2998_v60  ;;  %7235 = vmatprep.mubr.msk.bf16.mxu0 %vm7892_vm2, %v13656_v37  ;;  %vm13937_vm13 = vcmp.eq.s32.totalorder %v13795_v7, 199  ;;  %vm13940_vm3 = vcmp.eq.s32.totalorder %v13794_v28, 199  ;;  %v13944_v7 = vld [vmem:[#allocation19_spill] sm:$0xff] }
 0x21b   :  { %v2859_v32 = vadd.f32 %v9916_v49, %v2802_v16  ;;  %v2958_v0 = vrot.slane %v2908_v9, 7  ;;  %v3108_v12 = vrot.slane %v2908_v9, 1  ;;  %v2348_v53 = vpop.f32.mrf.mxu1 }
 0x21c   :  { %v2700_v42 = vpop.f32.mrf.mxu0 }
 0x21d   :  { %v2909_v15 = vmax.f32 %v2859_v32, 0.0  ;;  %v2803_v34 = vadd.f32 %v2700_v42, %v2341_v25  ;;  %v2997_v60 = vsel %vm13935_vm1, %v2957_v14, %v2958_v0  ;;  %v3147_v63 = vsel %vm1386_vm4, %v3107_v61, %v3108_v12  ;;  %v6935_v2 = vpop.f32.mrf.mxu1  ;;  %v13936_v32 = vld [vmem:[#allocation50_spill] sm:$0xff] }
 0x21e   :  { %v7037_v49 = vpop.f32.mrf.mxu0  ;;  %v2344_v25 = vadd.f32 %v2343_v19, %v13936_v32  ;;  %v10453_v14 = vsel %vm13937_vm13, 0.0, %v3147_v63  ;;  %v10461_v2 = vsel %vm13940_vm3, 0.0, %v3148_v58  ;;  %v13942_v32 = vld [vmem:[#allocation18_spill] sm:$0xff]  ;;  %vm13945_vm13 = vcmp.eq.s32.totalorder %v13944_v7, 0 }
 0x21f   :  { %v2959_v16 = vrot.slane %v2909_v15, 7  ;;  %v3109_v10 = vrot.slane %v2909_v15, 1  ;;  %v3243_v13 = vpack.c.bf16 %v2909_v15, %v2908_v9  ;;  %v2860_v30 = vadd.f32 %v10447_v36, %v2803_v34  ;;  %v2351_v42 = vpop.f32.mrf.mxu1  ;;  %13938 = vst [vmem:[#allocation42_spill] sm:$0xff] %v10453_v14  ;;  %13941 = vst [vmem:[#allocation30_spill] sm:$0xff] %v10461_v2 }
 0x220   :  { %v2703_v29 = vpop.f32.mrf.mxu0  ;;  %vm13943_vm1 = vcmp.eq.s32.totalorder %v13942_v32, 0  ;;  %vm13946_vm3 = vcmp.eq.s32.totalorder %v13942_v32, 199 }
 0x221   :  { %v2996_v61 = vsel %vm13939_vm10, %v2958_v0, %v2959_v16  ;;  %v3146_v9 = vsel %vm1386_vm4, %v3108_v12, %v3109_v10  ;;  %v2910_v15 = vmax.f32 %v2860_v30, 0.0  ;;  %v2804_v34 = vadd.f32 %v2703_v29, %v2344_v25  ;;  %7236 = vmatmul.mubr.msk.bf16.gmra.mxu0 %vm3289_vm5, %v3243_v13  ;;  %v6936_v19 = vpop.f32.mrf.mxu1 }
 0x222   :  { %v7038_v49 = vpop.f32.mrf.mxu0  ;;  %v10466_v63 = vsel %vm13943_vm1, 0.0, %v2997_v60  ;;  %v10470_v0 = vsel %vm13945_vm13, 0.0, %v2996_v61  ;;  %v2349_v12 = vadd.f32 %v2348_v53, %v9620_v57  ;;  %7239 = vmatprep.mubr.msk.bf16.mxu0 %vm7892_vm2, %v13656_v37  ;;  %v10486_v2 = vsel %vm13946_vm3, 0.0, %v3146_v9  ;;  %vm13950_vm13 = vmmov %vm13939_vm10 }
 0x223   :  { %v2960_v58 = vrot.slane %v2910_v15, 7  ;;  %v3110_v28 = vrot.slane %v2910_v15, 1  ;;  %v2861_v29 = vadd.f32 %v10447_v36, %v2804_v34  ;;  %v2356_v60 = vpop.f32.mrf.mxu1  ;;  %13947 = vst [vmem:[#allocation50_spill] sm:$0xff] %v10486_v2  ;;  %vm13948_vm1 = vcmp.eq.s32.totalorder %v13944_v7, 199  ;;  %v13957_v2 = vld [vmem:[#allocation55_spill] sm:$0xff] }
 0x224   :  { %v2708_v25 = vpop.f32.mrf.mxu0  ;;  %v2352_v34 = vadd.f32 %v2351_v42, %v9632_v41 }
 0x225   :  { %v2995_v61 = vsel %vm13939_vm10, %v2959_v16, %v2960_v58  ;;  %v3145_v19 = vsel %vm1386_vm4, %v3109_v10, %v3110_v28  ;;  %v2805_v49 = vadd.f32 %v2708_v25, %v2349_v12  ;;  %v2911_v57 = vmax.f32 %v2861_v29, 0.0  ;;  %v6939_v53 = vpop.f32.mrf.mxu1 }
 0x226   :  { %v7041_v30 = vpop.f32.mrf.mxu0  ;;  %v10490_v13 = vsel %vm13948_vm1, 0.0, %v3145_v19  ;;  %vm13956_vm1 = vmmov %vm13950_vm13 }
 0x227   :  { %13949 = vst [vmem:[#allocation99_spill] sm:$0xff] %v10490_v13  ;;  %v2862_v14 = vadd.f32 %v10447_v36, %v2805_v49  ;;  %v2961_v10 = vrot.slane %v2911_v57, 7  ;;  %v3111_v12 = vrot.slane %v2911_v57, 1  ;;  %v3244_v29 = vpack.c.bf16 %v2911_v57, %v2910_v15  ;;  %v2359_v25 = vpop.f32.mrf.mxu1  ;;  %v13951_v49 = vld [vmem:[#allocation22_spill] sm:$0xff] }
 0x228   :  { %v2711_v30 = vpop.f32.mrf.mxu0  ;;  %vm13952_vm10 = vcmp.eq.s32.totalorder %v13951_v49, 0  ;;  %v2360_v13 = vadd.f32 %v2359_v25, %v13957_v2 }
 0x229   :  { %v2912_v53 = vmax.f32 %v2862_v14, 0.0  ;;  %v2806_v32 = vadd.f32 %v2711_v30, %v2352_v34  ;;  %v2994_v9 = vsel %vm13950_vm13, %v2960_v58, %v2961_v10  ;;  %v3144_v19 = vsel %vm1386_vm4, %v3110_v28, %v3111_v12  ;;  %7240 = vmatmul.mubr.msk.bf16.gmra.mxu0 %vm3289_vm5, %v3244_v29  ;;  %v6940_v41 = vpop.f32.mrf.mxu1  ;;  %v13953_v14 = vld [vmem:[#allocation23_spill] sm:$0xff]  ;;  %v13955_v28 = vld [vmem:[#allocation34_spill] sm:$0xff] }
 0x22a   :  { %v7042_v42 = vpop.f32.mrf.mxu0  ;;  %v10503_v16 = vsel %vm13952_vm10, 0.0, %v2995_v61  ;;  %7243 = vmatprep.mubr.msk.bf16.mxu0 %vm7892_vm2, %v13656_v37  ;;  %vm13954_vm3 = vcmp.eq.s32.totalorder %v13953_v14, 0  ;;  %v2357_v34 = vadd.f32 %v2356_v60, %v13955_v28  ;;  %vm13958_vm13 = vcmp.eq.s32.totalorder %v13951_v49, 199 }
 0x22b   :  { %v2962_v7 = vrot.slane %v2912_v53, 7  ;;  %v3112_v15 = vrot.slane %v2912_v53, 1  ;;  %v2863_v57 = vadd.f32 %v10447_v36, %v2806_v32  ;;  %v10510_v58 = vsel %vm13954_vm3, 0.0, %v2994_v9  ;;  %v2364_v29 = vpop.f32.mrf.mxu1  ;;  %vm13962_vm3 = vmmov %vm13956_vm1 }
 0x22c   :  { %v2716_v30 = vpop.f32.mrf.mxu0  ;;  %v10522_v60 = vsel %vm13958_vm13, 0.0, %v3144_v19  ;;  %vm13960_vm10 = vcmp.eq.s32.totalorder %v13953_v14, 199  ;;  %v13968_v14 = vld [vmem:[#allocation40_spill] sm:$0xff] }
 0x22d   :  { %v2993_v61 = vsel %vm13956_vm1, %v2961_v10, %v2962_v7  ;;  %v3143_v32 = vsel %vm1386_vm4, %v3111_v12, %v3112_v15  ;;  %v2913_v42 = vmax.f32 %v2863_v57, 0.0  ;;  %v2807_v27 = vadd.f32 %v2716_v30, %v2357_v34  ;;  %v6943_v59 = vpop.f32.mrf.mxu1  ;;  %13959 = vst [vmem:[#allocation34_spill] sm:$0xff] %v10522_v60  ;;  %v13966_v12 = vld [vmem:[#allocation28_spill] sm:$0xff] }
 0x22e   :  { %v7045_v9 = vpop.f32.mrf.mxu0  ;;  %v10526_v28 = vsel %vm13960_vm10, 0.0, %v3143_v32  ;;  %vm13967_vm13 = vcmp.eq.s32.totalorder %v13966_v12, 0  ;;  %v2365_v49 = vadd.f32 %v2364_v29, %v13968_v14  ;;  %vm13969_vm10 = vmmov %vm13962_vm3 }
 0x22f   :  { %13961 = vst [vmem:[#allocation55_spill] sm:$0xff] %v10526_v28  ;;  %v2963_v41 = vrot.slane %v2913_v42, 7  ;;  %v3113_v33 = vrot.slane %v2913_v42, 1  ;;  %v3245_v10 = vpack.c.bf16 %v2913_v42, %v2912_v53  ;;  %v2864_v57 = vadd.f32 %v10447_v36, %v2807_v27  ;;  %v2367_v2 = vpop.f32.mrf.mxu1  ;;  %v13963_v53 = vld [vmem:[#allocation27_spill] sm:$0xff] }
 0x230   :  { %v2719_v25 = vpop.f32.mrf.mxu0  ;;  %vm13964_vm1 = vcmp.eq.s32.totalorder %v13963_v53, 0 }
 0x231   :  { %v2992_v59 = vsel %vm13962_vm3, %v2962_v7, %v2963_v41  ;;  %v3142_v19 = vsel %vm1386_vm4, %v3112_v15, %v3113_v33  ;;  %v2808_v34 = vadd.f32 %v2719_v25, %v2360_v13  ;;  %v2914_v30 = vmax.f32 %v2864_v57, 0.0  ;;  %7244 = vmatmul.mubr.msk.bf16.gmra.mxu0 %vm3289_vm5, %v3245_v10  ;;  %v6944_v32 = vpop.f32.mrf.mxu1  ;;  %v13970_v13 = vld [vmem:[#allocation47_spill] sm:$0xff] }
 0x232   :  { %v7046_v9 = vpop.f32.mrf.mxu0  ;;  %v10538_v42 = vsel %vm13964_vm1, 0.0, %v2993_v61  ;;  %v10542_v27 = vsel %vm13967_vm13, 0.0, %v2992_v59  ;;  %7247 = vmatprep.mubr.msk.bf16.mxu0 %vm7892_vm2, %v13656_v37  ;;  %v2368_v52 = vadd.f32 %v2367_v2, %v13970_v13  ;;  %vm13971_vm3 = vcmp.eq.s32.totalorder %v13966_v12, 199  ;;  %vm13973_vm1 = vmmov %vm13969_vm10 }
 0x233   :  { %13965 = vst [vmem:[#allocation100_spill] sm:$0xff] %v10538_v42  ;;  %v2865_v7 = vadd.f32 %v10447_v36, %v2808_v34  ;;  %v2964_v15 = vrot.slane %v2914_v30, 7  ;;  %v3114_v10 = vrot.slane %v2914_v30, 1  ;;  %v2372_v57 = vpop.f32.mrf.mxu1  ;;  %vm13974_vm13 = vcmp.eq.s32.totalorder %v13963_v53, 199 }
 0x234   :  { %v2724_v25 = vpop.f32.mrf.mxu0 }
 0x235   :  { %v2915_v61 = vmax.f32 %v2865_v7, 0.0  ;;  %v2809_v32 = vadd.f32 %v2724_v25, %v2365_v49  ;;  %v2991_v59 = vsel %vm13969_vm10, %v2963_v41, %v2964_v15  ;;  %v3141_v14 = vsel %vm1386_vm4, %v3113_v33, %v3114_v10  ;;  %v6947_v29 = vpop.f32.mrf.mxu1 }
 0x236   :  { %v7049_v34 = vpop.f32.mrf.mxu0  ;;  %v10558_v49 = vsel %vm13971_vm3, 0.0, %v3141_v14  ;;  %v13979_v14 = vld [vmem:[#allocation33_spill] sm:$0xff] }
 0x237   :  { %v2965_v9 = vrot.slane %v2915_v61, 7  ;;  %v3115_v60 = vrot.slane %v2915_v61, 1  ;;  %v3246_v28 = vpack.c.bf16 %v2915_v61, %v2914_v30  ;;  %v2866_v20 = vadd.f32 %v10447_v36, %v2809_v32  ;;  %v2375_v45 = vpop.f32.mrf.mxu1  ;;  %13972 = vst [vmem:[#allocation40_spill] sm:$0xff] %v10558_v49  ;;  %v13976_v61 = vld [vmem:[#allocation32_spill] sm:$0xff] }
 0x238   :  { %v2727_v42 = vpop.f32.mrf.mxu0  ;;  %v10566_v30 = vsel %vm13974_vm13, 0.0, %v3142_v19  ;;  %vm13977_vm10 = vcmp.eq.s32.totalorder %v13976_v61, 0  ;;  %vm13980_vm3 = vcmp.eq.s32.totalorder %v13979_v14, 0  ;;  %vm13983_vm13 = vcmp.eq.s32.totalorder %v13976_v61, 199 }
 0x239   :  { %v2990_v41 = vsel %vm13973_vm1, %v2964_v15, %v2965_v9  ;;  %v3140_v33 = vsel %vm1386_vm4, %v3114_v10, %v3115_v60  ;;  %v2916_v7 = vmax.f32 %v2866_v20, 0.0  ;;  %13975 = vst [vmem:[#allocation47_spill] sm:$0xff] %v10566_v30  ;;  %v2810_v25 = vadd.f32 %v2727_v42, %v2368_v52  ;;  %7248 = vmatmul.mubr.msk.bf16.gmra.mxu0 %vm3289_vm5, %v3246_v28  ;;  %v6948_v2 = vpop.f32.mrf.mxu1  ;;  %v13982_v10 = vld [vmem:[#allocation3_spill] sm:$0xff] }
 0x23a   :  { %v7050_v13 = vpop.f32.mrf.mxu0  ;;  %v10571_v32 = vsel %vm13977_vm10, 0.0, %v2991_v59  ;;  %v10575_v15 = vsel %vm13980_vm3, 0.0, %v2990_v41  ;;  %v2373_v29 = vadd.f32 %v2372_v57, %v13982_v10  ;;  %7251 = vmatprep.mubr.msk.bf16.mxu0 %vm7892_vm2, %v13656_v37  ;;  %v10591_v12 = vsel %vm13983_vm13, 0.0, %v3140_v33  ;;  %vm13988_vm3 = vmmov %vm13973_vm1 }
 0x23b   :  { %13978 = vst [vmem:[#allocation101_spill] sm:$0xff] %v10571_v32  ;;  %13981 = vst [vmem:[#allocation102_spill] sm:$0xff] %v10575_v15  ;;  %v2966_v19 = vrot.slane %v2916_v7, 7  ;;  %v3116_v34 = vrot.slane %v2916_v7, 1  ;;  %v2867_v28 = vadd.f32 %v10447_v36, %v2810_v25  ;;  %v2380_v42 = vpop.f32.mrf.mxu1  ;;  %vm13985_vm10 = vcmp.eq.s32.totalorder %v13979_v14, 199  ;;  %v13987_v25 = vld [vmem:[#allocation4_spill] sm:$0xff] }
 0x23c   :  { %v2732_v59 = vpop.f32.mrf.mxu0  ;;  %13984 = vst [vmem:[#allocation3_spill] sm:$0xff] %v10591_v12  ;;  %v2376_v53 = vadd.f32 %v2375_v45, %v13987_v25  ;;  %v13989_v25 = vld [vmem:[#allocation37_spill] sm:$0xff]  ;;  %v13997_v12 = vld [vmem:[#allocation6_spill] sm:$0xff] }
 0x23d   :  { %v2989_v41 = vsel %vm13973_vm1, %v2965_v9, %v2966_v19  ;;  %v3139_v2 = vsel %vm1386_vm4, %v3115_v60, %v3116_v34  ;;  %v2811_v13 = vadd.f32 %v2732_v59, %v2373_v29  ;;  %v2917_v57 = vmax.f32 %v2867_v28, 0.0  ;;  %v6951_v10 = vpop.f32.mrf.mxu1 }
 0x23e   :  { %v7053_v20 = vpop.f32.mrf.mxu0  ;;  %v10595_v52 = vsel %vm13985_vm10, 0.0, %v3139_v2  ;;  %vm13990_vm1 = vcmp.eq.s32.totalorder %v13989_v25, 0  ;;  %vm13996_vm10 = vmmov %vm13988_vm3 }
 0x23f   :  { %13986 = vst [vmem:[#allocation103_spill] sm:$0xff] %v10595_v52  ;;  %v2868_v30 = vadd.f32 %v10447_v36, %v2811_v13  ;;  %v2967_v60 = vrot.slane %v2917_v57, 7  ;;  %v3117_v29 = vrot.slane %v2917_v57, 1  ;;  %v3247_v28 = vpack.c.bf16 %v2917_v57, %v2916_v7  ;;  %v2383_v59 = vpop.f32.mrf.mxu1 }
 0x240   :  { %v2735_v20 = vpop.f32.mrf.mxu0  ;;  %v10608_v9 = vsel %vm13990_vm1, 0.0, %v2989_v41  ;;  %v2384_v52 = vadd.f32 %v2383_v59, %v13997_v12 }
 0x241   :  { %v2918_v10 = vmax.f32 %v2868_v30, 0.0  ;;  %v2812_v61 = vadd.f32 %v2735_v20, %v2376_v53  ;;  %v2988_v33 = vsel %vm13988_vm3, %v2966_v19, %v2967_v60  ;;  %v3138_v2 = vsel %vm1386_vm4, %v3116_v34, %v3117_v29  ;;  %7252 = vmatmul.mubr.msk.bf16.gmra.mxu0 %vm3289_vm5, %v3247_v28  ;;  %v6952_v45 = vpop.f32.mrf.mxu1  ;;  %13991 = vst [vmem:[#allocation4_spill] sm:$0xff] %v10608_v9  ;;  %v13992_v53 = vld [vmem:[#allocation38_spill] sm:$0xff]  ;;  %v13995_v19 = vld [vmem:[#allocation5_spill] sm:$0xff] }
 0x242   :  { %v7054_v13 = vpop.f32.mrf.mxu0  ;;  %7255 = vmatprep.mubr.msk.bf16.mxu0 %vm7892_vm2, %v13656_v37  ;;  %vm13993_vm13 = vcmp.eq.s32.totalorder %v13992_v53, 0  ;;  %v2381_v34 = vadd.f32 %v2380_v42, %v13995_v19  ;;  %vm13998_vm3 = vcmp.eq.s32.totalorder %v13989_v25, 199  ;;  %vm14000_vm1 = vcmp.eq.s32.totalorder %v13992_v53, 199  ;;  %v14009_v53 = vld [vmem:[#allocation9_spill] sm:$0xff] }
 0x243   :  { %v2968_v14 = vrot.slane %v2918_v10, 7  ;;  %v3118_v7 = vrot.slane %v2918_v10, 1  ;;  %v2869_v57 = vadd.f32 %v10447_v36, %v2812_v61  ;;  %v10615_v30 = vsel %vm13993_vm13, 0.0, %v2988_v33  ;;  %v2388_v28 = vpop.f32.mrf.mxu1  ;;  %vm14002_vm13 = vmmov %vm13996_vm10 }
 0x244   :  { %13994 = vst [vmem:[#allocation104_spill] sm:$0xff] %v10615_v30  ;;  %v2740_v20 = vpop.f32.mrf.mxu0  ;;  %v10627_v42 = vsel %vm13998_vm3, 0.0, %v3138_v2  ;;  %v2389_v25 = vadd.f32 %v2388_v28, %v14009_v53 }
 0x245   :  { %v2987_v41 = vsel %vm13996_vm10, %v2967_v60, %v2968_v14  ;;  %v3137_v61 = vsel %vm1386_vm4, %v3117_v29, %v3118_v7  ;;  %v2919_v13 = vmax.f32 %v2869_v57, 0.0  ;;  %v2813_v49 = vadd.f32 %v2740_v20, %v2381_v34  ;;  %v6955_v32 = vpop.f32.mrf.mxu1  ;;  %13999 = vst [vmem:[#allocation5_spill] sm:$0xff] %v10627_v42  ;;  %v14006_v29 = vld [vmem:[#allocation44_spill] sm:$0xff] }
 0x246   :  { %v7057_v33 = vpop.f32.mrf.mxu0  ;;  %v10631_v19 = vsel %vm14000_vm1, 0.0, %v3137_v61  ;;  %vm14007_vm3 = vcmp.eq.s32.totalorder %v14006_v29, 0  ;;  %vm14010_vm1 = vmmov %vm14002_vm13 }
 0x247   :  { %14001 = vst [vmem:[#allocation6_spill] sm:$0xff] %v10631_v19  ;;  %v2969_v45 = vrot.slane %v2919_v13, 7  ;;  %v3119_v9 = vrot.slane %v2919_v13, 1  ;;  %v3248_v60 = vpack.c.bf16 %v2919_v13, %v2918_v10  ;;  %v2870_v57 = vadd.f32 %v10447_v36, %v2813_v49  ;;  %v2391_v12 = vpop.f32.mrf.mxu1  ;;  %v14003_v10 = vld [vmem:[#allocation43_spill] sm:$0xff] }
 0x248   :  { %v2743_v59 = vpop.f32.mrf.mxu0  ;;  %vm14004_vm10 = vcmp.eq.s32.totalorder %v14003_v10, 0 }
 0x249   :  { %v2986_v32 = vsel %vm14002_vm13, %v2968_v14, %v2969_v45  ;;  %v3136_v2 = vsel %vm1386_vm4, %v3118_v7, %v3119_v9  ;;  %v2814_v34 = vadd.f32 %v2743_v59, %v2384_v52  ;;  %v2920_v20 = vmax.f32 %v2870_v57, 0.0  ;;  %7256 = vmatmul.mubr.msk.bf16.gmra.mxu0 %vm3289_vm5, %v3248_v60  ;;  %v6956_v61 = vpop.f32.mrf.mxu1  ;;  %v14011_v52 = vld [vmem:[#allocation70_spill] sm:$0xff] }
 0x24a   :  { %v7058_v33 = vpop.f32.mrf.mxu0  ;;  %v10643_v13 = vsel %vm14004_vm10, 0.0, %v2987_v41  ;;  %v10647_v49 = vsel %vm14007_vm3, 0.0, %v2986_v32  ;;  %7259 = vmatprep.mubr.msk.bf16.mxu0 %vm7892_vm2, %v13656_v37  ;;  %vm14012_vm13 = vcmp.eq.s32.totalorder %v14006_v29, 199  ;;  %vm14014_vm10 = vmmov %vm14010_vm1  ;;  %vm14015_vm3 = vcmp.eq.s32.totalorder %v14003_v10, 199 }
 0x24b   :  { %14005 = vst [vmem:[#allocation105_spill] sm:$0xff] %v10643_v13  ;;  %14008 = vst [vmem:[#allocation106_spill] sm:$0xff] %v10647_v49  ;;  %v2871_v14 = vadd.f32 %v10447_v36, %v2814_v34  ;;  %v2970_v7 = vrot.slane %v2920_v20, 7  ;;  %v3120_v60 = vrot.slane %v2920_v20, 1  ;;  %v2396_v57 = vpop.f32.mrf.mxu1  ;;  %v2392_v13 = vadd.f32 %v2391_v12, %v14011_v52 }
 0x24c   :  { %v2748_v59 = vpop.f32.mrf.mxu0 }
 0x24d   :  { %v2921_v41 = vmax.f32 %v2871_v14, 0.0  ;;  %v2815_v61 = vadd.f32 %v2748_v59, %v2389_v25  ;;  %v2985_v32 = vsel %vm14010_vm1, %v2969_v45, %v2970_v7  ;;  %v3135_v53 = vsel %vm1386_vm4, %v3119_v9, %v3120_v60  ;;  %v6959_v28 = vpop.f32.mrf.mxu1 }
 0x24e   :  { %v7061_v34 = vpop.f32.mrf.mxu0  ;;  %v10663_v25 = vsel %vm14012_vm13, 0.0, %v3135_v53  ;;  %v14019_v53 = vld [vmem:[#allocation49_spill] sm:$0xff] }
 0x24f   :  { %v2971_v33 = vrot.slane %v2921_v41, 7  ;;  %v3121_v42 = vrot.slane %v2921_v41, 1  ;;  %v3249_v19 = vpack.c.bf16 %v2921_v41, %v2920_v20  ;;  %v2872_v30 = vadd.f32 %v10447_v36, %v2815_v61  ;;  %v2399_v49 = vpop.f32.mrf.mxu1  ;;  %14013 = vst [vmem:[#allocation9_spill] sm:$0xff] %v10663_v25  ;;  %v14017_v41 = vld [vmem:[#allocation48_spill] sm:$0xff] }
 0x250   :  { %v2751_v15 = vpop.f32.mrf.mxu0  ;;  %v10671_v20 = vsel %vm14015_vm3, 0.0, %v3136_v2  ;;  %vm14018_vm1 = vcmp.eq.s32.totalorder %v14017_v41, 0  ;;  %vm14020_vm13 = vcmp.eq.s32.totalorder %v14019_v53, 0  ;;  %vm14022_vm3 = vcmp.eq.s32.totalorder %v14017_v41, 199 }
 0x251   :  { %v2984_v45 = vsel %vm14014_vm10, %v2970_v7, %v2971_v33  ;;  %v3134_v9 = vsel %vm1386_vm4, %v3120_v60, %v3121_v42  ;;  %v2922_v14 = vmax.f32 %v2872_v30, 0.0  ;;  %14016 = vst [vmem:[#allocation70_spill] sm:$0xff] %v10671_v20  ;;  %v2816_v59 = vadd.f32 %v2751_v15, %v2392_v13  ;;  %7260 = vmatmul.mubr.msk.bf16.gmra.mxu0 %vm3289_vm5, %v3249_v19  ;;  %v6960_v12 = vpop.f32.mrf.mxu1  ;;  %v14021_v60 = vld [vmem:[#allocation71_spill] sm:$0xff] }
 0x252   :  { %v7062_v52 = vpop.f32.mrf.mxu0  ;;  %v10676_v61 = vsel %vm14018_vm1, 0.0, %v2985_v32  ;;  %v10680_v7 = vsel %vm14020_vm13, 0.0, %v2984_v45  ;;  %v2397_v28 = vadd.f32 %v2396_v57, %v14021_v60  ;;  %7263 = vmatprep.mubr.msk.bf16.mxu0 %vm7892_vm2, %v13656_v37  ;;  %v10696_v29 = vsel %vm14022_vm3, 0.0, %v3134_v9  ;;  %vm14027_vm13 = vmmov %vm14014_vm10 }
 0x253   :  { %v2972_v2 = vrot.slane %v2922_v14, 7  ;;  %v3122_v34 = vrot.slane %v2922_v14, 1  ;;  %v2873_v19 = vadd.f32 %v10447_v36, %v2816_v59  ;;  %v2404_v13 = vpop.f32.mrf.mxu1  ;;  %14023 = vst [vmem:[#allocation71_spill] sm:$0xff] %v10696_v29  ;;  %vm14024_vm1 = vcmp.eq.s32.totalorder %v14019_v53, 199  ;;  %v14026_v59 = vld [vmem:[#allocation72_spill] sm:$0xff]  ;;  %v14028_v53 = vld [vmem:[#allocation73_spill] sm:$0xff] }
 0x254   :  { %v2756_v32 = vpop.f32.mrf.mxu0  ;;  %v2400_v10 = vadd.f32 %v2399_v49, %v14026_v59  ;;  %v2405_v49 = vadd.f32 %v2404_v13, %v14028_v53 }
 0x255   :  { %v2983_v45 = vsel %vm14014_vm10, %v2971_v33, %v2972_v2  ;;  %v3133_v12 = vsel %vm1386_vm4, %v3121_v42, %v3122_v34  ;;  %v2817_v52 = vadd.f32 %v2756_v32, %v2397_v28  ;;  %v2923_v57 = vmax.f32 %v2873_v19, 0.0  ;;  %v6963_v60 = vpop.f32.mrf.mxu1  ;;  %v14029_v33 = vld [vmem:[#allocation53_spill] sm:$0xff] }
 0x256   :  { %v7065_v30 = vpop.f32.mrf.mxu0  ;;  %v10700_v15 = vsel %vm14024_vm1, 0.0, %v3133_v12  ;;  %vm14030_vm10 = vcmp.eq.s32.totalorder %v14029_v33, 0  ;;  %vm14035_vm1 = vmmov %vm14027_vm13 }
 0x257   :  { %14025 = vst [vmem:[#allocation107_spill] sm:$0xff] %v10700_v15  ;;  %v2874_v20 = vadd.f32 %v10447_v36, %v2817_v52  ;;  %v2973_v42 = vrot.slane %v2923_v57, 7  ;;  %v3123_v28 = vrot.slane %v2923_v57, 1  ;;  %v3250_v19 = vpack.c.bf16 %v2923_v57, %v2922_v14  ;;  %v2407_v32 = vpop.f32.mrf.mxu1 }
 0x258   :  { %v2759_v30 = vpop.f32.mrf.mxu0  ;;  %v10714_v29 = vsel %vm14030_vm10, 0.0, %v2983_v45 }
 0x259   :  { %v2924_v60 = vmax.f32 %v2874_v20, 0.0  ;;  %v2818_v41 = vadd.f32 %v2759_v30, %v2400_v10  ;;  %v2982_v9 = vsel %vm14027_vm13, %v2972_v2, %v2973_v42  ;;  %v3132_v12 = vsel %vm1386_vm4, %v3122_v34, %v3123_v28  ;;  %7264 = vmatmul.mubr.msk.bf16.gmra.mxu0 %vm3289_vm5, %v3250_v19  ;;  %v6964_v52 = vpop.f32.mrf.mxu1  ;;  %14031 = vst [vmem:[#allocation72_spill] sm:$0xff] %v10714_v29  ;;  %v14032_v20 = vld [vmem:[#allocation54_spill] sm:$0xff] }
 0x25a   :  { %v7066_v59 = vpop.f32.mrf.mxu0  ;;  %7267 = vmatprep.mubr.msk.bf16.mxu0 %vm7892_vm2, %v13656_v37  ;;  %vm14033_vm3 = vcmp.eq.s32.totalorder %v14032_v20, 0  ;;  %vm14037_vm13 = vcmp.eq.s32.totalorder %v14029_v33, 199  ;;  %vm14038_vm10 = vcmp.eq.s32.totalorder %v14032_v20, 199  ;;  %v14101_v20 = vld [vmem:[#allocation104_spill] sm:$0xff] }
 0x25b   :  { %v2974_v14 = vrot.slane %v2924_v60, 7  ;;  %v3124_v57 = vrot.slane %v2924_v60, 1  ;;  %v2875_v10 = vadd.f32 %v10447_v36, %v2818_v41  ;;  %v10721_v2 = vsel %vm14033_vm3, 0.0, %v2982_v9  ;;  %v14036_v41 = vld [vmem:[#allocation74_spill] sm:$0xff]  ;;  %vm14039_vm3 = vmmov %vm14035_vm1  ;;  %v14102_v33 = vld [vmem:[#allocation4_spill] sm:$0xff] }
 0x25c   :  { %14034 = vst [vmem:[#allocation73_spill] sm:$0xff] %v10721_v2  ;;  %v2764_v53 = vpop.f32.mrf.mxu0  ;;  %v2408_v52 = vadd.f32 %v2407_v32, %v14036_v41  ;;  %v10732_v15 = vsel %vm14037_vm13, 0.0, %v3132_v12 }
 0x25d   :  { %v2981_v13 = vsel %vm14035_vm1, %v2973_v42, %v2974_v14  ;;  %v3131_v45 = vsel %vm1386_vm4, %v3123_v28, %v3124_v57  ;;  %v2925_v19 = vmax.f32 %v2875_v10, 0.0  ;;  %v2819_v30 = vadd.f32 %v2764_v53, %v2405_v49  ;;  %v14047_v28 = vld [vmem:[#allocation76_spill] sm:$0xff] }
 0x25e   :  { %v7069_v59 = vpop.f32.mrf.mxu0  ;;  %v10736_v9 = vsel %vm14038_vm10, 0.0, %v3131_v45  ;;  %v14040_v45 = vld [vmem:[#allocation58_spill] sm:$0xff]  ;;  %vm14044_vm10 = vmmov %vm14039_vm3 }
 0x25f   :  { %v2975_v34 = vrot.slane %v2925_v19, 7  ;;  %v3125_v25 = vrot.slane %v2925_v19, 1  ;;  %v3251_v29 = vpack.c.bf16 %v2925_v19, %v2924_v60  ;;  %v2876_v42 = vadd.f32 %v10447_v36, %v2819_v30  ;;  %v14042_v19 = vld [vmem:[#allocation59_spill] sm:$0xff] }
 0x260   :  { %v2767_v2 = vpop.f32.mrf.mxu0  ;;  %vm14041_vm1 = vcmp.eq.s32.totalorder %v14040_v45, 0  ;;  %vm14043_vm13 = vcmp.eq.s32.totalorder %v14042_v19, 0 }
 0x261   :  { %v2980_v32 = vsel %vm14039_vm3, %v2974_v14, %v2975_v34  ;;  %v3130_v12 = vsel %vm1386_vm4, %v3124_v57, %v3125_v25  ;;  %v2926_v49 = vmax.f32 %v2876_v42, 0.0  ;;  %v2820_v10 = vadd.f32 %v2767_v2, %v2408_v52  ;;  %7268 = vmatmul.mubr.msk.bf16.gmra.mxu0 %vm3289_vm5, %v3251_v29  ;;  %v14052_v57 = vld [vmem:[#allocation75_spill] sm:$0xff] }
 0x262   :  { %v7070_v53 = vpop.f32.mrf.mxu0  ;;  %v10748_v60 = vsel %vm14041_vm1, 0.0, %v2981_v13  ;;  %v10752_v30 = vsel %vm14043_vm13, 0.0, %v2980_v32  ;;  %7271 = vmatprep.mubr.msk.bf16.mxu0 %vm7892_vm2, %v13656_v37  ;;  %vm14045_vm3 = vcmp.eq.s32.totalorder %v14040_v45, 199  ;;  %vm14046_vm1 = vcmp.eq.s32.totalorder %v14042_v19, 199 }
 0x263   :  { %v2976_v41 = vrot.slane %v2926_v49, 7  ;;  %v3126_v59 = vrot.slane %v2926_v49, 1  ;;  %v2877_v14 = vadd.f32 %v10447_v36, %v2820_v10  ;;  %v10765_v52 = vsel %vm14045_vm3, 0.0, %v3130_v12 }
 0x264   :  { %vm14048_vm13 = vcmp.eq.s32.totalorder %v13822_v5, 0  ;;  %vm14051_vm3 = vcmp.lt.s32.totalorder %v7967_v11, 1  ;;  %v10792_v53 = vpop.f32.mrf.mxu0 }
 0x265   :  { %v2979_v29 = vsel %vm14044_vm10, %v2975_v34, %v2976_v41  ;;  %v3129_v2 = vsel %vm1386_vm4, %v3125_v25, %v3126_v59  ;;  %v2927_v13 = vmax.f32 %v2877_v14, 0.0  ;;  %v3029_v34 = vsel %vm14048_vm13, 0.0, %v14047_v28  ;;  %v14049_v25 = vld [vmem:[#allocation62_spill] sm:$0xff] }
 0x266   :  { %v10769_v36 = vsel %vm14046_vm1, 0.0, %v3129_v2  ;;  %vm14050_vm10 = vcmp.eq.s32.totalorder %v14049_v25, 0  ;;  %v14053_v2 = vrot.slane %v14052_v57, 7  ;;  %vm14054_vm1 = vmmov %vm14051_vm3 }
 0x267   :  { %v2977_v42 = vrot.slane %v2927_v13, 7  ;;  %v3127_v32 = vrot.slane %v2927_v13, 1  ;;  %v3252_v10 = vpack.c.bf16 %v2927_v13, %v2926_v49  ;;  %v10778_v14 = vsel %vm14050_vm10, 0.0, %v2979_v29  ;;  %v14056_v29 = vld [vmem:[#allocation7_spill] sm:$0xff] }
 0x268   :  { %v14055_v13 = vrot.slane %v14052_v57, 1  ;;  %vm14057_vm13 = vcmp.eq.s32.totalorder %v14056_v29, 0 }
 0x269   :  { %v2978_v12 = vsel %vm14051_vm3, %v2976_v41, %v2977_v42  ;;  %v3027_v19 = vsel %vm14054_vm1, %v2977_v42, %v14053_v2  ;;  %v3128_v49 = vsel %vm1386_vm4, %v3126_v59, %v3127_v32  ;;  %7272 = vmatmul.mubr.msk.bf16.gmra.mxu0 %vm3289_vm5, %v3252_v10  ;;  %v7834_v41 = vld [vmem:[%s13194_s3 + $0x10] sm:$0xff]   ;;  %v14058_v42 = vld [vmem:[#allocation63_spill] sm:$0xff]  ;;  %vm14060_vm3 = vcmp.eq.s32.totalorder %v14049_v25, 199  ;;  %v14092_v10 = vld [vmem:[#allocation100_spill] sm:$0xff] }
 0x26a   :  { %v3177_v28 = vsel %vm1386_vm4, %v3127_v32, %v14055_v13  ;;  %v3028_v45 = vsel %vm14057_vm13, 0.0, %v3027_v19  ;;  %vm14059_vm10 = vcmp.eq.s32.totalorder %v14058_v42, 0  ;;  %v10806_v59 = vsel %vm14060_vm3, 0.0, %v3128_v49  ;;  %v7177_v19 = vpop.f32.mrf.mxu0  ;;  %7381 = vmatprep.mubr.msk.bf16.mxu0 %vm7892_vm2, %v13656_v37  ;;  %v14097_v25 = vld [vmem:[#allocation101_spill] sm:$0xff] }
 0x26b   :  { %v10802_v2 = vsel %vm14059_vm10, 0.0, %v2978_v12  ;;  %vm14061_vm1 = vcmp.eq.s32.totalorder %v14058_v42, 199  ;;  %v3256_v32 = vpack.c.bf16 %v3029_v34, %v3028_v45  ;;  %v14096_v42 = vld [vmem:[#allocation102_spill] sm:$0xff]  ;;  %vm14216_vm13 = vcmp.lt.s32.totalorder %v7967_v11, 1 }
 0x26c   :  { %v10810_v57 = vsel %vm14061_vm1, 0.0, %v3177_v28  ;;  %v10819_v12 = vpop.f32.mrf.mxu0  ;;  %v14062_v28 = vpack.c.bf16 %v9980_v56, %v9973_v23  ;;  %vm14217_vm10 = vmmov %vm14216_vm13  ;;  %vm14218_vm3 = vcmp.eq.s32.totalorder %v14056_v29, 199  ;;  %vm14220_vm1 = vcmp.eq.s32.totalorder %v13822_v5, 199 }
 0x26d   :  { %7074 = vmatmul.mubr.msk.bf16.vlgmr.msra.gmra.mxu1 %vm3289_vm5, %v3256_v32 }
 0x26e   :  { %7276 = vmatpush3.bf16.msra.mxu1 %v7834_v41  ;;  %7077 = vmatprep.mubr.msk.bf16.mxu1 %vm7892_vm2, %v13656_v37  ;;  %v7178_v49 = vpop.f32.mrf.mxu0 }
 0x26f   :  { %7481 = vmatprep.subr.bf16.mxu1 %v13656_v37  ;;  %v14063_v49 = vpack.c.bf16 %v10012_v48, %v10008_v21 }
 0x270   :  { %v10824_v45 = vpop.f32.mrf.mxu0 }
 0x272   :  { %v7181_v34 = vpop.f32.mrf.mxu0 }
 0x274   :  { %v10830_v19 = vpop.f32.mrf.mxu0 }
 0x275   :  { %7078 = vmatmul.mubr.msk.bf16.gmra.mxu1 %vm3289_vm5, %v14062_v28 }
 0x276   :  { %7081 = vmatprep.mubr.msk.bf16.mxu1 %vm7892_vm2, %v13656_v37  ;;  %v7182_v41 = vpop.f32.mrf.mxu0 }
 0x277   :  { %v14064_v41 = vpack.c.bf16 %v10045_v24, %v10041_v44 }
 0x278   :  { %v10834_v32 = vpop.f32.mrf.mxu0 }
 0x27a   :  { %v7185_v13 = vpop.f32.mrf.mxu0 }
 0x27c   :  { %v10840_v34 = vpop.f32.mrf.mxu0 }
 0x27d   :  { %7082 = vmatmul.mubr.msk.bf16.gmra.mxu1 %vm3289_vm5, %v14063_v49 }
 0x27e   :  { %7085 = vmatprep.mubr.msk.bf16.mxu1 %vm7892_vm2, %v13656_v37  ;;  %v7186_v23 = vpop.f32.mrf.mxu0 }
 0x27f   :  { %v14065_v23 = vpack.c.bf16 %v10085_v54, %v10078_v6 }
 0x281   :  { %v10844_v56 = vpop.f32.mrf.mxu0 }
 0x283   :  { %v7189_v28 = vpop.f32.mrf.mxu0 }
 0x285   :  { %7086 = vmatmul.mubr.msk.bf16.gmra.mxu1 %vm3289_vm5, %v14064_v41  ;;  %v10850_v13 = vpop.f32.mrf.mxu0 }
 0x286   :  { %7089 = vmatprep.mubr.msk.bf16.mxu1 %vm7892_vm2, %v13656_v37 }
 0x287   :  { %v7190_v21 = vpop.f32.mrf.mxu0 }
 0x288   :  { %v14066_v21 = vpack.c.bf16 %v10117_v50, %v10113_v38 }
 0x289   :  { %v10854_v48 = vpop.f32.mrf.mxu0 }
 0x28b   :  { %v7193_v49 = vpop.f32.mrf.mxu0 }
 0x28d   :  { %7090 = vmatmul.mubr.msk.bf16.gmra.mxu1 %vm3289_vm5, %v14065_v23  ;;  %v10860_v28 = vpop.f32.mrf.mxu0 }
 0x28e   :  { %7093 = vmatprep.mubr.msk.bf16.mxu1 %vm7892_vm2, %v13656_v37 }
 0x28f   :  { %v7194_v44 = vpop.f32.mrf.mxu0 }
 0x290   :  { %v14067_v44 = vpack.c.bf16 %v10150_v31, %v10146_v1 }
 0x291   :  { %v10864_v24 = vpop.f32.mrf.mxu0 }
 0x293   :  { %v7197_v41 = vpop.f32.mrf.mxu0 }
 0x295   :  { %7094 = vmatmul.mubr.msk.bf16.gmra.mxu1 %vm3289_vm5, %v14066_v21  ;;  %v10870_v49 = vpop.f32.mrf.mxu0 }
 0x296   :  { %7097 = vmatprep.mubr.msk.bf16.mxu1 %vm7892_vm2, %v13656_v37 }
 0x297   :  { %v7198_v6 = vpop.f32.mrf.mxu0 }
 0x298   :  { %v14068_v6 = vpack.c.bf16 %v10190_v47, %v10183_v18 }
 0x299   :  { %v10874_v54 = vpop.f32.mrf.mxu0 }
 0x29b   :  { %v7201_v23 = vpop.f32.mrf.mxu0 }
 0x29d   :  { %7098 = vmatmul.mubr.msk.bf16.gmra.mxu1 %vm3289_vm5, %v14067_v44  ;;  %v10880_v41 = vpop.f32.mrf.mxu0 }
 0x29e   :  { %7101 = vmatprep.mubr.msk.bf16.mxu1 %vm7892_vm2, %v13656_v37 }
 0x29f   :  { %v7202_v38 = vpop.f32.mrf.mxu0 }
 0x2a0   :  { %v14069_v38 = vpack.c.bf16 %v10222_v3, %v10218_v4 }
 0x2a1   :  { %v10884_v50 = vpop.f32.mrf.mxu0 }
 0x2a3   :  { %v7205_v21 = vpop.f32.mrf.mxu0 }
 0x2a5   :  { %7102 = vmatmul.mubr.msk.bf16.gmra.mxu1 %vm3289_vm5, %v14068_v6  ;;  %v10890_v23 = vpop.f32.mrf.mxu0 }
 0x2a6   :  { %7105 = vmatprep.mubr.msk.bf16.mxu1 %vm7892_vm2, %v13656_v37 }
 0x2a7   :  { %v7206_v1 = vpop.f32.mrf.mxu0 }
 0x2a8   :  { %v14070_v1 = vpack.c.bf16 %v10255_v62, %v10251_v17 }
 0x2a9   :  { %v10894_v31 = vpop.f32.mrf.mxu0 }
 0x2ab   :  { %v7209_v44 = vpop.f32.mrf.mxu0 }
 0x2ad   :  { %7106 = vmatmul.mubr.msk.bf16.gmra.mxu1 %vm3289_vm5, %v14069_v38  ;;  %v10900_v21 = vpop.f32.mrf.mxu0 }
 0x2ae   :  { %7109 = vmatprep.mubr.msk.bf16.mxu1 %vm7892_vm2, %v13656_v37 }
 0x2af   :  { %v7210_v18 = vpop.f32.mrf.mxu0 }
 0x2b0   :  { %v14071_v18 = vpack.c.bf16 %v10295_v26, %v10288_v8 }
 0x2b1   :  { %v10904_v47 = vpop.f32.mrf.mxu0 }
 0x2b3   :  { %v7213_v6 = vpop.f32.mrf.mxu0 }
 0x2b5   :  { %7110 = vmatmul.mubr.msk.bf16.gmra.mxu1 %vm3289_vm5, %v14070_v1  ;;  %v10910_v44 = vpop.f32.mrf.mxu0 }
 0x2b6   :  { %7113 = vmatprep.mubr.msk.bf16.mxu1 %vm7892_vm2, %v13656_v37 }
 0x2b7   :  { %v7214_v4 = vpop.f32.mrf.mxu0 }
 0x2b8   :  { %v14074_v4 = vpack.c.bf16 %v10327_v55, %v10323_v35 }
 0x2b9   :  { %v10914_v3 = vpop.f32.mrf.mxu0 }
 0x2bb   :  { %v7217_v38 = vpop.f32.mrf.mxu0 }
 0x2bd   :  { %7114 = vmatmul.mubr.msk.bf16.gmra.mxu1 %vm3289_vm5, %v14071_v18  ;;  %v10920_v6 = vpop.f32.mrf.mxu0 }
 0x2be   :  { %14072 = vst [vmem:[#allocation74_spill] sm:$0xff] %v10920_v6  ;;  %7117 = vmatprep.mubr.msk.bf16.mxu1 %vm7892_vm2, %v13656_v37 }
 0x2bf   :  { %v7218_v17 = vpop.f32.mrf.mxu0 }
 0x2c0   :  { %v14077_v17 = vpack.c.bf16 %v10360_v22, %v10356_v51 }
 0x2c1   :  { %v10924_v62 = vpop.f32.mrf.mxu0 }
 0x2c2   :  { %14073 = vst [vmem:[#allocation76_spill] sm:$0xff] %v10924_v62  ;;  %v14161_v62 = vld [vmem:[#allocation66_spill] sm:$0xff] }
 0x2c3   :  { %v7221_v1 = vpop.f32.mrf.mxu0 }
 0x2c5   :  { %7118 = vmatmul.mubr.msk.bf16.gmra.mxu1 %vm3289_vm5, %v14074_v4  ;;  %v10930_v38 = vpop.f32.mrf.mxu0 }
 0x2c6   :  { %14075 = vst [vmem:[#allocation75_spill] sm:$0xff] %v10930_v38  ;;  %7121 = vmatprep.mubr.msk.bf16.mxu1 %vm7892_vm2, %v13656_v37 }
 0x2c7   :  { %v7222_v8 = vpop.f32.mrf.mxu0 }
 0x2c8   :  { %v14080_v8 = vpack.c.bf16 %v10400_v39, %v10393_v43 }
 0x2c9   :  { %v10934_v26 = vpop.f32.mrf.mxu0 }
 0x2ca   :  { %14076 = vst [vmem:[#allocation7_spill] sm:$0xff] %v10934_v26 }
 0x2cb   :  { %v7225_v18 = vpop.f32.mrf.mxu0 }
 0x2cd   :  { %7122 = vmatmul.mubr.msk.bf16.gmra.mxu1 %vm3289_vm5, %v14077_v17  ;;  %v10940_v1 = vpop.f32.mrf.mxu0 }
 0x2ce   :  { %14078 = vst [vmem:[#allocation108_spill] sm:$0xff] %v10940_v1  ;;  %7125 = vmatprep.mubr.msk.bf16.mxu1 %vm7892_vm2, %v13656_v37  ;;  %v14152_v1 = vld [vmem:[#allocation94_spill] sm:$0xff] }
 0x2cf   :  { %v7226_v35 = vpop.f32.mrf.mxu0 }
 0x2d0   :  { %v14083_v35 = vpack.c.bf16 %v10432_v40, %v10428_v46 }
 0x2d1   :  { %v10944_v55 = vpop.f32.mrf.mxu0 }
 0x2d2   :  { %14079 = vst [vmem:[#allocation109_spill] sm:$0xff] %v10944_v55 }
 0x2d3   :  { %v7229_v4 = vpop.f32.mrf.mxu0 }
 0x2d5   :  { %7126 = vmatmul.mubr.msk.bf16.gmra.mxu1 %vm3289_vm5, %v14080_v8  ;;  %v10950_v18 = vpop.f32.mrf.mxu0 }
 0x2d6   :  { %14081 = vst [vmem:[#allocation110_spill] sm:$0xff] %v10950_v18  ;;  %7129 = vmatprep.mubr.msk.bf16.mxu1 %vm7892_vm2, %v13656_v37  ;;  %v14149_v18 = vld [vmem:[#allocation93_spill] sm:$0xff] }
 0x2d7   :  { %v7230_v51 = vpop.f32.mrf.mxu0 }
 0x2d8   :  { %v14086_v51 = vpack.c.bf16 %v10470_v0, %v10466_v63 }
 0x2d9   :  { %v10954_v22 = vpop.f32.mrf.mxu0 }
 0x2da   :  { %14082 = vst [vmem:[#allocation111_spill] sm:$0xff] %v10954_v22 }
 0x2db   :  { %v7233_v17 = vpop.f32.mrf.mxu0 }
 0x2dd   :  { %7130 = vmatmul.mubr.msk.bf16.gmra.mxu1 %vm3289_vm5, %v14083_v35  ;;  %v10960_v4 = vpop.f32.mrf.mxu0 }
 0x2de   :  { %14084 = vst [vmem:[#allocation112_spill] sm:$0xff] %v10960_v4  ;;  %7133 = vmatprep.mubr.msk.bf16.mxu1 %vm7892_vm2, %v13656_v37  ;;  %v14146_v4 = vld [vmem:[#allocation90_spill] sm:$0xff] }
 0x2df   :  { %v7234_v43 = vpop.f32.mrf.mxu0 }
 0x2e0   :  { %v14089_v43 = vpack.c.bf16 %v10510_v58, %v10503_v16 }
 0x2e1   :  { %v10964_v39 = vpop.f32.mrf.mxu0 }
 0x2e2   :  { %14085 = vst [vmem:[#allocation113_spill] sm:$0xff] %v10964_v39 }
 0x2e3   :  { %v7237_v8 = vpop.f32.mrf.mxu0 }
 0x2e5   :  { %7134 = vmatmul.mubr.msk.bf16.gmra.mxu1 %vm3289_vm5, %v14086_v51  ;;  %v10970_v17 = vpop.f32.mrf.mxu0 }
 0x2e6   :  { %14087 = vst [vmem:[#allocation114_spill] sm:$0xff] %v10970_v17  ;;  %7137 = vmatprep.mubr.msk.bf16.mxu1 %vm7892_vm2, %v13656_v37  ;;  %v14143_v17 = vld [vmem:[#allocation88_spill] sm:$0xff] }
 0x2e7   :  { %v7238_v46 = vpop.f32.mrf.mxu0 }
 0x2e8   :  { %v14093_v46 = vpack.c.bf16 %v10542_v27, %v14092_v10 }
 0x2e9   :  { %v10974_v40 = vpop.f32.mrf.mxu0 }
 0x2ea   :  { %14088 = vst [vmem:[#allocation115_spill] sm:$0xff] %v10974_v40 }
 0x2eb   :  { %v7241_v35 = vpop.f32.mrf.mxu0 }
 0x2ed   :  { %7138 = vmatmul.mubr.msk.bf16.gmra.mxu1 %vm3289_vm5, %v14089_v43  ;;  %v10980_v8 = vpop.f32.mrf.mxu0 }
 0x2ee   :  { %14090 = vst [vmem:[#allocation116_spill] sm:$0xff] %v10980_v8  ;;  %7141 = vmatprep.mubr.msk.bf16.mxu1 %vm7892_vm2, %v13656_v37  ;;  %v14140_v8 = vld [vmem:[#allocation87_spill] sm:$0xff] }
 0x2ef   :  { %v7242_v63 = vpop.f32.mrf.mxu0 }
 0x2f0   :  { %v14098_v63 = vpack.c.bf16 %v14096_v42, %v14097_v25 }
 0x2f1   :  { %v10984_v0 = vpop.f32.mrf.mxu0 }
 0x2f2   :  { %14091 = vst [vmem:[#allocation117_spill] sm:$0xff] %v10984_v0 }
 0x2f3   :  { %v7245_v51 = vpop.f32.mrf.mxu0 }
 0x2f5   :  { %7142 = vmatmul.mubr.msk.bf16.gmra.mxu1 %vm3289_vm5, %v14093_v46  ;;  %v10990_v35 = vpop.f32.mrf.mxu0 }
 0x2f6   :  { %14094 = vst [vmem:[#allocation100_spill] sm:$0xff] %v10990_v35  ;;  %7145 = vmatprep.mubr.msk.bf16.mxu1 %vm7892_vm2, %v13656_v37  ;;  %v14137_v35 = vld [vmem:[#allocation84_spill] sm:$0xff] }
 0x2f7   :  { %v7246_v16 = vpop.f32.mrf.mxu0 }
 0x2f8   :  { %v14103_v16 = vpack.c.bf16 %v14101_v20, %v14102_v33 }
 0x2f9   :  { %v10994_v58 = vpop.f32.mrf.mxu0 }
 0x2fa   :  { %14095 = vst [vmem:[#allocation118_spill] sm:$0xff] %v10994_v58  ;;  %v14107_v58 = vld [vmem:[#allocation105_spill] sm:$0xff] }
 0x2fb   :  { %v7249_v43 = vpop.f32.mrf.mxu0 }
 0x2fd   :  { %7146 = vmatmul.mubr.msk.bf16.gmra.mxu1 %vm3289_vm5, %v14098_v63  ;;  %v11000_v51 = vpop.f32.mrf.mxu0 }
 0x2fe   :  { %14099 = vst [vmem:[#allocation102_spill] sm:$0xff] %v11000_v51  ;;  %7149 = vmatprep.mubr.msk.bf16.mxu1 %vm7892_vm2, %v13656_v37  ;;  %v14106_v51 = vld [vmem:[#allocation106_spill] sm:$0xff] }
 0x2ff   :  { %v7250_v27 = vpop.f32.mrf.mxu0 }
 0x300   :  { %v14108_v27 = vpack.c.bf16 %v14106_v51, %v14107_v58 }
 0x301   :  { %v11004_v10 = vpop.f32.mrf.mxu0 }
 0x302   :  { %14100 = vst [vmem:[#allocation101_spill] sm:$0xff] %v11004_v10 }
 0x303   :  { %v7253_v46 = vpop.f32.mrf.mxu0 }
 0x305   :  { %7150 = vmatmul.mubr.msk.bf16.gmra.mxu1 %vm3289_vm5, %v14103_v16  ;;  %v11010_v43 = vpop.f32.mrf.mxu0 }
 0x306   :  { %14104 = vst [vmem:[#allocation104_spill] sm:$0xff] %v11010_v43  ;;  %7153 = vmatprep.mubr.msk.bf16.mxu1 %vm7892_vm2, %v13656_v37  ;;  %v14134_v43 = vld [vmem:[#allocation82_spill] sm:$0xff] }
 0x307   :  { %v7254_v25 = vpop.f32.mrf.mxu0 }
 0x308   :  { %v14111_v25 = vpack.c.bf16 %v10680_v7, %v10676_v61 }
 0x309   :  { %v11014_v42 = vpop.f32.mrf.mxu0 }
 0x30a   :  { %14105 = vst [vmem:[#allocation4_spill] sm:$0xff] %v11014_v42  ;;  %v14115_v42 = vld [vmem:[#allocation72_spill] sm:$0xff] }
 0x30b   :  { %v7257_v63 = vpop.f32.mrf.mxu0 }
 0x30d   :  { %7154 = vmatmul.mubr.msk.bf16.gmra.mxu1 %vm3289_vm5, %v14108_v27  ;;  %v11020_v46 = vpop.f32.mrf.mxu0 }
 0x30e   :  { %14109 = vst [vmem:[#allocation106_spill] sm:$0xff] %v11020_v46  ;;  %7157 = vmatprep.mubr.msk.bf16.mxu1 %vm7892_vm2, %v13656_v37  ;;  %v14114_v46 = vld [vmem:[#allocation73_spill] sm:$0xff] }
 0x30f   :  { %v7258_v33 = vpop.f32.mrf.mxu0 }
 0x310   :  { %v14116_v33 = vpack.c.bf16 %v14114_v46, %v14115_v42 }
 0x311   :  { %v11024_v20 = vpop.f32.mrf.mxu0 }
 0x312   :  { %14110 = vst [vmem:[#allocation105_spill] sm:$0xff] %v11024_v20 }
 0x313   :  { %v7261_v16 = vpop.f32.mrf.mxu0 }
 0x315   :  { %7158 = vmatmul.mubr.msk.bf16.gmra.mxu1 %vm3289_vm5, %v14111_v25  ;;  %v11030_v63 = vpop.f32.mrf.mxu0 }
 0x316   :  { %14112 = vst [vmem:[#allocation119_spill] sm:$0xff] %v11030_v63  ;;  %7161 = vmatprep.mubr.msk.bf16.mxu1 %vm7892_vm2, %v13656_v37  ;;  %v14131_v63 = vld [vmem:[#allocation81_spill] sm:$0xff] }
 0x317   :  { %v7262_v58 = vpop.f32.mrf.mxu0 }
 0x318   :  { %v14119_v58 = vpack.c.bf16 %v10752_v30, %v10748_v60 }
 0x319   :  { %v11034_v51 = vpop.f32.mrf.mxu0 }
 0x31a   :  { %14113 = vst [vmem:[#allocation120_spill] sm:$0xff] %v11034_v51 }
 0x31b   :  { %v7265_v27 = vpop.f32.mrf.mxu0 }
 0x31d   :  { %7162 = vmatmul.mubr.msk.bf16.gmra.mxu1 %vm3289_vm5, %v14116_v33  ;;  %v11040_v16 = vpop.f32.mrf.mxu0 }
 0x31e   :  { %14117 = vst [vmem:[#allocation73_spill] sm:$0xff] %v11040_v16  ;;  %7165 = vmatprep.mubr.msk.bf16.mxu1 %vm7892_vm2, %v13656_v37 }
 0x31f   :  { %v7266_v61 = vpop.f32.mrf.mxu0 }
 0x320   :  { %v14122_v61 = vpack.c.bf16 %v10802_v2, %v10778_v14 }
 0x321   :  { %v11044_v7 = vpop.f32.mrf.mxu0 }
 0x322   :  { %14118 = vst [vmem:[#allocation72_spill] sm:$0xff] %v11044_v7 }
 0x323   :  { %v7269_v25 = vpop.f32.mrf.mxu0 }
 0x325   :  { %7166 = vmatmul.mubr.msk.bf16.gmra.mxu1 %vm3289_vm5, %v14119_v58  ;;  %v11050_v27 = vpop.f32.mrf.mxu0 }
 0x326   :  { %14120 = vst [vmem:[#allocation121_spill] sm:$0xff] %v11050_v27  ;;  %7169 = vmatprep.mubr.msk.bf16.mxu1 %vm7892_vm2, %v13656_v37 }
 0x327   :  { %v7270_v42 = vpop.f32.mrf.mxu0 }
 0x329   :  { %v11054_v46 = vpop.f32.mrf.mxu0 }
 0x32a   :  { %14121 = vst [vmem:[#allocation122_spill] sm:$0xff] %v11054_v46  ;;  %v14125_v46 = vld [vmem:[#allocation77_spill] sm:$0xff] }
 0x32b   :  { %v7273_v33 = vpop.f32.mrf.mxu0 }
 0x32c   :  { %v14124_v33 = vld [vmem:[#allocation8_spill] sm:$0xff] }
 0x32d   :  { %v11056_v16 = vpop.f32.mrf.mxu1  ;;  %7170 = vmatmul.mubr.msk.bf16.gmra.mxu1 %vm3289_vm5, %v14122_v61  ;;  %v11062_v25 = vpop.f32.mrf.mxu0  ;;  %v14126_v7 = vpack.c.bf16 %v14124_v33, %v14125_v46 }
 0x32e   :  { %14123 = vst [vmem:[#allocation123_spill] sm:$0xff] %v11062_v25  ;;  %7277 = vmatprep.mubr.msk.bf16.mxu1 %vm7892_vm2, %v13656_v37 }
 0x32f   :  { %v7075_v60 = vpop.f32.mrf.mxu1  ;;  %v7274_v30 = vpop.f32.mrf.mxu0 }
 0x330   :  { %v14127_v60 = vld [vmem:[#allocation79_spill] sm:$0xff]  ;;  %v14128_v30 = vld [vmem:[#allocation78_spill] sm:$0xff] }
 0x331   :  { %v11066_v58 = vpop.f32.mrf.mxu1  ;;  %v14129_v51 = vpack.c.bf16 %v14127_v60, %v14128_v30 }
 0x333   :  { %v7076_v42 = vpop.f32.mrf.mxu1 }
 0x335   :  { %v11068_v27 = vpop.f32.mrf.mxu1  ;;  %7278 = vmatmul.mubr.msk.bf16.vlgmr.msra.gmra.mxu1 %vm3289_vm5, %v14126_v7 }
 0x336   :  { %7281 = vmatprep.mubr.msk.bf16.mxu1 %vm7892_vm2, %v13656_v37 }
 0x337   :  { %v7079_v14 = vpop.f32.mrf.mxu1 }
 0x338   :  { %v14130_v14 = vld [vmem:[#allocation80_spill] sm:$0xff] }
 0x339   :  { %v11076_v2 = vpop.f32.mrf.mxu1  ;;  %v14132_v20 = vpack.c.bf16 %v14130_v14, %v14131_v63 }
 0x33b   :  { %v7080_v61 = vpop.f32.mrf.mxu1 }
 0x33d   :  { %v11078_v25 = vpop.f32.mrf.mxu1  ;;  %7282 = vmatmul.mubr.msk.bf16.gmra.mxu1 %vm3289_vm5, %v14129_v51 }
 0x33e   :  { %7285 = vmatprep.mubr.msk.bf16.mxu1 %vm7892_vm2, %v13656_v37 }
 0x33f   :  { %v7083_v46 = vpop.f32.mrf.mxu1 }
 0x340   :  { %v14133_v46 = vld [vmem:[#allocation83_spill] sm:$0xff] }
 0x341   :  { %v11086_v42 = vpop.f32.mrf.mxu1  ;;  %v14135_v10 = vpack.c.bf16 %v14133_v46, %v14134_v43 }
 0x343   :  { %v7084_v7 = vpop.f32.mrf.mxu1 }
 0x345   :  { %v11088_v33 = vpop.f32.mrf.mxu1  ;;  %7286 = vmatmul.mubr.msk.bf16.gmra.mxu1 %vm3289_vm5, %v14132_v20 }
 0x346   :  { %7289 = vmatprep.mubr.msk.bf16.mxu1 %vm7892_vm2, %v13656_v37 }
 0x347   :  { %v7087_v61 = vpop.f32.mrf.mxu1 }
 0x348   :  { %v14136_v61 = vld [vmem:[#allocation85_spill] sm:$0xff] }
 0x349   :  { %v11096_v60 = vpop.f32.mrf.mxu1  ;;  %v14138_v0 = vpack.c.bf16 %v14136_v61, %v14137_v35 }
 0x34b   :  { %v7088_v51 = vpop.f32.mrf.mxu1 }
 0x34d   :  { %v11098_v30 = vpop.f32.mrf.mxu1  ;;  %7290 = vmatmul.mubr.msk.bf16.gmra.mxu1 %vm3289_vm5, %v14135_v10 }
 0x34e   :  { %7293 = vmatprep.mubr.msk.bf16.mxu1 %vm7892_vm2, %v13656_v37 }
 0x34f   :  { %v7091_v63 = vpop.f32.mrf.mxu1 }
 0x350   :  { %v14139_v63 = vld [vmem:[#allocation86_spill] sm:$0xff] }
 0x351   :  { %v11106_v7 = vpop.f32.mrf.mxu1  ;;  %v14141_v40 = vpack.c.bf16 %v14139_v63, %v14140_v8 }
 0x353   :  { %v7092_v20 = vpop.f32.mrf.mxu1 }
 0x355   :  { %v11108_v14 = vpop.f32.mrf.mxu1  ;;  %7294 = vmatmul.mubr.msk.bf16.gmra.mxu1 %vm3289_vm5, %v14138_v0 }
 0x356   :  { %7297 = vmatprep.mubr.msk.bf16.mxu1 %vm7892_vm2, %v13656_v37 }
 0x357   :  { %v7095_v43 = vpop.f32.mrf.mxu1 }
 0x358   :  { %v14142_v43 = vld [vmem:[#allocation89_spill] sm:$0xff] }
 0x359   :  { %v11116_v51 = vpop.f32.mrf.mxu1  ;;  %v14144_v39 = vpack.c.bf16 %v14142_v43, %v14143_v17 }
 0x35b   :  { %v7096_v10 = vpop.f32.mrf.mxu1 }
 0x35d   :  { %v11118_v46 = vpop.f32.mrf.mxu1  ;;  %7298 = vmatmul.mubr.msk.bf16.gmra.mxu1 %vm3289_vm5, %v14141_v40 }
 0x35e   :  { %7301 = vmatprep.mubr.msk.bf16.mxu1 %vm7892_vm2, %v13656_v37 }
 0x35f   :  { %v7099_v35 = vpop.f32.mrf.mxu1 }
 0x360   :  { %v14145_v35 = vld [vmem:[#allocation91_spill] sm:$0xff] }
 0x361   :  { %v11126_v20 = vpop.f32.mrf.mxu1  ;;  %v14147_v22 = vpack.c.bf16 %v14145_v35, %v14146_v4  ;;  %v7835_v35 = vld [vmem:[%s13196_s5 + $0x18] sm:$0xff]  }
 0x362   :  { %7482 = vmatpush3.bf16.msra.mxu1 %v7835_v35 }
 0x363   :  { %v7100_v0 = vpop.f32.mrf.mxu1  ;;  %7483 = vmatprep.subr.bf16.mxu1 %v13656_v37 }
 0x365   :  { %v11128_v61 = vpop.f32.mrf.mxu1  ;;  %7302 = vmatmul.mubr.msk.bf16.gmra.mxu1 %vm3289_vm5, %v14144_v39 }
 0x366   :  { %7305 = vmatprep.mubr.msk.bf16.mxu1 %vm7892_vm2, %v13656_v37 }
 0x367   :  { %v7103_v8 = vpop.f32.mrf.mxu1 }
 0x368   :  { %v14148_v8 = vld [vmem:[#allocation92_spill] sm:$0xff] }
 0x369   :  { %v11136_v10 = vpop.f32.mrf.mxu1  ;;  %v14150_v55 = vpack.c.bf16 %v14148_v8, %v14149_v18  ;;  %v7837_v18 = vld [vmem:[%s13196_s5 + $0x10] sm:$0xff]  }
 0x36a   :  { %7484 = vmatpush3.bf16.msra.mxu1 %v7837_v18 }
 0x36b   :  { %v7104_v40 = vpop.f32.mrf.mxu1 }
 0x36d   :  { %v11138_v63 = vpop.f32.mrf.mxu1  ;;  %7306 = vmatmul.mubr.msk.bf16.gmra.mxu1 %vm3289_vm5, %v14147_v22 }
 0x36e   :  { %7309 = vmatprep.mubr.msk.bf16.mxu1 %vm7892_vm2, %v13656_v37 }
 0x36f   :  { %v7107_v17 = vpop.f32.mrf.mxu1 }
 0x371   :  { %v11146_v0 = vpop.f32.mrf.mxu1 }
 0x373   :  { %v7108_v39 = vpop.f32.mrf.mxu1 }
 0x374   :  { %v14151_v39 = vld [vmem:[#allocation95_spill] sm:$0xff] }
 0x375   :  { %v11148_v43 = vpop.f32.mrf.mxu1  ;;  %7310 = vmatmul.mubr.msk.bf16.gmra.mxu1 %vm3289_vm5, %v14150_v55  ;;  %v14153_v26 = vpack.c.bf16 %v14151_v39, %v14152_v1  ;;  %v14156_v1 = vld [vmem:[#allocation97_spill] sm:$0xff]  ;;  %v14157_v39 = vld [vmem:[#allocation96_spill] sm:$0xff] }
 0x376   :  { %7313 = vmatprep.mubr.msk.bf16.mxu1 %vm7892_vm2, %v13656_v37 }
 0x377   :  { %v7111_v4 = vpop.f32.mrf.mxu1 }
 0x379   :  { %v11156_v40 = vpop.f32.mrf.mxu1 }
 0x37b   :  { %v7112_v22 = vpop.f32.mrf.mxu1 }
 0x37d   :  { %v11161_v17 = vpop.f32.mrf.mxu1  ;;  %7314 = vmatmul.mubr.msk.bf16.gmra.mxu1 %vm3289_vm5, %v14153_v26  ;;  %v14158_v26 = vpack.c.bf16 %v14156_v1, %v14157_v39  ;;  %v14162_v1 = vld [vmem:[#allocation67_spill] sm:$0xff] }
 0x37e   :  { %7317 = vmatprep.mubr.msk.bf16.mxu1 %vm7892_vm2, %v13656_v37  ;;  %v14163_v39 = vpack.c.bf16 %v14161_v62, %v14162_v1 }
 0x37f   :  { %v7115_v55 = vpop.f32.mrf.mxu1 }
 0x380   :  { %v7836_v55 = vld [vmem:[%s13196_s5 + $0x8] sm:$0xff]  }
 0x381   :  { %v11173_v8 = vpop.f32.mrf.mxu1  ;;  %7378 = vmatpush3.bf16.msra.mxu0 %v7836_v55  ;;  %v14166_v55 = vld [vmem:[#allocation98_spill] sm:$0xff] }
 0x382   :  { %14154 = vst [vmem:[#allocation8_spill] sm:$0xff] %v11173_v8  ;;  %7379 = vmatprep.subr.bf16.mxu0 %v13656_v37  ;;  %v14172_v8 = vld [vmem:[#allocation69_spill] sm:$0xff] }
 0x383   :  { %v7116_v4 = vpop.f32.mrf.mxu1 }
 0x385   :  { %v11175_v22 = vpop.f32.mrf.mxu1  ;;  %7318 = vmatmul.mubr.msk.bf16.gmra.mxu1 %vm3289_vm5, %v14158_v26 }
 0x386   :  { %14155 = vst [vmem:[#allocation77_spill] sm:$0xff] %v11175_v22  ;;  %7321 = vmatprep.mubr.msk.bf16.mxu1 %vm7892_vm2, %v13656_v37 }
 0x387   :  { %v7119_v35 = vpop.f32.mrf.mxu1 }
 0x389   :  { %v11186_v38 = vpop.f32.mrf.mxu1 }
 0x38a   :  { %14159 = vst [vmem:[#allocation79_spill] sm:$0xff] %v11186_v38 }
 0x38b   :  { %v7120_v18 = vpop.f32.mrf.mxu1 }
 0x38c   :  { %v14167_v18 = vld [vmem:[#allocation68_spill] sm:$0xff] }
 0x38d   :  { %v11189_v4 = vpop.f32.mrf.mxu1  ;;  %7322 = vmatmul.mubr.msk.bf16.gmra.mxu1 %vm3289_vm5, %v14163_v39  ;;  %v14168_v38 = vpack.c.bf16 %v14166_v55, %v14167_v18 }
 0x38e   :  { %14160 = vst [vmem:[#allocation78_spill] sm:$0xff] %v11189_v4  ;;  %7325 = vmatprep.mubr.msk.bf16.mxu1 %vm7892_vm2, %v13656_v37 }
 0x38f   :  { %v7123_v26 = vpop.f32.mrf.mxu1 }
 0x390   :  { %v14171_v26 = vld [vmem:[#allocation25_spill] sm:$0xff] }
 0x391   :  { %v11197_v35 = vpop.f32.mrf.mxu1 }
 0x392   :  { %14164 = vst [vmem:[#allocation80_spill] sm:$0xff] %v11197_v35  ;;  %v14173_v35 = vpack.c.bf16 %v14171_v26, %v14172_v8 }
 0x393   :  { %v7124_v22 = vpop.f32.mrf.mxu1 }
 0x395   :  { %v11199_v6 = vpop.f32.mrf.mxu1  ;;  %7326 = vmatmul.mubr.msk.bf16.gmra.mxu1 %vm3289_vm5, %v14168_v38 }
 0x396   :  { %14165 = vst [vmem:[#allocation81_spill] sm:$0xff] %v11199_v6  ;;  %7329 = vmatprep.mubr.msk.bf16.mxu1 %vm7892_vm2, %v13656_v37  ;;  %v14177_v6 = vld [vmem:[#allocation30_spill] sm:$0xff] }
 0x397   :  { %v7127_v62 = vpop.f32.mrf.mxu1 }
 0x398   :  { %v14176_v62 = vld [vmem:[#allocation42_spill] sm:$0xff] }
 0x399   :  { %v11207_v1 = vpop.f32.mrf.mxu1 }
 0x39a   :  { %14169 = vst [vmem:[#allocation83_spill] sm:$0xff] %v11207_v1  ;;  %v14178_v1 = vpack.c.bf16 %v14176_v62, %v14177_v6 }
 0x39b   :  { %v7128_v39 = vpop.f32.mrf.mxu1 }
 0x39d   :  { %v11209_v4 = vpop.f32.mrf.mxu1  ;;  %7330 = vmatmul.mubr.msk.bf16.gmra.mxu1 %vm3289_vm5, %v14173_v35 }
 0x39e   :  { %14170 = vst [vmem:[#allocation82_spill] sm:$0xff] %v11209_v4  ;;  %7333 = vmatprep.mubr.msk.bf16.mxu1 %vm7892_vm2, %v13656_v37  ;;  %v14182_v4 = vld [vmem:[#allocation50_spill] sm:$0xff] }
 0x39f   :  { %v7131_v22 = vpop.f32.mrf.mxu1 }
 0x3a0   :  { %v14181_v22 = vld [vmem:[#allocation99_spill] sm:$0xff] }
 0x3a1   :  { %v11217_v55 = vpop.f32.mrf.mxu1 }
 0x3a2   :  { %14174 = vst [vmem:[#allocation85_spill] sm:$0xff] %v11217_v55  ;;  %v14183_v55 = vpack.c.bf16 %v14181_v22, %v14182_v4 }
 0x3a3   :  { %v7132_v38 = vpop.f32.mrf.mxu1 }
 0x3a5   :  { %v11219_v18 = vpop.f32.mrf.mxu1  ;;  %7334 = vmatmul.mubr.msk.bf16.gmra.mxu1 %vm3289_vm5, %v14178_v1 }
 0x3a6   :  { %14175 = vst [vmem:[#allocation84_spill] sm:$0xff] %v11219_v18  ;;  %7337 = vmatprep.mubr.msk.bf16.mxu1 %vm7892_vm2, %v13656_v37  ;;  %v14187_v18 = vld [vmem:[#allocation34_spill] sm:$0xff] }
 0x3a7   :  { %v7135_v8 = vpop.f32.mrf.mxu1 }
 0x3a8   :  { %v14186_v8 = vld [vmem:[#allocation55_spill] sm:$0xff] }
 0x3a9   :  { %v11227_v39 = vpop.f32.mrf.mxu1 }
 0x3aa   :  { %14179 = vst [vmem:[#allocation86_spill] sm:$0xff] %v11227_v39  ;;  %v14188_v39 = vpack.c.bf16 %v14186_v8, %v14187_v18 }
 0x3ab   :  { %v7136_v35 = vpop.f32.mrf.mxu1 }
 0x3ad   :  { %v11229_v26 = vpop.f32.mrf.mxu1  ;;  %7338 = vmatmul.mubr.msk.bf16.gmra.mxu1 %vm3289_vm5, %v14183_v55 }
 0x3ae   :  { %14180 = vst [vmem:[#allocation87_spill] sm:$0xff] %v11229_v26  ;;  %7341 = vmatprep.mubr.msk.bf16.mxu1 %vm7892_vm2, %v13656_v37  ;;  %v14192_v26 = vld [vmem:[#allocation47_spill] sm:$0xff] }
 0x3af   :  { %v7139_v6 = vpop.f32.mrf.mxu1 }
 0x3b0   :  { %v14191_v6 = vld [vmem:[#allocation40_spill] sm:$0xff] }
 0x3b1   :  { %v11237_v38 = vpop.f32.mrf.mxu1 }
 0x3b2   :  { %14184 = vst [vmem:[#allocation89_spill] sm:$0xff] %v11237_v38  ;;  %v14193_v38 = vpack.c.bf16 %v14191_v6, %v14192_v26 }
 0x3b3   :  { %v7140_v1 = vpop.f32.mrf.mxu1 }
 0x3b5   :  { %v11239_v62 = vpop.f32.mrf.mxu1  ;;  %7342 = vmatmul.mubr.msk.bf16.gmra.mxu1 %vm3289_vm5, %v14188_v39 }
 0x3b6   :  { %14185 = vst [vmem:[#allocation88_spill] sm:$0xff] %v11239_v62  ;;  %7345 = vmatprep.mubr.msk.bf16.mxu1 %vm7892_vm2, %v13656_v37  ;;  %v14197_v62 = vld [vmem:[#allocation3_spill] sm:$0xff] }
 0x3b7   :  { %v7143_v4 = vpop.f32.mrf.mxu1 }
 0x3b8   :  { %v14196_v4 = vld [vmem:[#allocation103_spill] sm:$0xff] }
 0x3b9   :  { %v11247_v35 = vpop.f32.mrf.mxu1 }
 0x3ba   :  { %14189 = vst [vmem:[#allocation91_spill] sm:$0xff] %v11247_v35  ;;  %v14198_v35 = vpack.c.bf16 %v14196_v4, %v14197_v62 }
 0x3bb   :  { %v7144_v55 = vpop.f32.mrf.mxu1 }
 0x3bd   :  { %v11249_v22 = vpop.f32.mrf.mxu1  ;;  %7346 = vmatmul.mubr.msk.bf16.gmra.mxu1 %vm3289_vm5, %v14193_v38 }
 0x3be   :  { %14190 = vst [vmem:[#allocation90_spill] sm:$0xff] %v11249_v22  ;;  %7349 = vmatprep.mubr.msk.bf16.mxu1 %vm7892_vm2, %v13656_v37  ;;  %v14202_v22 = vld [vmem:[#allocation5_spill] sm:$0xff] }
 0x3bf   :  { %v7147_v18 = vpop.f32.mrf.mxu1 }
 0x3c0   :  { %v14201_v18 = vld [vmem:[#allocation6_spill] sm:$0xff] }
 0x3c1   :  { %v11257_v1 = vpop.f32.mrf.mxu1 }
 0x3c2   :  { %14194 = vst [vmem:[#allocation92_spill] sm:$0xff] %v11257_v1  ;;  %v14203_v1 = vpack.c.bf16 %v14201_v18, %v14202_v22 }
 0x3c3   :  { %v7148_v39 = vpop.f32.mrf.mxu1 }
 0x3c5   :  { %v11259_v8 = vpop.f32.mrf.mxu1  ;;  %7350 = vmatmul.mubr.msk.bf16.gmra.mxu1 %vm3289_vm5, %v14198_v35 }
 0x3c6   :  { %14195 = vst [vmem:[#allocation93_spill] sm:$0xff] %v11259_v8  ;;  %7353 = vmatprep.mubr.msk.bf16.mxu1 %vm7892_vm2, %v13656_v37  ;;  %v14206_v8 = vld [vmem:[#allocation70_spill] sm:$0xff] }
 0x3c7   :  { %v7151_v26 = vpop.f32.mrf.mxu1 }
 0x3c8   :  { %v14205_v26 = vld [vmem:[#allocation9_spill] sm:$0xff] }
 0x3c9   :  { %v11267_v55 = vpop.f32.mrf.mxu1 }
 0x3ca   :  { %14199 = vst [vmem:[#allocation95_spill] sm:$0xff] %v11267_v55  ;;  %v14207_v55 = vpack.c.bf16 %v14205_v26, %v14206_v8 }
 0x3cb   :  { %v7152_v38 = vpop.f32.mrf.mxu1 }
 0x3cd   :  { %v11269_v6 = vpop.f32.mrf.mxu1  ;;  %7354 = vmatmul.mubr.msk.bf16.gmra.mxu1 %vm3289_vm5, %v14203_v1 }
 0x3ce   :  { %14200 = vst [vmem:[#allocation94_spill] sm:$0xff] %v11269_v6  ;;  %7357 = vmatprep.mubr.msk.bf16.mxu1 %vm7892_vm2, %v13656_v37  ;;  %v14209_v6 = vld [vmem:[#allocation71_spill] sm:$0xff] }
 0x3cf   :  { %v7155_v62 = vpop.f32.mrf.mxu1 }
 0x3d0   :  { %v14208_v62 = vld [vmem:[#allocation107_spill] sm:$0xff] }
 0x3d1   :  { %v11277_v39 = vpop.f32.mrf.mxu1 }
 0x3d2   :  { %14204 = vst [vmem:[#allocation97_spill] sm:$0xff] %v11277_v39  ;;  %v14210_v39 = vpack.c.bf16 %v14208_v62, %v14209_v6 }
 0x3d3   :  { %v7156_v35 = vpop.f32.mrf.mxu1 }
 0x3d5   :  { %v11279_v4 = vpop.f32.mrf.mxu1  ;;  %7358 = vmatmul.mubr.msk.bf16.gmra.mxu1 %vm3289_vm5, %v14207_v55 }
 0x3d6   :  { %7361 = vmatprep.mubr.msk.bf16.mxu1 %vm7892_vm2, %v13656_v37 }
 0x3d7   :  { %v7159_v22 = vpop.f32.mrf.mxu1 }
 0x3d8   :  { %v14211_v22 = vpack.c.bf16 %v10736_v9, %v10732_v15 }
 0x3d9   :  { %v11287_v38 = vpop.f32.mrf.mxu1 }
 0x3db   :  { %v7160_v1 = vpop.f32.mrf.mxu1 }
 0x3dd   :  { %v11289_v18 = vpop.f32.mrf.mxu1  ;;  %7362 = vmatmul.mubr.msk.bf16.gmra.mxu1 %vm3289_vm5, %v14210_v39  ;;  %v7838_v39 = vld [vmem:[%s13196_s5] sm:$0xff]  }
 0x3de   :  { %7365 = vmatprep.mubr.msk.bf16.mxu1 %vm7892_vm2, %v13656_v37  ;;  %7380 = vmatpush3.bf16.msra.mxu0 %v7838_v39 }
 0x3df   :  { %v7163_v8 = vpop.f32.mrf.mxu1  ;;  %7585 = vmatprep.subr.bf16.mxu0 %v13656_v37 }
 0x3e1   :  { %v11297_v35 = vpop.f32.mrf.mxu1 }
 0x3e3   :  { %v7164_v55 = vpop.f32.mrf.mxu1 }
 0x3e4   :  { %v14213_v55 = vpack.c.bf16 %v10769_v36, %v10765_v52  ;;  %v14215_v52 = vpack.c.bf16 %v10810_v57, %v10806_v59  ;;  %v3722_v59 = vadd.f32 %v10824_v45, %v11068_v27 }
 0x3e5   :  { %v11299_v26 = vpop.f32.mrf.mxu1  ;;  %7366 = vmatmul.mubr.msk.bf16.gmra.mxu1 %vm3289_vm5, %v14211_v22 }
 0x3e6   :  { %7369 = vmatprep.mubr.msk.bf16.mxu1 %vm7892_vm2, %v13656_v37 }
 0x3e7   :  { %v7167_v6 = vpop.f32.mrf.mxu1 }
 0x3e8   :  { %v3714_v6 = vadd.f32 %v10792_v53, %v11056_v16 }
 0x3e9   :  { %v11307_v1 = vpop.f32.mrf.mxu1 }
 0x3eb   :  { %v7168_v62 = vpop.f32.mrf.mxu1 }
 0x3ec   :  { %v11328_v62 = vld [vmem:[%s13197_s4] ss:$0 sm:$0xff] }
 0x3ed   :  { %v11312_v8 = vpop.f32.mrf.mxu1  ;;  %7370 = vmatmul.mubr.msk.bf16.gmra.mxu1 %vm3289_vm5, %v14213_v55 }
 0x3ee   :  { %14212 = vst [vmem:[#allocation96_spill] sm:$0xff] %v11312_v8  ;;  %7373 = vmatprep.mubr.msk.bf16.mxu1 %vm7892_vm2, %v13656_v37 }
 0x3ef   :  { %v7171_v15 = vpop.f32.mrf.mxu1 }
 0x3f0   :  { %v3717_v15 = vadd.f32 %v10819_v12, %v11066_v58 }
 0x3f1   :  { %v11321_v9 = vpop.f32.mrf.mxu1 }
 0x3f2   :  { %14214 = vst [vmem:[#allocation66_spill] sm:$0xff] %v11321_v9 }
 0x3f3   :  { %v7172_v22 = vpop.f32.mrf.mxu1 }
 0x3f5   :  { %v4055_v39 = vpop.f32.mrf.mxu1  ;;  %7374 = vmatmul.mubr.msk.bf16.gmra.mxu1 %vm3289_vm5, %v14215_v52  ;;  %vm4782_vm5 = vcmask 261120  }
 0x3f6   :  { %v4254_v36 = vadd.f32 %v4055_v39, %v3714_v6  ;;  %7485 = vmatprep.mubr.msk.bf16.mxu1 %vm7892_vm2, %v13656_v37 }
 0x3f7   :  { %v7279_v55 = vpop.f32.mrf.mxu1 }
 0x3f8   :  { %v4311_v53 = vadd.f32 %v11328_v62, %v4254_v36  ;;  %v3725_v55 = vadd.f32 %v10830_v19, %v11076_v2 }
 0x3f9   :  { %v4058_v16 = vpop.f32.mrf.mxu1 }
 0x3fa   :  { %v4255_v22 = vadd.f32 %v4058_v16, %v3717_v15  ;;  %v11339_v9 = vmax.f32 %v4311_v53, 0.0 }
 0x3fb   :  { %v7280_v8 = vpop.f32.mrf.mxu1 }
 0x3fc   :  { %v4312_v57 = vadd.f32 %v11328_v62, %v4255_v22  ;;  %v13571_v12 = vrot.slane %v11339_v9, 7  ;;  %v13570_v45 = vrot.slane %v11339_v9, 1  ;;  %v3730_v22 = vadd.f32 %v10834_v32, %v11078_v25 }
 0x3fd   :  { %v4063_v6 = vpop.f32.mrf.mxu1 }
 0x3fe   :  { %v4362_v39 = vmax.f32 %v4312_v57, 0.0  ;;  %v4256_v52 = vadd.f32 %v4063_v6, %v3722_v59 }
 0x3ff   :  { %v7283_v58 = vpop.f32.mrf.mxu1 }
 0x400   :  { %v4412_v36 = vrot.slane %v4362_v39, 7  ;;  %v4562_v15 = vrot.slane %v4362_v39, 1  ;;  %v4711_v53 = vpack.c.bf16 %v4362_v39, %v11339_v9  ;;  %v4313_v8 = vadd.f32 %v11328_v62, %v4256_v52 }
 0x401   :  { %v4066_v16 = vpop.f32.mrf.mxu1 }
 0x402   :  { %v11354_v27 = vsel %vm14216_vm13, %v13571_v12, %v4412_v36  ;;  %v4363_v19 = vmax.f32 %v4313_v8, 0.0  ;;  %v4257_v2 = vadd.f32 %v4066_v16, %v3725_v55  ;;  %7486 = vmatmul.mubr.msk.bf16.vlgmr.msra.gmra.mxu1 %vm4782_vm5, %v4711_v53  ;;  %v4659_v57 = vsel %vm1386_vm4, %v13570_v45, %v4562_v15  ;;  %vm14222_vm13 = vmmov %vm14217_vm10 }
 0x403   :  { %v7284_v59 = vpop.f32.mrf.mxu1  ;;  %7489 = vmatprep.mubr.msk.bf16.mxu1 %vm7892_vm2, %v13656_v37  ;;  %v3733_v8 = vadd.f32 %v10840_v34, %v11086_v42  ;;  %v11374_v16 = vsel %vm14218_vm3, 0.0, %v4659_v57 }
 0x404   :  { %v4413_v6 = vrot.slane %v4363_v19, 7  ;;  %v4563_v39 = vrot.slane %v4363_v19, 1  ;;  %v4314_v52 = vadd.f32 %v11328_v62, %v4257_v2  ;;  %14219 = vst [vmem:[#allocation67_spill] sm:$0xff] %v11374_v16 }
 0x405   :  { %v4071_v58 = vpop.f32.mrf.mxu1 }
 0x406   :  { %v4508_v55 = vsel %vm14217_vm10, %v4412_v36, %v4413_v6  ;;  %v4658_v32 = vsel %vm1386_vm4, %v4562_v15, %v4563_v39  ;;  %v4364_v25 = vmax.f32 %v4314_v52, 0.0  ;;  %v4258_v53 = vadd.f32 %v4071_v58, %v3730_v22 }
 0x407   :  { %v11378_v59 = vsel %vm14220_vm1, 0.0, %v4658_v32  ;;  %v7287_v2 = vpop.f32.mrf.mxu1  ;;  %vm14228_vm1 = vmmov %vm14222_vm13 }
 0x408   :  { %14221 = vst [vmem:[#allocation98_spill] sm:$0xff] %v11378_v59  ;;  %v4414_v45 = vrot.slane %v4364_v25, 7  ;;  %v4564_v12 = vrot.slane %v4364_v25, 1  ;;  %v4712_v15 = vpack.c.bf16 %v4364_v25, %v4363_v19  ;;  %v4315_v22 = vadd.f32 %v11328_v62, %v4258_v53  ;;  %v14223_v2 = vld [vmem:[#allocation12_spill] sm:$0xff]  ;;  %v14226_v25 = vld [vmem:[#allocation13_spill] sm:$0xff] }
 0x409   :  { %v4074_v52 = vpop.f32.mrf.mxu1  ;;  %vm14224_vm10 = vcmp.eq.s32.totalorder %v14223_v2, 0  ;;  %vm14227_vm3 = vcmp.eq.s32.totalorder %v14226_v25, 0 }
 0x40a   :  { %v4507_v34 = vsel %vm14222_vm13, %v4413_v6, %v4414_v45  ;;  %v4657_v42 = vsel %vm1386_vm4, %v4563_v39, %v4564_v12  ;;  %v4259_v57 = vadd.f32 %v4074_v52, %v3733_v8  ;;  %7490 = vmatmul.mubr.msk.bf16.gmra.mxu1 %vm4782_vm5, %v4712_v15  ;;  %v4365_v58 = vmax.f32 %v4315_v22, 0.0 }
 0x40b   :  { %v7288_v32 = vpop.f32.mrf.mxu1  ;;  %7493 = vmatprep.mubr.msk.bf16.mxu1 %vm7892_vm2, %v13656_v37  ;;  %v11392_v19 = vsel %vm14224_vm10, 0.0, %v4508_v55  ;;  %v11396_v53 = vsel %vm14227_vm3, 0.0, %v4507_v34  ;;  %v3738_v6 = vadd.f32 %v10844_v56, %v11088_v33  ;;  %v3741_v55 = vadd.f32 %v10850_v13, %v11096_v60  ;;  %vm14233_vm3 = vmmov %vm14228_vm1 }
 0x40c   :  { %14225 = vst [vmem:[#allocation68_spill] sm:$0xff] %v11392_v19  ;;  %v4316_v39 = vadd.f32 %v11328_v62, %v4259_v57  ;;  %v4415_v15 = vrot.slane %v4365_v58, 7  ;;  %v4565_v22 = vrot.slane %v4365_v58, 1  ;;  %vm14229_vm13 = vcmp.eq.s32.totalorder %v14223_v2, 199  ;;  %v14236_v2 = vld [vmem:[#allocation17_spill] sm:$0xff] }
 0x40d   :  { %v4079_v52 = vpop.f32.mrf.mxu1  ;;  %vm14231_vm10 = vcmp.eq.s32.totalorder %v14226_v25, 199 }
 0x40e   :  { %v4366_v32 = vmax.f32 %v4316_v39, 0.0  ;;  %v4260_v36 = vadd.f32 %v4079_v52, %v3738_v6  ;;  %v4506_v34 = vsel %vm14228_vm1, %v4414_v45, %v4415_v15  ;;  %v4656_v16 = vsel %vm1386_vm4, %v4564_v12, %v4565_v22 }
 0x40f   :  { %v7291_v56 = vpop.f32.mrf.mxu1  ;;  %v11412_v39 = vsel %vm14229_vm13, 0.0, %v4657_v42  ;;  %v11416_v13 = vsel %vm14231_vm10, 0.0, %v4656_v16  ;;  %v14234_v42 = vld [vmem:[#allocation16_spill] sm:$0xff]  ;;  %vm14237_vm13 = vcmp.eq.s32.totalorder %v14236_v2, 0  ;;  %vm14238_vm10 = vmmov %vm14233_vm3 }
 0x410   :  { %v4416_v33 = vrot.slane %v4366_v32, 7  ;;  %v4566_v57 = vrot.slane %v4366_v32, 1  ;;  %v4713_v59 = vpack.c.bf16 %v4366_v32, %v4365_v58  ;;  %v4317_v8 = vadd.f32 %v11328_v62, %v4260_v36  ;;  %14230 = vst [vmem:[#allocation25_spill] sm:$0xff] %v11412_v39  ;;  %14232 = vst [vmem:[#allocation69_spill] sm:$0xff] %v11416_v13 }
 0x411   :  { %v4082_v19 = vpop.f32.mrf.mxu1  ;;  %v3746_v36 = vadd.f32 %v10854_v48, %v11098_v30  ;;  %vm14235_vm1 = vcmp.eq.s32.totalorder %v14234_v42, 0 }
 0x412   :  { %v4505_v60 = vsel %vm14233_vm3, %v4415_v15, %v4416_v33  ;;  %v4655_v12 = vsel %vm1386_vm4, %v4565_v22, %v4566_v57  ;;  %v4367_v45 = vmax.f32 %v4317_v8, 0.0  ;;  %v4261_v6 = vadd.f32 %v4082_v19, %v3741_v55  ;;  %7494 = vmatmul.mubr.msk.bf16.gmra.mxu1 %vm4782_vm5, %v4713_v59 }
 0x413   :  { %v7292_v58 = vpop.f32.mrf.mxu1  ;;  %7497 = vmatprep.mubr.msk.bf16.mxu1 %vm7892_vm2, %v13656_v37  ;;  %v11429_v16 = vsel %vm14235_vm1, 0.0, %v4506_v34  ;;  %v11433_v25 = vsel %vm14237_vm13, 0.0, %v4505_v60  ;;  %v3749_v34 = vadd.f32 %v10860_v28, %v11106_v7  ;;  %vm14239_vm3 = vcmp.eq.s32.totalorder %v14234_v42, 199  ;;  %vm14243_vm13 = vmmov %vm14238_vm10 }
 0x414   :  { %v4417_v8 = vrot.slane %v4367_v45, 7  ;;  %v4567_v59 = vrot.slane %v4367_v45, 1  ;;  %v4318_v15 = vadd.f32 %v11328_v62, %v4261_v6  ;;  %v11448_v60 = vsel %vm14239_vm3, 0.0, %v4655_v12 }
 0x415   :  { %v4087_v30 = vpop.f32.mrf.mxu1  ;;  %14240 = vst [vmem:[#allocation42_spill] sm:$0xff] %v11448_v60  ;;  %vm14241_vm1 = vcmp.eq.s32.totalorder %v14236_v2, 199  ;;  %v3754_v2 = vadd.f32 %v10864_v24, %v11108_v14 }
 0x416   :  { %v4504_v22 = vsel %vm14238_vm10, %v4416_v33, %v4417_v8  ;;  %v4654_v52 = vsel %vm1386_vm4, %v4566_v57, %v4567_v59  ;;  %v4368_v32 = vmax.f32 %v4318_v15, 0.0  ;;  %v4262_v55 = vadd.f32 %v4087_v30, %v3746_v36  ;;  %v14244_v15 = vld [vmem:[#allocation20_spill] sm:$0xff] }
 0x417   :  { %v7295_v56 = vpop.f32.mrf.mxu1  ;;  %v11452_v6 = vsel %vm14241_vm1, 0.0, %v4654_v52  ;;  %vm14245_vm10 = vcmp.eq.s32.totalorder %v14244_v15, 0  ;;  %v14246_v52 = vld [vmem:[#allocation21_spill] sm:$0xff]  ;;  %vm14248_vm1 = vmmov %vm14243_vm13 }
 0x418   :  { %14242 = vst [vmem:[#allocation30_spill] sm:$0xff] %v11452_v6  ;;  %v4418_v58 = vrot.slane %v4368_v32, 7  ;;  %v4568_v19 = vrot.slane %v4368_v32, 1  ;;  %v4714_v33 = vpack.c.bf16 %v4368_v32, %v4367_v45  ;;  %v4319_v48 = vadd.f32 %v11328_v62, %v4262_v55 }
 0x419   :  { %v4090_v57 = vpop.f32.mrf.mxu1  ;;  %v11468_v30 = vsel %vm14245_vm10, 0.0, %v4504_v22  ;;  %vm14247_vm3 = vcmp.eq.s32.totalorder %v14246_v52, 0  ;;  %vm14251_vm10 = vcmp.eq.s32.totalorder %v14246_v52, 199  ;;  %v3762_v52 = vadd.f32 %v10874_v54, %v11118_v46 }
 0x41a   :  { %v4503_v28 = vsel %vm14243_vm13, %v4417_v8, %v4418_v58  ;;  %v4653_v7 = vsel %vm1386_vm4, %v4567_v59, %v4568_v19  ;;  %v4369_v12 = vmax.f32 %v4319_v48, 0.0  ;;  %v4263_v42 = vadd.f32 %v4090_v57, %v3749_v34  ;;  %7498 = vmatmul.mubr.msk.bf16.gmra.mxu1 %vm4782_vm5, %v4714_v33 }
 0x41b   :  { %v7296_v45 = vpop.f32.mrf.mxu1  ;;  %7501 = vmatprep.mubr.msk.bf16.mxu1 %vm7892_vm2, %v13656_v37  ;;  %v11472_v8 = vsel %vm14247_vm3, 0.0, %v4503_v28  ;;  %v3757_v33 = vadd.f32 %v10870_v49, %v11116_v51  ;;  %vm14249_vm13 = vcmp.eq.s32.totalorder %v14244_v15, 199  ;;  %vm14253_vm3 = vmmov %vm14248_vm1 }
 0x41c   :  { %v4419_v59 = vrot.slane %v4369_v12, 7  ;;  %v4569_v48 = vrot.slane %v4369_v12, 1  ;;  %v4320_v32 = vadd.f32 %v11328_v62, %v4263_v42  ;;  %v11485_v28 = vsel %vm14249_vm13, 0.0, %v4653_v7 }
 0x41d   :  { %v4095_v24 = vpop.f32.mrf.mxu1  ;;  %14250 = vst [vmem:[#allocation99_spill] sm:$0xff] %v11485_v28 }
 0x41e   :  { %v4502_v14 = vsel %vm14248_vm1, %v4418_v58, %v4419_v59  ;;  %v4652_v34 = vsel %vm1386_vm4, %v4568_v19, %v4569_v48  ;;  %v4370_v22 = vmax.f32 %v4320_v32, 0.0  ;;  %v4264_v56 = vadd.f32 %v4095_v24, %v3754_v2  ;;  %v14254_v32 = vld [vmem:[#allocation24_spill] sm:$0xff] }
 0x41f   :  { %v7299_v57 = vpop.f32.mrf.mxu1  ;;  %v11489_v42 = vsel %vm14251_vm10, 0.0, %v4652_v34  ;;  %vm14255_vm1 = vcmp.eq.s32.totalorder %v14254_v32, 0  ;;  %v14256_v34 = vld [vmem:[#allocation26_spill] sm:$0xff]  ;;  %vm14258_vm10 = vmmov %vm14253_vm3 }
 0x420   :  { %14252 = vst [vmem:[#allocation50_spill] sm:$0xff] %v11489_v42  ;;  %v4420_v45 = vrot.slane %v4370_v22, 7  ;;  %v4570_v36 = vrot.slane %v4370_v22, 1  ;;  %v4715_v58 = vpack.c.bf16 %v4370_v22, %v4369_v12  ;;  %v4321_v55 = vadd.f32 %v11328_v62, %v4264_v56 }
 0x421   :  { %v4098_v19 = vpop.f32.mrf.mxu1  ;;  %v11505_v24 = vsel %vm14255_vm1, 0.0, %v4502_v14  ;;  %vm14257_vm13 = vcmp.eq.s32.totalorder %v14256_v34, 0  ;;  %v3770_v34 = vadd.f32 %v10884_v50, %v11128_v61  ;;  %vm14265_vm1 = vmmov %vm14253_vm3 }
 0x422   :  { %v4501_v49 = vsel %vm14253_vm3, %v4419_v59, %v4420_v45  ;;  %v4651_v51 = vsel %vm1386_vm4, %v4569_v48, %v4570_v36  ;;  %v4371_v7 = vmax.f32 %v4321_v55, 0.0  ;;  %v4265_v15 = vadd.f32 %v4098_v19, %v3757_v33  ;;  %7502 = vmatmul.mubr.msk.bf16.gmra.mxu1 %vm4782_vm5, %v4715_v58 }
 0x423   :  { %v7300_v12 = vpop.f32.mrf.mxu1  ;;  %7505 = vmatprep.mubr.msk.bf16.mxu1 %vm7892_vm2, %v13656_v37  ;;  %v11509_v59 = vsel %vm14257_vm13, 0.0, %v4501_v49  ;;  %v3765_v58 = vadd.f32 %v10880_v41, %v11126_v20  ;;  %v11522_v49 = vsel %vm1043_vm6, 0.0, %v4651_v51  ;;  %vm14268_vm13 = vmmov %vm14265_vm1 }
 0x424   :  { %v4421_v48 = vrot.slane %v4371_v7, 7  ;;  %v4571_v55 = vrot.slane %v4371_v7, 1  ;;  %v4322_v22 = vadd.f32 %v11328_v62, %v4265_v15  ;;  %14259 = vst [vmem:[#allocation55_spill] sm:$0xff] %v11522_v49 }
 0x425   :  { %v4103_v54 = vpop.f32.mrf.mxu1 }
 0x426   :  { %v4500_v46 = vsel %vm14258_vm10, %v4420_v45, %v4421_v48  ;;  %v4650_v33 = vsel %vm1386_vm4, %v4570_v36, %v4571_v55  ;;  %v4372_v14 = vmax.f32 %v4322_v22, 0.0  ;;  %v4266_v57 = vadd.f32 %v4103_v54, %v3762_v52  ;;  %v14261_v22 = vld [vmem:[#allocation29_spill] sm:$0xff]  ;;  %vm14273_vm10 = vmmov %vm14265_vm1 }
 0x427   :  { %v7303_v19 = vpop.f32.mrf.mxu1  ;;  %v11526_v15 = vsel %vm1044_vm9, 0.0, %v4650_v33  ;;  %vm14262_vm9 = vcmp.eq.s32.totalorder %v14261_v22, 0  ;;  %v14263_v33 = vld [vmem:[#allocation31_spill] sm:$0xff] }
 0x428   :  { %14260 = vst [vmem:[#allocation34_spill] sm:$0xff] %v11526_v15  ;;  %v4422_v12 = vrot.slane %v4372_v14, 7  ;;  %v4572_v2 = vrot.slane %v4372_v14, 1  ;;  %v4716_v45 = vpack.c.bf16 %v4372_v14, %v4371_v7  ;;  %v4323_v56 = vadd.f32 %v11328_v62, %v4266_v57 }
 0x429   :  { %v4106_v36 = vpop.f32.mrf.mxu1  ;;  %v11542_v54 = vsel %vm14262_vm9, 0.0, %v4500_v46  ;;  %vm14264_vm6 = vcmp.eq.s32.totalorder %v14263_v33, 0  ;;  %v3778_v33 = vadd.f32 %v10894_v31, %v11138_v63  ;;  %vm14281_vm9 = vmmov %vm14265_vm1 }
 0x42a   :  { %v4499_v41 = vsel %vm14253_vm3, %v4421_v48, %v4422_v12  ;;  %v4649_v20 = vsel %vm1386_vm4, %v4571_v55, %v4572_v2  ;;  %v4373_v51 = vmax.f32 %v4323_v56, 0.0  ;;  %v4267_v32 = vadd.f32 %v4106_v36, %v3765_v58  ;;  %7506 = vmatmul.mubr.msk.bf16.gmra.mxu1 %vm4782_vm5, %v4716_v45  ;;  %vm14276_vm3 = vmmov %vm14265_vm1 }
 0x42b   :  { %v7304_v7 = vpop.f32.mrf.mxu1  ;;  %7509 = vmatprep.mubr.msk.bf16.mxu1 %vm7892_vm2, %v13656_v37  ;;  %v11546_v48 = vsel %vm14264_vm6, 0.0, %v4499_v41  ;;  %v3773_v45 = vadd.f32 %v10890_v23, %v11136_v10  ;;  %v11559_v41 = vsel %vm1045_vm11, 0.0, %v4649_v20  ;;  %vm14284_vm6 = vmmov %vm14265_vm1 }
 0x42c   :  { %v4423_v55 = vrot.slane %v4373_v51, 7  ;;  %v4573_v56 = vrot.slane %v4373_v51, 1  ;;  %v4324_v14 = vadd.f32 %v11328_v62, %v4267_v32  ;;  %14266 = vst [vmem:[#allocation40_spill] sm:$0xff] %v11559_v41 }
 0x42d   :  { %v4111_v50 = vpop.f32.mrf.mxu1 }
 0x42e   :  { %v4498_v61 = vsel %vm14265_vm1, %v4422_v12, %v4423_v55  ;;  %v4648_v58 = vsel %vm1386_vm4, %v4572_v2, %v4573_v56  ;;  %v4374_v46 = vmax.f32 %v4324_v14, 0.0  ;;  %v4268_v19 = vadd.f32 %v4111_v50, %v3770_v34  ;;  %v14269_v14 = vld [vmem:[#allocation35_spill] sm:$0xff] }
 0x42f   :  { %v7307_v36 = vpop.f32.mrf.mxu1  ;;  %v11563_v32 = vsel %vm1046_vm15, 0.0, %v4648_v58  ;;  %vm14270_vm15 = vcmp.eq.s32.totalorder %v14269_v14, 0  ;;  %v14271_v58 = vld [vmem:[#allocation36_spill] sm:$0xff] }
 0x430   :  { %14267 = vst [vmem:[#allocation47_spill] sm:$0xff] %v11563_v32  ;;  %v4424_v7 = vrot.slane %v4374_v46, 7  ;;  %v4574_v52 = vrot.slane %v4374_v46, 1  ;;  %v4717_v12 = vpack.c.bf16 %v4374_v46, %v4373_v51  ;;  %v4325_v57 = vadd.f32 %v11328_v62, %v4268_v19 }
 0x431   :  { %v4114_v2 = vpop.f32.mrf.mxu1  ;;  %v11579_v50 = vsel %vm14270_vm15, 0.0, %v4498_v61  ;;  %vm14272_vm11 = vcmp.eq.s32.totalorder %v14271_v58, 0  ;;  %v3786_v58 = vadd.f32 %v10904_v47, %v11148_v43  ;;  %vm14294_vm15 = vmmov %vm14265_vm1 }
 0x432   :  { %v4497_v23 = vsel %vm14268_vm13, %v4423_v55, %v4424_v7  ;;  %v4647_v10 = vsel %vm1386_vm4, %v4573_v56, %v4574_v52  ;;  %v4375_v20 = vmax.f32 %v4325_v57, 0.0  ;;  %v4269_v22 = vadd.f32 %v4114_v2, %v3773_v45  ;;  %7510 = vmatmul.mubr.msk.bf16.gmra.mxu1 %vm4782_vm5, %v4717_v12 }
 0x433   :  { %v7308_v51 = vpop.f32.mrf.mxu1  ;;  %7513 = vmatprep.mubr.msk.bf16.mxu1 %vm7892_vm2, %v13656_v37  ;;  %v11583_v55 = vsel %vm14272_vm11, 0.0, %v4497_v23  ;;  %v3781_v12 = vadd.f32 %v10900_v21, %v11146_v0  ;;  %v11596_v23 = vsel %vm1047_vm8, 0.0, %v4647_v10 }
 0x434   :  { %v4425_v56 = vrot.slane %v4375_v20, 7  ;;  %v4575_v57 = vrot.slane %v4375_v20, 1  ;;  %v4326_v46 = vadd.f32 %v11328_v62, %v4269_v22  ;;  %14274 = vst [vmem:[#allocation103_spill] sm:$0xff] %v11596_v23 }
 0x435   :  { %v4119_v31 = vpop.f32.mrf.mxu1 }
 0x436   :  { %v4496_v63 = vsel %vm14273_vm10, %v4424_v7, %v4425_v56  ;;  %v4646_v45 = vsel %vm1386_vm4, %v4574_v52, %v4575_v57  ;;  %v4376_v61 = vmax.f32 %v4326_v46, 0.0  ;;  %v4270_v36 = vadd.f32 %v4119_v31, %v3778_v33  ;;  %v14277_v46 = vld [vmem:[#allocation39_spill] sm:$0xff]  ;;  %vm14301_vm10 = vmmov %vm14265_vm1 }
 0x437   :  { %v7311_v2 = vpop.f32.mrf.mxu1  ;;  %v11600_v22 = vsel %vm1048_vm0, 0.0, %v4646_v45  ;;  %vm14278_vm0 = vcmp.eq.s32.totalorder %v14277_v46, 0  ;;  %v14279_v45 = vld [vmem:[#allocation41_spill] sm:$0xff] }
 0x438   :  { %14275 = vst [vmem:[#allocation3_spill] sm:$0xff] %v11600_v22  ;;  %v4426_v51 = vrot.slane %v4376_v61, 7  ;;  %v4576_v34 = vrot.slane %v4376_v61, 1  ;;  %v4718_v7 = vpack.c.bf16 %v4376_v61, %v4375_v20  ;;  %v4327_v19 = vadd.f32 %v11328_v62, %v4270_v36 }
 0x439   :  { %v4122_v52 = vpop.f32.mrf.mxu1  ;;  %v11616_v31 = vsel %vm14278_vm0, 0.0, %v4496_v63  ;;  %vm14280_vm8 = vcmp.eq.s32.totalorder %v14279_v45, 0  ;;  %v3794_v45 = vadd.f32 %v10914_v3, %v11161_v17 }
 0x43a   :  { %v4495_v21 = vsel %vm14276_vm3, %v4425_v56, %v4426_v51  ;;  %v4645_v0 = vsel %vm1386_vm4, %v4575_v57, %v4576_v34  ;;  %v4377_v10 = vmax.f32 %v4327_v19, 0.0  ;;  %v4271_v14 = vadd.f32 %v4122_v52, %v3781_v12  ;;  %7514 = vmatmul.mubr.msk.bf16.gmra.mxu1 %vm4782_vm5, %v4718_v7 }
 0x43b   :  { %v7312_v20 = vpop.f32.mrf.mxu1  ;;  %7517 = vmatprep.mubr.msk.bf16.mxu1 %vm7892_vm2, %v13656_v37  ;;  %v11620_v56 = vsel %vm14280_vm8, 0.0, %v4495_v21  ;;  %v3789_v7 = vadd.f32 %v10910_v44, %v11156_v40  ;;  %v11633_v21 = vsel %vm1049_vm12, 0.0, %v4645_v0  ;;  %vm14308_vm8 = vmmov %vm14265_vm1 }
 0x43c   :  { %v4427_v57 = vrot.slane %v4377_v10, 7  ;;  %v4577_v19 = vrot.slane %v4377_v10, 1  ;;  %v4328_v61 = vadd.f32 %v11328_v62, %v4271_v14  ;;  %14282 = vst [vmem:[#allocation6_spill] sm:$0xff] %v11633_v21 }
 0x43d   :  { %v4127_v47 = vpop.f32.mrf.mxu1 }
 0x43e   :  { %v4494_v43 = vsel %vm14281_vm9, %v4426_v51, %v4427_v57  ;;  %v4644_v12 = vsel %vm1386_vm4, %v4576_v34, %v4577_v19  ;;  %v4378_v63 = vmax.f32 %v4328_v61, 0.0  ;;  %v4272_v2 = vadd.f32 %v4127_v47, %v3786_v58  ;;  %v14285_v61 = vld [vmem:[#allocation45_spill] sm:$0xff] }
 0x43f   :  { %v7315_v52 = vpop.f32.mrf.mxu1  ;;  %v11637_v14 = vsel %vm1050_vm7, 0.0, %v4644_v12  ;;  %vm14286_vm7 = vcmp.eq.s32.totalorder %v14285_v61, 0  ;;  %v14287_v12 = vld [vmem:[#allocation46_spill] sm:$0xff]  ;;  %vm14291_vm13 = vcmp.eq.s32.totalorder %v14285_v61, 199 }
 0x440   :  { %14283 = vst [vmem:[#allocation5_spill] sm:$0xff] %v11637_v14  ;;  %v4428_v20 = vrot.slane %v4378_v63, 7  ;;  %v4578_v33 = vrot.slane %v4378_v63, 1  ;;  %v4719_v51 = vpack.c.bf16 %v4378_v63, %v4377_v10  ;;  %v4329_v36 = vadd.f32 %v11328_v62, %v4272_v2 }
 0x441   :  { %v4130_v34 = vpop.f32.mrf.mxu1  ;;  %v11653_v47 = vsel %vm14286_vm7, 0.0, %v4494_v43  ;;  %vm14288_vm12 = vcmp.eq.s32.totalorder %v14287_v12, 0  ;;  %v14295_v12 = vld [vmem:[#allocation77_spill] sm:$0xff]  ;;  %vm14315_vm7 = vmmov %vm14265_vm1 }
 0x442   :  { %v4493_v44 = vsel %vm14284_vm6, %v4427_v57, %v4428_v20  ;;  %v4643_v40 = vsel %vm1386_vm4, %v4577_v19, %v4578_v33  ;;  %v4379_v0 = vmax.f32 %v4329_v36, 0.0  ;;  %v4273_v46 = vadd.f32 %v4130_v34, %v3789_v7  ;;  %7518 = vmatmul.mubr.msk.bf16.gmra.mxu1 %vm4782_vm5, %v4719_v51  ;;  %v14289_v51 = vld [vmem:[#allocation8_spill] sm:$0xff]  ;;  %v14290_v34 = vld [vmem:[#allocation74_spill] sm:$0xff] }
 0x443   :  { %v7316_v10 = vpop.f32.mrf.mxu1  ;;  %7521 = vmatprep.mubr.msk.bf16.mxu1 %vm7892_vm2, %v13656_v37  ;;  %v11657_v57 = vsel %vm14288_vm12, 0.0, %v4493_v44  ;;  %v3797_v44 = vadd.f32 %v14290_v34, %v14289_v51  ;;  %v11670_v58 = vsel %vm14291_vm13, 0.0, %v4643_v40  ;;  %v14299_v34 = vld [vmem:[#allocation52_spill] sm:$0xff]  ;;  %vm14322_vm13 = vmmov %vm14315_vm7 }
 0x444   :  { %v4429_v19 = vrot.slane %v4379_v0, 7  ;;  %v4579_v36 = vrot.slane %v4379_v0, 1  ;;  %v4330_v63 = vadd.f32 %v11328_v62, %v4273_v46  ;;  %14292 = vst [vmem:[#allocation9_spill] sm:$0xff] %v11670_v58  ;;  %vm14300_vm11 = vcmp.eq.s32.totalorder %v14299_v34, 0 }
 0x445   :  { %v4135_v3 = vpop.f32.mrf.mxu1  ;;  %vm14306_vm0 = vcmp.eq.s32.totalorder %v14299_v34, 199  ;;  %v14309_v34 = vld [vmem:[#allocation78_spill] sm:$0xff] }
 0x446   :  { %v4492_v17 = vsel %vm14265_vm1, %v4428_v20, %v4429_v19  ;;  %v4642_v7 = vsel %vm1386_vm4, %v4578_v33, %v4579_v36  ;;  %v4380_v43 = vmax.f32 %v4330_v63, 0.0  ;;  %v4274_v52 = vadd.f32 %v4135_v3, %v3794_v45  ;;  %v14303_v45 = vld [vmem:[#allocation75_spill] sm:$0xff] }
 0x447   :  { %v7319_v10 = vpop.f32.mrf.mxu1  ;;  %v11674_v46 = vsel %vm1052_vm14, 0.0, %v4642_v7  ;;  %v14296_v7 = vld [vmem:[#allocation76_spill] sm:$0xff] }
 0x448   :  { %14293 = vst [vmem:[#allocation70_spill] sm:$0xff] %v11674_v46  ;;  %v4430_v2 = vrot.slane %v4380_v43, 7  ;;  %v4580_v21 = vrot.slane %v4380_v43, 1  ;;  %v4720_v20 = vpack.c.bf16 %v4380_v43, %v4379_v0  ;;  %v4331_v14 = vadd.f32 %v11328_v62, %v4274_v52  ;;  %v14297_v43 = vld [vmem:[#allocation51_spill] sm:$0xff] }
 0x449   :  { %v4138_v33 = vpop.f32.mrf.mxu1  ;;  %v3802_v51 = vadd.f32 %v14296_v7, %v14295_v12  ;;  %vm14298_vm14 = vcmp.eq.s32.totalorder %v14297_v43, 0  ;;  %vm14304_vm3 = vcmp.eq.s32.totalorder %v14297_v43, 199 }
 0x44a   :  { %v4491_v63 = vsel %vm14294_vm15, %v4429_v19, %v4430_v2  ;;  %v4641_v40 = vsel %vm1386_vm4, %v4579_v36, %v4580_v21  ;;  %v4381_v61 = vmax.f32 %v4331_v14, 0.0  ;;  %v4275_v3 = vadd.f32 %v4138_v33, %v3797_v44  ;;  %7522 = vmatmul.mubr.msk.bf16.gmra.mxu1 %vm4782_vm5, %v4720_v20 }
 0x44b   :  { %v7320_v0 = vpop.f32.mrf.mxu1  ;;  %7525 = vmatprep.mubr.msk.bf16.mxu1 %vm7892_vm2, %v13656_v37  ;;  %v11690_v52 = vsel %vm14298_vm14, 0.0, %v4492_v17  ;;  %v11694_v19 = vsel %vm14300_vm11, 0.0, %v4491_v63  ;;  %v11707_v46 = vsel %vm14304_vm3, 0.0, %v4641_v40  ;;  %vm14329_vm11 = vmmov %vm14315_vm7 }
 0x44c   :  { %v4431_v36 = vrot.slane %v4381_v61, 7  ;;  %v4581_v14 = vrot.slane %v4381_v61, 1  ;;  %v4332_v44 = vadd.f32 %v11328_v62, %v4275_v3  ;;  %v14302_v0 = vld [vmem:[#allocation79_spill] sm:$0xff]  ;;  %14305 = vst [vmem:[#allocation107_spill] sm:$0xff] %v11707_v46 }
 0x44d   :  { %v4143_v20 = vpop.f32.mrf.mxu1  ;;  %v3805_v63 = vadd.f32 %v14303_v45, %v14302_v0 }
 0x44e   :  { %v4490_v33 = vsel %vm14301_vm10, %v4430_v2, %v4431_v36  ;;  %v4640_v12 = vsel %vm1386_vm4, %v4580_v21, %v4581_v14  ;;  %v4382_v17 = vmax.f32 %v4332_v44, 0.0  ;;  %v4276_v7 = vadd.f32 %v4143_v20, %v3802_v51  ;;  %v14310_v44 = vld [vmem:[#allocation7_spill] sm:$0xff]  ;;  %v14317_v51 = vld [vmem:[#allocation108_spill] sm:$0xff] }
 0x44f   :  { %v7323_v58 = vpop.f32.mrf.mxu1  ;;  %v11711_v3 = vsel %vm14306_vm0, 0.0, %v4640_v12  ;;  %v3810_v20 = vadd.f32 %v14310_v44, %v14309_v34  ;;  %v14311_v12 = vld [vmem:[#allocation56_spill] sm:$0xff]  ;;  %vm14336_vm0 = vmmov %vm14315_vm7 }
 0x450   :  { %14307 = vst [vmem:[#allocation71_spill] sm:$0xff] %v11711_v3  ;;  %v4432_v10 = vrot.slane %v4382_v17, 7  ;;  %v4582_v23 = vrot.slane %v4382_v17, 1  ;;  %v4721_v2 = vpack.c.bf16 %v4382_v17, %v4381_v61  ;;  %v4333_v22 = vadd.f32 %v11328_v62, %v4276_v7  ;;  %v14313_v7 = vld [vmem:[#allocation57_spill] sm:$0xff] }
 0x451   :  { %v4146_v21 = vpop.f32.mrf.mxu1  ;;  %vm14312_vm9 = vcmp.eq.s32.totalorder %v14311_v12, 0  ;;  %vm14314_vm6 = vcmp.eq.s32.totalorder %v14313_v7, 0  ;;  %vm14318_vm12 = vcmp.eq.s32.totalorder %v14311_v12, 199  ;;  %vm14320_vm1 = vcmp.eq.s32.totalorder %v14313_v7, 199  ;;  %v14323_v7 = vld [vmem:[#allocation81_spill] sm:$0xff] }
 0x452   :  { %v4489_v58 = vsel %vm14308_vm8, %v4431_v36, %v4432_v10  ;;  %v4639_v45 = vsel %vm1386_vm4, %v4581_v14, %v4582_v23  ;;  %v4383_v40 = vmax.f32 %v4333_v22, 0.0  ;;  %v4277_v43 = vadd.f32 %v4146_v21, %v3805_v63  ;;  %7526 = vmatmul.mubr.msk.bf16.gmra.mxu1 %vm4782_vm5, %v4721_v2 }
 0x453   :  { %v7324_v61 = vpop.f32.mrf.mxu1  ;;  %7529 = vmatprep.mubr.msk.bf16.mxu1 %vm7892_vm2, %v13656_v37  ;;  %v11727_v17 = vsel %vm14312_vm9, 0.0, %v4490_v33  ;;  %v11731_v36 = vsel %vm14314_vm6, 0.0, %v4489_v58  ;;  %v11744_v3 = vsel %vm14318_vm12, 0.0, %v4639_v45  ;;  %vm14343_vm6 = vmmov %vm14336_vm0 }
 0x454   :  { %v4433_v14 = vrot.slane %v4383_v40, 7  ;;  %v4583_v22 = vrot.slane %v4383_v40, 1  ;;  %v4334_v0 = vadd.f32 %v11328_v62, %v4277_v43  ;;  %v14316_v61 = vld [vmem:[#allocation80_spill] sm:$0xff]  ;;  %14319 = vst [vmem:[#allocation12_spill] sm:$0xff] %v11744_v3 }
 0x455   :  { %v4151_v2 = vpop.f32.mrf.mxu1  ;;  %v3813_v58 = vadd.f32 %v14317_v51, %v14316_v61 }
 0x456   :  { %v4488_v21 = vsel %vm14315_vm7, %v4432_v10, %v4433_v14  ;;  %v4638_v34 = vsel %vm1386_vm4, %v4582_v23, %v4583_v22  ;;  %v4384_v33 = vmax.f32 %v4334_v0, 0.0  ;;  %v4278_v44 = vadd.f32 %v4151_v2, %v3810_v20  ;;  %v14324_v0 = vld [vmem:[#allocation109_spill] sm:$0xff]  ;;  %v14331_v20 = vld [vmem:[#allocation110_spill] sm:$0xff] }
 0x457   :  { %v7327_v46 = vpop.f32.mrf.mxu1  ;;  %v11748_v43 = vsel %vm14320_vm1, 0.0, %v4638_v34  ;;  %v3818_v2 = vadd.f32 %v14324_v0, %v14323_v7  ;;  %v14325_v34 = vld [vmem:[#allocation60_spill] sm:$0xff]  ;;  %vm14350_vm1 = vmmov %vm14336_vm0 }
 0x458   :  { %14321 = vst [vmem:[#allocation13_spill] sm:$0xff] %v11748_v43  ;;  %v4434_v63 = vrot.slane %v4384_v33, 7  ;;  %v4584_v41 = vrot.slane %v4384_v33, 1  ;;  %v4722_v10 = vpack.c.bf16 %v4384_v33, %v4383_v40  ;;  %v4335_v32 = vadd.f32 %v11328_v62, %v4278_v44  ;;  %v14327_v44 = vld [vmem:[#allocation61_spill] sm:$0xff] }
 0x459   :  { %v4154_v23 = vpop.f32.mrf.mxu1  ;;  %vm14326_vm15 = vcmp.eq.s32.totalorder %v14325_v34, 0  ;;  %vm14328_vm14 = vcmp.eq.s32.totalorder %v14327_v44, 0  ;;  %vm14332_vm10 = vcmp.eq.s32.totalorder %v14325_v34, 199  ;;  %vm14334_vm3 = vcmp.eq.s32.totalorder %v14327_v44, 199  ;;  %v14337_v44 = vld [vmem:[#allocation82_spill] sm:$0xff] }
 0x45a   :  { %v4487_v46 = vsel %vm14322_vm13, %v4433_v14, %v4434_v63  ;;  %v4637_v51 = vsel %vm1386_vm4, %v4583_v22, %v4584_v41  ;;  %v4385_v45 = vmax.f32 %v4335_v32, 0.0  ;;  %v4279_v12 = vadd.f32 %v4154_v23, %v3813_v58  ;;  %7530 = vmatmul.mubr.msk.bf16.gmra.mxu1 %vm4782_vm5, %v4722_v10 }
 0x45b   :  { %v7328_v40 = vpop.f32.mrf.mxu1  ;;  %7533 = vmatprep.mubr.msk.bf16.mxu1 %vm7892_vm2, %v13656_v37  ;;  %v11764_v33 = vsel %vm14326_vm15, 0.0, %v4488_v21  ;;  %v11768_v14 = vsel %vm14328_vm14, 0.0, %v4487_v46  ;;  %v11781_v43 = vsel %vm14332_vm10, 0.0, %v4637_v51  ;;  %vm14357_vm14 = vmmov %vm14336_vm0 }
 0x45c   :  { %v4435_v22 = vrot.slane %v4385_v45, 7  ;;  %v4585_v32 = vrot.slane %v4385_v45, 1  ;;  %v4336_v61 = vadd.f32 %v11328_v62, %v4279_v12  ;;  %v14330_v40 = vld [vmem:[#allocation83_spill] sm:$0xff]  ;;  %14333 = vst [vmem:[#allocation16_spill] sm:$0xff] %v11781_v43 }
 0x45d   :  { %v4159_v10 = vpop.f32.mrf.mxu1  ;;  %v3821_v46 = vadd.f32 %v14331_v20, %v14330_v40 }
 0x45e   :  { %v4486_v23 = vsel %vm14329_vm11, %v4434_v63, %v4435_v22  ;;  %v4636_v7 = vsel %vm1386_vm4, %v4584_v41, %v4585_v32  ;;  %v4386_v21 = vmax.f32 %v4336_v61, 0.0  ;;  %v4280_v0 = vadd.f32 %v4159_v10, %v3818_v2  ;;  %v14338_v61 = vld [vmem:[#allocation111_spill] sm:$0xff]  ;;  %v14345_v2 = vld [vmem:[#allocation112_spill] sm:$0xff] }
 0x45f   :  { %v7331_v3 = vpop.f32.mrf.mxu1  ;;  %v11785_v12 = vsel %vm14334_vm3, 0.0, %v4636_v7  ;;  %v3826_v10 = vadd.f32 %v14338_v61, %v14337_v44  ;;  %v14339_v7 = vld [vmem:[#allocation64_spill] sm:$0xff]  ;;  %vm14364_vm3 = vmmov %vm14336_vm0 }
 0x460   :  { %14335 = vst [vmem:[#allocation17_spill] sm:$0xff] %v11785_v12  ;;  %v4436_v58 = vrot.slane %v4386_v21, 7  ;;  %v4586_v49 = vrot.slane %v4386_v21, 1  ;;  %v4723_v63 = vpack.c.bf16 %v4386_v21, %v4385_v45  ;;  %v4337_v15 = vadd.f32 %v11328_v62, %v4280_v0  ;;  %v14341_v0 = vld [vmem:[#allocation65_spill] sm:$0xff] }
 0x461   :  { %v4162_v41 = vpop.f32.mrf.mxu1  ;;  %vm14340_vm8 = vcmp.eq.s32.totalorder %v14339_v7, 0  ;;  %vm14342_vm9 = vcmp.eq.s32.totalorder %v14341_v0, 0  ;;  %vm14346_vm7 = vcmp.eq.s32.totalorder %v14339_v7, 199  ;;  %vm14348_vm12 = vcmp.eq.s32.totalorder %v14341_v0, 199  ;;  %v14351_v0 = vld [vmem:[#allocation84_spill] sm:$0xff] }
 0x462   :  { %v4485_v3 = vsel %vm14336_vm0, %v4435_v22, %v4436_v58  ;;  %v4635_v20 = vsel %vm1386_vm4, %v4585_v32, %v4586_v49  ;;  %v4387_v51 = vmax.f32 %v4337_v15, 0.0  ;;  %v4281_v34 = vadd.f32 %v4162_v41, %v3821_v46  ;;  %7534 = vmatmul.mubr.msk.bf16.gmra.mxu1 %vm4782_vm5, %v4723_v63 }
 0x463   :  { %v7332_v45 = vpop.f32.mrf.mxu1  ;;  %7537 = vmatprep.mubr.msk.bf16.mxu1 %vm7892_vm2, %v13656_v37  ;;  %v11801_v21 = vsel %vm14340_vm8, 0.0, %v4486_v23  ;;  %v11805_v22 = vsel %vm14342_vm9, 0.0, %v4485_v3  ;;  %v11818_v12 = vsel %vm14346_vm7, 0.0, %v4635_v20  ;;  %vm14371_vm9 = vmmov %vm14350_vm1 }
 0x464   :  { %v4437_v32 = vrot.slane %v4387_v51, 7  ;;  %v4587_v15 = vrot.slane %v4387_v51, 1  ;;  %v4338_v40 = vadd.f32 %v11328_v62, %v4281_v34  ;;  %v14344_v45 = vld [vmem:[#allocation85_spill] sm:$0xff]  ;;  %14347 = vst [vmem:[#allocation20_spill] sm:$0xff] %v11818_v12 }
 0x465   :  { %v4167_v63 = vpop.f32.mrf.mxu1  ;;  %v3829_v3 = vadd.f32 %v14345_v2, %v14344_v45 }
 0x466   :  { %v4484_v41 = vsel %vm14343_vm6, %v4436_v58, %v4437_v32  ;;  %v4634_v44 = vsel %vm1386_vm4, %v4586_v49, %v4587_v15  ;;  %v4388_v23 = vmax.f32 %v4338_v40, 0.0  ;;  %v4282_v61 = vadd.f32 %v4167_v63, %v3826_v10  ;;  %v14352_v40 = vld [vmem:[#allocation113_spill] sm:$0xff]  ;;  %v14359_v10 = vld [vmem:[#allocation114_spill] sm:$0xff] }
 0x467   :  { %v7335_v43 = vpop.f32.mrf.mxu1  ;;  %v11822_v34 = vsel %vm14348_vm12, 0.0, %v4634_v44  ;;  %v3834_v63 = vadd.f32 %v14352_v40, %v14351_v0  ;;  %v14353_v44 = vld [vmem:[#allocation10_spill] sm:$0xff]  ;;  %vm14378_vm12 = vmmov %vm14350_vm1 }
 0x468   :  { %14349 = vst [vmem:[#allocation21_spill] sm:$0xff] %v11822_v34  ;;  %v4438_v46 = vrot.slane %v4388_v23, 7  ;;  %v4588_v28 = vrot.slane %v4388_v23, 1  ;;  %v4724_v58 = vpack.c.bf16 %v4388_v23, %v4387_v51  ;;  %v4339_v42 = vadd.f32 %v11328_v62, %v4282_v61  ;;  %v14355_v61 = vld [vmem:[#allocation11_spill] sm:$0xff] }
 0x469   :  { %v4170_v49 = vpop.f32.mrf.mxu1  ;;  %vm14354_vm13 = vcmp.eq.s32.totalorder %v14353_v44, 0  ;;  %vm14356_vm15 = vcmp.eq.s32.totalorder %v14355_v61, 0  ;;  %vm14360_vm11 = vcmp.eq.s32.totalorder %v14353_v44, 199  ;;  %vm14362_vm10 = vcmp.eq.s32.totalorder %v14355_v61, 199  ;;  %v14365_v61 = vld [vmem:[#allocation87_spill] sm:$0xff] }
 0x46a   :  { %v4483_v43 = vsel %vm14350_vm1, %v4437_v32, %v4438_v46  ;;  %v4633_v2 = vsel %vm1386_vm4, %v4587_v15, %v4588_v28  ;;  %v4389_v20 = vmax.f32 %v4339_v42, 0.0  ;;  %v4283_v7 = vadd.f32 %v4170_v49, %v3829_v3  ;;  %7538 = vmatmul.mubr.msk.bf16.gmra.mxu1 %vm4782_vm5, %v4724_v58 }
 0x46b   :  { %v7336_v51 = vpop.f32.mrf.mxu1  ;;  %7541 = vmatprep.mubr.msk.bf16.mxu1 %vm7892_vm2, %v13656_v37  ;;  %v11838_v23 = vsel %vm14354_vm13, 0.0, %v4484_v41  ;;  %v11842_v32 = vsel %vm14356_vm15, 0.0, %v4483_v43  ;;  %v11855_v34 = vsel %vm14360_vm11, 0.0, %v4633_v2  ;;  %vm14387_vm15 = vmmov %vm14364_vm3 }
 0x46c   :  { %v4439_v15 = vrot.slane %v4389_v20, 7  ;;  %v4589_v42 = vrot.slane %v4389_v20, 1  ;;  %v4340_v45 = vadd.f32 %v11328_v62, %v4283_v7  ;;  %v14358_v51 = vld [vmem:[#allocation86_spill] sm:$0xff]  ;;  %14361 = vst [vmem:[#allocation24_spill] sm:$0xff] %v11855_v34 }
 0x46d   :  { %v4175_v58 = vpop.f32.mrf.mxu1  ;;  %v3837_v43 = vadd.f32 %v14359_v10, %v14358_v51 }
 0x46e   :  { %v4482_v49 = vsel %vm14357_vm14, %v4438_v46, %v4439_v15  ;;  %v4632_v0 = vsel %vm1386_vm4, %v4588_v28, %v4589_v42  ;;  %v4390_v41 = vmax.f32 %v4340_v45, 0.0  ;;  %v4284_v40 = vadd.f32 %v4175_v58, %v3834_v63  ;;  %v14366_v45 = vld [vmem:[#allocation115_spill] sm:$0xff]  ;;  %v14373_v63 = vld [vmem:[#allocation116_spill] sm:$0xff] }
 0x46f   :  { %v7339_v12 = vpop.f32.mrf.mxu1  ;;  %v11859_v7 = vsel %vm14362_vm10, 0.0, %v4632_v0  ;;  %v3842_v58 = vadd.f32 %v14366_v45, %v14365_v61  ;;  %v14367_v0 = vld [vmem:[#allocation14_spill] sm:$0xff]  ;;  %vm14394_vm10 = vmmov %vm14364_vm3 }
 0x470   :  { %14363 = vst [vmem:[#allocation26_spill] sm:$0xff] %v11859_v7  ;;  %v4440_v3 = vrot.slane %v4390_v41, 7  ;;  %v4590_v60 = vrot.slane %v4390_v41, 1  ;;  %v4725_v46 = vpack.c.bf16 %v4390_v41, %v4389_v20  ;;  %v4341_v6 = vadd.f32 %v11328_v62, %v4284_v40  ;;  %v14369_v40 = vld [vmem:[#allocation15_spill] sm:$0xff] }
 0x471   :  { %v4178_v28 = vpop.f32.mrf.mxu1  ;;  %vm14368_vm0 = vcmp.eq.s32.totalorder %v14367_v0, 0  ;;  %vm14370_vm8 = vcmp.eq.s32.totalorder %v14369_v40, 0  ;;  %vm14374_vm6 = vcmp.eq.s32.totalorder %v14367_v0, 199  ;;  %vm14376_vm7 = vcmp.eq.s32.totalorder %v14369_v40, 199  ;;  %v14379_v40 = vld [vmem:[#allocation88_spill] sm:$0xff] }
 0x472   :  { %v4481_v12 = vsel %vm14364_vm3, %v4439_v15, %v4440_v3  ;;  %v4631_v10 = vsel %vm1386_vm4, %v4589_v42, %v4590_v60  ;;  %v4391_v2 = vmax.f32 %v4341_v6, 0.0  ;;  %v4285_v44 = vadd.f32 %v4178_v28, %v3837_v43  ;;  %7542 = vmatmul.mubr.msk.bf16.gmra.mxu1 %vm4782_vm5, %v4725_v46 }
 0x473   :  { %v7340_v20 = vpop.f32.mrf.mxu1  ;;  %7545 = vmatprep.mubr.msk.bf16.mxu1 %vm7892_vm2, %v13656_v37  ;;  %v11875_v41 = vsel %vm14368_vm0, 0.0, %v4482_v49  ;;  %v11879_v15 = vsel %vm14370_vm8, 0.0, %v4481_v12  ;;  %v11892_v7 = vsel %vm14374_vm6, 0.0, %v4631_v10  ;;  %vm14403_vm8 = vmmov %vm14371_vm9 }
 0x474   :  { %v4441_v42 = vrot.slane %v4391_v2, 7  ;;  %v4591_v6 = vrot.slane %v4391_v2, 1  ;;  %v4342_v51 = vadd.f32 %v11328_v62, %v4285_v44  ;;  %v14372_v20 = vld [vmem:[#allocation89_spill] sm:$0xff]  ;;  %14375 = vst [vmem:[#allocation29_spill] sm:$0xff] %v11892_v7 }
 0x475   :  { %v4183_v46 = vpop.f32.mrf.mxu1  ;;  %v3845_v12 = vadd.f32 %v14373_v63, %v14372_v20 }
 0x476   :  { %v4480_v28 = vsel %vm14371_vm9, %v4440_v3, %v4441_v42  ;;  %v4630_v61 = vsel %vm1386_vm4, %v4590_v60, %v4591_v6  ;;  %v4392_v49 = vmax.f32 %v4342_v51, 0.0  ;;  %v4286_v45 = vadd.f32 %v4183_v46, %v3842_v58  ;;  %v14380_v51 = vld [vmem:[#allocation117_spill] sm:$0xff]  ;;  %v14389_v58 = vld [vmem:[#allocation100_spill] sm:$0xff] }
 0x477   :  { %v7343_v34 = vpop.f32.mrf.mxu1  ;;  %v11896_v44 = vsel %vm14376_vm7, 0.0, %v4630_v61  ;;  %v3850_v46 = vadd.f32 %v14380_v51, %v14379_v40  ;;  %v14381_v61 = vld [vmem:[#allocation18_spill] sm:$0xff]  ;;  %vm14410_vm7 = vmmov %vm14403_vm8 }
 0x478   :  { %14377 = vst [vmem:[#allocation31_spill] sm:$0xff] %v11896_v44  ;;  %v4442_v43 = vrot.slane %v4392_v49, 7  ;;  %v4592_v39 = vrot.slane %v4392_v49, 1  ;;  %v4726_v3 = vpack.c.bf16 %v4392_v49, %v4391_v2  ;;  %v4343_v13 = vadd.f32 %v11328_v62, %v4286_v45  ;;  %v14384_v45 = vld [vmem:[#allocation19_spill] sm:$0xff] }
 0x479   :  { %v4186_v60 = vpop.f32.mrf.mxu1  ;;  %vm14382_vm1 = vcmp.eq.s32.totalorder %v14381_v61, 0  ;;  %vm14385_vm13 = vcmp.eq.s32.totalorder %v14384_v45, 0  ;;  %vm14390_vm14 = vcmp.eq.s32.totalorder %v14381_v61, 199  ;;  %vm14392_vm11 = vcmp.eq.s32.totalorder %v14384_v45, 199  ;;  %v14395_v45 = vld [vmem:[#allocation90_spill] sm:$0xff] }
 0x47a   :  { %v4479_v34 = vsel %vm14378_vm12, %v4441_v42, %v4442_v43  ;;  %v4629_v63 = vsel %vm1386_vm4, %v4591_v6, %v4592_v39  ;;  %v4393_v10 = vmax.f32 %v4343_v13, 0.0  ;;  %v4287_v0 = vadd.f32 %v4186_v60, %v3845_v12  ;;  %7546 = vmatmul.mubr.msk.bf16.gmra.mxu1 %vm4782_vm5, %v4726_v3 }
 0x47b   :  { %v7344_v2 = vpop.f32.mrf.mxu1  ;;  %7549 = vmatprep.mubr.msk.bf16.mxu1 %vm7892_vm2, %v13656_v37  ;;  %v11912_v49 = vsel %vm14382_vm1, 0.0, %v4480_v28  ;;  %v11916_v42 = vsel %vm14385_vm13, 0.0, %v4479_v34  ;;  %v11929_v44 = vsel %vm14390_vm14, 0.0, %v4629_v63  ;;  %vm14419_vm13 = vmmov %vm14410_vm7 }
 0x47c   :  { %14383 = vst [vmem:[#allocation35_spill] sm:$0xff] %v11912_v49  ;;  %14386 = vst [vmem:[#allocation36_spill] sm:$0xff] %v11916_v42  ;;  %v4443_v6 = vrot.slane %v4393_v10, 7  ;;  %v4593_v13 = vrot.slane %v4393_v10, 1  ;;  %v4344_v20 = vadd.f32 %v11328_v62, %v4287_v0  ;;  %v14388_v2 = vld [vmem:[#allocation91_spill] sm:$0xff] }
 0x47d   :  { %v4191_v3 = vpop.f32.mrf.mxu1  ;;  %v3853_v34 = vadd.f32 %v14389_v58, %v14388_v2  ;;  %14391 = vst [vmem:[#allocation39_spill] sm:$0xff] %v11929_v44 }
 0x47e   :  { %v4478_v60 = vsel %vm14387_vm15, %v4442_v43, %v4443_v6  ;;  %v4628_v40 = vsel %vm1386_vm4, %v4592_v39, %v4593_v13  ;;  %v4394_v28 = vmax.f32 %v4344_v20, 0.0  ;;  %v4288_v51 = vadd.f32 %v4191_v3, %v3850_v46  ;;  %v14396_v20 = vld [vmem:[#allocation118_spill] sm:$0xff] }
 0x47f   :  { %v7347_v7 = vpop.f32.mrf.mxu1  ;;  %v11933_v0 = vsel %vm14392_vm11, 0.0, %v4628_v40  ;;  %v3858_v3 = vadd.f32 %v14396_v20, %v14395_v45  ;;  %v14397_v40 = vld [vmem:[#allocation22_spill] sm:$0xff]  ;;  %vm14426_vm11 = vmmov %vm14410_vm7 }
 0x480   :  { %14393 = vst [vmem:[#allocation41_spill] sm:$0xff] %v11933_v0  ;;  %v4444_v12 = vrot.slane %v4394_v28, 7  ;;  %v4594_v49 = vrot.slane %v4394_v28, 1  ;;  %v4727_v43 = vpack.c.bf16 %v4394_v28, %v4393_v10  ;;  %v4345_v42 = vadd.f32 %v11328_v62, %v4288_v51  ;;  %v14400_v51 = vld [vmem:[#allocation23_spill] sm:$0xff]  ;;  %v14405_v46 = vld [vmem:[#allocation102_spill] sm:$0xff] }
 0x481   :  { %v4194_v39 = vpop.f32.mrf.mxu1  ;;  %vm14398_vm3 = vcmp.eq.s32.totalorder %v14397_v40, 0  ;;  %vm14401_vm0 = vcmp.eq.s32.totalorder %v14400_v51, 0  ;;  %vm14406_vm9 = vcmp.eq.s32.totalorder %v14397_v40, 199  ;;  %vm14408_vm6 = vcmp.eq.s32.totalorder %v14400_v51, 199 }
 0x482   :  { %v4477_v7 = vsel %vm14394_vm10, %v4443_v6, %v4444_v12  ;;  %v4627_v58 = vsel %vm1386_vm4, %v4593_v13, %v4594_v49  ;;  %v4395_v63 = vmax.f32 %v4345_v42, 0.0  ;;  %v4289_v61 = vadd.f32 %v4194_v39, %v3853_v34  ;;  %7550 = vmatmul.mubr.msk.bf16.gmra.mxu1 %vm4782_vm5, %v4727_v43 }
 0x483   :  { %v7348_v10 = vpop.f32.mrf.mxu1  ;;  %7553 = vmatprep.mubr.msk.bf16.mxu1 %vm7892_vm2, %v13656_v37  ;;  %v11949_v28 = vsel %vm14398_vm3, 0.0, %v4478_v60  ;;  %v11953_v6 = vsel %vm14401_vm0, 0.0, %v4477_v7  ;;  %v11966_v0 = vsel %vm14406_vm9, 0.0, %v4627_v58  ;;  %vm14435_vm0 = vmmov %vm14410_vm7 }
 0x484   :  { %14399 = vst [vmem:[#allocation45_spill] sm:$0xff] %v11949_v28  ;;  %14402 = vst [vmem:[#allocation46_spill] sm:$0xff] %v11953_v6  ;;  %v4445_v13 = vrot.slane %v4395_v63, 7  ;;  %v4595_v42 = vrot.slane %v4395_v63, 1  ;;  %v4346_v2 = vadd.f32 %v11328_v62, %v4289_v61  ;;  %v14404_v10 = vld [vmem:[#allocation92_spill] sm:$0xff] }
 0x485   :  { %v4199_v43 = vpop.f32.mrf.mxu1  ;;  %v3861_v7 = vadd.f32 %v14405_v46, %v14404_v10  ;;  %14407 = vst [vmem:[#allocation8_spill] sm:$0xff] %v11966_v0  ;;  %v14420_v0 = vld [vmem:[#allocation95_spill] sm:$0xff] }
 0x486   :  { %v4476_v39 = vsel %vm14403_vm8, %v4444_v12, %v4445_v13  ;;  %v4626_v45 = vsel %vm1386_vm4, %v4594_v49, %v4595_v42  ;;  %v4396_v60 = vmax.f32 %v4346_v2, 0.0  ;;  %v4290_v20 = vadd.f32 %v4199_v43, %v3858_v3  ;;  %v11975_v49 = vld [vmem:[%s13197_s4] ss:$0 sm:$0xff]  ;;  %v14412_v43 = vld [vmem:[#allocation101_spill] sm:$0xff] }
 0x487   :  { %v7351_v44 = vpop.f32.mrf.mxu1  ;;  %v11970_v62 = vsel %vm14408_vm6, 0.0, %v4626_v45  ;;  %vm14442_vm6 = vmmov %vm14435_vm0 }
 0x488   :  { %14409 = vst [vmem:[#allocation74_spill] sm:$0xff] %v11970_v62  ;;  %v4446_v61 = vrot.slane %v4396_v60, 7  ;;  %v4596_v34 = vrot.slane %v4396_v60, 1  ;;  %v4728_v12 = vpack.c.bf16 %v4396_v60, %v4395_v63  ;;  %v4347_v3 = vadd.f32 %v11975_v49, %v4290_v20  ;;  %v14411_v63 = vld [vmem:[#allocation93_spill] sm:$0xff]  ;;  %v14413_v20 = vld [vmem:[#allocation27_spill] sm:$0xff]  ;;  %v14416_v44 = vld [vmem:[#allocation28_spill] sm:$0xff] }
 0x489   :  { %v4202_v46 = vpop.f32.mrf.mxu1  ;;  %v3866_v45 = vadd.f32 %v14412_v43, %v14411_v63  ;;  %vm14414_vm12 = vcmp.eq.s32.totalorder %v14413_v20, 0  ;;  %vm14417_vm1 = vcmp.eq.s32.totalorder %v14416_v44, 0  ;;  %v14421_v62 = vld [vmem:[#allocation104_spill] sm:$0xff]  ;;  %vm14422_vm15 = vcmp.eq.s32.totalorder %v14413_v20, 199 }
 0x48a   :  { %v4475_v58 = vsel %vm14410_vm7, %v4445_v13, %v4446_v61  ;;  %v4625_v40 = vsel %vm1386_vm4, %v4595_v42, %v4596_v34  ;;  %v4397_v51 = vmax.f32 %v4347_v3, 0.0  ;;  %v4291_v2 = vadd.f32 %v4202_v46, %v3861_v7  ;;  %7554 = vmatmul.mubr.msk.bf16.gmra.mxu1 %vm4782_vm5, %v4728_v12  ;;  %v14428_v20 = vld [vmem:[#allocation4_spill] sm:$0xff] }
 0x48b   :  { %v7352_v60 = vpop.f32.mrf.mxu1  ;;  %7557 = vmatprep.mubr.msk.bf16.mxu1 %vm7892_vm2, %v13656_v37  ;;  %v11991_v10 = vsel %vm14414_vm12, 0.0, %v4476_v39  ;;  %v11995_v13 = vsel %vm14417_vm1, 0.0, %v4475_v58  ;;  %v3869_v58 = vadd.f32 %v14421_v62, %v14420_v0  ;;  %v12008_v6 = vsel %vm14422_vm15, 0.0, %v4625_v40  ;;  %vm14448_vm1 = vmmov %vm14435_vm0 }
 0x48c   :  { %14415 = vst [vmem:[#allocation77_spill] sm:$0xff] %v11991_v10  ;;  %14418 = vst [vmem:[#allocation76_spill] sm:$0xff] %v11995_v13  ;;  %v4447_v42 = vrot.slane %v4397_v51, 7  ;;  %v4597_v3 = vrot.slane %v4397_v51, 1  ;;  %v4348_v7 = vadd.f32 %v11975_v49, %v4291_v2  ;;  %vm14424_vm14 = vcmp.eq.s32.totalorder %v14416_v44, 199  ;;  %v14427_v44 = vld [vmem:[#allocation94_spill] sm:$0xff] }
 0x48d   :  { %v4207_v46 = vpop.f32.mrf.mxu1  ;;  %14423 = vst [vmem:[#allocation51_spill] sm:$0xff] %v12008_v6 }
 0x48e   :  { %v4474_v63 = vsel %vm14419_vm13, %v4446_v61, %v4447_v42  ;;  %v4624_v43 = vsel %vm1386_vm4, %v4596_v34, %v4597_v3  ;;  %v4398_v39 = vmax.f32 %v4348_v7, 0.0  ;;  %v4292_v60 = vadd.f32 %v4207_v46, %v3866_v45  ;;  %v14429_v46 = vld [vmem:[#allocation32_spill] sm:$0xff]  ;;  %v14437_v45 = vld [vmem:[#allocation106_spill] sm:$0xff] }
 0x48f   :  { %v7355_v28 = vpop.f32.mrf.mxu1  ;;  %v12012_v2 = vsel %vm14424_vm14, 0.0, %v4624_v43  ;;  %v3874_v7 = vadd.f32 %v14428_v20, %v14427_v44  ;;  %vm14430_vm10 = vcmp.eq.s32.totalorder %v14429_v46, 0  ;;  %vm14438_vm8 = vcmp.eq.s32.totalorder %v14429_v46, 199  ;;  %vm14454_vm14 = vmmov %vm14435_vm0 }
 0x490   :  { %14425 = vst [vmem:[#allocation52_spill] sm:$0xff] %v12012_v2  ;;  %v4448_v12 = vrot.slane %v4398_v39, 7  ;;  %v4598_v10 = vrot.slane %v4398_v39, 1  ;;  %v4729_v61 = vpack.c.bf16 %v4398_v39, %v4397_v51  ;;  %v4349_v13 = vadd.f32 %v11975_v49, %v4292_v60  ;;  %v14432_v39 = vld [vmem:[#allocation33_spill] sm:$0xff] }
 0x491   :  { %v4210_v34 = vpop.f32.mrf.mxu1  ;;  %v12028_v43 = vsel %vm14430_vm10, 0.0, %v4474_v63  ;;  %vm14433_vm3 = vcmp.eq.s32.totalorder %v14432_v39, 0  ;;  %vm14440_vm9 = vcmp.eq.s32.totalorder %v14432_v39, 199  ;;  %v14443_v39 = vld [vmem:[#allocation105_spill] sm:$0xff] }
 0x492   :  { %v4473_v0 = vsel %vm14426_vm11, %v4447_v42, %v4448_v12  ;;  %v4623_v28 = vsel %vm1386_vm4, %v4597_v3, %v4598_v10  ;;  %v4399_v62 = vmax.f32 %v4349_v13, 0.0  ;;  %v4293_v40 = vadd.f32 %v4210_v34, %v3869_v58  ;;  %7558 = vmatmul.mubr.msk.bf16.gmra.mxu1 %vm4782_vm5, %v4729_v61  ;;  %14431 = vst [vmem:[#allocation79_spill] sm:$0xff] %v12028_v43 }
 0x493   :  { %v7356_v51 = vpop.f32.mrf.mxu1  ;;  %7561 = vmatprep.mubr.msk.bf16.mxu1 %vm7892_vm2, %v13656_v37  ;;  %v12032_v42 = vsel %vm14433_vm3, 0.0, %v4473_v0  ;;  %v12045_v2 = vsel %vm14438_vm8, 0.0, %v4623_v28  ;;  %vm14460_vm3 = vmmov %vm14435_vm0 }
 0x494   :  { %14434 = vst [vmem:[#allocation75_spill] sm:$0xff] %v12032_v42  ;;  %v4449_v3 = vrot.slane %v4399_v62, 7  ;;  %v4599_v13 = vrot.slane %v4399_v62, 1  ;;  %v4350_v60 = vadd.f32 %v11975_v49, %v4293_v40  ;;  %v14436_v51 = vld [vmem:[#allocation97_spill] sm:$0xff]  ;;  %14439 = vst [vmem:[#allocation78_spill] sm:$0xff] %v12045_v2 }
 0x495   :  { %v4215_v61 = vpop.f32.mrf.mxu1  ;;  %v3877_v0 = vadd.f32 %v14437_v45, %v14436_v51 }
 0x496   :  { %v4472_v34 = vsel %vm14435_vm0, %v4448_v12, %v4449_v3  ;;  %v4622_v44 = vsel %vm1386_vm4, %v4598_v10, %v4599_v13  ;;  %v4400_v63 = vmax.f32 %v4350_v60, 0.0  ;;  %v4294_v20 = vadd.f32 %v4215_v61, %v3874_v7  ;;  %v14444_v61 = vld [vmem:[#allocation37_spill] sm:$0xff] }
 0x497   :  { %v7359_v6 = vpop.f32.mrf.mxu1  ;;  %v12049_v40 = vsel %vm14440_vm9, 0.0, %v4622_v44  ;;  %v3882_v60 = vadd.f32 %v14443_v39, %v11279_v4  ;;  %vm14445_vm7 = vcmp.eq.s32.totalorder %v14444_v61, 0  ;;  %v14449_v39 = vld [vmem:[#allocation119_spill] sm:$0xff]  ;;  %vm14450_vm13 = vcmp.eq.s32.totalorder %v14444_v61, 199  ;;  %vm14466_vm9 = vmmov %vm14448_vm1 }
 0x498   :  { %14441 = vst [vmem:[#allocation7_spill] sm:$0xff] %v12049_v40  ;;  %v4450_v58 = vrot.slane %v4400_v63, 7  ;;  %v4600_v43 = vrot.slane %v4400_v63, 1  ;;  %v4730_v12 = vpack.c.bf16 %v4400_v63, %v4399_v62  ;;  %v4351_v42 = vadd.f32 %v11975_v49, %v4294_v20  ;;  %v14446_v63 = vld [vmem:[#allocation38_spill] sm:$0xff] }
 0x499   :  { %v4218_v10 = vpop.f32.mrf.mxu1  ;;  %v12065_v44 = vsel %vm14445_vm7, 0.0, %v4472_v34  ;;  %vm14447_vm12 = vcmp.eq.s32.totalorder %v14446_v63, 0  ;;  %vm14452_vm15 = vcmp.eq.s32.totalorder %v14446_v63, 199  ;;  %v14455_v63 = vld [vmem:[#allocation120_spill] sm:$0xff] }
 0x49a   :  { %v4471_v6 = vsel %vm14442_vm6, %v4449_v3, %v4450_v58  ;;  %v4621_v45 = vsel %vm1386_vm4, %v4599_v13, %v4600_v43  ;;  %v4401_v28 = vmax.f32 %v4351_v42, 0.0  ;;  %v4295_v46 = vadd.f32 %v4218_v10, %v3877_v0  ;;  %7562 = vmatmul.mubr.msk.bf16.gmra.mxu1 %vm4782_vm5, %v4730_v12 }
 0x49b   :  { %v7360_v62 = vpop.f32.mrf.mxu1  ;;  %7565 = vmatprep.mubr.msk.bf16.mxu1 %vm7892_vm2, %v13656_v37  ;;  %v12069_v3 = vsel %vm14447_vm12, 0.0, %v4471_v6  ;;  %v3885_v6 = vadd.f32 %v14449_v39, %v11287_v38  ;;  %v12082_v7 = vsel %vm14450_vm13, 0.0, %v4621_v45  ;;  %vm14472_vm12 = vmmov %vm14448_vm1 }
 0x49c   :  { %v4451_v13 = vrot.slane %v4401_v28, 7  ;;  %v4601_v42 = vrot.slane %v4401_v28, 1  ;;  %v4352_v20 = vadd.f32 %v11975_v49, %v4295_v46  ;;  %14451 = vst [vmem:[#allocation56_spill] sm:$0xff] %v12082_v7 }
 0x49d   :  { %v4223_v4 = vpop.f32.mrf.mxu1 }
 0x49e   :  { %v4470_v0 = vsel %vm14448_vm1, %v4450_v58, %v4451_v13  ;;  %v4620_v12 = vsel %vm1386_vm4, %v4600_v43, %v4601_v42  ;;  %v4402_v34 = vmax.f32 %v4352_v20, 0.0  ;;  %v4296_v10 = vadd.f32 %v4223_v4, %v3882_v60 }
 0x49f   :  { %v7363_v62 = vpop.f32.mrf.mxu1  ;;  %v12086_v46 = vsel %vm14452_vm15, 0.0, %v4620_v12  ;;  %v3890_v4 = vadd.f32 %v14455_v63, %v11289_v18  ;;  %v14456_v12 = vld [vmem:[#allocation43_spill] sm:$0xff]  ;;  %v14461_v63 = vld [vmem:[#allocation73_spill] sm:$0xff]  ;;  %vm14478_vm15 = vmmov %vm14460_vm3 }
 0x4a0   :  { %14453 = vst [vmem:[#allocation57_spill] sm:$0xff] %v12086_v46  ;;  %v4452_v51 = vrot.slane %v4402_v34, 7  ;;  %v4602_v2 = vrot.slane %v4402_v34, 1  ;;  %v4731_v58 = vpack.c.bf16 %v4402_v34, %v4401_v28  ;;  %v4353_v40 = vadd.f32 %v11975_v49, %v4296_v10  ;;  %v14458_v10 = vld [vmem:[#allocation44_spill] sm:$0xff] }
 0x4a1   :  { %v4226_v43 = vpop.f32.mrf.mxu1  ;;  %vm14457_vm11 = vcmp.eq.s32.totalorder %v14456_v12, 0  ;;  %vm14459_vm10 = vcmp.eq.s32.totalorder %v14458_v10, 0  ;;  %vm14462_vm0 = vcmp.eq.s32.totalorder %v14456_v12, 199  ;;  %vm14464_vm8 = vcmp.eq.s32.totalorder %v14458_v10, 199  ;;  %v14467_v10 = vld [vmem:[#allocation72_spill] sm:$0xff] }
 0x4a2   :  { %v4469_v38 = vsel %vm14454_vm14, %v4451_v13, %v4452_v51  ;;  %v4619_v45 = vsel %vm1386_vm4, %v4601_v42, %v4602_v2  ;;  %v4403_v61 = vmax.f32 %v4353_v40, 0.0  ;;  %v4297_v20 = vadd.f32 %v4226_v43, %v3885_v6  ;;  %7566 = vmatmul.mubr.msk.bf16.gmra.mxu1 %vm4782_vm5, %v4731_v58 }
 0x4a3   :  { %v7364_v28 = vpop.f32.mrf.mxu1  ;;  %7569 = vmatprep.mubr.msk.bf16.mxu1 %vm7892_vm2, %v13656_v37  ;;  %v12102_v34 = vsel %vm14457_vm11, 0.0, %v4470_v0  ;;  %v12106_v13 = vsel %vm14459_vm10, 0.0, %v4469_v38  ;;  %v3893_v38 = vadd.f32 %v14461_v63, %v11297_v35  ;;  %v12119_v60 = vsel %vm14462_vm0, 0.0, %v4619_v45  ;;  %vm14487_vm10 = vmmov %vm14460_vm3 }
 0x4a4   :  { %v4453_v42 = vrot.slane %v4403_v61, 7  ;;  %v4603_v40 = vrot.slane %v4403_v61, 1  ;;  %v4354_v39 = vadd.f32 %v11975_v49, %v4297_v20  ;;  %14463 = vst [vmem:[#allocation80_spill] sm:$0xff] %v12119_v60 }
 0x4a5   :  { %v4231_v18 = vpop.f32.mrf.mxu1 }
 0x4a6   :  { %v4468_v62 = vsel %vm14460_vm3, %v4452_v51, %v4453_v42  ;;  %v4618_v58 = vsel %vm1386_vm4, %v4602_v2, %v4603_v40  ;;  %v4404_v0 = vmax.f32 %v4354_v39, 0.0  ;;  %v4298_v43 = vadd.f32 %v4231_v18, %v3890_v4 }
 0x4a7   :  { %v7367_v28 = vpop.f32.mrf.mxu1  ;;  %v12123_v20 = vsel %vm14464_vm8, 0.0, %v4618_v58  ;;  %v3898_v18 = vadd.f32 %v14467_v10, %v11299_v26  ;;  %v14468_v58 = vld [vmem:[#allocation48_spill] sm:$0xff]  ;;  %v14473_v10 = vld [vmem:[#allocation121_spill] sm:$0xff]  ;;  %vm14492_vm8 = vmmov %vm14466_vm9 }
 0x4a8   :  { %14465 = vst [vmem:[#allocation108_spill] sm:$0xff] %v12123_v20  ;;  %v4454_v6 = vrot.slane %v4404_v0, 7  ;;  %v4604_v7 = vrot.slane %v4404_v0, 1  ;;  %v4732_v51 = vpack.c.bf16 %v4404_v0, %v4403_v61  ;;  %v4355_v46 = vadd.f32 %v11975_v49, %v4298_v43  ;;  %v14470_v43 = vld [vmem:[#allocation49_spill] sm:$0xff] }
 0x4a9   :  { %v4234_v2 = vpop.f32.mrf.mxu1  ;;  %vm14469_vm6 = vcmp.eq.s32.totalorder %v14468_v58, 0  ;;  %vm14471_vm7 = vcmp.eq.s32.totalorder %v14470_v43, 0  ;;  %vm14474_vm1 = vcmp.eq.s32.totalorder %v14468_v58, 199  ;;  %vm14476_vm13 = vcmp.eq.s32.totalorder %v14470_v43, 199  ;;  %v14479_v43 = vld [vmem:[#allocation96_spill] sm:$0xff] }
 0x4aa   :  { %v4467_v35 = vsel %vm14466_vm9, %v4453_v42, %v4454_v6  ;;  %v4617_v45 = vsel %vm1386_vm4, %v4603_v40, %v4604_v7  ;;  %v4405_v12 = vmax.f32 %v4355_v46, 0.0  ;;  %v4299_v39 = vadd.f32 %v4234_v2, %v3893_v38  ;;  %7570 = vmatmul.mubr.msk.bf16.gmra.mxu1 %vm4782_vm5, %v4732_v51 }
 0x4ab   :  { %v7368_v61 = vpop.f32.mrf.mxu1  ;;  %7573 = vmatprep.mubr.msk.bf16.mxu1 %vm7892_vm2, %v13656_v37  ;;  %v12139_v0 = vsel %vm14469_vm6, 0.0, %v4468_v62  ;;  %v12143_v42 = vsel %vm14471_vm7, 0.0, %v4467_v35  ;;  %v3901_v35 = vadd.f32 %v14473_v10, %v11307_v1  ;;  %v12156_v4 = vsel %vm14474_vm1, 0.0, %v4617_v45  ;;  %v14484_v10 = vld [vmem:[#allocation54_spill] sm:$0xff]  ;;  %vm14497_vm7 = vmmov %vm14492_vm8 }
 0x4ac   :  { %v4455_v40 = vrot.slane %v4405_v12, 7  ;;  %v4605_v46 = vrot.slane %v4405_v12, 1  ;;  %v4356_v63 = vadd.f32 %v11975_v49, %v4299_v39  ;;  %14475 = vst [vmem:[#allocation81_spill] sm:$0xff] %v12156_v4  ;;  %vm14485_vm11 = vcmp.eq.s32.totalorder %v14484_v10, 0 }
 0x4ad   :  { %v4239_v26 = vpop.f32.mrf.mxu1  ;;  %vm14491_vm0 = vcmp.eq.s32.totalorder %v14484_v10, 199 }
 0x4ae   :  { %v4466_v28 = vsel %vm14472_vm12, %v4454_v6, %v4455_v40  ;;  %v4616_v51 = vsel %vm1386_vm4, %v4604_v7, %v4605_v46  ;;  %v4406_v62 = vmax.f32 %v4356_v63, 0.0  ;;  %v4300_v2 = vadd.f32 %v4239_v26, %v3898_v18  ;;  %v14480_v26 = vld [vmem:[#allocation122_spill] sm:$0xff]  ;;  %v14489_v18 = vld [vmem:[#allocation123_spill] sm:$0xff] }
 0x4af   :  { %v7371_v61 = vpop.f32.mrf.mxu1  ;;  %v12160_v39 = vsel %vm14476_vm13, 0.0, %v4616_v51  ;;  %v3906_v51 = vadd.f32 %v14480_v26, %v14479_v43  ;;  %vm14500_vm13 = vcmp.eq.s32.totalorder %v13822_v5, 0 }
 0x4b0   :  { %14477 = vst [vmem:[#allocation109_spill] sm:$0xff] %v12160_v39  ;;  %v4456_v38 = vrot.slane %v4406_v62, 7  ;;  %v4606_v60 = vrot.slane %v4406_v62, 1  ;;  %v4733_v6 = vpack.c.bf16 %v4406_v62, %v4405_v12  ;;  %v4357_v20 = vadd.f32 %v11975_v49, %v4300_v2  ;;  %v14481_v62 = vld [vmem:[#allocation53_spill] sm:$0xff] }
 0x4b1   :  { %v4242_v7 = vpop.f32.mrf.mxu1  ;;  %vm14482_vm14 = vcmp.eq.s32.totalorder %v14481_v62, 0  ;;  %vm14490_vm3 = vcmp.eq.s32.totalorder %v14481_v62, 199 }
 0x4b2   :  { %v4465_v1 = vsel %vm14478_vm15, %v4455_v40, %v4456_v38  ;;  %v4615_v45 = vsel %vm1386_vm4, %v4605_v46, %v4606_v60  ;;  %v4407_v58 = vmax.f32 %v4357_v20, 0.0  ;;  %v4301_v63 = vadd.f32 %v4242_v7, %v3901_v35  ;;  %7574 = vmatmul.mubr.msk.bf16.gmra.mxu1 %vm4782_vm5, %v4733_v6 }
 0x4b3   :  { %v7372_v12 = vpop.f32.mrf.mxu1  ;;  %7577 = vmatprep.mubr.msk.bf16.mxu1 %vm7892_vm2, %v13656_v37  ;;  %v12176_v2 = vsel %vm14482_vm14, 0.0, %v4466_v28  ;;  %v12180_v40 = vsel %vm14485_vm11, 0.0, %v4465_v1  ;;  %v12193_v39 = vsel %vm14490_vm3, 0.0, %v4615_v45  ;;  %vm14503_vm14 = vmmov %vm14497_vm7 }
 0x4b4   :  { %14483 = vst [vmem:[#allocation60_spill] sm:$0xff] %v12176_v2  ;;  %14486 = vst [vmem:[#allocation61_spill] sm:$0xff] %v12180_v40  ;;  %v4457_v46 = vrot.slane %v4407_v58, 7  ;;  %v4607_v20 = vrot.slane %v4407_v58, 1  ;;  %v4358_v35 = vadd.f32 %v11975_v49, %v4301_v63  ;;  %v14488_v12 = vld [vmem:[#allocation66_spill] sm:$0xff] }
 0x4b5   :  { %v4247_v6 = vpop.f32.mrf.mxu1  ;;  %v3909_v1 = vadd.f32 %v14489_v18, %v14488_v12  ;;  %vm14505_vm11 = vmmov %vm14497_vm7 }
 0x4b6   :  { %v4464_v7 = vsel %vm14487_vm10, %v4456_v38, %v4457_v46  ;;  %v4614_v43 = vsel %vm1386_vm4, %v4606_v60, %v4607_v20  ;;  %v4408_v28 = vmax.f32 %v4358_v35, 0.0  ;;  %v4302_v26 = vadd.f32 %v4247_v6, %v3906_v51  ;;  %v14495_v6 = vld [vmem:[#allocation59_spill] sm:$0xff] }
 0x4b7   :  { %v7375_v4 = vpop.f32.mrf.mxu1  ;;  %v12197_v63 = vsel %vm14491_vm0, 0.0, %v4614_v43  ;;  %vm14496_vm6 = vcmp.eq.s32.totalorder %v14495_v6, 0  ;;  %vm14499_vm1 = vcmp.eq.s32.totalorder %v14495_v6, 199  ;;  %vm14507_vm10 = vcmp.eq.s32.totalorder %v14056_v29, 0  ;;  %v14551_v51 = vld [vmem:[#allocation75_spill] sm:$0xff] }
 0x4b8   :  { %v4458_v61 = vrot.slane %v4408_v28, 7  ;;  %v4608_v2 = vrot.slane %v4408_v28, 1  ;;  %v4734_v38 = vpack.c.bf16 %v4408_v28, %v4407_v58  ;;  %v4359_v40 = vadd.f32 %v11975_v49, %v4302_v26  ;;  %v14493_v58 = vld [vmem:[#allocation58_spill] sm:$0xff]  ;;  %v14552_v29 = vld [vmem:[#allocation79_spill] sm:$0xff] }
 0x4b9   :  { %v4250_v60 = vpop.f32.mrf.mxu1  ;;  %vm14494_vm9 = vcmp.eq.s32.totalorder %v14493_v58, 0  ;;  %vm14498_vm12 = vcmp.eq.s32.totalorder %v14493_v58, 199  ;;  %v14504_v58 = vrot.slane %v11339_v9, 7 }
 0x4ba   :  { %v4463_v4 = vsel %vm14492_vm8, %v4457_v46, %v4458_v61  ;;  %v4613_v18 = vsel %vm1386_vm4, %v4607_v20, %v4608_v2  ;;  %v4409_v45 = vmax.f32 %v4359_v40, 0.0  ;;  %v4303_v62 = vadd.f32 %v4250_v60, %v3909_v1  ;;  %7578 = vmatmul.mubr.msk.bf16.gmra.mxu1 %vm4782_vm5, %v4734_v38 }
 0x4bb   :  { %v7376_v10 = vpop.f32.mrf.mxu1  ;;  %7581 = vmatprep.mubr.msk.bf16.mxu1 %vm7892_vm2, %v13656_v37  ;;  %v12211_v35 = vsel %vm14494_vm9, 0.0, %v4464_v7  ;;  %v12215_v43 = vsel %vm14496_vm6, 0.0, %v4463_v4  ;;  %v12226_v7 = vsel %vm14498_vm12, 0.0, %v4613_v18  ;;  %v14565_v40 = vld [vmem:[#allocation61_spill] sm:$0xff] }
 0x4bc   :  { %v4459_v46 = vrot.slane %v4409_v45, 7  ;;  %v4609_v28 = vrot.slane %v4409_v45, 1  ;;  %v4360_v20 = vadd.f32 %v11975_v49, %v4303_v62  ;;  %v14547_v62 = vld [vmem:[#allocation77_spill] sm:$0xff] }
 0x4be   :  { %v4462_v26 = vsel %vm14497_vm7, %v4458_v61, %v4459_v46  ;;  %v4612_v12 = vsel %vm1386_vm4, %v4608_v2, %v4609_v28  ;;  %v4410_v1 = vmax.f32 %v4360_v20, 0.0  ;;  %v4512_v61 = vsel %vm14500_vm13, 0.0, %v11354_v27  ;;  %v14501_v2 = vld [vmem:[#allocation62_spill] sm:$0xff] }
 0x4bf   :  { %v12230_v38 = vsel %vm14499_vm1, 0.0, %v4612_v12  ;;  %vm14502_vm15 = vcmp.eq.s32.totalorder %v14501_v2, 0  ;;  %v14506_v20 = vrot.slane %v11339_v9, 1  ;;  %v14508_v12 = vld [vmem:[#allocation63_spill] sm:$0xff]  ;;  %vm14510_vm0 = vcmp.eq.s32.totalorder %v14501_v2, 199 }
 0x4c0   :  { %v4460_v60 = vrot.slane %v4410_v1, 7  ;;  %v4610_v49 = vrot.slane %v4410_v1, 1  ;;  %v4735_v4 = vpack.c.bf16 %v4410_v1, %v4409_v45  ;;  %v12239_v10 = vsel %vm14502_vm15, 0.0, %v4462_v26  ;;  %v7839_v26 = vld [vmem:[%s13196_s5 + $0x28] sm:$0xff]   ;;  %v7840_v2 = vld [vmem:[%s13196_s5 + $0x20] sm:$0xff]  }
 0x4c1   :  { %vm14509_vm3 = vcmp.eq.s32.totalorder %v14508_v12, 0 }
 0x4c2   :  { %v4461_v18 = vsel %vm14503_vm14, %v4459_v46, %v4460_v60  ;;  %v4510_v6 = vsel %vm14505_vm11, %v4460_v60, %v14504_v58  ;;  %v4611_v45 = vsel %vm1386_vm4, %v4609_v28, %v4610_v49  ;;  %v4660_v5 = vsel %vm1386_vm4, %v4610_v49, %v14506_v20  ;;  %v12253_v27 = vpop.f32.mrf.mxu1  ;;  %7582 = vmatmul.mubr.msk.bf16.gmra.mxu1 %vm4782_vm5, %v4735_v4  ;;  %v14546_v49 = vld [vmem:[#allocation76_spill] sm:$0xff] }
 0x4c3   :  { %v4511_v46 = vsel %vm14507_vm10, 0.0, %v4510_v6  ;;  %v12263_v1 = vsel %vm14509_vm3, 0.0, %v4461_v18  ;;  %v12267_v9 = vsel %vm14510_vm0, 0.0, %v4611_v45  ;;  %vm14511_vm4 = vcmp.eq.s32.totalorder %v14508_v12, 199  ;;  %v14512_v6 = vld [vmem:[#allocation68_spill] sm:$0xff] }
 0x4c4   :  { %v12271_v11 = vsel %vm14511_vm4, 0.0, %v4660_v5  ;;  %v4741_v28 = vpack.c.bf16 %v4512_v61, %v4511_v46  ;;  %v7487_v60 = vpop.f32.mrf.mxu1  ;;  %v14513_v45 = vpack.c.bf16 %v11396_v53, %v14512_v6  ;;  %v14514_v12 = vpack.c.bf16 %v11433_v25, %v11429_v16 }
 0x4c6   :  { %7382 = vmatmul.mubr.msk.bf16.vlgmr.msra.gmra.mxu0 %vm4782_vm5, %v4741_v28  ;;  %v12278_v4 = vpop.f32.mrf.mxu1 }
 0x4c7   :  { %7586 = vmatpush3.bf16.msra.mxu0 %v7839_v26  ;;  %7385 = vmatprep.mubr.msk.bf16.mxu0 %vm7892_vm2, %v13656_v37 }
 0x4c8   :  { %v7488_v61 = vpop.f32.mrf.mxu1  ;;  %7587 = vmatprep.subr.bf16.mxu0 %v13656_v37 }
 0x4c9   :  { %v14515_v61 = vpack.c.bf16 %v11472_v8, %v11468_v30 }
 0x4ca   :  { %v12286_v18 = vpop.f32.mrf.mxu1 }
 0x4cb   :  { %7588 = vmatpush3.bf16.msra.mxu0 %v7840_v2 }
 0x4cc   :  { %v7491_v58 = vpop.f32.mrf.mxu1 }
 0x4ce   :  { %7386 = vmatmul.mubr.msk.bf16.gmra.mxu0 %vm4782_vm5, %v14513_v45  ;;  %v12292_v20 = vpop.f32.mrf.mxu1  ;;  %v14516_v45 = vpack.c.bf16 %v11509_v59, %v11505_v24 }
 0x4cf   :  { %7389 = vmatprep.mubr.msk.bf16.mxu0 %vm7892_vm2, %v13656_v37 }
 0x4d0   :  { %v7492_v5 = vpop.f32.mrf.mxu1 }
 0x4d2   :  { %v12296_v46 = vpop.f32.mrf.mxu1 }
 0x4d4   :  { %v7495_v26 = vpop.f32.mrf.mxu1 }
 0x4d6   :  { %7390 = vmatmul.mubr.msk.bf16.gmra.mxu0 %vm4782_vm5, %v14514_v12  ;;  %v12302_v28 = vpop.f32.mrf.mxu1  ;;  %v14517_v12 = vpack.c.bf16 %v11546_v48, %v11542_v54 }
 0x4d7   :  { %7393 = vmatprep.mubr.msk.bf16.mxu0 %vm7892_vm2, %v13656_v37 }
 0x4d8   :  { %v7496_v53 = vpop.f32.mrf.mxu1 }
 0x4da   :  { %v12306_v60 = vpop.f32.mrf.mxu1 }
 0x4dc   :  { %v7499_v2 = vpop.f32.mrf.mxu1 }
 0x4de   :  { %7394 = vmatmul.mubr.msk.bf16.gmra.mxu0 %vm4782_vm5, %v14515_v61  ;;  %v12312_v58 = vpop.f32.mrf.mxu1  ;;  %v14518_v61 = vpack.c.bf16 %v11583_v55, %v11579_v50 }
 0x4df   :  { %7397 = vmatprep.mubr.msk.bf16.mxu0 %vm7892_vm2, %v13656_v37 }
 0x4e0   :  { %v7500_v16 = vpop.f32.mrf.mxu1 }
 0x4e2   :  { %v12316_v25 = vpop.f32.mrf.mxu1 }
 0x4e4   :  { %v7503_v6 = vpop.f32.mrf.mxu1 }
 0x4e6   :  { %7398 = vmatmul.mubr.msk.bf16.gmra.mxu0 %vm4782_vm5, %v14516_v45  ;;  %v12322_v5 = vpop.f32.mrf.mxu1  ;;  %v14519_v45 = vpack.c.bf16 %v11620_v56, %v11616_v31 }
 0x4e7   :  { %7401 = vmatprep.mubr.msk.bf16.mxu0 %vm7892_vm2, %v13656_v37 }
 0x4e8   :  { %v7504_v30 = vpop.f32.mrf.mxu1 }
 0x4ea   :  { %v12326_v8 = vpop.f32.mrf.mxu1 }
 0x4ec   :  { %v7507_v26 = vpop.f32.mrf.mxu1 }
 0x4ee   :  { %7402 = vmatmul.mubr.msk.bf16.gmra.mxu0 %vm4782_vm5, %v14517_v12  ;;  %v12332_v53 = vpop.f32.mrf.mxu1  ;;  %v14520_v12 = vpack.c.bf16 %v11657_v57, %v11653_v47 }
 0x4ef   :  { %7405 = vmatprep.mubr.msk.bf16.mxu0 %vm7892_vm2, %v13656_v37 }
 0x4f0   :  { %v7508_v24 = vpop.f32.mrf.mxu1 }
 0x4f2   :  { %v12336_v59 = vpop.f32.mrf.mxu1 }
 0x4f4   :  { %v7511_v2 = vpop.f32.mrf.mxu1 }
 0x4f6   :  { %7406 = vmatmul.mubr.msk.bf16.gmra.mxu0 %vm4782_vm5, %v14518_v61  ;;  %v12342_v16 = vpop.f32.mrf.mxu1  ;;  %v14521_v61 = vpack.c.bf16 %v11694_v19, %v11690_v52 }
 0x4f7   :  { %7409 = vmatprep.mubr.msk.bf16.mxu0 %vm7892_vm2, %v13656_v37 }
 0x4f8   :  { %v7512_v54 = vpop.f32.mrf.mxu1 }
 0x4fa   :  { %v12346_v48 = vpop.f32.mrf.mxu1 }
 0x4fc   :  { %v7515_v6 = vpop.f32.mrf.mxu1 }
 0x4fe   :  { %7410 = vmatmul.mubr.msk.bf16.gmra.mxu0 %vm4782_vm5, %v14519_v45  ;;  %v12352_v30 = vpop.f32.mrf.mxu1  ;;  %v14522_v45 = vpack.c.bf16 %v11731_v36, %v11727_v17 }
 0x4ff   :  { %7413 = vmatprep.mubr.msk.bf16.mxu0 %vm7892_vm2, %v13656_v37 }
 0x500   :  { %v7516_v50 = vpop.f32.mrf.mxu1 }
 0x502   :  { %v12356_v55 = vpop.f32.mrf.mxu1 }
 0x504   :  { %v7519_v26 = vpop.f32.mrf.mxu1 }
 0x506   :  { %7414 = vmatmul.mubr.msk.bf16.gmra.mxu0 %vm4782_vm5, %v14520_v12  ;;  %v12362_v24 = vpop.f32.mrf.mxu1  ;;  %v14524_v12 = vpack.c.bf16 %v11768_v14, %v11764_v33 }
 0x507   :  { %7417 = vmatprep.mubr.msk.bf16.mxu0 %vm7892_vm2, %v13656_v37 }
 0x508   :  { %v7520_v31 = vpop.f32.mrf.mxu1 }
 0x50a   :  { %v12366_v56 = vpop.f32.mrf.mxu1 }
 0x50c   :  { %v7523_v2 = vpop.f32.mrf.mxu1 }
 0x50e   :  { %7418 = vmatmul.mubr.msk.bf16.gmra.mxu0 %vm4782_vm5, %v14521_v61  ;;  %v12372_v54 = vpop.f32.mrf.mxu1  ;;  %v14527_v61 = vpack.c.bf16 %v11805_v22, %v11801_v21 }
 0x50f   :  { %7421 = vmatprep.mubr.msk.bf16.mxu0 %vm7892_vm2, %v13656_v37 }
 0x510   :  { %v7524_v47 = vpop.f32.mrf.mxu1 }
 0x512   :  { %v12376_v57 = vpop.f32.mrf.mxu1 }
 0x514   :  { %v7527_v6 = vpop.f32.mrf.mxu1 }
 0x516   :  { %7422 = vmatmul.mubr.msk.bf16.gmra.mxu0 %vm4782_vm5, %v14522_v45  ;;  %v12382_v50 = vpop.f32.mrf.mxu1  ;;  %v14530_v45 = vpack.c.bf16 %v11842_v32, %v11838_v23 }
 0x517   :  { %7425 = vmatprep.mubr.msk.bf16.mxu0 %vm7892_vm2, %v13656_v37 }
 0x518   :  { %v7528_v52 = vpop.f32.mrf.mxu1 }
 0x51a   :  { %v12386_v19 = vpop.f32.mrf.mxu1 }
 0x51b   :  { %14523 = vst [vmem:[#allocation83_spill] sm:$0xff] %v12386_v19  ;;  %v14616_v19 = vld [vmem:[#allocation20_spill] sm:$0xff] }
 0x51c   :  { %v7531_v26 = vpop.f32.mrf.mxu1 }
 0x51e   :  { %7426 = vmatmul.mubr.msk.bf16.gmra.mxu0 %vm4782_vm5, %v14524_v12  ;;  %v12392_v31 = vpop.f32.mrf.mxu1  ;;  %v14533_v12 = vpack.c.bf16 %v11879_v15, %v11875_v41 }
 0x51f   :  { %14525 = vst [vmem:[#allocation110_spill] sm:$0xff] %v12392_v31  ;;  %7429 = vmatprep.mubr.msk.bf16.mxu0 %vm7892_vm2, %v13656_v37 }
 0x520   :  { %v7532_v17 = vpop.f32.mrf.mxu1 }
 0x522   :  { %v12396_v36 = vpop.f32.mrf.mxu1 }
 0x523   :  { %14526 = vst [vmem:[#allocation82_spill] sm:$0xff] %v12396_v36  ;;  %v14611_v36 = vld [vmem:[#allocation16_spill] sm:$0xff] }
 0x524   :  { %v7535_v2 = vpop.f32.mrf.mxu1 }
 0x526   :  { %7430 = vmatmul.mubr.msk.bf16.gmra.mxu0 %vm4782_vm5, %v14527_v61  ;;  %v12402_v47 = vpop.f32.mrf.mxu1  ;;  %v14536_v61 = vld [vmem:[#allocation36_spill] sm:$0xff] }
 0x527   :  { %14528 = vst [vmem:[#allocation111_spill] sm:$0xff] %v12402_v47  ;;  %7433 = vmatprep.mubr.msk.bf16.mxu0 %vm7892_vm2, %v13656_v37 }
 0x528   :  { %v7536_v33 = vpop.f32.mrf.mxu1 }
 0x529   :  { %v14537_v33 = vld [vmem:[#allocation35_spill] sm:$0xff] }
 0x52a   :  { %v12406_v14 = vpop.f32.mrf.mxu1 }
 0x52b   :  { %14529 = vst [vmem:[#allocation64_spill] sm:$0xff] %v12406_v14  ;;  %v14606_v14 = vld [vmem:[#allocation12_spill] sm:$0xff] }
 0x52c   :  { %v7539_v6 = vpop.f32.mrf.mxu1 }
 0x52d   :  { %v14538_v6 = vpack.c.bf16 %v14536_v61, %v14537_v33 }
 0x52e   :  { %7434 = vmatmul.mubr.msk.bf16.gmra.mxu0 %vm4782_vm5, %v14530_v45  ;;  %v12412_v52 = vpop.f32.mrf.mxu1 }
 0x52f   :  { %14531 = vst [vmem:[#allocation65_spill] sm:$0xff] %v12412_v52  ;;  %7437 = vmatprep.mubr.msk.bf16.mxu0 %vm7892_vm2, %v13656_v37 }
 0x530   :  { %v7540_v21 = vpop.f32.mrf.mxu1 }
 0x532   :  { %v12416_v22 = vpop.f32.mrf.mxu1 }
 0x533   :  { %14532 = vst [vmem:[#allocation85_spill] sm:$0xff] %v12416_v22  ;;  %v14603_v22 = vld [vmem:[#allocation107_spill] sm:$0xff] }
 0x534   :  { %v7543_v26 = vpop.f32.mrf.mxu1 }
 0x535   :  { %v14541_v26 = vld [vmem:[#allocation46_spill] sm:$0xff] }
 0x536   :  { %7438 = vmatmul.mubr.msk.bf16.gmra.mxu0 %vm4782_vm5, %v14533_v12  ;;  %v12422_v17 = vpop.f32.mrf.mxu1  ;;  %v14542_v12 = vld [vmem:[#allocation45_spill] sm:$0xff] }
 0x537   :  { %14534 = vst [vmem:[#allocation112_spill] sm:$0xff] %v12422_v17  ;;  %7441 = vmatprep.mubr.msk.bf16.mxu0 %vm7892_vm2, %v13656_v37 }
 0x538   :  { %v7544_v23 = vpop.f32.mrf.mxu1 }
 0x539   :  { %v14543_v23 = vpack.c.bf16 %v14541_v26, %v14542_v12 }
 0x53a   :  { %v12426_v32 = vpop.f32.mrf.mxu1 }
 0x53b   :  { %14535 = vst [vmem:[#allocation84_spill] sm:$0xff] %v12426_v32  ;;  %v14600_v32 = vld [vmem:[#allocation9_spill] sm:$0xff] }
 0x53c   :  { %v7547_v2 = vpop.f32.mrf.mxu1 }
 0x53e   :  { %7442 = vmatmul.mubr.msk.bf16.gmra.mxu0 %vm4782_vm5, %v14538_v6  ;;  %v12432_v45 = vpop.f32.mrf.mxu1 }
 0x53f   :  { %14539 = vst [vmem:[#allocation113_spill] sm:$0xff] %v12432_v45  ;;  %7445 = vmatprep.mubr.msk.bf16.mxu0 %vm7892_vm2, %v13656_v37 }
 0x540   :  { %v7548_v41 = vpop.f32.mrf.mxu1 }
 0x541   :  { %v14548_v41 = vpack.c.bf16 %v14546_v49, %v14547_v62 }
 0x542   :  { %v12436_v15 = vpop.f32.mrf.mxu1 }
 0x543   :  { %14540 = vst [vmem:[#allocation10_spill] sm:$0xff] %v12436_v15  ;;  %v14597_v15 = vld [vmem:[#allocation6_spill] sm:$0xff] }
 0x544   :  { %v7551_v21 = vpop.f32.mrf.mxu1 }
 0x546   :  { %7446 = vmatmul.mubr.msk.bf16.gmra.mxu0 %vm4782_vm5, %v14543_v23  ;;  %v12442_v2 = vpop.f32.mrf.mxu1 }
 0x547   :  { %14544 = vst [vmem:[#allocation11_spill] sm:$0xff] %v12442_v2  ;;  %7449 = vmatprep.mubr.msk.bf16.mxu0 %vm7892_vm2, %v13656_v37 }
 0x548   :  { %v7552_v61 = vpop.f32.mrf.mxu1 }
 0x549   :  { %v14553_v61 = vpack.c.bf16 %v14551_v51, %v14552_v29 }
 0x54a   :  { %v12446_v33 = vpop.f32.mrf.mxu1 }
 0x54b   :  { %14545 = vst [vmem:[#allocation86_spill] sm:$0xff] %v12446_v33  ;;  %v14594_v33 = vld [vmem:[#allocation103_spill] sm:$0xff] }
 0x54c   :  { %v7555_v6 = vpop.f32.mrf.mxu1 }
 0x54e   :  { %7450 = vmatmul.mubr.msk.bf16.gmra.mxu0 %vm4782_vm5, %v14548_v41  ;;  %v12452_v21 = vpop.f32.mrf.mxu1 }
 0x54f   :  { %14549 = vst [vmem:[#allocation114_spill] sm:$0xff] %v12452_v21  ;;  %7453 = vmatprep.mubr.msk.bf16.mxu0 %vm7892_vm2, %v13656_v37 }
 0x550   :  { %v7556_v26 = vpop.f32.mrf.mxu1 }
 0x551   :  { %v14556_v26 = vpack.c.bf16 %v12069_v3, %v12065_v44 }
 0x552   :  { %v12456_v12 = vpop.f32.mrf.mxu1 }
 0x553   :  { %14550 = vst [vmem:[#allocation87_spill] sm:$0xff] %v12456_v12  ;;  %v14591_v12 = vld [vmem:[#allocation40_spill] sm:$0xff] }
 0x554   :  { %v7559_v23 = vpop.f32.mrf.mxu1 }
 0x556   :  { %7454 = vmatmul.mubr.msk.bf16.gmra.mxu0 %vm4782_vm5, %v14553_v61  ;;  %v12462_v6 = vpop.f32.mrf.mxu1 }
 0x557   :  { %14554 = vst [vmem:[#allocation115_spill] sm:$0xff] %v12462_v6  ;;  %7457 = vmatprep.mubr.msk.bf16.mxu0 %vm7892_vm2, %v13656_v37 }
 0x558   :  { %v7560_v62 = vpop.f32.mrf.mxu1 }
 0x559   :  { %v14559_v62 = vpack.c.bf16 %v12106_v13, %v12102_v34 }
 0x55a   :  { %v12466_v49 = vpop.f32.mrf.mxu1 }
 0x55b   :  { %14555 = vst [vmem:[#allocation14_spill] sm:$0xff] %v12466_v49  ;;  %v14588_v49 = vld [vmem:[#allocation55_spill] sm:$0xff] }
 0x55c   :  { %v7563_v41 = vpop.f32.mrf.mxu1 }
 0x55e   :  { %7458 = vmatmul.mubr.msk.bf16.gmra.mxu0 %vm4782_vm5, %v14556_v26  ;;  %v12472_v23 = vpop.f32.mrf.mxu1 }
 0x55f   :  { %14557 = vst [vmem:[#allocation15_spill] sm:$0xff] %v12472_v23  ;;  %7461 = vmatprep.mubr.msk.bf16.mxu0 %vm7892_vm2, %v13656_v37 }
 0x560   :  { %v7564_v51 = vpop.f32.mrf.mxu1 }
 0x561   :  { %v14562_v51 = vpack.c.bf16 %v12143_v42, %v12139_v0 }
 0x562   :  { %v12476_v29 = vpop.f32.mrf.mxu1 }
 0x563   :  { %14558 = vst [vmem:[#allocation89_spill] sm:$0xff] %v12476_v29  ;;  %v14585_v29 = vld [vmem:[#allocation99_spill] sm:$0xff] }
 0x564   :  { %v7567_v61 = vpop.f32.mrf.mxu1 }
 0x566   :  { %7462 = vmatmul.mubr.msk.bf16.gmra.mxu0 %vm4782_vm5, %v14559_v62  ;;  %v12482_v41 = vpop.f32.mrf.mxu1 }
 0x567   :  { %14560 = vst [vmem:[#allocation116_spill] sm:$0xff] %v12482_v41  ;;  %7465 = vmatprep.mubr.msk.bf16.mxu0 %vm7892_vm2, %v13656_v37  ;;  %v14566_v41 = vld [vmem:[#allocation60_spill] sm:$0xff] }
 0x568   :  { %v7568_v44 = vpop.f32.mrf.mxu1 }
 0x569   :  { %v14567_v44 = vpack.c.bf16 %v14565_v40, %v14566_v41 }
 0x56a   :  { %v12486_v3 = vpop.f32.mrf.mxu1 }
 0x56b   :  { %14561 = vst [vmem:[#allocation88_spill] sm:$0xff] %v12486_v3 }
 0x56c   :  { %v7571_v26 = vpop.f32.mrf.mxu1 }
 0x56e   :  { %7466 = vmatmul.mubr.msk.bf16.gmra.mxu0 %vm4782_vm5, %v14562_v51  ;;  %v12492_v61 = vpop.f32.mrf.mxu1 }
 0x56f   :  { %14563 = vst [vmem:[#allocation117_spill] sm:$0xff] %v12492_v61  ;;  %7469 = vmatprep.mubr.msk.bf16.mxu0 %vm7892_vm2, %v13656_v37  ;;  %v14582_v61 = vld [vmem:[#allocation42_spill] sm:$0xff] }
 0x570   :  { %v7572_v34 = vpop.f32.mrf.mxu1 }
 0x571   :  { %v14570_v34 = vpack.c.bf16 %v12215_v43, %v12211_v35 }
 0x572   :  { %v12496_v13 = vpop.f32.mrf.mxu1 }
 0x573   :  { %14564 = vst [vmem:[#allocation18_spill] sm:$0xff] %v12496_v13 }
 0x574   :  { %v7575_v62 = vpop.f32.mrf.mxu1 }
 0x576   :  { %7470 = vmatmul.mubr.msk.bf16.gmra.mxu0 %vm4782_vm5, %v14567_v44  ;;  %v12502_v26 = vpop.f32.mrf.mxu1 }
 0x577   :  { %14568 = vst [vmem:[#allocation19_spill] sm:$0xff] %v12502_v26  ;;  %7473 = vmatprep.mubr.msk.bf16.mxu0 %vm7892_vm2, %v13656_v37 }
 0x578   :  { %v7576_v0 = vpop.f32.mrf.mxu1 }
 0x579   :  { %v14573_v0 = vpack.c.bf16 %v12263_v1, %v12239_v10 }
 0x57a   :  { %v12506_v42 = vpop.f32.mrf.mxu1 }
 0x57b   :  { %14569 = vst [vmem:[#allocation91_spill] sm:$0xff] %v12506_v42 }
 0x57c   :  { %v7579_v51 = vpop.f32.mrf.mxu1 }
 0x57e   :  { %7474 = vmatmul.mubr.msk.bf16.gmra.mxu0 %vm4782_vm5, %v14570_v34  ;;  %v12512_v62 = vpop.f32.mrf.mxu1 }
 0x57f   :  { %14571 = vst [vmem:[#allocation100_spill] sm:$0xff] %v12512_v62  ;;  %7477 = vmatprep.mubr.msk.bf16.mxu0 %vm7892_vm2, %v13656_v37 }
 0x580   :  { %v7580_v40 = vpop.f32.mrf.mxu1 }
 0x582   :  { %v12516_v41 = vpop.f32.mrf.mxu1 }
 0x583   :  { %14572 = vst [vmem:[#allocation90_spill] sm:$0xff] %v12516_v41  ;;  %v14576_v41 = vld [vmem:[#allocation67_spill] sm:$0xff] }
 0x584   :  { %v7583_v44 = vpop.f32.mrf.mxu1 }
 0x585   :  { %v14575_v44 = vld [vmem:[#allocation98_spill] sm:$0xff] }
 0x586   :  { %v12518_v26 = vpop.f32.mrf.mxu0  ;;  %7478 = vmatmul.mubr.msk.bf16.gmra.mxu0 %vm4782_vm5, %v14573_v0  ;;  %v12524_v51 = vpop.f32.mrf.mxu1  ;;  %v14577_v42 = vpack.c.bf16 %v14575_v44, %v14576_v41 }
 0x587   :  { %14574 = vst [vmem:[#allocation118_spill] sm:$0xff] %v12524_v51  ;;  %7589 = vmatprep.mubr.msk.bf16.mxu0 %vm7892_vm2, %v13656_v37 }
 0x588   :  { %v7383_v35 = vpop.f32.mrf.mxu0  ;;  %v7584_v43 = vpop.f32.mrf.mxu1 }
 0x589   :  { %v14578_v35 = vld [vmem:[#allocation69_spill] sm:$0xff] }
 0x58a   :  { %v12528_v34 = vpop.f32.mrf.mxu0  ;;  %v14579_v43 = vld [vmem:[#allocation25_spill] sm:$0xff] }
 0x58b   :  { %v14580_v13 = vpack.c.bf16 %v14578_v35, %v14579_v43 }
 0x58c   :  { %v7384_v40 = vpop.f32.mrf.mxu0 }
 0x58e   :  { %v12530_v62 = vpop.f32.mrf.mxu0  ;;  %7590 = vmatmul.mubr.msk.bf16.vlgmr.msra.gmra.mxu0 %vm4782_vm5, %v14577_v42 }
 0x58f   :  { %7593 = vmatprep.mubr.msk.bf16.mxu0 %vm7892_vm2, %v13656_v37 }
 0x590   :  { %v7387_v10 = vpop.f32.mrf.mxu0 }
 0x591   :  { %v14581_v10 = vld [vmem:[#allocation30_spill] sm:$0xff] }
 0x592   :  { %v12538_v1 = vpop.f32.mrf.mxu0  ;;  %v14583_v3 = vpack.c.bf16 %v14581_v10, %v14582_v61 }
 0x594   :  { %v7388_v0 = vpop.f32.mrf.mxu0 }
 0x596   :  { %v12540_v51 = vpop.f32.mrf.mxu0  ;;  %7594 = vmatmul.mubr.msk.bf16.gmra.mxu0 %vm4782_vm5, %v14580_v13 }
 0x597   :  { %7597 = vmatprep.mubr.msk.bf16.mxu0 %vm7892_vm2, %v13656_v37 }
 0x598   :  { %v7391_v41 = vpop.f32.mrf.mxu0 }
 0x599   :  { %v14584_v41 = vld [vmem:[#allocation50_spill] sm:$0xff] }
 0x59a   :  { %v12548_v40 = vpop.f32.mrf.mxu0  ;;  %v14586_v23 = vpack.c.bf16 %v14584_v41, %v14585_v29 }
 0x59c   :  { %v7392_v42 = vpop.f32.mrf.mxu0 }
 0x59e   :  { %v12550_v44 = vpop.f32.mrf.mxu0  ;;  %7598 = vmatmul.mubr.msk.bf16.gmra.mxu0 %vm4782_vm5, %v14583_v3 }
 0x59f   :  { %7601 = vmatprep.mubr.msk.bf16.mxu0 %vm7892_vm2, %v13656_v37 }
 0x5a0   :  { %v7395_v0 = vpop.f32.mrf.mxu0 }
 0x5a1   :  { %v14587_v0 = vld [vmem:[#allocation34_spill] sm:$0xff] }
 0x5a2   :  { %v12558_v35 = vpop.f32.mrf.mxu0  ;;  %v14589_v6 = vpack.c.bf16 %v14587_v0, %v14588_v49 }
 0x5a4   :  { %v7396_v13 = vpop.f32.mrf.mxu0 }
 0x5a6   :  { %v12560_v43 = vpop.f32.mrf.mxu0  ;;  %7602 = vmatmul.mubr.msk.bf16.gmra.mxu0 %vm4782_vm5, %v14586_v23 }
 0x5a7   :  { %7605 = vmatprep.mubr.msk.bf16.mxu0 %vm7892_vm2, %v13656_v37 }
 0x5a8   :  { %v7399_v61 = vpop.f32.mrf.mxu0 }
 0x5a9   :  { %v14590_v61 = vld [vmem:[#allocation47_spill] sm:$0xff] }
 0x5aa   :  { %v12568_v42 = vpop.f32.mrf.mxu0  ;;  %v14592_v21 = vpack.c.bf16 %v14590_v61, %v14591_v12 }
 0x5ac   :  { %v7400_v3 = vpop.f32.mrf.mxu0 }
 0x5ae   :  { %v12570_v10 = vpop.f32.mrf.mxu0  ;;  %7606 = vmatmul.mubr.msk.bf16.gmra.mxu0 %vm4782_vm5, %v14589_v6 }
 0x5af   :  { %7609 = vmatprep.mubr.msk.bf16.mxu0 %vm7892_vm2, %v13656_v37 }
 0x5b0   :  { %v7403_v29 = vpop.f32.mrf.mxu0 }
 0x5b1   :  { %v14593_v29 = vld [vmem:[#allocation3_spill] sm:$0xff] }
 0x5b2   :  { %v12578_v13 = vpop.f32.mrf.mxu0  ;;  %v14595_v2 = vpack.c.bf16 %v14593_v29, %v14594_v33 }
 0x5b4   :  { %v7404_v23 = vpop.f32.mrf.mxu0 }
 0x5b6   :  { %v12580_v41 = vpop.f32.mrf.mxu0  ;;  %7610 = vmatmul.mubr.msk.bf16.gmra.mxu0 %vm4782_vm5, %v14592_v21 }
 0x5b7   :  { %7613 = vmatprep.mubr.msk.bf16.mxu0 %vm7892_vm2, %v13656_v37 }
 0x5b8   :  { %v7407_v49 = vpop.f32.mrf.mxu0 }
 0x5b9   :  { %v14596_v49 = vld [vmem:[#allocation5_spill] sm:$0xff] }
 0x5ba   :  { %v12588_v3 = vpop.f32.mrf.mxu0  ;;  %v14598_v45 = vpack.c.bf16 %v14596_v49, %v14597_v15 }
 0x5bc   :  { %v7408_v6 = vpop.f32.mrf.mxu0 }
 0x5be   :  { %v12590_v0 = vpop.f32.mrf.mxu0  ;;  %7614 = vmatmul.mubr.msk.bf16.gmra.mxu0 %vm4782_vm5, %v14595_v2 }
 0x5bf   :  { %7617 = vmatprep.mubr.msk.bf16.mxu0 %vm7892_vm2, %v13656_v37 }
 0x5c0   :  { %v7411_v12 = vpop.f32.mrf.mxu0 }
 0x5c1   :  { %v14599_v12 = vld [vmem:[#allocation70_spill] sm:$0xff] }
 0x5c2   :  { %v12598_v23 = vpop.f32.mrf.mxu0  ;;  %v14601_v17 = vpack.c.bf16 %v14599_v12, %v14600_v32 }
 0x5c4   :  { %v7412_v21 = vpop.f32.mrf.mxu0 }
 0x5c6   :  { %v12600_v61 = vpop.f32.mrf.mxu0  ;;  %7618 = vmatmul.mubr.msk.bf16.gmra.mxu0 %vm4782_vm5, %v14598_v45 }
 0x5c7   :  { %7621 = vmatprep.mubr.msk.bf16.mxu0 %vm7892_vm2, %v13656_v37 }
 0x5c8   :  { %v7415_v33 = vpop.f32.mrf.mxu0 }
 0x5c9   :  { %v14602_v33 = vld [vmem:[#allocation71_spill] sm:$0xff] }
 0x5ca   :  { %v12608_v6 = vpop.f32.mrf.mxu0  ;;  %v14604_v52 = vpack.c.bf16 %v14602_v33, %v14603_v22 }
 0x5cc   :  { %v7416_v2 = vpop.f32.mrf.mxu0 }
 0x5ce   :  { %v12610_v29 = vpop.f32.mrf.mxu0  ;;  %7622 = vmatmul.mubr.msk.bf16.gmra.mxu0 %vm4782_vm5, %v14601_v17 }
 0x5cf   :  { %7625 = vmatprep.mubr.msk.bf16.mxu0 %vm7892_vm2, %v13656_v37 }
 0x5d0   :  { %v7419_v15 = vpop.f32.mrf.mxu0 }
 0x5d1   :  { %v14605_v15 = vld [vmem:[#allocation13_spill] sm:$0xff] }
 0x5d2   :  { %v12618_v21 = vpop.f32.mrf.mxu0  ;;  %v14607_v47 = vpack.c.bf16 %v14605_v15, %v14606_v14 }
 0x5d4   :  { %v7420_v45 = vpop.f32.mrf.mxu0 }
 0x5d6   :  { %v12620_v49 = vpop.f32.mrf.mxu0  ;;  %7626 = vmatmul.mubr.msk.bf16.gmra.mxu0 %vm4782_vm5, %v14604_v52 }
 0x5d7   :  { %7629 = vmatprep.mubr.msk.bf16.mxu0 %vm7892_vm2, %v13656_v37 }
 0x5d8   :  { %v7423_v32 = vpop.f32.mrf.mxu0 }
 0x5d9   :  { %v14610_v32 = vld [vmem:[#allocation17_spill] sm:$0xff] }
 0x5da   :  { %v12628_v2 = vpop.f32.mrf.mxu0  ;;  %v14612_v31 = vpack.c.bf16 %v14610_v32, %v14611_v36 }
 0x5dc   :  { %v7424_v17 = vpop.f32.mrf.mxu0 }
 0x5de   :  { %v12630_v12 = vpop.f32.mrf.mxu0  ;;  %7630 = vmatmul.mubr.msk.bf16.gmra.mxu0 %vm4782_vm5, %v14607_v47 }
 0x5df   :  { %7633 = vmatprep.mubr.msk.bf16.mxu0 %vm7892_vm2, %v13656_v37 }
 0x5e0   :  { %v7427_v22 = vpop.f32.mrf.mxu0 }
 0x5e1   :  { %v14615_v22 = vld [vmem:[#allocation21_spill] sm:$0xff] }
 0x5e2   :  { %v12638_v45 = vpop.f32.mrf.mxu0 }
 0x5e3   :  { %14608 = vst [vmem:[#allocation22_spill] sm:$0xff] %v12638_v45  ;;  %v14617_v45 = vpack.c.bf16 %v14615_v22, %v14616_v19 }
 0x5e4   :  { %v7428_v52 = vpop.f32.mrf.mxu0 }
 0x5e6   :  { %v12640_v33 = vpop.f32.mrf.mxu0  ;;  %7634 = vmatmul.mubr.msk.bf16.gmra.mxu0 %vm4782_vm5, %v14612_v31 }
 0x5e7   :  { %14609 = vst [vmem:[#allocation23_spill] sm:$0xff] %v12640_v33  ;;  %7637 = vmatprep.mubr.msk.bf16.mxu0 %vm7892_vm2, %v13656_v37  ;;  %v14621_v33 = vld [vmem:[#allocation24_spill] sm:$0xff] }
 0x5e8   :  { %v7431_v14 = vpop.f32.mrf.mxu0 }
 0x5e9   :  { %v14620_v14 = vld [vmem:[#allocation26_spill] sm:$0xff] }
 0x5ea   :  { %v12648_v17 = vpop.f32.mrf.mxu0 }
 0x5eb   :  { %14613 = vst [vmem:[#allocation92_spill] sm:$0xff] %v12648_v17  ;;  %v14622_v17 = vpack.c.bf16 %v14620_v14, %v14621_v33 }
 0x5ec   :  { %v7432_v47 = vpop.f32.mrf.mxu0 }
 0x5ee   :  { %v12650_v15 = vpop.f32.mrf.mxu0  ;;  %7638 = vmatmul.mubr.msk.bf16.gmra.mxu0 %vm4782_vm5, %v14617_v45 }
 0x5ef   :  { %14614 = vst [vmem:[#allocation102_spill] sm:$0xff] %v12650_v15  ;;  %7641 = vmatprep.mubr.msk.bf16.mxu0 %vm7892_vm2, %v13656_v37  ;;  %v14626_v15 = vld [vmem:[#allocation29_spill] sm:$0xff] }
 0x5f0   :  { %v7435_v36 = vpop.f32.mrf.mxu0 }
 0x5f1   :  { %v14625_v36 = vld [vmem:[#allocation31_spill] sm:$0xff] }
 0x5f2   :  { %v12658_v52 = vpop.f32.mrf.mxu0 }
 0x5f3   :  { %14618 = vst [vmem:[#allocation93_spill] sm:$0xff] %v12658_v52  ;;  %v14627_v52 = vpack.c.bf16 %v14625_v36, %v14626_v15 }
 0x5f4   :  { %v7436_v31 = vpop.f32.mrf.mxu0 }
 0x5f6   :  { %v12660_v32 = vpop.f32.mrf.mxu0  ;;  %7642 = vmatmul.mubr.msk.bf16.gmra.mxu0 %vm4782_vm5, %v14622_v17 }
 0x5f7   :  { %14619 = vst [vmem:[#allocation101_spill] sm:$0xff] %v12660_v32  ;;  %7645 = vmatprep.mubr.msk.bf16.mxu0 %vm7892_vm2, %v13656_v37  ;;  %v14631_v32 = vld [vmem:[#allocation39_spill] sm:$0xff] }
 0x5f8   :  { %v7439_v19 = vpop.f32.mrf.mxu0 }
 0x5f9   :  { %v14630_v19 = vld [vmem:[#allocation41_spill] sm:$0xff] }
 0x5fa   :  { %v12668_v47 = vpop.f32.mrf.mxu0 }
 0x5fb   :  { %14623 = vst [vmem:[#allocation27_spill] sm:$0xff] %v12668_v47  ;;  %v14632_v47 = vpack.c.bf16 %v14630_v19, %v14631_v32 }
 0x5fc   :  { %v7440_v45 = vpop.f32.mrf.mxu0 }
 0x5fe   :  { %v12670_v22 = vpop.f32.mrf.mxu0  ;;  %7646 = vmatmul.mubr.msk.bf16.gmra.mxu0 %vm4782_vm5, %v14627_v52 }
 0x5ff   :  { %14624 = vst [vmem:[#allocation28_spill] sm:$0xff] %v12670_v22  ;;  %7649 = vmatprep.mubr.msk.bf16.mxu0 %vm7892_vm2, %v13656_v37  ;;  %v14636_v22 = vld [vmem:[#allocation8_spill] sm:$0xff] }
 0x600   :  { %v7443_v33 = vpop.f32.mrf.mxu0 }
 0x601   :  { %v14635_v33 = vld [vmem:[#allocation74_spill] sm:$0xff] }
 0x602   :  { %v12678_v31 = vpop.f32.mrf.mxu0 }
 0x603   :  { %14628 = vst [vmem:[#allocation95_spill] sm:$0xff] %v12678_v31  ;;  %v14637_v31 = vpack.c.bf16 %v14635_v33, %v14636_v22 }
 0x604   :  { %v7444_v17 = vpop.f32.mrf.mxu0 }
 0x606   :  { %v12680_v14 = vpop.f32.mrf.mxu0  ;;  %7650 = vmatmul.mubr.msk.bf16.gmra.mxu0 %vm4782_vm5, %v14632_v47 }
 0x607   :  { %14629 = vst [vmem:[#allocation104_spill] sm:$0xff] %v12680_v14  ;;  %7653 = vmatprep.mubr.msk.bf16.mxu0 %vm7892_vm2, %v13656_v37  ;;  %v14641_v14 = vld [vmem:[#allocation51_spill] sm:$0xff] }
 0x608   :  { %v7447_v15 = vpop.f32.mrf.mxu0 }
 0x609   :  { %v14640_v15 = vld [vmem:[#allocation52_spill] sm:$0xff] }
 0x60a   :  { %v12688_v45 = vpop.f32.mrf.mxu0 }
 0x60b   :  { %14633 = vst [vmem:[#allocation94_spill] sm:$0xff] %v12688_v45  ;;  %v14642_v45 = vpack.c.bf16 %v14640_v15, %v14641_v14 }
 0x60c   :  { %v7448_v52 = vpop.f32.mrf.mxu0 }
 0x60e   :  { %v12690_v36 = vpop.f32.mrf.mxu0  ;;  %7654 = vmatmul.mubr.msk.bf16.gmra.mxu0 %vm4782_vm5, %v14637_v31 }
 0x60f   :  { %14634 = vst [vmem:[#allocation4_spill] sm:$0xff] %v12690_v36  ;;  %7657 = vmatprep.mubr.msk.bf16.mxu0 %vm7892_vm2, %v13656_v37  ;;  %v14646_v36 = vld [vmem:[#allocation78_spill] sm:$0xff] }
 0x610   :  { %v7451_v32 = vpop.f32.mrf.mxu0 }
 0x611   :  { %v14645_v32 = vld [vmem:[#allocation7_spill] sm:$0xff] }
 0x612   :  { %v12698_v17 = vpop.f32.mrf.mxu0 }
 0x613   :  { %14638 = vst [vmem:[#allocation32_spill] sm:$0xff] %v12698_v17  ;;  %v14647_v17 = vpack.c.bf16 %v14645_v32, %v14646_v36 }
 0x614   :  { %v7452_v47 = vpop.f32.mrf.mxu0 }
 0x616   :  { %v12700_v19 = vpop.f32.mrf.mxu0  ;;  %7658 = vmatmul.mubr.msk.bf16.gmra.mxu0 %vm4782_vm5, %v14642_v45 }
 0x617   :  { %14639 = vst [vmem:[#allocation33_spill] sm:$0xff] %v12700_v19  ;;  %7661 = vmatprep.mubr.msk.bf16.mxu0 %vm7892_vm2, %v13656_v37  ;;  %v14651_v19 = vld [vmem:[#allocation56_spill] sm:$0xff] }
 0x618   :  { %v7455_v22 = vpop.f32.mrf.mxu0 }
 0x619   :  { %v14650_v22 = vld [vmem:[#allocation57_spill] sm:$0xff] }
 0x61a   :  { %v12708_v52 = vpop.f32.mrf.mxu0 }
 0x61b   :  { %14643 = vst [vmem:[#allocation97_spill] sm:$0xff] %v12708_v52  ;;  %v14652_v52 = vpack.c.bf16 %v14650_v22, %v14651_v19 }
 0x61c   :  { %v7456_v31 = vpop.f32.mrf.mxu0 }
 0x61e   :  { %v12710_v33 = vpop.f32.mrf.mxu0  ;;  %7662 = vmatmul.mubr.msk.bf16.gmra.mxu0 %vm4782_vm5, %v14647_v17 }
 0x61f   :  { %14644 = vst [vmem:[#allocation106_spill] sm:$0xff] %v12710_v33  ;;  %7665 = vmatprep.mubr.msk.bf16.mxu0 %vm7892_vm2, %v13656_v37  ;;  %v14655_v33 = vld [vmem:[#allocation80_spill] sm:$0xff] }
 0x620   :  { %v7459_v14 = vpop.f32.mrf.mxu0 }
 0x621   :  { %v14654_v14 = vld [vmem:[#allocation108_spill] sm:$0xff] }
 0x622   :  { %v12718_v47 = vpop.f32.mrf.mxu0 }
 0x623   :  { %14648 = vst [vmem:[#allocation105_spill] sm:$0xff] %v12718_v47  ;;  %v14656_v47 = vpack.c.bf16 %v14654_v14, %v14655_v33 }
 0x624   :  { %v7460_v45 = vpop.f32.mrf.mxu0 }
 0x626   :  { %v12720_v15 = vpop.f32.mrf.mxu0  ;;  %7666 = vmatmul.mubr.msk.bf16.gmra.mxu0 %vm4782_vm5, %v14652_v52 }
 0x627   :  { %14649 = vst [vmem:[#allocation37_spill] sm:$0xff] %v12720_v15  ;;  %7669 = vmatprep.mubr.msk.bf16.mxu0 %vm7892_vm2, %v13656_v37  ;;  %v14658_v15 = vld [vmem:[#allocation81_spill] sm:$0xff] }
 0x628   :  { %v7463_v36 = vpop.f32.mrf.mxu0 }
 0x629   :  { %v14657_v36 = vld [vmem:[#allocation109_spill] sm:$0xff] }
 0x62a   :  { %v12728_v31 = vpop.f32.mrf.mxu0 }
 0x62b   :  { %14653 = vst [vmem:[#allocation38_spill] sm:$0xff] %v12728_v31  ;;  %v14659_v31 = vpack.c.bf16 %v14657_v36, %v14658_v15 }
 0x62c   :  { %v7464_v17 = vpop.f32.mrf.mxu0 }
 0x62e   :  { %v12730_v32 = vpop.f32.mrf.mxu0  ;;  %7670 = vmatmul.mubr.msk.bf16.gmra.mxu0 %vm4782_vm5, %v14656_v47 }
 0x62f   :  { %7673 = vmatprep.mubr.msk.bf16.mxu0 %vm7892_vm2, %v13656_v37 }
 0x630   :  { %v7467_v19 = vpop.f32.mrf.mxu0 }
 0x631   :  { %v14660_v19 = vpack.c.bf16 %v12197_v63, %v12193_v39 }
 0x632   :  { %v12738_v45 = vpop.f32.mrf.mxu0 }
 0x634   :  { %v7468_v52 = vpop.f32.mrf.mxu0 }
 0x636   :  { %v12740_v22 = vpop.f32.mrf.mxu0  ;;  %7674 = vmatmul.mubr.msk.bf16.gmra.mxu0 %vm4782_vm5, %v14659_v31 }
 0x637   :  { %7677 = vmatprep.mubr.msk.bf16.mxu0 %vm7892_vm2, %v13656_v37 }
 0x638   :  { %v7471_v33 = vpop.f32.mrf.mxu0 }
 0x639   :  { %v14662_v33 = vpack.c.bf16 %v12230_v38, %v12226_v7  ;;  %v14664_v7 = vpack.c.bf16 %v12271_v11, %v12267_v9  ;;  %v5221_v9 = vadd.f32 %v12286_v18, %v12530_v62 }
 0x63a   :  { %v12748_v17 = vpop.f32.mrf.mxu0 }
 0x63c   :  { %v7472_v47 = vpop.f32.mrf.mxu0 }
 0x63e   :  { %v12750_v14 = vpop.f32.mrf.mxu0  ;;  %7678 = vmatmul.mubr.msk.bf16.gmra.mxu0 %vm4782_vm5, %v14660_v19  ;;  %v5213_v19 = vadd.f32 %v12253_v27, %v12518_v26  ;;  %v12787_v27 = vld [vmem:[%s13199_s7] sm:$0xff] }
 0x63f   :  { %7681 = vmatprep.mubr.msk.bf16.mxu0 %vm7892_vm2, %v13656_v37 }
 0x640   :  { %v7475_v15 = vpop.f32.mrf.mxu0 }
 0x642   :  { %v12758_v52 = vpop.f32.mrf.mxu0 }
 0x644   :  { %v7476_v31 = vpop.f32.mrf.mxu0 }
 0x645   :  { %v12775_v31 = vld [vmem:[%s13198_s6] ss:$0 sm:$0xff] }
 0x646   :  { %v12760_v36 = vpop.f32.mrf.mxu0  ;;  %7682 = vmatmul.mubr.msk.bf16.gmra.mxu0 %vm4782_vm5, %v14662_v33  ;;  %v5216_v33 = vadd.f32 %v12278_v4, %v12528_v34  ;;  %v12796_v34 = vld [vmem:[%s13199_s7 + $0x8] sm:$0xff] }
 0x647   :  { %14661 = vst [vmem:[#allocation119_spill] sm:$0xff] %v12760_v36  ;;  %7685 = vmatprep.mubr.msk.bf16.mxu0 %vm7892_vm2, %v13656_v37  ;;  %vm5993_vm2 = vcmask 523264  }
 0x648   :  { %v7479_v39 = vpop.f32.mrf.mxu0 }
 0x64a   :  { %v12768_v63 = vpop.f32.mrf.mxu0 }
 0x64b   :  { %14663 = vst [vmem:[#allocation120_spill] sm:$0xff] %v12768_v63 }
 0x64c   :  { %v7480_v47 = vpop.f32.mrf.mxu0 }
 0x64e   :  { %v5562_v15 = vpop.f32.mrf.mxu0  ;;  %7686 = vmatmul.mubr.msk.bf16.gmra.mxu0 %vm4782_vm5, %v14664_v7  ;;  %vm6208_vm5 = vcmask 0  }
 0x64f   :  { %v5761_v38 = vadd.f32 %v5562_v15, %v5213_v19 }
 0x650   :  { %v7591_v37 = vpop.f32.mrf.mxu0 }
 0x651   :  { %v5818_v39 = vadd.f32 %v12775_v31, %v5761_v38  ;;  %v5224_v37 = vadd.f32 %v12292_v20, %v12538_v1 }
 0x652   :  { %v5565_v47 = vpop.f32.mrf.mxu0 }
 0x653   :  { %v5868_v26 = vmax.f32 %v5818_v39, 0.0  ;;  %v5762_v63 = vadd.f32 %v5565_v47, %v5216_v33  ;;  %v12806_v33 = vld [vmem:[%s13199_s7 + $0x10] sm:$0xff] }
 0x654   :  { %v7592_v36 = vpop.f32.mrf.mxu0 }
 0x655   :  { %v5819_v11 = vadd.f32 %v12775_v31, %v5762_v63  ;;  %v5943_v19 = vmul.f32 %v12787_v27, %v5868_v26 }
 0x656   :  { %v5570_v4 = vpop.f32.mrf.mxu0 }
 0x657   :  { %v5869_v15 = vmax.f32 %v5819_v11, 0.0  ;;  %v5763_v7 = vadd.f32 %v5570_v4, %v5221_v9  ;;  %v5994_v38 = vsel %vm5993_vm2, %v5943_v19, 0.0  ;;  %v5229_v11 = vadd.f32 %v12296_v46, %v12540_v51  ;;  %v12816_v4 = vld [vmem:[%s13199_s7 + $0x18] sm:$0xff] }
 0x658   :  { %5995 = vadd.xlane.f32.xlu0 %v5994_v38  ;;  %v7595_v36 = vpop.f32.mrf.mxu0 }
 0x659   :  { %v5820_v18 = vadd.f32 %v12775_v31, %v5763_v7  ;;  %v5944_v62 = vmul.f32 %v12796_v34, %v5869_v15 }
 0x65a   :  { %v5573_v63 = vpop.f32.mrf.mxu0 }
 0x65b   :  { %v5870_v39 = vmax.f32 %v5820_v18, 0.0  ;;  %v5764_v47 = vadd.f32 %v5573_v63, %v5224_v37  ;;  %v5997_v26 = vsel %vm5993_vm2, %v5944_v62, 0.0  ;;  %v5232_v37 = vadd.f32 %v12302_v28, %v12548_v40  ;;  %v12826_v62 = vld [vmem:[%s13199_s7 + $0x20] sm:$0xff] }
 0x65c   :  { %5998 = vadd.xlane.f32.xlu0 %v5997_v26  ;;  %v7596_v9 = vpop.f32.mrf.mxu0 }
 0x65d   :  { %v5821_v20 = vadd.f32 %v12775_v31, %v5764_v47  ;;  %v5945_v1 = vmul.f32 %v12806_v33, %v5870_v39  ;;  %v5237_v9 = vadd.f32 %v12306_v60, %v12550_v44 }
 0x65e   :  { %v5578_v19 = vpop.f32.mrf.mxu0 }
 0x65f   :  { %v5871_v15 = vmax.f32 %v5821_v20, 0.0  ;;  %v5765_v7 = vadd.f32 %v5578_v19, %v5229_v11  ;;  %v6000_v38 = vsel %vm5993_vm2, %v5945_v1, 0.0  ;;  %v12836_v20 = vld [vmem:[%s13199_s7 + $0x28] sm:$0xff] }
 0x660   :  { %6001 = vadd.xlane.f32.xlu0 %v6000_v38  ;;  %v7599_v36 = vpop.f32.mrf.mxu0  ;;  %v5240_v38 = vadd.f32 %v12312_v58, %v12558_v35 }
 0x661   :  { %v5822_v46 = vadd.f32 %v12775_v31, %v5765_v7  ;;  %v5946_v51 = vmul.f32 %v12816_v4, %v5871_v15 }
 0x662   :  { %v5581_v18 = vpop.f32.mrf.mxu0 }
 0x663   :  { %v5872_v63 = vmax.f32 %v5822_v46, 0.0  ;;  %v5766_v39 = vadd.f32 %v5581_v18, %v5232_v37  ;;  %v6003_v47 = vsel %vm5993_vm2, %v5946_v51, 0.0  ;;  %v12846_v37 = vld [vmem:[%s13199_s7 + $0x30] sm:$0xff] }
 0x664   :  { %6004 = vadd.xlane.f32.xlu0 %v6003_v47  ;;  %v7600_v26 = vpop.f32.mrf.mxu0 }
 0x665   :  { %v5823_v28 = vadd.f32 %v12775_v31, %v5766_v39  ;;  %v5947_v40 = vmul.f32 %v12826_v62, %v5872_v63  ;;  %v5245_v39 = vadd.f32 %v12316_v25, %v12560_v43  ;;  %v12856_v26 = vld [vmem:[%s13199_s7 + $0x38] sm:$0xff] }
 0x666   :  { %v5586_v11 = vpop.f32.mrf.mxu0 }
 0x667   :  { %v5873_v1 = vmax.f32 %v5823_v28, 0.0  ;;  %v5767_v19 = vadd.f32 %v5586_v11, %v5237_v9  ;;  %v6006_v15 = vsel %vm5993_vm2, %v5947_v40, 0.0 }
 0x668   :  { %6007 = vadd.xlane.f32.xlu0 %v6006_v15  ;;  %v7603_v7 = vpop.f32.mrf.mxu0  ;;  %v12866_v15 = vld [vmem:[%s13199_s7 + $0x40] sm:$0xff] }
 0x669   :  { %v5824_v60 = vadd.f32 %v12775_v31, %v5767_v19  ;;  %v5948_v44 = vmul.f32 %v12836_v20, %v5873_v1  ;;  %v5248_v1 = vadd.f32 %v12322_v5, %v12568_v42 }
 0x66a   :  { %v5589_v36 = vpop.f32.mrf.mxu0 }
 0x66b   :  { %v5874_v46 = vmax.f32 %v5824_v60, 0.0  ;;  %v5768_v51 = vadd.f32 %v5589_v36, %v5240_v38  ;;  %v6009_v18 = vsel %vm5993_vm2, %v5948_v44, 0.0  ;;  %v5253_v36 = vadd.f32 %v12326_v8, %v12570_v10 }
 0x66c   :  { %6010 = vadd.xlane.f32.xlu0 %v6009_v18  ;;  %v7604_v63 = vpop.f32.mrf.mxu0 }
 0x66d   :  { %v5825_v58 = vadd.f32 %v12775_v31, %v5768_v51  ;;  %v5949_v35 = vmul.f32 %v12846_v37, %v5874_v46  ;;  %v12876_v51 = vld [vmem:[%s13199_s7 + $0x48] sm:$0xff] }
 0x66e   :  { %v5594_v47 = vpop.f32.mrf.mxu0 }
 0x66f   :  { %v5875_v9 = vmax.f32 %v5825_v58, 0.0  ;;  %v5769_v28 = vadd.f32 %v5594_v47, %v5245_v39  ;;  %v6012_v40 = vsel %vm5993_vm2, %v5949_v35, 0.0  ;;  %v5256_v35 = vadd.f32 %v12332_v53, %v12578_v13 }
 0x670   :  { %6013 = vadd.xlane.f32.xlu0 %v6012_v40  ;;  %v7607_v11 = vpop.f32.mrf.mxu0 }
 0x671   :  { %v5826_v25 = vadd.f32 %v12775_v31, %v5769_v28  ;;  %v5950_v43 = vmul.f32 %v12856_v26, %v5875_v9  ;;  %v12886_v9 = vld [vmem:[%s13199_s7 + $0x50] sm:$0xff] }
 0x672   :  { %v5597_v19 = vpop.f32.mrf.mxu0 }
 0x673   :  { %v5876_v7 = vmax.f32 %v5826_v25, 0.0  ;;  %v5770_v38 = vadd.f32 %v5597_v19, %v5248_v1  ;;  %v6015_v60 = vsel %vm5993_vm2, %v5950_v43, 0.0  ;;  %v5261_v25 = vadd.f32 %v12336_v59, %v12580_v41  ;;  %v12896_v19 = vld [vmem:[%s13199_s7 + $0x58] sm:$0xff] }
 0x674   :  { %6016 = vadd.xlane.f32.xlu0 %v6015_v60  ;;  %v7608_v44 = vpop.f32.mrf.mxu0 }
 0x675   :  { %v5827_v5 = vadd.f32 %v12775_v31, %v5770_v38  ;;  %v5951_v42 = vmul.f32 %v12866_v15, %v5876_v7 }
 0x676   :  { %v5602_v46 = vpop.f32.mrf.mxu0 }
 0x677   :  { %v5877_v18 = vmax.f32 %v5827_v5, 0.0  ;;  %v5771_v63 = vadd.f32 %v5602_v46, %v5253_v36  ;;  %v6018_v39 = vsel %vm5993_vm2, %v5951_v42, 0.0  ;;  %v5264_v36 = vadd.f32 %v12342_v16, %v12588_v3  ;;  %v12906_v42 = vld [vmem:[%s13199_s7 + $0x60] sm:$0xff] }
 0x678   :  { %6019 = vadd.xlane.f32.xlu0 %v6018_v39  ;;  %v7611_v58 = vpop.f32.mrf.mxu0 }
 0x679   :  { %v5828_v8 = vadd.f32 %v12775_v31, %v5771_v63  ;;  %v5952_v10 = vmul.f32 %v12876_v51, %v5877_v18  ;;  %v5269_v58 = vadd.f32 %v12346_v48, %v12590_v0 }
 0x67a   :  { %v5605_v47 = vpop.f32.mrf.mxu0 }
 0x67b   :  { %v5878_v28 = vmax.f32 %v5828_v8, 0.0  ;;  %v5772_v40 = vadd.f32 %v5605_v47, %v5256_v35  ;;  %v6021_v11 = vsel %vm5993_vm2, %v5952_v10, 0.0  ;;  %v12916_v8 = vld [vmem:[%s13199_s7 + $0x68] sm:$0xff] }
 0x67c   :  { %6022 = vadd.xlane.f32.xlu0 %v6021_v11  ;;  %v7612_v1 = vpop.f32.mrf.mxu0  ;;  %v5272_v11 = vadd.f32 %v12352_v30, %v12598_v23 }
 0x67d   :  { %v5829_v53 = vadd.f32 %v12775_v31, %v5772_v40  ;;  %v5953_v13 = vmul.f32 %v12886_v9, %v5878_v28 }
 0x67e   :  { %v5610_v43 = vpop.f32.mrf.mxu0 }
 0x67f   :  { %v5879_v7 = vmax.f32 %v5829_v53, 0.0  ;;  %v5773_v38 = vadd.f32 %v5610_v43, %v5261_v25  ;;  %v6024_v60 = vsel %vm5993_vm2, %v5953_v13, 0.0  ;;  %v12926_v25 = vld [vmem:[%s13199_s7 + $0x70] sm:$0xff] }
 0x680   :  { %6025 = vadd.xlane.f32.xlu0 %v6024_v60  ;;  %v7615_v44 = vpop.f32.mrf.mxu0 }
 0x681   :  { %v5830_v59 = vadd.f32 %v12775_v31, %v5773_v38  ;;  %v5954_v41 = vmul.f32 %v12896_v19, %v5879_v7  ;;  %v5277_v38 = vadd.f32 %v12356_v55, %v12600_v61  ;;  %v12936_v44 = vld [vmem:[%s13199_s7 + $0x78] sm:$0xff] }
 0x682   :  { %v5613_v5 = vpop.f32.mrf.mxu0 }
 0x683   :  { %v5880_v46 = vmax.f32 %v5830_v59, 0.0  ;;  %v5774_v18 = vadd.f32 %v5613_v5, %v5264_v36  ;;  %v6027_v63 = vsel %vm5993_vm2, %v5954_v41, 0.0 }
 0x684   :  { %6028 = vadd.xlane.f32.xlu0 %v6027_v63  ;;  %v7616_v39 = vpop.f32.mrf.mxu0  ;;  %v12946_v63 = vld [vmem:[%s13199_s7 + $0x80] sm:$0xff] }
 0x685   :  { %v5831_v16 = vadd.f32 %v12775_v31, %v5774_v18  ;;  %v5955_v3 = vmul.f32 %v12906_v42, %v5880_v46  ;;  %v5280_v46 = vadd.f32 %v12362_v24, %v12608_v6 }
 0x686   :  { %v5618_v35 = vpop.f32.mrf.mxu0 }
 0x687   :  { %v5881_v10 = vmax.f32 %v5831_v16, 0.0  ;;  %v5775_v47 = vadd.f32 %v5618_v35, %v5269_v58  ;;  %v6030_v28 = vsel %vm5993_vm2, %v5955_v3, 0.0  ;;  %v5285_v35 = vadd.f32 %v12366_v56, %v12610_v29 }
 0x688   :  { %6031 = vadd.xlane.f32.xlu0 %v6030_v28  ;;  %v7619_v40 = vpop.f32.mrf.mxu0 }
 0x689   :  { %v5832_v48 = vadd.f32 %v12775_v31, %v5775_v47  ;;  %v5956_v0 = vmul.f32 %v12916_v8, %v5881_v10  ;;  %v12956_v47 = vld [vmem:[%s13199_s7 + $0x88] sm:$0xff] }
 0x68a   :  { %v5621_v1 = vpop.f32.mrf.mxu0 }
 0x68b   :  { %v5882_v53 = vmax.f32 %v5832_v48, 0.0  ;;  %v5776_v13 = vadd.f32 %v5621_v1, %v5272_v11  ;;  %v6033_v43 = vsel %vm5993_vm2, %v5956_v0, 0.0  ;;  %v5288_v0 = vadd.f32 %v12372_v54, %v12618_v21 }
 0x68c   :  { %6034 = vadd.xlane.f32.xlu0 %v6033_v43  ;;  %v7620_v7 = vpop.f32.mrf.mxu0 }
 0x68d   :  { %v5833_v30 = vadd.f32 %v12775_v31, %v5776_v13  ;;  %v5957_v23 = vmul.f32 %v12926_v25, %v5882_v53  ;;  %v12966_v53 = vld [vmem:[%s13199_s7 + $0x90] sm:$0xff] }
 0x68e   :  { %v5626_v60 = vpop.f32.mrf.mxu0 }
 0x68f   :  { %v5883_v36 = vmax.f32 %v5833_v30, 0.0  ;;  %v5777_v59 = vadd.f32 %v5626_v60, %v5277_v38  ;;  %v6036_v41 = vsel %vm5993_vm2, %v5957_v23, 0.0  ;;  %v5293_v30 = vadd.f32 %v12376_v57, %v12620_v49  ;;  %v12976_v60 = vld [vmem:[%s13199_s7 + $0x98] sm:$0xff] }
 0x690   :  { %6037 = vadd.xlane.f32.xlu0 %v6036_v41  ;;  %v7623_v5 = vpop.f32.mrf.mxu0 }
 0x691   :  { %v5834_v55 = vadd.f32 %v12775_v31, %v5777_v59  ;;  %v5958_v61 = vmul.f32 %v12936_v44, %v5883_v36 }
 0x692   :  { %v5629_v18 = vpop.f32.mrf.mxu0 }
 0x693   :  { %v5884_v39 = vmax.f32 %v5834_v55, 0.0  ;;  %v5778_v58 = vadd.f32 %v5629_v18, %v5280_v46  ;;  %v6039_v16 = vsel %vm5993_vm2, %v5958_v61, 0.0  ;;  %v5296_v46 = vadd.f32 %v12382_v50, %v12628_v2  ;;  %v12986_v61 = vld [vmem:[%s13199_s7 + $0xa0] sm:$0xff] }
 0x694   :  { %6040 = vadd.xlane.f32.xlu0 %v6039_v16  ;;  %v7624_v3 = vpop.f32.mrf.mxu0 }
 0x695   :  { %v5835_v24 = vadd.f32 %v12775_v31, %v5778_v58  ;;  %v5959_v6 = vmul.f32 %v12946_v63, %v5884_v39  ;;  %v14665_v3 = vld [vmem:[#allocation83_spill] sm:$0xff] }
 0x696   :  { %v5634_v10 = vpop.f32.mrf.mxu0 }
 0x697   :  { %v5885_v28 = vmax.f32 %v5835_v24, 0.0  ;;  %v5779_v40 = vadd.f32 %v5634_v10, %v5285_v35  ;;  %v6042_v11 = vsel %vm5993_vm2, %v5959_v6, 0.0  ;;  %v5301_v35 = vadd.f32 %v14665_v3, %v12630_v12  ;;  %v12996_v6 = vld [vmem:[%s13199_s7 + $0xa8] sm:$0xff] }
 0x698   :  { %6043 = vadd.xlane.f32.xlu0 %v6042_v11  ;;  %v7627_v48 = vpop.f32.mrf.mxu0 }
 0x699   :  { %v5836_v56 = vadd.f32 %v12775_v31, %v5779_v40  ;;  %v5960_v29 = vmul.f32 %v12956_v47, %v5885_v28  ;;  %v14666_v48 = vld [vmem:[#allocation22_spill] sm:$0xff] }
 0x69a   :  { %v5637_v1 = vpop.f32.mrf.mxu0 }
 0x69b   :  { %v5886_v13 = vmax.f32 %v5836_v56, 0.0  ;;  %v5780_v43 = vadd.f32 %v5637_v1, %v5288_v0  ;;  %v6045_v7 = vsel %vm5993_vm2, %v5960_v29, 0.0  ;;  %v14667_v0 = vld [vmem:[#allocation110_spill] sm:$0xff] }
 0x69c   :  { %6046 = vadd.xlane.f32.xlu0 %v6045_v7  ;;  %v7628_v38 = vpop.f32.mrf.mxu0  ;;  %v5304_v56 = vadd.f32 %v14667_v0, %v14666_v48 }
 0x69d   :  { %v5837_v54 = vadd.f32 %v12775_v31, %v5780_v43  ;;  %v5961_v21 = vmul.f32 %v12966_v53, %v5886_v13  ;;  %v13006_v13 = vld [vmem:[%s13199_s7 + $0xb0] sm:$0xff] }
 0x69e   :  { %v5642_v23 = vpop.f32.mrf.mxu0 }
 0x69f   :  { %v5887_v36 = vmax.f32 %v5837_v54, 0.0  ;;  %v5781_v59 = vadd.f32 %v5642_v23, %v5293_v30  ;;  %v6048_v41 = vsel %vm5993_vm2, %v5961_v21, 0.0  ;;  %v14668_v54 = vld [vmem:[#allocation23_spill] sm:$0xff]  ;;  %v14669_v21 = vld [vmem:[#allocation82_spill] sm:$0xff] }
 0x6a0   :  { %6049 = vadd.xlane.f32.xlu0 %v6048_v41  ;;  %v7631_v5 = vpop.f32.mrf.mxu0  ;;  %v5309_v23 = vadd.f32 %v14669_v21, %v14668_v54 }
 0x6a1   :  { %v5838_v57 = vadd.f32 %v12775_v31, %v5781_v59  ;;  %v5962_v49 = vmul.f32 %v12976_v60, %v5887_v36  ;;  %v13016_v5 = vld [vmem:[%s13199_s7 + $0xb8] sm:$0xff] }
 0x6a2   :  { %v5645_v55 = vpop.f32.mrf.mxu0 }
 0x6a3   :  { %v5888_v18 = vmax.f32 %v5838_v57, 0.0  ;;  %v5782_v39 = vadd.f32 %v5645_v55, %v5296_v46  ;;  %v6051_v58 = vsel %vm5993_vm2, %v5962_v49, 0.0 }
 0x6a4   :  { %6052 = vadd.xlane.f32.xlu0 %v6051_v58  ;;  %v7632_v16 = vpop.f32.mrf.mxu0 }
 0x6a5   :  { %v5839_v50 = vadd.f32 %v12775_v31, %v5782_v39  ;;  %v5963_v2 = vmul.f32 %v12986_v61, %v5888_v18  ;;  %v14670_v18 = vld [vmem:[#allocation92_spill] sm:$0xff]  ;;  %v14671_v39 = vld [vmem:[#allocation111_spill] sm:$0xff] }
 0x6a6   :  { %v5650_v24 = vpop.f32.mrf.mxu0  ;;  %v5312_v58 = vadd.f32 %v14671_v39, %v14670_v18 }
 0x6a7   :  { %v5889_v10 = vmax.f32 %v5839_v50, 0.0  ;;  %v5783_v28 = vadd.f32 %v5650_v24, %v5301_v35  ;;  %v6054_v40 = vsel %vm5993_vm2, %v5963_v2, 0.0  ;;  %v13026_v50 = vld [vmem:[%s13199_s7 + $0xc0] sm:$0xff] }
 0x6a8   :  { %6055 = vadd.xlane.f32.xlu0 %v6054_v40  ;;  %v7635_v11 = vpop.f32.mrf.mxu0  ;;  %v14672_v40 = vld [vmem:[#allocation102_spill] sm:$0xff] }
 0x6a9   :  { %v5840_v12 = vadd.f32 %v12775_v31, %v5783_v28  ;;  %v5964_v29 = vmul.f32 %v12996_v6, %v5889_v10  ;;  %v14673_v11 = vld [vmem:[#allocation64_spill] sm:$0xff] }
 0x6aa   :  { %v5653_v1 = vpop.f32.mrf.mxu0  ;;  %v5317_v48 = vadd.f32 %v14673_v11, %v14672_v40 }
 0x6ab   :  { %v5890_v43 = vmax.f32 %v5840_v12, 0.0  ;;  %v5784_v7 = vadd.f32 %v5653_v1, %v5304_v56  ;;  %v6057_v38 = vsel %vm5993_vm2, %v5964_v29, 0.0 }
 0x6ac   :  { %6058 = vadd.xlane.f32.xlu0 %v6057_v38  ;;  %v7636_v30 = vpop.f32.mrf.mxu0  ;;  %v14674_v38 = vld [vmem:[#allocation93_spill] sm:$0xff] }
 0x6ad   :  { %v5841_v36 = vadd.f32 %v12775_v31, %v5784_v7  ;;  %v5965_v59 = vmul.f32 %v13006_v13, %v5890_v43  ;;  %v14675_v30 = vld [vmem:[#allocation65_spill] sm:$0xff] }
 0x6ae   :  { %v5658_v41 = vpop.f32.mrf.mxu0  ;;  %v5320_v54 = vadd.f32 %v14675_v30, %v14674_v38 }
 0x6af   :  { %v5891_v46 = vmax.f32 %v5841_v36, 0.0  ;;  %v5785_v57 = vadd.f32 %v5658_v41, %v5309_v23  ;;  %v6060_v49 = vsel %vm5993_vm2, %v5965_v59, 0.0 }
 0x6b0   :  { %6061 = vadd.xlane.f32.xlu0 %v6060_v49  ;;  %v7639_v55 = vpop.f32.mrf.mxu0  ;;  %v14676_v49 = vld [vmem:[#allocation101_spill] sm:$0xff] }
 0x6b1   :  { %v5842_v16 = vadd.f32 %v12775_v31, %v5785_v57  ;;  %v5966_v3 = vmul.f32 %v13016_v5, %v5891_v46  ;;  %v14677_v55 = vld [vmem:[#allocation85_spill] sm:$0xff] }
 0x6b2   :  { %v5661_v35 = vpop.f32.mrf.mxu0  ;;  %v5325_v18 = vadd.f32 %v14677_v55, %v14676_v49 }
 0x6b3   :  { %v5892_v2 = vmax.f32 %v5842_v16, 0.0  ;;  %v5786_v24 = vadd.f32 %v5661_v35, %v5312_v58  ;;  %v6063_v10 = vsel %vm5993_vm2, %v5966_v3, 0.0 }
 0x6b4   :  { %6064 = vadd.xlane.f32.xlu0 %v6063_v10  ;;  %v7640_v28 = vpop.f32.mrf.mxu0  ;;  %v14679_v10 = vld [vmem:[#allocation112_spill] sm:$0xff] }
 0x6b5   :  { %v5843_v0 = vadd.f32 %v12775_v31, %v5786_v24  ;;  %v5967_v56 = vmul.f32 %v13026_v50, %v5892_v2  ;;  %v14678_v24 = vld [vmem:[#allocation27_spill] sm:$0xff] }
 0x6b6   :  { %v5666_v12 = vpop.f32.mrf.mxu0  ;;  %v5328_v28 = vadd.f32 %v14679_v10, %v14678_v24 }
 0x6b7   :  { %v5893_v29 = vmax.f32 %v5843_v0, 0.0  ;;  %v5787_v1 = vadd.f32 %v5666_v12, %v5317_v48  ;;  %v6066_v43 = vsel %vm5993_vm2, %v5967_v56, 0.0 }
 0x6b8   :  { %6067 = vadd.xlane.f32.xlu0 %v6066_v43  ;;  %v7643_v7 = vpop.f32.mrf.mxu0 }
 0x6b9   :  { %v5844_v21 = vadd.f32 %v12775_v31, %v5787_v1  ;;  %v5968_v23 = vmul.f32 %v12787_v27, %v5893_v29  ;;  %v14680_v29 = vld [vmem:[#allocation28_spill] sm:$0xff] }
 0x6ba   :  { %v5669_v36 = vpop.f32.mrf.mxu0  ;;  %v14681_v1 = vld [vmem:[#allocation84_spill] sm:$0xff] }
 0x6bb   :  { %v5894_v59 = vmax.f32 %v5844_v21, 0.0  ;;  %v5788_v41 = vadd.f32 %v5669_v36, %v5320_v54  ;;  %v6069_v46 = vsel %vm5993_vm2, %v5968_v23, 0.0  ;;  %v5333_v43 = vadd.f32 %v14681_v1, %v14680_v29  ;;  %v14682_v36 = vld [vmem:[#allocation95_spill] sm:$0xff] }
 0x6bc   :  { %6070 = vadd.xlane.f32.xlu1 %v6069_v46  ;;  %v7644_v57 = vpop.f32.mrf.mxu0 }
 0x6bd   :  { %v5845_v39 = vadd.f32 %v12775_v31, %v5788_v41  ;;  %v5969_v58 = vmul.f32 %v12796_v34, %v5894_v59  ;;  %v14683_v59 = vld [vmem:[#allocation113_spill] sm:$0xff] }
 0x6be   :  { %v5674_v16 = vpop.f32.mrf.mxu0  ;;  %v5336_v41 = vadd.f32 %v14683_v59, %v14682_v36  ;;  %v14690_v59 = vld [vmem:[#allocation32_spill] sm:$0xff] }
 0x6bf   :  { %v5895_v3 = vmax.f32 %v5845_v39, 0.0  ;;  %v5789_v35 = vadd.f32 %v5674_v16, %v5325_v18  ;;  %v6072_v2 = vsel %vm5993_vm2, %v5969_v58, 0.0  ;;  %v14684_v58 = vld [vmem:[#allocation104_spill] sm:$0xff]  ;;  %v14685_v16 = vld [vmem:[#allocation10_spill] sm:$0xff] }
 0x6c0   :  { %6073 = vadd.xlane.f32.xlu1 %v6072_v2  ;;  %v7647_v27 = vpop.f32.mrf.mxu0 }
 0x6c1   :  { %v5846_v40 = vadd.f32 %v12775_v31, %v5789_v35  ;;  %v5970_v11 = vmul.f32 %v12806_v33, %v5895_v3  ;;  %v5341_v3 = vadd.f32 %v14685_v16, %v14684_v58  ;;  %v14692_v58 = vld [vmem:[#allocation33_spill] sm:$0xff]  ;;  %v14693_v16 = vld [vmem:[#allocation87_spill] sm:$0xff] }
 0x6c2   :  { %v5677_v48 = vpop.f32.mrf.mxu0 }
 0x6c3   :  { %v5896_v0 = vmax.f32 %v5846_v40, 0.0  ;;  %v5790_v56 = vadd.f32 %v5677_v48, %v5328_v28  ;;  %v6075_v12 = vsel %vm5993_vm2, %v5970_v11, 0.0  ;;  %v14686_v40 = vld [vmem:[#allocation94_spill] sm:$0xff]  ;;  %v14687_v11 = vld [vmem:[#allocation11_spill] sm:$0xff] }
 0x6c4   :  { %6076 = vadd.xlane.f32.xlu1 %v6075_v12  ;;  %v7648_v34 = vpop.f32.mrf.mxu0  ;;  %v5344_v48 = vadd.f32 %v14687_v11, %v14686_v40  ;;  %v14695_v40 = vld [vmem:[#allocation115_spill] sm:$0xff] }
 0x6c5   :  { %v5847_v7 = vadd.f32 %v12775_v31, %v5790_v56  ;;  %v5971_v38 = vmul.f32 %v12816_v4, %v5896_v0 }
 0x6c6   :  { %v5682_v30 = vpop.f32.mrf.mxu0 }
 0x6c7   :  { %v5897_v54 = vmax.f32 %v5847_v7, 0.0  ;;  %v5791_v21 = vadd.f32 %v5682_v30, %v5333_v43  ;;  %v6078_v23 = vsel %vm5993_vm2, %v5971_v38, 0.0  ;;  %v14688_v43 = vld [vmem:[#allocation4_spill] sm:$0xff]  ;;  %v14689_v7 = vld [vmem:[#allocation86_spill] sm:$0xff] }
 0x6c8   :  { %6079 = vadd.xlane.f32.xlu1 %v6078_v23  ;;  %v7651_v33 = vpop.f32.mrf.mxu0  ;;  %v5349_v38 = vadd.f32 %v14689_v7, %v14688_v43  ;;  %v14697_v43 = vld [vmem:[#allocation14_spill] sm:$0xff] }
 0x6c9   :  { %v5848_v46 = vadd.f32 %v12775_v31, %v5791_v21  ;;  %v5972_v57 = vmul.f32 %v12826_v62, %v5897_v54 }
 0x6ca   :  { %v5685_v49 = vpop.f32.mrf.mxu0 }
 0x6cb   :  { %v5898_v55 = vmax.f32 %v5848_v46, 0.0  ;;  %v5792_v18 = vadd.f32 %v5685_v49, %v5336_v41  ;;  %v6081_v39 = vsel %vm5993_vm2, %v5972_v57, 0.0  ;;  %v14691_v41 = vld [vmem:[#allocation114_spill] sm:$0xff] }
 0x6cc   :  { %6082 = vadd.xlane.f32.xlu1 %v6081_v39  ;;  %v7652_v4 = vpop.f32.mrf.mxu0  ;;  %v5352_v46 = vadd.f32 %v14691_v41, %v14690_v59  ;;  %v14699_v59 = vld [vmem:[#allocation15_spill] sm:$0xff] }
 0x6cd   :  { %v5849_v35 = vadd.f32 %v12775_v31, %v5792_v18  ;;  %v5973_v2 = vmul.f32 %v12836_v20, %v5898_v55 }
 0x6ce   :  { %v5690_v27 = vpop.f32.mrf.mxu0 }
 0x6cf   :  { %v5899_v24 = vmax.f32 %v5849_v35, 0.0  ;;  %v5793_v10 = vadd.f32 %v5690_v27, %v5341_v3  ;;  %v6084_v28 = vsel %vm5993_vm2, %v5973_v2, 0.0  ;;  %v5357_v3 = vadd.f32 %v14693_v16, %v14692_v58  ;;  %v14701_v58 = vld [vmem:[#allocation89_spill] sm:$0xff] }
 0x6d0   :  { %6085 = vadd.xlane.f32.xlu1 %v6084_v28  ;;  %v7655_v62 = vpop.f32.mrf.mxu0 }
 0x6d1   :  { %v5850_v0 = vadd.f32 %v12775_v31, %v5793_v10  ;;  %v5974_v56 = vmul.f32 %v12846_v37, %v5899_v24  ;;  %v14694_v62 = vld [vmem:[#allocation97_spill] sm:$0xff] }
 0x6d2   :  { %v5693_v12 = vpop.f32.mrf.mxu0  ;;  %v5360_v11 = vadd.f32 %v14695_v40, %v14694_v62  ;;  %v14703_v62 = vld [vmem:[#allocation116_spill] sm:$0xff] }
 0x6d3   :  { %v5900_v34 = vmax.f32 %v5850_v0, 0.0  ;;  %v5794_v29 = vadd.f32 %v5693_v12, %v5344_v48  ;;  %v6087_v1 = vsel %vm5993_vm2, %v5974_v56, 0.0 }
 0x6d4   :  { %6088 = vadd.xlane.f32.xlu1 %v6087_v1  ;;  %v7656_v20 = vpop.f32.mrf.mxu0 }
 0x6d5   :  { %v5851_v30 = vadd.f32 %v12775_v31, %v5794_v29  ;;  %v5975_v54 = vmul.f32 %v12856_v26, %v5900_v34  ;;  %v14696_v20 = vld [vmem:[#allocation106_spill] sm:$0xff] }
 0x6d6   :  { %v5698_v21 = vpop.f32.mrf.mxu0  ;;  %v5365_v7 = vadd.f32 %v14697_v43, %v14696_v20 }
 0x6d7   :  { %v5901_v23 = vmax.f32 %v5851_v30, 0.0  ;;  %v5795_v33 = vadd.f32 %v5698_v21, %v5349_v38  ;;  %v6090_v36 = vsel %vm5993_vm2, %v5975_v54, 0.0 }
 0x6d8   :  { %6091 = vadd.xlane.f32.xlu1 %v6090_v36  ;;  %v7659_v37 = vpop.f32.mrf.mxu0 }
 0x6d9   :  { %v5852_v57 = vadd.f32 %v12775_v31, %v5795_v33  ;;  %v5976_v49 = vmul.f32 %v12866_v15, %v5901_v23  ;;  %v14698_v37 = vld [vmem:[#allocation105_spill] sm:$0xff] }
 0x6da   :  { %v5701_v55 = vpop.f32.mrf.mxu0  ;;  %v5368_v41 = vadd.f32 %v14699_v59, %v14698_v37 }
 0x6db   :  { %v5902_v18 = vmax.f32 %v5852_v57, 0.0  ;;  %v5796_v39 = vadd.f32 %v5701_v55, %v5352_v46  ;;  %v6093_v4 = vsel %vm5993_vm2, %v5976_v49, 0.0 }
 0x6dc   :  { %6094 = vadd.xlane.f32.xlu1 %v6093_v4  ;;  %v7660_v26 = vpop.f32.mrf.mxu0 }
 0x6dd   :  { %v5853_v35 = vadd.f32 %v12775_v31, %v5796_v39  ;;  %v5977_v2 = vmul.f32 %v12876_v51, %v5902_v18  ;;  %v14700_v26 = vld [vmem:[#allocation37_spill] sm:$0xff] }
 0x6de   :  { %v5706_v27 = vpop.f32.mrf.mxu0  ;;  %v5373_v16 = vadd.f32 %v14701_v58, %v14700_v26 }
 0x6df   :  { %v5903_v24 = vmax.f32 %v5853_v35, 0.0  ;;  %v5797_v10 = vadd.f32 %v5706_v27, %v5357_v3  ;;  %v6096_v28 = vsel %vm5993_vm2, %v5977_v2, 0.0 }
 0x6e0   :  { %6097 = vadd.xlane.f32.xlu1 %v6096_v28  ;;  %v7663_v15 = vpop.f32.mrf.mxu0 }
 0x6e1   :  { %v5854_v48 = vadd.f32 %v12775_v31, %v5797_v10  ;;  %v13087_v0 = vpop.xlane.xlu0 %5995  ;;  %v5978_v56 = vmul.f32 %v12886_v9, %v5903_v24  ;;  %v14702_v15 = vld [vmem:[#allocation38_spill] sm:$0xff] }
 0x6e2   :  { %v5709_v12 = vpop.f32.mrf.mxu0  ;;  %v5376_v40 = vadd.f32 %v14703_v62, %v14702_v15 }
 0x6e3   :  { %v5904_v34 = vmax.f32 %v5854_v48, 0.0  ;;  %v5798_v29 = vadd.f32 %v5709_v12, %v5360_v11  ;;  %v6099_v51 = vsel %vm5993_vm2, %v5978_v56, 0.0 }
 0x6e4   :  { %6100 = vadd.xlane.f32.xlu1 %v6099_v51  ;;  %v7664_v1 = vpop.f32.mrf.mxu0 }
 0x6e5   :  { %v5855_v38 = vadd.f32 %v12775_v31, %v5798_v29  ;;  %v13094_v30 = vpop.xlane.xlu0 %5998  ;;  %v5979_v54 = vmul.f32 %v12896_v19, %v5904_v34  ;;  %v14704_v1 = vld [vmem:[#allocation88_spill] sm:$0xff] }
 0x6e6   :  { %v5714_v21 = vpop.f32.mrf.mxu0  ;;  %v5381_v20 = vadd.f32 %v14704_v1, %v12730_v32  ;;  %v14709_v1 = vld [vmem:[#allocation100_spill] sm:$0xff] }
 0x6e7   :  { %v5905_v23 = vmax.f32 %v5855_v38, 0.0  ;;  %v5799_v33 = vadd.f32 %v5714_v21, %v5365_v7  ;;  %v6102_v9 = vsel %vm5993_vm2, %v5979_v54, 0.0 }
 0x6e8   :  { %6103 = vadd.xlane.f32.xlu1 %v6102_v9  ;;  %v7667_v36 = vpop.f32.mrf.mxu0  ;;  %v14705_v9 = vld [vmem:[#allocation117_spill] sm:$0xff] }
 0x6e9   :  { %v5856_v46 = vadd.f32 %v12775_v31, %v5799_v33  ;;  %v13101_v57 = vpop.xlane.xlu0 %6001  ;;  %v5980_v49 = vmul.f32 %v12906_v42, %v5905_v23  ;;  %v5384_v36 = vadd.f32 %v14705_v9, %v12738_v45  ;;  %v14711_v9 = vld [vmem:[#allocation90_spill] sm:$0xff] }
 0x6ea   :  { %v5717_v55 = vpop.f32.mrf.mxu0 }
 0x6eb   :  { %v5906_v18 = vmax.f32 %v5856_v46, 0.0  ;;  %v5800_v39 = vadd.f32 %v5717_v55, %v5368_v41  ;;  %v6105_v19 = vsel %vm5993_vm2, %v5980_v49, 0.0 }
 0x6ec   :  { %6106 = vadd.xlane.f32.xlu1 %v6105_v19  ;;  %v7668_v4 = vpop.f32.mrf.mxu0 }
 0x6ed   :  { %v5857_v3 = vadd.f32 %v12775_v31, %v5800_v39  ;;  %v13108_v35 = vpop.xlane.xlu0 %6004  ;;  %v5981_v2 = vmul.f32 %v12916_v8, %v5906_v18  ;;  %v14706_v18 = vld [vmem:[#allocation18_spill] sm:$0xff] }
 0x6ee   :  { %v5722_v27 = vpop.f32.mrf.mxu0  ;;  %v5389_v39 = vadd.f32 %v14706_v18, %v12740_v22  ;;  %v14713_v18 = vld [vmem:[#allocation118_spill] sm:$0xff] }
 0x6ef   :  { %v5907_v24 = vmax.f32 %v5857_v3, 0.0  ;;  %v5801_v10 = vadd.f32 %v5722_v27, %v5373_v16  ;;  %v6108_v42 = vsel %vm5993_vm2, %v5981_v2, 0.0  ;;  %v14707_v2 = vld [vmem:[#allocation19_spill] sm:$0xff] }
 0x6f0   :  { %6109 = vadd.xlane.f32.xlu1 %v6108_v42  ;;  %v7671_v28 = vpop.f32.mrf.mxu0  ;;  %v5392_v27 = vadd.f32 %v14707_v2, %v12748_v17 }
 0x6f1   :  { %v5858_v11 = vadd.f32 %v12775_v31, %v5801_v10  ;;  %v13115_v48 = vpop.xlane.xlu0 %6007  ;;  %v5982_v56 = vmul.f32 %v12926_v25, %v5907_v24 }
 0x6f2   :  { %v5725_v12 = vpop.f32.mrf.mxu0 }
 0x6f3   :  { %v5908_v34 = vmax.f32 %v5858_v11, 0.0  ;;  %v5802_v29 = vadd.f32 %v5725_v12, %v5376_v40  ;;  %v6111_v8 = vsel %vm5993_vm2, %v5982_v56, 0.0  ;;  %v14708_v40 = vld [vmem:[#allocation91_spill] sm:$0xff] }
 0x6f4   :  { %6112 = vadd.xlane.f32.xlu1 %v6111_v8  ;;  %v7672_v51 = vpop.f32.mrf.mxu0  ;;  %v5397_v11 = vadd.f32 %v14708_v40, %v12750_v14 }
 0x6f5   :  { %v5859_v43 = vadd.f32 %v12775_v31, %v5802_v29  ;;  %v13122_v7 = vpop.xlane.xlu0 %6010  ;;  %v5983_v38 = vmul.f32 %v12936_v44, %v5908_v34 }
 0x6f6   :  { %v5730_v54 = vpop.f32.mrf.mxu0 }
 0x6f7   :  { %v5909_v21 = vmax.f32 %v5859_v43, 0.0  ;;  %v5803_v23 = vadd.f32 %v5730_v54, %v5381_v20  ;;  %v6114_v25 = vsel %vm5993_vm2, %v5983_v38, 0.0  ;;  %v5400_v20 = vadd.f32 %v14709_v1, %v12758_v52 }
 0x6f8   :  { %6115 = vadd.xlane.f32.xlu1 %v6114_v25  ;;  %v7675_v33 = vpop.f32.mrf.mxu0 }
 0x6f9   :  { %v5860_v37 = vadd.f32 %v12775_v31, %v5803_v23  ;;  %v13129_v59 = vpop.xlane.xlu0 %6013  ;;  %v5984_v32 = vmul.f32 %v12946_v63, %v5909_v21  ;;  %v14710_v33 = vld [vmem:[#allocation119_spill] sm:$0xff] }
 0x6fa   :  { %v5733_v41 = vpop.f32.mrf.mxu0 }
 0x6fb   :  { %v5910_v46 = vmax.f32 %v5860_v37, 0.0  ;;  %v5804_v49 = vadd.f32 %v5733_v41, %v5384_v36  ;;  %v6117_v44 = vsel %vm5993_vm2, %v5984_v32, 0.0  ;;  %v5405_v36 = vadd.f32 %v14711_v9, %v14710_v33 }
 0x6fc   :  { %6118 = vadd.xlane.f32.xlu1 %v6117_v44  ;;  %v7676_v55 = vpop.f32.mrf.mxu0 }
 0x6fd   :  { %v5861_v19 = vadd.f32 %v12775_v31, %v5804_v49  ;;  %v13136_v4 = vpop.xlane.xlu0 %6016  ;;  %v5985_v45 = vmul.f32 %v12956_v47, %v5910_v46  ;;  %v14712_v55 = vld [vmem:[#allocation120_spill] sm:$0xff] }
 0x6fe   :  { %v5738_v26 = vpop.f32.mrf.mxu0 }
 0x6ff   :  { %v5911_v58 = vmax.f32 %v5861_v19, 0.0  ;;  %v5805_v16 = vadd.f32 %v5738_v26, %v5389_v39  ;;  %v6120_v63 = vsel %vm5993_vm2, %v5985_v45, 0.0  ;;  %v5408_v39 = vadd.f32 %v14713_v18, %v14712_v55 }
 0x700   :  { %6121 = vadd.xlane.f32.xlu1 %v6120_v63  ;;  %v7679_v3 = vpop.f32.mrf.mxu0 }
 0x701   :  { %v5862_v24 = vadd.f32 %v12775_v31, %v5805_v16  ;;  %v13143_v10 = vpop.xlane.xlu0 %6019  ;;  %v5986_v22 = vmul.f32 %v12966_v53, %v5911_v58  ;;  %v6144_v3 = vadd.f32 %v13094_v30, %v13087_v0 }
 0x702   :  { %v5741_v42 = vpop.f32.mrf.mxu0 }
 0x703   :  { %v5912_v28 = vmax.f32 %v5862_v24, 0.0  ;;  %v5806_v15 = vadd.f32 %v5741_v42, %v5392_v27  ;;  %v6123_v47 = vsel %vm5993_vm2, %v5986_v22, 0.0  ;;  %v6145_v42 = vadd.f32 %v6144_v3, %v13101_v57 }
 0x704   :  { %6124 = vadd.xlane.f32.xlu1 %v6123_v47  ;;  %v7680_v62 = vpop.f32.mrf.mxu0 }
 0x705   :  { %v5863_v56 = vadd.f32 %v12775_v31, %v5806_v15  ;;  %v6023_v12 = vpop.xlane.xlu0 %6022  ;;  %v5987_v17 = vmul.f32 %v12976_v60, %v5912_v28  ;;  %v6146_v15 = vadd.f32 %v6145_v42, %v13108_v35 }
 0x706   :  { %v5746_v34 = vpop.f32.mrf.mxu0 }
 0x707   :  { %v5913_v29 = vmax.f32 %v5863_v56, 0.0  ;;  %v5807_v8 = vadd.f32 %v5746_v34, %v5397_v11  ;;  %v6126_v53 = vsel %vm5993_vm2, %v5987_v17, 0.0  ;;  %v6147_v0 = vadd.f32 %v6146_v15, %v13115_v48 }
 0x708   :  { %6127 = vadd.xlane.f32.xlu1 %v6126_v53  ;;  %v7683_v51 = vpop.f32.mrf.mxu0 }
 0x709   :  { %v5864_v43 = vadd.f32 %v12775_v31, %v5807_v8  ;;  %v6026_v38 = vpop.xlane.xlu0 %6025  ;;  %v5988_v14 = vmul.f32 %v12986_v61, %v5913_v29 }
 0x70a   :  { %v5749_v54 = vpop.f32.mrf.mxu0 }
 0x70b   :  { %v5914_v21 = vmax.f32 %v5864_v43, 0.0  ;;  %v5808_v23 = vadd.f32 %v5749_v54, %v5400_v20  ;;  %v6129_v60 = vsel %vm5993_vm2, %v5988_v14, 0.0 }
 0x70c   :  { %6130 = vadd.xlane.f32.xlu1 %v6129_v60  ;;  %v7684_v25 = vpop.f32.mrf.mxu0 }
 0x70d   :  { %v5865_v37 = vadd.f32 %v12775_v31, %v5808_v23  ;;  %v6029_v32 = vpop.xlane.xlu0 %6028  ;;  %v5989_v52 = vmul.f32 %v12996_v6, %v5914_v21 }
 0x70e   :  { %v5754_v41 = vpop.f32.mrf.mxu0 }
 0x70f   :  { %v5915_v46 = vmax.f32 %v5865_v37, 0.0  ;;  %v5809_v49 = vadd.f32 %v5754_v41, %v5405_v36  ;;  %v6132_v61 = vsel %vm5993_vm2, %v5989_v52, 0.0 }
 0x710   :  { %6133 = vadd.xlane.f32.xlu1 %v6132_v61  ;;  %v7687_v44 = vpop.f32.mrf.mxu0 }
 0x711   :  { %v5866_v19 = vadd.f32 %v12775_v31, %v5809_v49  ;;  %v6032_v45 = vpop.xlane.xlu0 %6031  ;;  %v5990_v26 = vmul.f32 %v13006_v13, %v5915_v46  ;;  %v6205_v46 = vstv %s13200_s8 }
 0x712   :  { %v5757_v58 = vpop.f32.mrf.mxu0 }
 0x713   :  { %v5916_v16 = vmax.f32 %v5866_v19, 0.0  ;;  %v5810_v63 = vadd.f32 %v5757_v58, %v5408_v39  ;;  %v6135_v6 = vsel %vm5993_vm2, %v5990_v26, 0.0 }
 0x714   :  { %6136 = vadd.xlane.f32.xlu1 %v6135_v6  ;;  %v7688_v2 = vpop.f32.mrf.mxu0 }
 0x715   :  { %v5867_v27 = vadd.f32 %v12775_v31, %v5810_v63  ;;  %v6035_v24 = vpop.xlane.xlu0 %6034  ;;  %v5991_v22 = vmul.f32 %v13016_v5, %v5916_v16  ;;  %v6148_v31 = vadd.f32 %v6147_v0, %v13122_v7 }
 0x717   :  { %v5917_v28 = vmax.f32 %v5867_v27, 0.0  ;;  %v6138_v13 = vsel %vm5993_vm2, %v5991_v22, 0.0  ;;  %v6149_v5 = vadd.f32 %v6148_v31, %v13129_v59 }
 0x718   :  { %6139 = vadd.xlane.f32.xlu1 %v6138_v13 }
 0x719   :  { %v6038_v47 = vpop.xlane.xlu0 %6037  ;;  %v5992_v62 = vmul.f32 %v13026_v50, %v5917_v28  ;;  %v6150_v57 = vadd.f32 %v6149_v5, %v13136_v4 }
 0x71b   :  { %v6141_v30 = vsel %vm5993_vm2, %v5992_v62, 0.0  ;;  %v6151_v56 = vadd.f32 %v6150_v57, %v13143_v10 }
 0x71c   :  { %6142 = vadd.xlane.f32.xlu1 %v6141_v30 }
 0x71d   :  { %v6041_v40 = vpop.xlane.xlu0 %6040  ;;  %v6152_v35 = vadd.f32 %v6151_v56, %v6023_v12 }
 0x71f   :  { %v6153_v34 = vadd.f32 %v6152_v35, %v6026_v38 }
 0x721   :  { %v6044_v11 = vpop.xlane.xlu0 %6043  ;;  %v6154_v29 = vadd.f32 %v6153_v34, %v6029_v32 }
 0x723   :  { %v6155_v8 = vadd.f32 %v6154_v29, %v6032_v45 }
 0x725   :  { %v6047_v17 = vpop.xlane.xlu0 %6046  ;;  %v6156_v48 = vadd.f32 %v6155_v8, %v6035_v24 }
 0x727   :  { %v6157_v51 = vadd.f32 %v6156_v48, %v6038_v47 }
 0x729   :  { %v6050_v50 = vpop.xlane.xlu0 %6049  ;;  %v6158_v1 = vadd.f32 %v6157_v51, %v6041_v40 }
 0x72b   :  { %v6159_v20 = vadd.f32 %v6158_v1, %v6044_v11 }
 0x72d   :  { %v6053_v53 = vpop.xlane.xlu0 %6052  ;;  %v6160_v43 = vadd.f32 %v6159_v20, %v6047_v17 }
 0x72f   :  { %v6161_v59 = vadd.f32 %v6160_v43, %v6050_v50 }
 0x731   :  { %v6056_v7 = vpop.xlane.xlu0 %6055  ;;  %v6162_v54 = vadd.f32 %v6161_v59, %v6053_v53 }
 0x733   :  { %v6163_v21 = vadd.f32 %v6162_v54, %v6056_v7 }
 0x735   :  { %v6059_v14 = vpop.xlane.xlu0 %6058 }
 0x736   :  { %v6164_v23 = vadd.f32 %v6163_v21, %v6059_v14 }
 0x739   :  { %v6062_v4 = vpop.xlane.xlu0 %6061 }
 0x73a   :  { %v6165_v12 = vadd.f32 %v6164_v23, %v6062_v4 }
 0x73d   :  { %v6065_v10 = vpop.xlane.xlu0 %6064 }
 0x73e   :  { %v6166_v60 = vadd.f32 %v6165_v12, %v6065_v10 }
 0x741   :  { %v6068_v38 = vpop.xlane.xlu0 %6067 }
 0x742   :  { %v6167_v25 = vadd.f32 %v6166_v60, %v6068_v38 }
 0x744   :  { %v6168_v33 = vrot.slane %v6167_v25, 4 }
 0x745   :  { %v6071_v9 = vpop.xlane.xlu1 %6070 }
 0x746   :  { %v6169_v36 = vadd.f32 %v6168_v33, %v6167_v25 }
 0x748   :  { %v6170_v37 = vrot.slane %v6169_v36, 2 }
 0x749   :  { %v6074_v32 = vpop.xlane.xlu1 %6073 }
 0x74a   :  { %v6171_v52 = vadd.f32 %v6170_v37, %v6169_v36  ;;  %v6174_v3 = vadd.f32 %v6074_v32, %v6071_v9 }
 0x74c   :  { %v6172_v41 = vrot.slane %v6171_v52, 1 }
 0x74d   :  { %v6077_v49 = vpop.xlane.xlu1 %6076 }
 0x74e   :  { %v6173_v61 = vadd.f32 %v6172_v41, %v6171_v52  ;;  %v6175_v27 = vadd.f32 %v6174_v3, %v6077_v49 }
 0x750   :  { %v6206_v44 = vadd.f32 %v6205_v46, %v6173_v61 }
 0x751   :  { %v6080_v55 = vpop.xlane.xlu1 %6079 }
 0x752   :  { %6209 = vst.msk [vmem:[%s13201_s9] sm:$0x1] %vm6208_vm5, %v6206_v44  ;;  %v6176_v24 = vadd.f32 %v6175_v27, %v6080_v55 }
 0x755   :  { %v6083_v18 = vpop.xlane.xlu1 %6082 }
 0x756   :  { %v6177_v42 = vadd.f32 %v6176_v24, %v6083_v18 }
 0x759   :  { %v6086_v39 = vpop.xlane.xlu1 %6085 }
 0x75a   :  { %v6178_v28 = vadd.f32 %v6177_v42, %v6086_v39 }
 0x75d   :  { %v6089_v19 = vpop.xlane.xlu1 %6088 }
 0x75e   :  { %v6179_v15 = vadd.f32 %v6178_v28, %v6089_v19 }
 0x761   :  { %v6092_v45 = vpop.xlane.xlu1 %6091 }
 0x762   :  { %v6180_v47 = vadd.f32 %v6179_v15, %v6092_v45 }
 0x765   :  { %v6095_v26 = vpop.xlane.xlu1 %6094 }
 0x766   :  { %v6181_v0 = vadd.f32 %v6180_v47, %v6095_v26 }
 0x769   :  { %v6098_v58 = vpop.xlane.xlu1 %6097 }
 0x76a   :  { %v6182_v30 = vadd.f32 %v6181_v0, %v6098_v58 }
 0x76d   :  { %v6101_v16 = vpop.xlane.xlu1 %6100 }
 0x76e   :  { %v6183_v40 = vadd.f32 %v6182_v30, %v6101_v16 }
 0x771   :  { %v6104_v63 = vpop.xlane.xlu1 %6103 }
 0x772   :  { %v6184_v5 = vadd.f32 %v6183_v40, %v6104_v63 }
 0x775   :  { %v6107_v6 = vpop.xlane.xlu1 %6106 }
 0x776   :  { %v6185_v11 = vadd.f32 %v6184_v5, %v6107_v6 }
 0x779   :  { %v6110_v2 = vpop.xlane.xlu1 %6109 }
 0x77a   :  { %v6186_v56 = vadd.f32 %v6185_v11, %v6110_v2 }
 0x77d   :  { %v6113_v22 = vpop.xlane.xlu1 %6112 }
 0x77e   :  { %v6187_v17 = vadd.f32 %v6186_v56, %v6113_v22 }
 0x781   :  { %v6116_v13 = vpop.xlane.xlu1 %6115 }
 0x782   :  { %v6188_v34 = vadd.f32 %v6187_v17, %v6116_v13 }
 0x785   :  { %v6119_v62 = vpop.xlane.xlu1 %6118 }
 0x786   :  { %v6189_v50 = vadd.f32 %v6188_v34, %v6119_v62 }
 0x789   :  { %v6122_v31 = vpop.xlane.xlu1 %6121 }
 0x78a   :  { %v6190_v8 = vadd.f32 %v6189_v50, %v6122_v31 }
 0x78d   :  { %v6125_v57 = vpop.xlane.xlu1 %6124 }
 0x78e   :  { %v6191_v53 = vadd.f32 %v6190_v8, %v6125_v57 }
 0x791   :  { %v6128_v35 = vpop.xlane.xlu1 %6127 }
 0x792   :  { %v6192_v51 = vadd.f32 %v6191_v53, %v6128_v35 }
 0x795   :  { %v6131_v29 = vpop.xlane.xlu1 %6130 }
 0x796   :  { %v6193_v7 = vadd.f32 %v6192_v51, %v6131_v29 }
 0x799   :  { %v6134_v48 = vpop.xlane.xlu1 %6133 }
 0x79a   :  { %v6194_v20 = vadd.f32 %v6193_v7, %v6134_v48 }
 0x79d   :  { %v6137_v1 = vpop.xlane.xlu1 %6136 }
 0x79e   :  { %v6195_v14 = vadd.f32 %v6194_v20, %v6137_v1 }
 0x7a1   :  { %v6140_v43 = vpop.xlane.xlu1 %6139 }
 0x7a2   :  { %v6196_v59 = vadd.f32 %v6195_v14, %v6140_v43 }
 0x7a5   :  { %v6143_v54 = vpop.xlane.xlu1 %6142 }
 0x7a6   :  { %v6197_v4 = vadd.f32 %v6196_v59, %v6143_v54 }
 0x7a8   :  { %v6198_v21 = vrot.slane %v6197_v4, 4 }
 0x7aa   :  { %v6199_v23 = vadd.f32 %v6198_v21, %v6197_v4 }
 0x7ac   :  { %v6200_v10 = vrot.slane %v6199_v23, 2 }
 0x7ae   :  { %v6201_v12 = vadd.f32 %v6200_v10, %v6199_v23 }
 0x7b0   :  { %v6202_v60 = vrot.slane %v6201_v12, 1 }
 0x7b2   :  { %v6203_v38 = vadd.f32 %v6202_v60, %v6201_v12 }
 0x7b4   :  { %v6207_v25 = vadd.f32 %v6205_v46, %v6203_v38 }
 0x7b6   :  { %6210 = vst.msk [vmem:[%s13201_s9 + $0x1] sm:$0x1] %vm6208_vm5, %v6207_v25 }

</bundles_post_ra>
